<compile_context>
chip_gen: v7x
topology: tpu7x:2x2x1
jax: 0.10.0
libtpu: 0.0.40
codegen_flags: <defaults>
</compile_context>

<pallas_src>
import functools
import numpy as np
import jax
import jax.numpy as jnp
from jax.experimental import pallas as pl
from jax.experimental.pallas import tpu as pltpu

N_NODES = 8        # num_of_vertices
F_IN = 1           # in_channels (fixed by the module)
T_IN = 8           # len_input
K = 2              # Chebyshev order
NB_CHEV = 16       # nb_chev_filter
NB_TIME = 16       # nb_time_filter
P_OUT = 8          # num_for_predict
LN_EPS = 1e-5

_PK_WIDTH = max(128, T_IN * NB_CHEV, T_IN * NB_TIME)


def _make_layout():
    """Row offsets (8-aligned) of each packed block inside the (rows, 128) param buffer."""
    rows, off = {}, 0

    def add(name, r):
        nonlocal off
        rows[name] = off
        off += ((r + 7) // 8) * 8

    add("M", N_NODES)            # scaled Laplacian (N, N)
    add("EYE", N_NODES)          # identity (N, N) (diag(S) extraction)
    add("BEt", T_IN)             # temporal-attn bias, transposed (T, T)
    add("VEt", T_IN)             # temporal-attn Ve, transposed (T, T)
    add("BS", N_NODES)           # spatial-attn bias (N, N)
    add("VS", N_NODES)           # spatial-attn Vs (N, N)
    add("U1C", N_NODES)          # (N, 1) column
    add("U2C", N_NODES)          # (N, 1) column, u3 folded in
    add("W1", 1)                 # (1, T) row
    add("W2", 1)                 # (1, T) row, w3 folded in
    add("R01", 2 * T_IN)         # (2T, T*Fc)  stacked [R0; R1] Cheb projection
    add("BC", 1)                 # (1, T*Fc)   tiled Cheb bias
    add("WT", T_IN * NB_CHEV)    # (T*Fc, T*Ft) block-tridiagonal temporal conv
    add("BT", 1)                 # (1, T*Ft)
    add("RR", T_IN)              # (T, T*Ft)   residual 1x1-conv expansion
    add("BR", 1)                 # (1, T*Ft)
    add("LNG", 1)                # (1, T*Ft)   tiled LN gamma
    add("LNB", 1)                # (1, T*Ft)   tiled LN beta
    add("AVG", T_IN * NB_TIME)   # (T*Ft, T*Ft) block-diag averaging (LN mean / E[Z^2])
    add("WFT", P_OUT)            # (P, T*Ft)   final conv, transposed
    add("BF", P_OUT)             # (P, 1)      final conv bias (column)
    return rows, off


_PK_ROWS, _PK_TOTAL = _make_layout()


def _astgcn_kernel(x_ref, pk_ref, out_ref):
    f32 = jnp.float32
    mm = functools.partial(jnp.dot, preferred_element_type=f32)

    bsz, n, t = x_ref.shape            # (Bt, N, T)
    tfc = t * NB_CHEV
    tft = t * NB_TIME
    p = out_ref.shape[1]
    rows = bsz * n

    X = x_ref[...].astype(f32)         # (Bt, N, T)

    def blk(name, r, c):
        o = _PK_ROWS[name]
        return pk_ref[o:o + r, 0:c]

    M = blk("M", n, n)
    EYE = blk("EYE", n, n)
    BEt = blk("BEt", t, t)             # BE^T
    VEt = blk("VEt", t, t)             # VE^T
    BS = blk("BS", n, n)
    VS = blk("VS", n, n)
    U1C = blk("U1C", n, 1)             # (N, 1)
    U2C = blk("U2C", n, 1)             # (N, 1), u3 folded
    W1 = blk("W1", 1, t)               # (1, T)
    W2 = blk("W2", 1, t)               # (1, T), w3 folded
    R01 = blk("R01", 2 * t, tfc)       # [R0; R1]
    BC = blk("BC", 1, tfc)
    WTB = blk("WT", tfc, tft)
    BTb = blk("BT", 1, tft)
    RR = blk("RR", t, tft)
    BR = blk("BR", 1, tft)
    GAM = blk("LNG", 1, tft)
    BET = blk("LNB", 1, tft)
    AVG = blk("AVG", tft, tft)
    WFT = blk("WFT", p, tft)
    BF = blk("BF", p, 1)

    # ---------------- temporal attention (transposed (b,k,i) layout) ----------------
    # E[b,p,k] = sum_i VE[p,i] * sigmoid(a3[b,i] * c3[b,k] + BE[i,k]); softmax over p.
    # Building sig_e directly as sig_e^T[b,k,i] lets the Ve stage be ONE 2D matmul with
    # Ve^T and puts the softmax on the lane axis.
    a3 = jnp.sum(X * U1C[None], axis=1)                           # (Bt, T)
    c3 = jnp.sum(X * U2C[None], axis=1)                           # (Bt, T)
    sig_eT = jax.nn.sigmoid(c3[:, :, None] * a3[:, None, :] + BEt[None])   # (Bt, k, i)
    ET = mm(sig_eT.reshape(bsz * t, t), VEt)                      # (Bt*k, p) = E[b,p,k]
    ET = ET - jnp.max(ET, axis=-1, keepdims=True)
    Ee = jnp.exp(ET)
    EnT = Ee * pl.reciprocal(jnp.sum(Ee, axis=-1, keepdims=True), approx=True)
    EnT = EnT.reshape(bsz, t, t)                                  # (b, k, p) = E_norm[b,p,k]
    Xt = jnp.einsum("bnp,bkp->bnk", X, EnT,
                    preferred_element_type=f32)                   # (Bt, N, T)

    # ---------------- spatial attention (rank-1 pre-score, natural layout) ----------------
    d3 = jnp.sum(Xt * W1[None], axis=2, keepdims=True)            # (Bt, N, 1)
    e3 = jnp.sum(Xt * W2[None], axis=2)                           # (Bt, N)
    sig_s = jax.nn.sigmoid(d3 * e3[:, None, :] + BS[None])        # (Bt, N, N)
    VS_b = jnp.broadcast_to(VS[None], (bsz, n, n))
    S = jnp.einsum("bij,bjk->bik", VS_b, sig_s,
                   preferred_element_type=f32)                    # (Bt, N, N)
    Sm = jnp.max(S, axis=1, keepdims=True)
    Se = jnp.exp(S - Sm)
    S_norm = Se * pl.reciprocal(jnp.sum(Se, axis=1, keepdims=True), approx=True)

    # ------- K=2 Chebyshev graph conv modulated by spatial attention -------
    # T0 = diag(S) * x, T1 = (M ⊙ S) @ T0 (S NOT transposed), as in ChebConvAttention.
    sdiag = jnp.sum(S_norm * EYE[None], axis=2, keepdims=True)    # (Bt, N, 1)
    MS = M[None] * S_norm
    T0 = sdiag * X                                                # (Bt, N, T)
    T1 = jnp.einsum("bij,bjt->bit", MS, T0,
                    preferred_element_type=f32)                   # (Bt, N, T)

    # ---------------- big-slab phase: (Bt*N, 128) 2D matmuls ----------------
    T01 = jnp.concatenate([T0.reshape(rows, t), T1.reshape(rows, t)], axis=1)  # (rows, 2T)
    Xf = X.reshape(rows, t)

    # fused Cheb projection (K=2) + bias + ReLU  -> (rows, T*Fc)
    XhatF = jax.nn.relu(mm(T01, R01) + BC)

    # 1x3 temporal conv (block-tridiagonal) + residual 1x1 conv + ReLU
    TC = mm(XhatF, WTB) + BTb                                     # (rows, T*Ft)
    RES = mm(Xf, RR) + BR                                         # (rows, T*Ft)
    Z = jax.nn.relu(TC + RES)

    # LayerNorm over Ft: one stacked [Z ; Z*Z] @ AVG matmul; VAR = E[Z^2] - MU^2
    STATS = mm(jnp.concatenate([Z, Z * Z], axis=0), AVG)          # (2*rows, T*Ft)
    MU = STATS[:rows]
    VAR = jnp.maximum(STATS[rows:] - MU * MU, 0.0)
    XL = (Z - MU) * jax.lax.rsqrt(VAR + LN_EPS) * GAM + BET       # (rows, T*Ft)

    # final conv: contract the full T*Ft = 128 axis, lane-dense (P, Bt*N) output
    OUTT = jax.lax.dot_general(WFT, XL, (((1,), (1,)), ((), ())),
                               preferred_element_type=f32) + BF   # (P, rows)
    out_ref[0] = OUTT.astype(out_ref.dtype)


def init_params(key):
    N, T, F = N_NODES, T_IN, F_IN
    Fc, Ft, P = NB_CHEV, NB_TIME, P_OUT
    ks = jax.random.split(key, 18)
    r = lambda k, s: 0.1 * jax.random.normal(k, s, jnp.float32)
    return dict(
        # temporal attention
        u1=r(ks[0], (1, N)), u2=r(ks[1], (F, N)), u3=r(ks[2], (1, F)),
        be=r(ks[3], (T, T)), ve=r(ks[4], (T, T)),
        # spatial attention
        w1=r(ks[5], (1, T)), w2=r(ks[6], (F, T)), w3=r(ks[7], (1, F)),
        bs=r(ks[8], (N, N)), vs=r(ks[9], (N, N)),
        # ChebConvAttention (K, F_in, Fc) + bias
        wc=r(ks[10], (K, F, Fc)), bc=r(ks[11], (1, Fc)),
        # temporal conv weight, pre-arranged as (3, Fc, Ft)
        wt=r(ks[12], (3, Fc, Ft)), bt=r(ks[13], (1, Ft)),
        # residual 1x1 conv, pre-transposed to (F_in, Ft)
        wr=r(ks[14], (F, Ft)), br=r(ks[15], (1, Ft)),
        # LayerNorm
        gamma=jnp.ones((1, Ft), jnp.float32),
        beta=jnp.zeros((1, Ft), jnp.float32),
        # final conv, pre-arranged as (T, Ft, P)
        wf=r(ks[16], (T, Ft, P)), bf=r(ks[17], (1, P)),
    )


def pack_params(params, m_dense):
    """Pack all small params (+ derived block matrices) into one (rows, 128) f32 buffer."""
    Fc, Ft, T, N, P = NB_CHEV, NB_TIME, T_IN, N_NODES, P_OUT
    pk = np.zeros((_PK_TOTAL, _PK_WIDTH), np.float32)

    def put(name, arr):
        arr = np.asarray(arr, np.float32)
        r, c = arr.shape
        o = _PK_ROWS[name]
        pk[o:o + r, :c] = arr

    u3 = float(np.asarray(params["u3"])[0, 0])
    w3 = float(np.asarray(params["w3"])[0, 0])

    put("M", m_dense)
    put("EYE", np.eye(N, dtype=np.float32))
    put("BEt", np.asarray(params["be"], np.float32).T)
    put("VEt", np.asarray(params["ve"], np.float32).T)
    put("BS", params["bs"]); put("VS", params["vs"])
    put("U1C", np.asarray(params["u1"], np.float32).T)                 # (N, 1)
    put("U2C", (u3 * np.asarray(params["u2"], np.float32)).T)          # (N, 1), u3 folded
    put("W1", params["w1"])                                            # (1, T)
    put("W2", w3 * np.asarray(params["w2"], np.float32))               # (1, T), w3 folded

    wc = np.asarray(params["wc"], np.float32)                          # (K, 1, Fc)
    R01 = np.zeros((2 * T, T * Fc), np.float32)
    for tt in range(T):
        R01[tt, tt * Fc:(tt + 1) * Fc] = wc[0, 0]
        R01[T + tt, tt * Fc:(tt + 1) * Fc] = wc[1, 0]
    put("R01", R01)
    put("BC", np.tile(np.asarray(params["bc"], np.float32), (1, T)))

    wt = np.asarray(params["wt"], np.float32)                          # (3, Fc, Ft)
    WTB = np.zeros((T * Fc, T * Ft), np.float32)                       # block tri-diagonal
    for tt in range(T):
        for k in range(3):
            tau = tt + k - 1
            if 0 <= tau < T:
                WTB[tau * Fc:(tau + 1) * Fc, tt * Ft:(tt + 1) * Ft] = wt[k]
    put("WT", WTB)
    put("BT", np.tile(np.asarray(params["bt"], np.float32), (1, T)))

    wr = np.asarray(params["wr"], np.float32)                          # (1, Ft)
    RR = np.zeros((T, T * Ft), np.float32)
    for tt in range(T):
        RR[tt, tt * Ft:(tt + 1) * Ft] = wr[0]
    put("RR", RR)
    put("BR", np.tile(np.asarray(params["br"], np.float32), (1, T)))
    put("LNG", np.tile(np.asarray(params["gamma"], np.float32), (1, T)))
    put("LNB", np.tile(np.asarray(params["beta"], np.float32), (1, T)))

    AVG = np.kron(np.eye(T, dtype=np.float32),
                  np.full((Ft, Ft), 1.0 / Ft, np.float32))             # block-diag mean
    put("AVG", AVG)

    wf = np.asarray(params["wf"], np.float32)                          # (T, Ft, P)
    put("WFT", np.transpose(wf, (2, 0, 1)).reshape(P, T * Ft))         # (P, T*Ft)
    put("BF", np.asarray(params["bf"], np.float32).reshape(P, 1))
    return jnp.asarray(pk)


def _scaled_laplacian(edge_index, n):
    """Dense M = 2L/lambda_max - I (host glue).
    TODO(synk): PyG's sparse edge-list ChebConv message passing + LaplacianLambdaMax are
    reproduced densely here (normalization=None default; lambda_max via host eigvalsh)."""
    ei = np.asarray(edge_index)
    A = np.zeros((n, n), np.float32)
    A[ei[0], ei[1]] = 1.0                 # ChebConvAttention is called with edge_weight=None
    deg = A.sum(axis=1)
    L = np.diag(deg) - A
    lam_max = float(np.linalg.eigvalsh(L).max())
    return (2.0 * L / lam_max - np.eye(n, dtype=np.float32)).astype(np.float32)


def _pick_bt(B):
    """Samples per grid step.  rows = Bt*N is the M dim of every slab matmul, so make it as
    large as VMEM comfortably allows (rows <= 2048); prefer an even number of steps so
    dimension_semantics=("parallel",) can split the grid across both v7x TensorCores."""
    cap = 256
    if B <= cap:
        if B % 2 == 0 and B >= 32:
            return B // 2          # G == 2: one big step per TensorCore
        return B                   # G == 1
    divs = [d for d in range(1, cap + 1) if B % d == 0]
    even_g = [d for d in divs if (B // d) % 2 == 0]
    return max(even_g) if even_g else max(divs)


def monster_forward(x, edge_index, edge_weight, params, bt=None):
    """x: (B, N, F_in=1, T) float32.  Returns (B, N, P_OUT)."""
    del edge_weight  # Monster.forward calls self.gat(x, edge_index): edge_weight unused.
    B, N, F, T = x.shape
    assert F == F_IN == 1 and N == N_NODES and T == T_IN
    x2 = jnp.asarray(x, jnp.float32).reshape(B, N, T)   # squeeze in_channels == 1

    if bt is None:
        bt = _pick_bt(B)
    assert B % bt == 0
    G = B // bt
    R = bt * N

    M = _scaled_laplacian(edge_index, N)
    pk = pack_params(params, M)

    out_t = pl.pallas_call(
        _astgcn_kernel,
        out_shape=jax.ShapeDtypeStruct((G, P_OUT, R), jnp.float32),
        grid=(G,),
        in_specs=[
            pl.BlockSpec((bt, N, T), lambda g: (g, 0, 0)),
            pl.BlockSpec(pk.shape, lambda g: (0, 0)),
        ],
        out_specs=pl.BlockSpec((1, P_OUT, R), lambda g: (g, 0, 0)),
        compiler_params=pltpu.CompilerParams(
            dimension_semantics=("parallel",),
            vmem_limit_bytes=48 * 1024 * 1024),
    )(x2, pk)

    # (G, P, Bt*N) lane-dense kernel output -> (B, N, P)
    out = out_t.reshape(G, P_OUT, bt, N)
    out = jnp.transpose(out, (0, 2, 3, 1)).reshape(B, N, P_OUT)
    return out


def _ref_forward(x2, M, params):
    """Pure-JAX reference (original, unfused formulation) for a tolerance check."""
    f32 = jnp.float32
    B, N, T = x2.shape
    X = x2.astype(f32)
    u1, u2, u3 = params["u1"], params["u2"], params["u3"]
    w1, w2, w3 = params["w1"], params["w2"], params["w3"]

    # temporal attention
    a3 = jnp.einsum("n,bnt->bt", u1[0], X)[:, :, None]
    c3 = jnp.einsum("n,bnt->bt", (u3[0, 0] * u2)[0], X)[:, None, :]
    E = jnp.einsum("ij,bjk->bik", params["ve"],
                   jax.nn.sigmoid(a3 * c3 + params["be"][None]))
    E = jax.nn.softmax(E, axis=1)
    Xt = jnp.einsum("bnj,bjt->bnt", X, E)

    # spatial attention
    d3 = jnp.einsum("t,bnt->bn", w1[0], Xt)[:, :, None]
    e3 = jnp.einsum("t,bnt->bn", (w3[0, 0] * w2)[0], Xt)[:, None, :]
    S = jnp.einsum("ij,bjk->bik", params["vs"],
                   jax.nn.sigmoid(d3 * e3 + params["bs"][None]))
    S = jax.nn.softmax(S, axis=1)

    # K=2 Chebyshev conv modulated by spatial attention
    sdiag = jnp.sum(S * jnp.eye(N, dtype=f32)[None], axis=2, keepdims=True)
    T0 = sdiag * X
    T1 = jnp.einsum("bij,bjt->bit", M[None] * S, T0)
    wc, bc = params["wc"], params["bc"]
    xhat = jax.nn.relu(T0[..., None] * wc[0, 0] + T1[..., None] * wc[1, 0] + bc[0])

    # 1x3 temporal conv (pad=1) + 1x1 residual conv + ReLU
    wt = params["wt"]
    xpad = jnp.pad(xhat, ((0, 0), (0, 0), (1, 1), (0, 0)))
    TC = sum(jnp.einsum("bntc,co->bnto", xpad[:, :, k:k + T, :], wt[k])
             for k in range(3)) + params["bt"][0]
    RES = X[..., None] * params["wr"][0] + params["br"][0]
    Z = jax.nn.relu(TC + RES)                                    # (B, N, T, Ft)

    # LayerNorm over Ft
    mu = Z.mean(axis=-1, keepdims=True)
    var = ((Z - mu) ** 2).mean(axis=-1, keepdims=True)
    XL = (Z - mu) * jax.lax.rsqrt(var + LN_EPS) * params["gamma"][0] + params["beta"][0]

    # final (1, Ft)-kernel conv over (time, Ft)
    return jnp.einsum("bntf,tfp->bnp", XL, params["wf"]) + params["bf"][0]


if __name__ == "__main__":
    key = jax.random.PRNGKey(0)
    kx, kp = jax.random.split(key)

    B = 64   # -> bt=32, rows=256 per step, G=2 (one big step per v7x TensorCore)
    x = jax.random.normal(kx, (B, N_NODES, F_IN, T_IN), jnp.float32)

    # ring graph on N_NODES nodes (symmetric edge list), weights unused by the forward
    src = np.arange(N_NODES)
    dst = (src + 1) % N_NODES
    edge_index = np.stack([np.concatenate([src, dst]),
                           np.concatenate([dst, src])]).astype(np.int32)
    edge_weight = np.ones(edge_index.shape[1], np.float32)

    params = init_params(kp)
    out = monster_forward(x, edge_index, edge_weight, params)
    out = jax.block_until_ready(out)

    assert out.shape == (B, N_NODES, P_OUT), out.shape
    assert bool(jnp.all(jnp.isfinite(out)))

    # tolerance-asserted pure-JAX reference (original formulation)
    x2 = jnp.asarray(x, jnp.float32).reshape(B, N_NODES, T_IN)
    M = jnp.asarray(_scaled_laplacian(edge_index, N_NODES))
    ref = _ref_forward(x2, M, params)
    rel = float(jnp.linalg.norm(out - ref) / (jnp.linalg.norm(ref) + 1e-12))
    assert rel < 5e-2, f"kernel/reference mismatch: rel={rel}"
    print("KERNEL_OK")
</pallas_src>

<mosaic_0001>
module attributes {stable_mosaic.version = 11 : i64} {
  func.func @_astgcn_kernel(%arg0: i32, %arg1: memref<32x8x8xf32, #tpu.memory_space<vmem>>, %arg2: memref<416x128xf32, #tpu.memory_space<vmem>>, %arg3: memref<1x8x256xf32, #tpu.memory_space<vmem>>) attributes {dimension_semantics = [#tpu.dimension_semantics<parallel>], iteration_bounds = array<i64: 2>, scalar_prefetch = 0 : i64, scratch_operands = 0 : i64, tpu.core_type = #tpu.core_type<tc>, window_params = [{transform_indices = @transform_0, window_bounds = array<i64: 32, 8, 8>}, {pipeline_mode = #tpu.pipeline_mode<synchronous>, transform_indices = @transform_1, window_bounds = array<i64: 416, 128>}, {transform_indices = @transform_2, window_bounds = array<i64: 1, 8, 256>}]} {
    %c0 = arith.constant 0 : index
    %c0_0 = arith.constant 0 : index
    %c0_1 = arith.constant 0 : index
    %0 = vector.load %arg1[%c0, %c0_0, %c0_1] : memref<32x8x8xf32, #tpu.memory_space<vmem>>, vector<32x8x8xf32>
    %c0_2 = arith.constant 0 : index
    %c0_3 = arith.constant 0 : index
    %1 = vector.load %arg2[%c0_2, %c0_3] : memref<416x128xf32, #tpu.memory_space<vmem>>, vector<8x8xf32>
    %c8 = arith.constant 8 : index
    %c0_4 = arith.constant 0 : index
    %2 = vector.load %arg2[%c8, %c0_4] : memref<416x128xf32, #tpu.memory_space<vmem>>, vector<8x8xf32>
    %c16 = arith.constant 16 : index
    %c0_5 = arith.constant 0 : index
    %3 = vector.load %arg2[%c16, %c0_5] : memref<416x128xf32, #tpu.memory_space<vmem>>, vector<8x8xf32>
    %c24 = arith.constant 24 : index
    %c0_6 = arith.constant 0 : index
    %4 = vector.load %arg2[%c24, %c0_6] : memref<416x128xf32, #tpu.memory_space<vmem>>, vector<8x8xf32>
    %c32 = arith.constant 32 : index
    %c0_7 = arith.constant 0 : index
    %5 = vector.load %arg2[%c32, %c0_7] : memref<416x128xf32, #tpu.memory_space<vmem>>, vector<8x8xf32>
    %c40 = arith.constant 40 : index
    %c0_8 = arith.constant 0 : index
    %6 = vector.load %arg2[%c40, %c0_8] : memref<416x128xf32, #tpu.memory_space<vmem>>, vector<8x8xf32>
    %c48 = arith.constant 48 : index
    %c0_9 = arith.constant 0 : index
    %7 = vector.load %arg2[%c48, %c0_9] : memref<416x128xf32, #tpu.memory_space<vmem>>, vector<8x1xf32>
    %c56 = arith.constant 56 : index
    %c0_10 = arith.constant 0 : index
    %8 = vector.load %arg2[%c56, %c0_10] : memref<416x128xf32, #tpu.memory_space<vmem>>, vector<8x1xf32>
    %c64 = arith.constant 64 : index
    %c0_11 = arith.constant 0 : index
    %9 = vector.load %arg2[%c64, %c0_11] : memref<416x128xf32, #tpu.memory_space<vmem>>, vector<1x8xf32>
    %c72 = arith.constant 72 : index
    %c0_12 = arith.constant 0 : index
    %10 = vector.load %arg2[%c72, %c0_12] : memref<416x128xf32, #tpu.memory_space<vmem>>, vector<1x8xf32>
    %c80 = arith.constant 80 : index
    %c0_13 = arith.constant 0 : index
    %11 = vector.load %arg2[%c80, %c0_13] : memref<416x128xf32, #tpu.memory_space<vmem>>, vector<16x128xf32>
    %c96 = arith.constant 96 : index
    %c0_14 = arith.constant 0 : index
    %12 = vector.load %arg2[%c96, %c0_14] : memref<416x128xf32, #tpu.memory_space<vmem>>, vector<1x128xf32>
    %c104 = arith.constant 104 : index
    %c0_15 = arith.constant 0 : index
    %13 = vector.load %arg2[%c104, %c0_15] : memref<416x128xf32, #tpu.memory_space<vmem>>, vector<128x128xf32>
    %c232 = arith.constant 232 : index
    %c0_16 = arith.constant 0 : index
    %14 = vector.load %arg2[%c232, %c0_16] : memref<416x128xf32, #tpu.memory_space<vmem>>, vector<1x128xf32>
    %c240 = arith.constant 240 : index
    %c0_17 = arith.constant 0 : index
    %15 = vector.load %arg2[%c240, %c0_17] : memref<416x128xf32, #tpu.memory_space<vmem>>, vector<8x128xf32>
    %c248 = arith.constant 248 : index
    %c0_18 = arith.constant 0 : index
    %16 = vector.load %arg2[%c248, %c0_18] : memref<416x128xf32, #tpu.memory_space<vmem>>, vector<1x128xf32>
    %c256 = arith.constant 256 : index
    %c0_19 = arith.constant 0 : index
    %17 = vector.load %arg2[%c256, %c0_19] : memref<416x128xf32, #tpu.memory_space<vmem>>, vector<1x128xf32>
    %c264 = arith.constant 264 : index
    %c0_20 = arith.constant 0 : index
    %18 = vector.load %arg2[%c264, %c0_20] : memref<416x128xf32, #tpu.memory_space<vmem>>, vector<1x128xf32>
    %c272 = arith.constant 272 : index
    %c0_21 = arith.constant 0 : index
    %19 = vector.load %arg2[%c272, %c0_21] : memref<416x128xf32, #tpu.memory_space<vmem>>, vector<128x128xf32>
    %c400 = arith.constant 400 : index
    %c0_22 = arith.constant 0 : index
    %20 = vector.load %arg2[%c400, %c0_22] : memref<416x128xf32, #tpu.memory_space<vmem>>, vector<8x128xf32>
    %c408 = arith.constant 408 : index
    %c0_23 = arith.constant 0 : index
    %21 = vector.load %arg2[%c408, %c0_23] : memref<416x128xf32, #tpu.memory_space<vmem>>, vector<8x1xf32>
    %22 = vector.shape_cast %7 : vector<8x1xf32> to vector<1x8x1xf32>
    %23 = vector.broadcast %22 : vector<1x8x1xf32> to vector<32x8x8xf32>
    %24 = arith.mulf %0, %23 : vector<32x8x8xf32>
    %cst = arith.constant dense<0.000000e+00> : vector<32x8xf32>
    %25 = vector.multi_reduction <add>, %24, %cst [1] : vector<32x8x8xf32> to vector<32x8xf32>
    %26 = vector.shape_cast %8 : vector<8x1xf32> to vector<1x8x1xf32>
    %27 = vector.broadcast %26 : vector<1x8x1xf32> to vector<32x8x8xf32>
    %28 = arith.mulf %0, %27 : vector<32x8x8xf32>
    %cst_24 = arith.constant dense<0.000000e+00> : vector<32x8xf32>
    %29 = vector.multi_reduction <add>, %28, %cst_24 [1] : vector<32x8x8xf32> to vector<32x8xf32>
    %30 = vector.shape_cast %29 : vector<32x8xf32> to vector<32x8x1xf32>
    %31 = vector.shape_cast %25 : vector<32x8xf32> to vector<32x1x8xf32>
    %32 = vector.broadcast %30 : vector<32x8x1xf32> to vector<32x8x8xf32>
    %33 = vector.broadcast %31 : vector<32x1x8xf32> to vector<32x8x8xf32>
    %34 = arith.mulf %32, %33 : vector<32x8x8xf32>
    %35 = vector.shape_cast %3 : vector<8x8xf32> to vector<1x8x8xf32>
    %36 = vector.broadcast %35 : vector<1x8x8xf32> to vector<32x8x8xf32>
    %37 = arith.addf %34, %36 : vector<32x8x8xf32>
    %38 = arith.negf %37 : vector<32x8x8xf32>
    %39 = math.exp %38 : vector<32x8x8xf32>
    %cst_25 = arith.constant 1.000000e+00 : f32
    %40 = vector.broadcast %cst_25 : f32 to vector<32x8x8xf32>
    %41 = arith.addf %40, %39 : vector<32x8x8xf32>
    %42 = arith.divf %40, %41 : vector<32x8x8xf32>
    %43 = vector.shape_cast %42 : vector<32x8x8xf32> to vector<256x8xf32>
    %cst_26 = arith.constant dense<0.000000e+00> : vector<256x8xf32>
    %44 = tpu.matmul %43, %4, %cst_26 {dimension_numbers = #tpu.dot_dimension_numbers<[1], [0], [0], [1], [0, 0, 1, 1], [], []>} : vector<256x8xf32>, vector<8x8xf32>, vector<256x8xf32> -> vector<256x8xf32>
    %cst_27 = arith.constant dense<0xFF800000> : vector<256xf32>
    %45 = vector.multi_reduction <maximumf>, %44, %cst_27 [1] : vector<256x8xf32> to vector<256xf32>
    %46 = vector.shape_cast %45 : vector<256xf32> to vector<256x1xf32>
    %47 = vector.broadcast %46 : vector<256x1xf32> to vector<256x8xf32>
    %48 = arith.subf %44, %47 : vector<256x8xf32>
    %49 = math.exp %48 : vector<256x8xf32>
    %cst_28 = arith.constant dense<0.000000e+00> : vector<256xf32>
    %50 = vector.multi_reduction <add>, %49, %cst_28 [1] : vector<256x8xf32> to vector<256xf32>
    %51 = vector.shape_cast %50 : vector<256xf32> to vector<256x1xf32>
    %52 = tpu.reciprocal %51 {approx = true} : vector<256x1xf32> -> vector<256x1xf32>
    %53 = vector.broadcast %52 : vector<256x1xf32> to vector<256x8xf32>
    %54 = arith.mulf %49, %53 : vector<256x8xf32>
    %55 = vector.shape_cast %54 : vector<256x8xf32> to vector<32x8x8xf32>
    "tpu.trace_start"() <{level = 10 : i32, message = "bnp,bkp->bnk"}> : () -> ()
    %cst_29 = arith.constant dense<0.000000e+00> : vector<32x8x8xf32>
    %56 = tpu.matmul %0, %55, %cst_29 {dimension_numbers = #tpu.dot_dimension_numbers<[2], [2], [1], [1], [0, 0, 0, 1, 1, 1], [0], [0]>} : vector<32x8x8xf32>, vector<32x8x8xf32>, vector<32x8x8xf32> -> vector<32x8x8xf32>
    "tpu.trace_stop"() : () -> ()
    %57 = vector.shape_cast %9 : vector<1x8xf32> to vector<1x1x8xf32>
    %58 = vector.broadcast %57 : vector<1x1x8xf32> to vector<32x8x8xf32>
    %59 = arith.mulf %56, %58 : vector<32x8x8xf32>
    %cst_30 = arith.constant dense<0.000000e+00> : vector<32x8xf32>
    %60 = vector.multi_reduction <add>, %59, %cst_30 [2] : vector<32x8x8xf32> to vector<32x8xf32>
    %61 = vector.shape_cast %60 : vector<32x8xf32> to vector<32x8x1xf32>
    %62 = vector.shape_cast %10 : vector<1x8xf32> to vector<1x1x8xf32>
    %63 = vector.broadcast %62 : vector<1x1x8xf32> to vector<32x8x8xf32>
    %64 = arith.mulf %56, %63 : vector<32x8x8xf32>
    %cst_31 = arith.constant dense<0.000000e+00> : vector<32x8xf32>
    %65 = vector.multi_reduction <add>, %64, %cst_31 [2] : vector<32x8x8xf32> to vector<32x8xf32>
    %66 = vector.shape_cast %65 : vector<32x8xf32> to vector<32x1x8xf32>
    %67 = vector.broadcast %61 : vector<32x8x1xf32> to vector<32x8x8xf32>
    %68 = vector.broadcast %66 : vector<32x1x8xf32> to vector<32x8x8xf32>
    %69 = arith.mulf %67, %68 : vector<32x8x8xf32>
    %70 = vector.shape_cast %5 : vector<8x8xf32> to vector<1x8x8xf32>
    %71 = vector.broadcast %70 : vector<1x8x8xf32> to vector<32x8x8xf32>
    %72 = arith.addf %69, %71 : vector<32x8x8xf32>
    %73 = arith.negf %72 : vector<32x8x8xf32>
    %74 = math.exp %73 : vector<32x8x8xf32>
    %cst_32 = arith.constant 1.000000e+00 : f32
    %75 = vector.broadcast %cst_32 : f32 to vector<32x8x8xf32>
    %76 = arith.addf %75, %74 : vector<32x8x8xf32>
    %77 = arith.divf %75, %76 : vector<32x8x8xf32>
    %78 = vector.shape_cast %6 : vector<8x8xf32> to vector<1x8x8xf32>
    %79 = vector.shape_cast %78 : vector<1x8x8xf32> to vector<1x8x8xf32>
    %80 = vector.broadcast %79 : vector<1x8x8xf32> to vector<32x8x8xf32>
    "tpu.trace_start"() <{level = 10 : i32, message = "bij,bjk->bik"}> : () -> ()
    %cst_33 = arith.constant dense<0.000000e+00> : vector<32x8x8xf32>
    %81 = tpu.matmul %80, %77, %cst_33 {dimension_numbers = #tpu.dot_dimension_numbers<[2], [1], [1], [2], [0, 0, 0, 1, 1, 2], [0], [0]>} : vector<32x8x8xf32>, vector<32x8x8xf32>, vector<32x8x8xf32> -> vector<32x8x8xf32>
    "tpu.trace_stop"() : () -> ()
    %cst_34 = arith.constant dense<0xFF800000> : vector<32x8xf32>
    %82 = vector.multi_reduction <maximumf>, %81, %cst_34 [1] : vector<32x8x8xf32> to vector<32x8xf32>
    %83 = vector.shape_cast %82 : vector<32x8xf32> to vector<32x1x8xf32>
    %84 = vector.broadcast %83 : vector<32x1x8xf32> to vector<32x8x8xf32>
    %85 = arith.subf %81, %84 : vector<32x8x8xf32>
    %86 = math.exp %85 : vector<32x8x8xf32>
    %cst_35 = arith.constant dense<0.000000e+00> : vector<32x8xf32>
    %87 = vector.multi_reduction <add>, %86, %cst_35 [1] : vector<32x8x8xf32> to vector<32x8xf32>
    %88 = vector.shape_cast %87 : vector<32x8xf32> to vector<32x1x8xf32>
    %89 = tpu.reciprocal %88 {approx = true} : vector<32x1x8xf32> -> vector<32x1x8xf32>
    %90 = vector.broadcast %89 : vector<32x1x8xf32> to vector<32x8x8xf32>
    %91 = arith.mulf %86, %90 : vector<32x8x8xf32>
    %92 = vector.shape_cast %2 : vector<8x8xf32> to vector<1x8x8xf32>
    %93 = vector.broadcast %92 : vector<1x8x8xf32> to vector<32x8x8xf32>
    %94 = arith.mulf %91, %93 : vector<32x8x8xf32>
    %cst_36 = arith.constant dense<0.000000e+00> : vector<32x8xf32>
    %95 = vector.multi_reduction <add>, %94, %cst_36 [2] : vector<32x8x8xf32> to vector<32x8xf32>
    %96 = vector.shape_cast %95 : vector<32x8xf32> to vector<32x8x1xf32>
    %97 = vector.shape_cast %1 : vector<8x8xf32> to vector<1x8x8xf32>
    %98 = vector.broadcast %97 : vector<1x8x8xf32> to vector<32x8x8xf32>
    %99 = arith.mulf %98, %91 : vector<32x8x8xf32>
    %100 = vector.broadcast %96 : vector<32x8x1xf32> to vector<32x8x8xf32>
    %101 = arith.mulf %100, %0 : vector<32x8x8xf32>
    "tpu.trace_start"() <{level = 10 : i32, message = "bij,bjt->bit"}> : () -> ()
    %cst_37 = arith.constant dense<0.000000e+00> : vector<32x8x8xf32>
    %102 = tpu.matmul %99, %101, %cst_37 {dimension_numbers = #tpu.dot_dimension_numbers<[2], [1], [1], [2], [0, 0, 0, 1, 1, 2], [0], [0]>} : vector<32x8x8xf32>, vector<32x8x8xf32>, vector<32x8x8xf32> -> vector<32x8x8xf32>
    "tpu.trace_stop"() : () -> ()
    %103 = vector.shape_cast %101 : vector<32x8x8xf32> to vector<256x8xf32>
    %104 = vector.shape_cast %102 : vector<32x8x8xf32> to vector<256x8xf32>
    %105 = tpu.concatenate %103, %104 in 1 : vector<256x8xf32>, vector<256x8xf32> -> vector<256x16xf32>
    %106 = vector.shape_cast %0 : vector<32x8x8xf32> to vector<256x8xf32>
    %cst_38 = arith.constant dense<0.000000e+00> : vector<256x128xf32>
    %107 = tpu.matmul %105, %11, %cst_38 {dimension_numbers = #tpu.dot_dimension_numbers<[1], [0], [0], [1], [0, 0, 1, 1], [], []>} : vector<256x16xf32>, vector<16x128xf32>, vector<256x128xf32> -> vector<256x128xf32>
    %108 = vector.broadcast %12 : vector<1x128xf32> to vector<256x128xf32>
    %109 = arith.addf %107, %108 : vector<256x128xf32>
    %cst_39 = arith.constant 0.000000e+00 : f32
    %110 = vector.broadcast %cst_39 : f32 to vector<256x128xf32>
    %111 = arith.maximumf %109, %110 : vector<256x128xf32>
    %cst_40 = arith.constant dense<0.000000e+00> : vector<256x128xf32>
    %112 = tpu.matmul %111, %13, %cst_40 {dimension_numbers = #tpu.dot_dimension_numbers<[1], [0], [0], [1], [0, 0, 1, 1], [], []>} : vector<256x128xf32>, vector<128x128xf32>, vector<256x128xf32> -> vector<256x128xf32>
    %113 = vector.broadcast %14 : vector<1x128xf32> to vector<256x128xf32>
    %114 = arith.addf %112, %113 : vector<256x128xf32>
    %cst_41 = arith.constant dense<0.000000e+00> : vector<256x128xf32>
    %115 = tpu.matmul %106, %15, %cst_41 {dimension_numbers = #tpu.dot_dimension_numbers<[1], [0], [0], [1], [0, 0, 1, 1], [], []>} : vector<256x8xf32>, vector<8x128xf32>, vector<256x128xf32> -> vector<256x128xf32>
    %116 = vector.broadcast %16 : vector<1x128xf32> to vector<256x128xf32>
    %117 = arith.addf %115, %116 : vector<256x128xf32>
    %118 = arith.addf %114, %117 : vector<256x128xf32>
    %cst_42 = arith.constant 0.000000e+00 : f32
    %119 = vector.broadcast %cst_42 : f32 to vector<256x128xf32>
    %120 = arith.maximumf %118, %119 : vector<256x128xf32>
    %121 = arith.mulf %120, %120 : vector<256x128xf32>
    %122 = tpu.concatenate %120, %121 in 0 : vector<256x128xf32>, vector<256x128xf32> -> vector<512x128xf32>
    %cst_43 = arith.constant dense<0.000000e+00> : vector<512x128xf32>
    %123 = tpu.matmul %122, %19, %cst_43 {dimension_numbers = #tpu.dot_dimension_numbers<[1], [0], [0], [1], [0, 0, 1, 1], [], []>} : vector<512x128xf32>, vector<128x128xf32>, vector<512x128xf32> -> vector<512x128xf32>
    %124 = vector.extract_strided_slice %123 {offsets = [0, 0], sizes = [256, 128], strides = [1, 1]} : vector<512x128xf32> to vector<256x128xf32>
    %125 = vector.extract_strided_slice %123 {offsets = [256, 0], sizes = [256, 128], strides = [1, 1]} : vector<512x128xf32> to vector<256x128xf32>
    %126 = arith.mulf %124, %124 : vector<256x128xf32>
    %127 = arith.subf %125, %126 : vector<256x128xf32>
    %cst_44 = arith.constant 0.000000e+00 : f32
    %128 = vector.broadcast %cst_44 : f32 to vector<256x128xf32>
    %129 = arith.maximumf %127, %128 : vector<256x128xf32>
    %130 = arith.subf %120, %124 : vector<256x128xf32>
    %cst_45 = arith.constant 9.99999974E-6 : f32
    %131 = vector.broadcast %cst_45 : f32 to vector<256x128xf32>
    %132 = arith.addf %129, %131 : vector<256x128xf32>
    %133 = math.rsqrt %132 : vector<256x128xf32>
    %134 = arith.mulf %130, %133 : vector<256x128xf32>
    %135 = vector.broadcast %17 : vector<1x128xf32> to vector<256x128xf32>
    %136 = arith.mulf %134, %135 : vector<256x128xf32>
    %137 = vector.broadcast %18 : vector<1x128xf32> to vector<256x128xf32>
    %138 = arith.addf %136, %137 : vector<256x128xf32>
    %cst_46 = arith.constant dense<0.000000e+00> : vector<8x256xf32>
    %139 = tpu.matmul %20, %138, %cst_46 {dimension_numbers = #tpu.dot_dimension_numbers<[1], [1], [0], [0], [0, 0, 1, 0], [], []>} : vector<8x128xf32>, vector<256x128xf32>, vector<8x256xf32> -> vector<8x256xf32>
    %140 = vector.broadcast %21 : vector<8x1xf32> to vector<8x256xf32>
    %141 = arith.addf %139, %140 : vector<8x256xf32>
    %c0_47 = arith.constant 0 : index
    %c0_48 = arith.constant 0 : index
    %c0_49 = arith.constant 0 : index
    %142 = vector.load %arg3[%c0_47, %c0_48, %c0_49] : memref<1x8x256xf32, #tpu.memory_space<vmem>>, vector<1x8x256xf32>
    %143 = vector.shape_cast %142 : vector<1x8x256xf32> to vector<8x256xf32>
    %144 = vector.shape_cast %141 : vector<8x256xf32> to vector<1x8x256xf32>
    tpu.vector_store %arg3[%c0_47, %c0_48, %c0_49], %144 {strides = array<i32>} : memref<1x8x256xf32, #tpu.memory_space<vmem>>, vector<1x8x256xf32>,
    return
  }
  func.func @transform_0(%arg0: i32) -> (i32, i32, i32) {
    %c0_i32 = arith.constant 0 : i32
    %c0_i32_0 = arith.constant 0 : i32
    %c0_i32_1 = arith.constant 0 : i32
    return %arg0, %c0_i32, %c0_i32_0 : i32, i32, i32
  }
  func.func @transform_1(%arg0: i32) -> (i32, i32) {
    %c0_i32 = arith.constant 0 : i32
    %c0_i32_0 = arith.constant 0 : i32
    %c0_i32_1 = arith.constant 0 : i32
    return %c0_i32, %c0_i32_0 : i32, i32
  }
  func.func @transform_2(%arg0: i32) -> (i32, i32, i32) {
    %c0_i32 = arith.constant 0 : i32
    %c0_i32_0 = arith.constant 0 : i32
    %c0_i32_1 = arith.constant 0 : i32
    return %arg0, %c0_i32, %c0_i32_0 : i32, i32, i32
  }
}

</mosaic_0001>

<bundles_post_ra>
// kernel: tpu_custom_call.1
= control target key start
LH: loop header
LB: loop body
LE: loop exit
PB: predicated region body
PF: predicated region fallthrough
CT: control target
= control target key end

     0   :  { %7 = vsyncpa [#allocation3], 0  ;;  %s18436_s0 = inlined_call_operand.vmem [shape: f32[64,8,8], index: 0, kind: input, shape index: {}]   ;;  %s18437_s1 = inlined_call_operand.vmem [shape: f32[416,128], index: 1, kind: input, shape index: {}]   ;;  %s18438_s2 = inlined_call_operand.hbm [shape: f32[2,8,256], index: 2, kind: output, shape index: {}]  }
   0x1   :  { %9 = vsyncpa [#allocation3 + $0x1], 0  ;;  %s14993_s9 = smov 0   ;;  %s14995_s10 = smov 0  }
   0x2   :  { %s14997_s11 = smov 0   ;;  %s14999_s12 = smov 0  }
   0x3 LB: > { %s15014_s13 = sadd.s32 4294967295, %s14971_s12   ;;  %s12404_s14 = sadd.s32 4294967294, %s14971_s12   ;;  %s14971_s12 = sphi %s14999_s12, %s18569_s12   ;;  %s14967_s11 = sphi %s14997_s11, %s18568_s11   ;;  %s14963_s10 = sphi %s14995_s10, %s18567_s10   ;;  %s14959_s9 = sphi %s14993_s9, %s18566_s9  }
   0x4   : > { %s15018_s15 = sadd.s32 1, %s14971_s12   ;;  %s69_s16 = sadd.s32 1, %s14967_s11 }
   0x5   : > { %s66_s17 = ssub.s32 %s14971_s12, %s15018_s15  ;;  %p79_p0 = scmp.ne.s32.totalorder %s14967_s11, %s14963_s10 }
   0x6   : > { %p67_p1 = scmp.eq.s32.totalorder %s66_s17, 0  ;;  %p80_p2 = scmp.eq.s32.totalorder %s15014_s13, 1 }
   0x7   : > { %p85_p3 = scmp.ne.s32.totalorder %s14963_s10, %s14959_s9  ;;  %p86_p4 = scmp.eq.s32.totalorder %s12404_s14, 1 }
   0x8   : > { %s15029_s18 = scalar_select %p67_p1, %s14967_s11, %s69_s16  }
   0x9   : > { %p15031_p5 = por %p80_p2, %p79_p0  ;;  %p15035_p6 = por %p86_p4, %p85_p3 }
   0xa   : > { %p12407_p7 = scmp.ge.s32.totalorder %s14971_s12, 1  ;;  %p116_p8 = scmp.lt.s32.totalorder %s14971_s12, 3 }
   0xc   : > { %p117_p9 = pnand %p12407_p7, %p116_p8 }
   0xe   : > { %120 = sbr.rel (%p117_p9) target bundleno = 3218 (0xc92), region = 28 }
  0x15   : > { %v183_v0 = vld [vmem:[%s18437_s1 + $0x38] sm:$0xff]  ;;  %v14973_v1 = vmov 0   ;;  %v182_v2 = vld [vmem:[%s18437_s1 + $0x30] sm:$0xff]  ;;  %s12409_s25 = sshll.u32 %s15014_s13, 5  ;;  %vm265_vm0 = vcmask 64512   ;;  %vm14975_vm1 = vmmov 0  }
  0x16   : > { %14247 = vset.pattern.permute.xlu0 %v14973_v1  ;;  %p139_p10 = scmp.lt.s32.totalorder %s12409_s25, 63  ;;  %s14976_s30 = smov 8   ;;  %vm10663_vm2 = vcmask 130048  }
  0x17   : > { %492 = vperm.xlu0 %14247, %v183_v0   ;;  %s135_s23 = sand.u32 1, %s14963_s10   ;;  %s12711_s24 = sshll.u32 %s15014_s13, 8 }
  0x18   : > { %s18571_s25 = smov (!%p139_p10, %s12409_s25), 63  ;;  %s12331_s13 = scalar_lea.sflag [#allocation3], %s135_s23 }
  0x19   : > { %s12410_s26 = sshll.u32 %s18571_s25, 3  ;;  %s14977_s4 = smov [#allocation2]  }
  0x1a   : > { %s15051_s29 = scalar_lea.vmem %s18436_s0, %s12410_s26  ;;  %s14913_s5 = sshll.u32 %s14977_s4, 4  ;;  %s14914_s5 = int_to_ptr.vmem [resolvable:$false] %s14913_s5 }
  0x1b   : > { %230 = vperm.xlu0 %14247, %v182_v2   ;;  %v15054_v3 = vld [vmem:[%s15051_s29 + $0x10] sm:$0xff]  ;;  %v15057_v4 = vld [vmem:[%s15051_s29] sm:$0xff]  ;;  %v15063_v6 = vld [vmem:[%s15051_s29 + $0x8] sm:$0xff]  ;;  %s14915_s6 = scalar_lea.vmem %s14914_s5, 512 }
  0x1c   : > { %v15060_v5 = vld [vmem:[%s15051_s29 + $0x20] sm:$0xff]  ;;  %v15066_v7 = vld [vmem:[%s15051_s29 + $0x30] sm:$0xff]  ;;  %v15069_v8 = vld [vmem:[%s15051_s29 + $0x18] sm:$0xff] }
  0x1d   : > { %v15072_v9 = vld [vmem:[%s15051_s29 + $0x40] sm:$0xff]  ;;  %v15075_v10 = vld [vmem:[%s15051_s29 + $0x28] sm:$0xff]  ;;  %v15104_v0 = vld [vmem:[%s15051_s29 + $0x50] sm:$0xff] }
  0x1e   : > { %v15107_v1 = vld [vmem:[%s15051_s29 + $0x38] sm:$0xff]  ;;  %v15110_v2 = vld [vmem:[%s15051_s29 + $0x60] sm:$0xff] }
  0x96   : > { %v15077_v11 = vpop.permute.xlu0 %492 }
  0x97   : > { %v497_v12 = vmul.f32 %v15077_v11, %v15054_v3  ;;  %v495_v13 = vmul.f32 %v15077_v11, %v15057_v4  ;;  %v499_v14 = vmul.f32 %v15077_v11, %v15060_v5  ;;  %v496_v15 = vmul.f32 %v15077_v11, %v15063_v6 }
  0x98   : > { %v501_v16 = vmul.f32 %v15077_v11, %v15066_v7  ;;  %v498_v17 = vmul.f32 %v15077_v11, %v15069_v8  ;;  %v503_v18 = vmul.f32 %v15077_v11, %v15072_v9  ;;  %v500_v19 = vmul.f32 %v15077_v11, %v15075_v10 }
  0x99   : > { %v541_v20 = vsel %vm265_vm0, %v497_v12, 0.0  ;;  %v527_v21 = vsel %vm265_vm0, %v495_v13, 0.0  ;;  %v555_v22 = vsel %vm265_vm0, %v499_v14, 0.0  ;;  %v534_v23 = vsel %vm265_vm0, %v496_v15, 0.0 }
  0x9a   : > { %v542_v24 = vrot.slane %v541_v20, 4  ;;  %v528_v25 = vrot.slane %v527_v21, 4  ;;  %v556_v26 = vrot.slane %v555_v22, 4  ;;  %v535_v27 = vrot.slane %v534_v23, 4 }
  0x9b   : > { %v569_v28 = vsel %vm265_vm0, %v501_v16, 0.0  ;;  %v548_v29 = vsel %vm265_vm0, %v498_v17, 0.0  ;;  %v583_v30 = vsel %vm265_vm0, %v503_v18, 0.0  ;;  %v562_v31 = vsel %vm265_vm0, %v500_v19, 0.0 }
  0x9c   : > { %v543_v32 = vadd.f32 %v542_v24, %v541_v20  ;;  %v529_v33 = vadd.f32 %v528_v25, %v527_v21  ;;  %v557_v34 = vadd.f32 %v556_v26, %v555_v22  ;;  %v536_v35 = vadd.f32 %v535_v27, %v534_v23  ;;  %v15113_v20 = vld [vmem:[%s15051_s29 + $0x48] sm:$0xff]  ;;  %v15122_v24 = vld [vmem:[%s15051_s29 + $0x70] sm:$0xff] }
  0x9d   : > { %v570_v36 = vrot.slane %v569_v28, 4  ;;  %v549_v37 = vrot.slane %v548_v29, 4  ;;  %v584_v38 = vrot.slane %v583_v30, 4  ;;  %v563_v39 = vrot.slane %v562_v31, 4 }
  0x9e   : > { %v544_v40 = vrot.slane %v543_v32, 2  ;;  %v530_v41 = vrot.slane %v529_v33, 2  ;;  %v558_v42 = vrot.slane %v557_v34, 2  ;;  %v537_v43 = vrot.slane %v536_v35, 2 }
  0x9f   : > { %v571_v44 = vadd.f32 %v570_v36, %v569_v28  ;;  %v550_v45 = vadd.f32 %v549_v37, %v548_v29  ;;  %v585_v46 = vadd.f32 %v584_v38, %v583_v30  ;;  %v564_v47 = vadd.f32 %v563_v39, %v562_v31  ;;  %v15125_v29 = vld [vmem:[%s15051_s29 + $0x58] sm:$0xff]  ;;  %v15128_v30 = vld [vmem:[%s15051_s29 + $0x80] sm:$0xff]  ;;  %v15131_v31 = vld [vmem:[%s15051_s29 + $0x68] sm:$0xff] }
  0xa0   : > { %v545_v48 = vadd.f32 %v544_v40, %v543_v32  ;;  %v531_v49 = vadd.f32 %v530_v41, %v529_v33  ;;  %v559_v50 = vadd.f32 %v558_v42, %v557_v34  ;;  %v538_v51 = vadd.f32 %v537_v43, %v536_v35 }
  0xa1   : > { %v572_v52 = vrot.slane %v571_v44, 2  ;;  %v551_v53 = vrot.slane %v550_v45, 2  ;;  %v586_v54 = vrot.slane %v585_v46, 2  ;;  %v565_v55 = vrot.slane %v564_v47, 2 }
  0xa2   : > { %v546_v56 = vrot.slane %v545_v48, 1  ;;  %v532_v57 = vrot.slane %v531_v49, 1  ;;  %v560_v58 = vrot.slane %v559_v50, 1  ;;  %v539_v59 = vrot.slane %v538_v51, 1 }
  0xa3   : > { %v573_v60 = vadd.f32 %v572_v52, %v571_v44  ;;  %v552_v61 = vadd.f32 %v551_v53, %v550_v45  ;;  %v587_v62 = vadd.f32 %v586_v54, %v585_v46  ;;  %v566_v63 = vadd.f32 %v565_v55, %v564_v47 }
  0xa4   : > { %v547_v12 = vadd.f32 %v546_v56, %v545_v48  ;;  %v533_v13 = vadd.f32 %v532_v57, %v531_v49  ;;  %v561_v14 = vadd.f32 %v560_v58, %v559_v50  ;;  %v540_v15 = vadd.f32 %v539_v59, %v538_v51 }
  0xa5   : > { %v574_v16 = vrot.slane %v573_v60, 1  ;;  %v553_v17 = vrot.slane %v552_v61, 1  ;;  %v588_v18 = vrot.slane %v587_v62, 1  ;;  %v567_v19 = vrot.slane %v566_v63, 1 }
  0xa6   : > { %758 = vbcast.lane.b32.xlu0 %v547_v12, 256  ;;  %752 = vbcast.lane.b32.xlu1 %v533_v13, 256  ;;  %v505_v21 = vmul.f32 %v15077_v11, %v15104_v0  ;;  %v502_v22 = vmul.f32 %v15077_v11, %v15107_v1  ;;  %v507_v23 = vmul.f32 %v15077_v11, %v15110_v2 }
  0xa7   : > { %v575_v25 = vadd.f32 %v574_v16, %v573_v60  ;;  %v554_v26 = vadd.f32 %v553_v17, %v552_v61  ;;  %v589_v27 = vadd.f32 %v588_v18, %v587_v62  ;;  %v568_v28 = vadd.f32 %v567_v19, %v566_v63 }
  0xa8   : > { %v597_v32 = vsel %vm265_vm0, %v505_v21, 0.0  ;;  %v576_v33 = vsel %vm265_vm0, %v502_v22, 0.0  ;;  %v611_v34 = vsel %vm265_vm0, %v507_v23, 0.0  ;;  %v504_v35 = vmul.f32 %v15077_v11, %v15113_v20  ;;  %v15152_v21 = vld [vmem:[%s15051_s29 + $0x90] sm:$0xff]  ;;  %v15155_v22 = vld [vmem:[%s15051_s29 + $0x78] sm:$0xff]  ;;  %v15158_v23 = vld [vmem:[%s15051_s29 + $0xa0] sm:$0xff] }
  0xa9   : > { %v598_v36 = vrot.slane %v597_v32, 4  ;;  %v577_v37 = vrot.slane %v576_v33, 4  ;;  %v612_v38 = vrot.slane %v611_v34, 4  ;;  %v509_v39 = vmul.f32 %v15077_v11, %v15122_v24 }
  0xaa   : > { %764 = vbcast.lane.b32.xlu0 %v561_v14, 256  ;;  %755 = vbcast.lane.b32.xlu1 %v540_v15, 256  ;;  %v590_v40 = vsel %vm265_vm0, %v504_v35, 0.0  ;;  %v506_v41 = vmul.f32 %v15077_v11, %v15125_v29  ;;  %v511_v42 = vmul.f32 %v15077_v11, %v15128_v30  ;;  %v508_v43 = vmul.f32 %v15077_v11, %v15131_v31 }
  0xab   : > { %v599_v44 = vadd.f32 %v598_v36, %v597_v32  ;;  %v578_v45 = vadd.f32 %v577_v37, %v576_v33  ;;  %v613_v46 = vadd.f32 %v612_v38, %v611_v34  ;;  %v591_v47 = vrot.slane %v590_v40, 4 }
  0xac   : > { %v625_v48 = vsel %vm265_vm0, %v509_v39, 0.0  ;;  %v604_v49 = vsel %vm265_vm0, %v506_v41, 0.0  ;;  %v639_v50 = vsel %vm265_vm0, %v511_v42, 0.0  ;;  %v618_v51 = vsel %vm265_vm0, %v508_v43, 0.0  ;;  %v15161_v42 = vld [vmem:[%s15051_s29 + $0x88] sm:$0xff] }
  0xad   : > { %v600_v52 = vrot.slane %v599_v44, 2  ;;  %v579_v53 = vrot.slane %v578_v45, 2  ;;  %v614_v54 = vrot.slane %v613_v46, 2  ;;  %v592_v55 = vadd.f32 %v591_v47, %v590_v40 }
  0xae   : > { %770 = vbcast.lane.b32.xlu0 %v575_v25, 256  ;;  %761 = vbcast.lane.b32.xlu1 %v554_v26, 256  ;;  %v626_v56 = vrot.slane %v625_v48, 4  ;;  %v605_v57 = vrot.slane %v604_v49, 4  ;;  %v640_v58 = vrot.slane %v639_v50, 4  ;;  %v619_v59 = vrot.slane %v618_v51, 4 }
  0xaf   : > { %v601_v60 = vadd.f32 %v600_v52, %v599_v44  ;;  %v580_v61 = vadd.f32 %v579_v53, %v578_v45  ;;  %v615_v62 = vadd.f32 %v614_v54, %v613_v46  ;;  %v593_v63 = vrot.slane %v592_v55, 2  ;;  %v15175_v53 = vld [vmem:[%s15051_s29 + $0xb0] sm:$0xff]  ;;  %v15178_v54 = vld [vmem:[%s15051_s29 + $0x98] sm:$0xff] }
  0xb0   : > { %v627_v12 = vadd.f32 %v626_v56, %v625_v48  ;;  %v606_v13 = vadd.f32 %v605_v57, %v604_v49  ;;  %v641_v14 = vadd.f32 %v640_v58, %v639_v50  ;;  %v620_v15 = vadd.f32 %v619_v59, %v618_v51 }
  0xb1   : > { %v602_v16 = vrot.slane %v601_v60, 1  ;;  %v581_v17 = vrot.slane %v580_v61, 1  ;;  %v616_v18 = vrot.slane %v615_v62, 1  ;;  %v594_v19 = vadd.f32 %v593_v63, %v592_v55  ;;  %v15181_v55 = vld [vmem:[%s15051_s29 + $0xc0] sm:$0xff] }
  0xb2   : > { %776 = vbcast.lane.b32.xlu0 %v589_v27, 256  ;;  %767 = vbcast.lane.b32.xlu1 %v568_v28, 256  ;;  %v628_v25 = vrot.slane %v627_v12, 2  ;;  %v607_v26 = vrot.slane %v606_v13, 2  ;;  %v642_v32 = vrot.slane %v641_v14, 2  ;;  %v621_v33 = vrot.slane %v620_v15, 2 }
  0xb3   : > { %v603_v34 = vadd.f32 %v602_v16, %v601_v60  ;;  %v582_v35 = vadd.f32 %v581_v17, %v580_v61  ;;  %v617_v36 = vadd.f32 %v616_v18, %v615_v62  ;;  %v595_v37 = vrot.slane %v594_v19, 1  ;;  %v15184_v60 = vld [vmem:[%s15051_s29 + $0xa8] sm:$0xff] }
  0xb4   : > { %v629_v38 = vadd.f32 %v628_v25, %v627_v12  ;;  %v608_v39 = vadd.f32 %v607_v26, %v606_v13  ;;  %v643_v40 = vadd.f32 %v642_v32, %v641_v14  ;;  %v622_v41 = vadd.f32 %v621_v33, %v620_v15 }
  0xb5   : > { %v596_v43 = vadd.f32 %v595_v37, %v594_v19  ;;  %v513_v27 = vmul.f32 %v15077_v11, %v15152_v21  ;;  %v510_v28 = vmul.f32 %v15077_v11, %v15155_v22  ;;  %v515_v44 = vmul.f32 %v15077_v11, %v15158_v23 }
  0xb6   : > { %782 = vbcast.lane.b32.xlu0 %v603_v34, 256  ;;  %773 = vbcast.lane.b32.xlu1 %v582_v35, 256  ;;  %v630_v45 = vrot.slane %v629_v38, 1  ;;  %v609_v46 = vrot.slane %v608_v39, 1  ;;  %v644_v47 = vrot.slane %v643_v40, 1  ;;  %v623_v48 = vrot.slane %v622_v41, 1 }
  0xb7   : > { %v653_v49 = vsel %vm265_vm0, %v513_v27, 0.0  ;;  %v632_v50 = vsel %vm265_vm0, %v510_v28, 0.0  ;;  %v667_v51 = vsel %vm265_vm0, %v515_v44, 0.0  ;;  %v512_v52 = vmul.f32 %v15077_v11, %v15161_v42 }
  0xb8   : > { %v631_v56 = vadd.f32 %v630_v45, %v629_v38  ;;  %v610_v57 = vadd.f32 %v609_v46, %v608_v39  ;;  %v645_v58 = vadd.f32 %v644_v47, %v643_v40  ;;  %v624_v59 = vadd.f32 %v623_v48, %v622_v41 }
  0xb9   : > { %v654_v61 = vrot.slane %v653_v49, 4  ;;  %v633_v62 = vrot.slane %v632_v50, 4  ;;  %v668_v63 = vrot.slane %v667_v51, 4  ;;  %v646_v12 = vsel %vm265_vm0, %v512_v52, 0.0 }
  0xba   : > { %788 = vbcast.lane.b32.xlu0 %v617_v36, 256  ;;  %779 = vbcast.lane.b32.xlu1 %v596_v43, 256  ;;  %v647_v13 = vrot.slane %v646_v12, 4  ;;  %v517_v14 = vmul.f32 %v15077_v11, %v15175_v53  ;;  %v514_v15 = vmul.f32 %v15077_v11, %v15178_v54  ;;  %v519_v16 = vmul.f32 %v15077_v11, %v15181_v55 }
  0xbb   : > { %v655_v17 = vadd.f32 %v654_v61, %v653_v49  ;;  %v634_v18 = vadd.f32 %v633_v62, %v632_v50  ;;  %v669_v19 = vadd.f32 %v668_v63, %v667_v51  ;;  %v516_v25 = vmul.f32 %v15077_v11, %v15184_v60  ;;  %v15203_v61 = vld [vmem:[%s15051_s29 + $0xb8] sm:$0xff] }
  0xbc   : > { %v648_v26 = vadd.f32 %v647_v13, %v646_v12  ;;  %v681_v32 = vsel %vm265_vm0, %v517_v14, 0.0  ;;  %v660_v33 = vsel %vm265_vm0, %v514_v15, 0.0  ;;  %v695_v34 = vsel %vm265_vm0, %v519_v16, 0.0  ;;  %v15206_v14 = vld [vmem:[%s15051_s29 + $0xe0] sm:$0xff] }
  0xbd   : > { %v656_v35 = vrot.slane %v655_v17, 2  ;;  %v635_v36 = vrot.slane %v634_v18, 2  ;;  %v670_v37 = vrot.slane %v669_v19, 2  ;;  %v682_v38 = vrot.slane %v681_v32, 4 }
  0xbe   : > { %794 = vbcast.lane.b32.xlu0 %v631_v56, 256  ;;  %785 = vbcast.lane.b32.xlu1 %v610_v57, 256  ;;  %v649_v39 = vrot.slane %v648_v26, 2  ;;  %v661_v40 = vrot.slane %v660_v33, 4  ;;  %v696_v41 = vrot.slane %v695_v34, 4  ;;  %v674_v43 = vsel %vm265_vm0, %v516_v25, 0.0 }
  0xbf   : > { %v657_v27 = vadd.f32 %v656_v35, %v655_v17  ;;  %v636_v28 = vadd.f32 %v635_v36, %v634_v18  ;;  %v671_v44 = vadd.f32 %v670_v37, %v669_v19  ;;  %v683_v45 = vadd.f32 %v682_v38, %v681_v32  ;;  %v15200_v57 = vld [vmem:[%s15051_s29 + $0xd0] sm:$0xff]  ;;  %v15209_v19 = vld [vmem:[%s15051_s29 + $0xc8] sm:$0xff] }
  0xc0   : > { %v650_v46 = vadd.f32 %v649_v39, %v648_v26  ;;  %v662_v47 = vadd.f32 %v661_v40, %v660_v33  ;;  %v697_v48 = vadd.f32 %v696_v41, %v695_v34  ;;  %v675_v49 = vrot.slane %v674_v43, 4  ;;  %v15220_v40 = vld [vmem:[%s15051_s29 + $0xf0] sm:$0xff] }
  0xc1   : > { %v658_v50 = vrot.slane %v657_v27, 1  ;;  %v637_v51 = vrot.slane %v636_v28, 1  ;;  %v672_v52 = vrot.slane %v671_v44, 1  ;;  %v684_v56 = vrot.slane %v683_v45, 2 }
  0xc2   : > { %800 = vbcast.lane.b32.xlu0 %v645_v58, 256  ;;  %791 = vbcast.lane.b32.xlu1 %v624_v59, 256  ;;  %v651_v62 = vrot.slane %v650_v46, 1  ;;  %v663_v63 = vrot.slane %v662_v47, 2  ;;  %v698_v12 = vrot.slane %v697_v48, 2  ;;  %v676_v13 = vadd.f32 %v675_v49, %v674_v43  ;;  %v15229_v49 = vld [vmem:[%s15051_s29 + $0xe8] sm:$0xff] }
  0xc3   : > { %v659_v15 = vadd.f32 %v658_v50, %v657_v27  ;;  %v638_v16 = vadd.f32 %v637_v51, %v636_v28  ;;  %v673_v17 = vadd.f32 %v672_v52, %v671_v44  ;;  %v685_v18 = vadd.f32 %v684_v56, %v683_v45  ;;  %v15226_v44 = vld [vmem:[%s15051_s29 + $0xd8] sm:$0xff] }
  0xc4   : > { %v652_v25 = vadd.f32 %v651_v62, %v650_v46  ;;  %v664_v26 = vadd.f32 %v663_v63, %v662_v47  ;;  %v699_v32 = vadd.f32 %v698_v12, %v697_v48  ;;  %v677_v33 = vrot.slane %v676_v13, 2 }
  0xc5   : > { %v686_v58 = vrot.slane %v685_v18, 1  ;;  %v521_v59 = vmul.f32 %v15077_v11, %v15200_v57  ;;  %v518_v34 = vmul.f32 %v15077_v11, %v15203_v61  ;;  %v523_v35 = vmul.f32 %v15077_v11, %v15206_v14 }
  0xc6   : > { %806 = vbcast.lane.b32.xlu0 %v659_v15, 256  ;;  %797 = vbcast.lane.b32.xlu1 %v638_v16, 256  ;;  %v665_v36 = vrot.slane %v664_v26, 1  ;;  %v700_v37 = vrot.slane %v699_v32, 1  ;;  %v678_v38 = vadd.f32 %v677_v33, %v676_v13  ;;  %v520_v39 = vmul.f32 %v15077_v11, %v15209_v19 }
  0xc7   : > { %v687_v41 = vadd.f32 %v686_v58, %v685_v18  ;;  %v709_v43 = vsel %vm265_vm0, %v521_v59, 0.0  ;;  %v688_v27 = vsel %vm265_vm0, %v518_v34, 0.0  ;;  %v723_v28 = vsel %vm265_vm0, %v523_v35, 0.0 }
  0xc8   : > { %v666_v45 = vadd.f32 %v665_v36, %v664_v26  ;;  %v701_v46 = vadd.f32 %v700_v37, %v699_v32  ;;  %v679_v47 = vrot.slane %v678_v38, 1  ;;  %v710_v48 = vrot.slane %v709_v43, 4 }
  0xc9   : > { %v689_v50 = vrot.slane %v688_v27, 4  ;;  %v724_v51 = vrot.slane %v723_v28, 4  ;;  %v702_v52 = vsel %vm265_vm0, %v520_v39, 0.0  ;;  %v525_v56 = vmul.f32 %v15077_v11, %v15220_v40 }
  0xca   : > { %812 = vbcast.lane.b32.xlu0 %v673_v17, 256  ;;  %803 = vbcast.lane.b32.xlu1 %v652_v25, 256  ;;  %v680_v62 = vadd.f32 %v679_v47, %v678_v38  ;;  %v711_v63 = vadd.f32 %v710_v48, %v709_v43  ;;  %v703_v12 = vrot.slane %v702_v52, 4  ;;  %v522_v13 = vmul.f32 %v15077_v11, %v15226_v44  ;;  %v15241_v17 = vld [vmem:[%s15051_s29 + $0xf8] sm:$0xff] }
  0xcb   : > { %v690_v15 = vadd.f32 %v689_v50, %v688_v27  ;;  %v725_v16 = vadd.f32 %v724_v51, %v723_v28  ;;  %v737_v18 = vsel %vm265_vm0, %v525_v56, 0.0  ;;  %v524_v26 = vmul.f32 %v15077_v11, %v15229_v49  ;;  %v179_v50 = vld [vmem:[%s18437_s1 + $0x18] sm:$0xff] }
  0xcc   : > { %v712_v32 = vrot.slane %v711_v63, 2  ;;  %v704_v33 = vadd.f32 %v703_v12, %v702_v52  ;;  %v738_v58 = vrot.slane %v737_v18, 4  ;;  %v716_v59 = vsel %vm265_vm0, %v522_v13, 0.0  ;;  %13166 = vmatprep.subr.mxu0 %v179_v50 }
  0xcd   : > { %v691_v25 = vrot.slane %v690_v15, 2  ;;  %v726_v34 = vrot.slane %v725_v16, 2  ;;  %v717_v35 = vrot.slane %v716_v59, 4  ;;  %v730_v36 = vsel %vm265_vm0, %v524_v26, 0.0  ;;  %13167 = vmatpush3.msra.mxu0 %v179_v50 }
  0xce   : > { %818 = vbcast.lane.b32.xlu0 %v687_v41, 256  ;;  %809 = vbcast.lane.b32.xlu1 %v666_v45, 256  ;;  %v713_v37 = vadd.f32 %v712_v32, %v711_v63  ;;  %v705_v38 = vrot.slane %v704_v33, 2  ;;  %v739_v39 = vadd.f32 %v738_v58, %v737_v18  ;;  %v731_v43 = vrot.slane %v730_v36, 4 }
  0xcf   : > { %v692_v27 = vadd.f32 %v691_v25, %v690_v15  ;;  %v727_v28 = vadd.f32 %v726_v34, %v725_v16  ;;  %v718_v47 = vadd.f32 %v717_v35, %v716_v59  ;;  %v526_v48 = vmul.f32 %v15077_v11, %v15241_v17 }
  0xd0   : > { %v714_v51 = vrot.slane %v713_v37, 1  ;;  %v706_v52 = vadd.f32 %v705_v38, %v704_v33  ;;  %v740_v56 = vrot.slane %v739_v39, 2  ;;  %v732_v12 = vadd.f32 %v731_v43, %v730_v36 }
  0xd1   : > { %v693_v41 = vrot.slane %v692_v27, 1  ;;  %v719_v45 = vrot.slane %v718_v47, 2  ;;  %v744_v63 = vsel %vm265_vm0, %v526_v48, 0.0  ;;  %v728_v15 = vrot.slane %v727_v28, 1  ;;  %v15250_v48 = vpop.permute.xlu0 %230 }
  0xd2   : > { %824 = vbcast.lane.b32.xlu0 %v701_v46, 256  ;;  %815 = vbcast.lane.b32.xlu1 %v680_v62, 256  ;;  %v715_v13 = vadd.f32 %v714_v51, %v713_v37  ;;  %v707_v16 = vrot.slane %v706_v52, 1  ;;  %v745_v11 = vrot.slane %v744_v63, 4  ;;  %v741_v26 = vadd.f32 %v740_v56, %v739_v39 }
  0xd3   : > { %v694_v18 = vadd.f32 %v693_v41, %v692_v27  ;;  %v720_v32 = vadd.f32 %v719_v45, %v718_v47  ;;  %v733_v58 = vrot.slane %v732_v12, 2  ;;  %v729_v33 = vadd.f32 %v728_v15, %v727_v28 }
  0xd4   : > { %v746_v59 = vadd.f32 %v745_v11, %v744_v63  ;;  %v708_v25 = vadd.f32 %v707_v16, %v706_v52  ;;  %v742_v34 = vrot.slane %v741_v26, 1  ;;  %v235_v28 = vmul.f32 %v15250_v48, %v15054_v3 }
  0xd5   : > { %v721_v35 = vrot.slane %v720_v32, 1  ;;  %v734_v36 = vadd.f32 %v733_v58, %v732_v12  ;;  %v233_v47 = vmul.f32 %v15250_v48, %v15057_v4  ;;  %v237_v50 = vmul.f32 %v15250_v48, %v15060_v5 }
  0xd6   : > { %830 = vbcast.lane.b32.xlu0 %v715_v13, 256  ;;  %821 = vbcast.lane.b32.xlu1 %v694_v18, 256  ;;  %v747_v38 = vrot.slane %v746_v59, 2  ;;  %v743_v46 = vadd.f32 %v742_v34, %v741_v26  ;;  %v234_v51 = vmul.f32 %v15250_v48, %v15063_v6  ;;  %v280_v56 = vsel %vm265_vm0, %v235_v28, 0.0 }
  0xd7   : > { %v722_v62 = vadd.f32 %v721_v35, %v720_v32  ;;  %v735_v37 = vrot.slane %v734_v36, 1  ;;  %v266_v12 = vsel %vm265_vm0, %v233_v47, 0.0  ;;  %v294_v41 = vsel %vm265_vm0, %v237_v50, 0.0 }
  0xd8   : > { %v748_v43 = vadd.f32 %v747_v38, %v746_v59  ;;  %v273_v3 = vsel %vm265_vm0, %v234_v51, 0.0  ;;  %v281_v45 = vrot.slane %v280_v56, 4  ;;  %v239_v4 = vmul.f32 %v15250_v48, %v15066_v7 }
  0xd9   : > { %v736_v39 = vadd.f32 %v735_v37, %v734_v36  ;;  %v267_v63 = vrot.slane %v266_v12, 4  ;;  %v295_v5 = vrot.slane %v294_v41, 4  ;;  %v236_v13 = vmul.f32 %v15250_v48, %v15069_v8 }
  0xda   : > { %836 = vbcast.lane.b32.xlu0 %v729_v33, 256  ;;  %827 = vbcast.lane.b32.xlu1 %v708_v25, 256  ;;  %v749_v27 = vrot.slane %v748_v43, 1  ;;  %v274_v6 = vrot.slane %v273_v3, 4  ;;  %v282_v15 = vadd.f32 %v281_v45, %v280_v56  ;;  %v308_v16 = vsel %vm265_vm0, %v239_v4, 0.0 }
  0xdb   : > { %v241_v11 = vmul.f32 %v15250_v48, %v15072_v9  ;;  %v268_v18 = vadd.f32 %v267_v63, %v266_v12  ;;  %v296_v26 = vadd.f32 %v295_v5, %v294_v41  ;;  %v287_v32 = vsel %vm265_vm0, %v236_v13, 0.0 }
  0xdc   : > { %v750_v52 = vadd.f32 %v749_v27, %v748_v43  ;;  %v275_v58 = vadd.f32 %v274_v6, %v273_v3  ;;  %v309_v59 = vrot.slane %v308_v16, 4  ;;  %v283_v33 = vrot.slane %v282_v15, 2 }
  0xdd   : > { %v288_v7 = vrot.slane %v287_v32, 4  ;;  %v322_v25 = vsel %vm265_vm0, %v241_v11, 0.0  ;;  %v269_v34 = vrot.slane %v268_v18, 2  ;;  %v297_v35 = vrot.slane %v296_v26, 2 }
  0xde   : > { %842 = vbcast.lane.b32.xlu0 %v743_v46, 256  ;;  %833 = vbcast.lane.b32.xlu1 %v722_v62, 256  ;;  %v276_v8 = vrot.slane %v275_v58, 2  ;;  %v238_v36 = vmul.f32 %v15250_v48, %v15075_v10  ;;  %v310_v38 = vadd.f32 %v309_v59, %v308_v16  ;;  %v323_v46 = vrot.slane %v322_v25, 4 }
  0xdf   : > { %v284_v62 = vadd.f32 %v283_v33, %v282_v15  ;;  %v289_v9 = vadd.f32 %v288_v7, %v287_v32  ;;  %v270_v37 = vadd.f32 %v269_v34, %v268_v18  ;;  %v298_v43 = vadd.f32 %v297_v35, %v296_v26 }
  0xe0   : > { %v301_v27 = vsel %vm265_vm0, %v238_v36, 0.0  ;;  %v311_v28 = vrot.slane %v310_v38, 2  ;;  %v324_v47 = vadd.f32 %v323_v46, %v322_v25  ;;  %v243_v50 = vmul.f32 %v15250_v48, %v15104_v0 }
  0xe1   : > { %v285_v51 = vrot.slane %v284_v62, 1  ;;  %v271_v56 = vrot.slane %v270_v37, 1  ;;  %v299_v12 = vrot.slane %v298_v43, 1  ;;  %v302_v41 = vrot.slane %v301_v27, 4 }
  0xe2   : > { %839 = vbcast.lane.b32.xlu1 %v736_v39, 256  ;;  %v277_v39 = vadd.f32 %v276_v8, %v275_v58  ;;  %v240_v3 = vmul.f32 %v15250_v48, %v15107_v1  ;;  %v312_v45 = vadd.f32 %v311_v28, %v310_v38  ;;  %v325_v4 = vrot.slane %v324_v47, 2 }
  0xe3   : > { %v336_v63 = vsel %vm265_vm0, %v243_v50, 0.0  ;;  %v245_v5 = vmul.f32 %v15250_v48, %v15110_v2  ;;  %v15283_v13 = vadd.f32 %v285_v51, %v284_v62  ;;  %v242_v0 = vmul.f32 %v15250_v48, %v15113_v20 }
  0xe4   : > { %v278_v10 = vrot.slane %v277_v39, 1  ;;  %v247_v15 = vmul.f32 %v15250_v48, %v15122_v24  ;;  %v15289_v16 = vadd.f32 %v271_v56, %v270_v37  ;;  %v15291_v11 = vadd.f32 %v299_v12, %v298_v43 }
  0xe5   : > { %v303_v1 = vadd.f32 %v302_v41, %v301_v27  ;;  %v244_v18 = vmul.f32 %v15250_v48, %v15125_v29  ;;  %v337_v2 = vrot.slane %v336_v63, 4  ;;  %v315_v32 = vsel %vm265_vm0, %v240_v3, 0.0 }
  0xe6   : > { %845 = vbcast.lane.b32.xlu1 %v750_v52, 256  ;;  %v290_v52 = vrot.slane %v289_v9, 2  ;;  %v15295_v26 = vadd.f32 %v278_v10, %v277_v39  ;;  %v249_v58 = vmul.f32 %v15250_v48, %v15128_v30  ;;  %v313_v20 = vrot.slane %v312_v45, 1 }
  0xe7   : > { %v326_v59 = vadd.f32 %v325_v4, %v324_v47  ;;  %v350_v24 = vsel %vm265_vm0, %v245_v5, 0.0  ;;  %v246_v33 = vmul.f32 %v15250_v48, %v15131_v31  ;;  %v329_v25 = vsel %vm265_vm0, %v242_v0, 0.0 }
  0xe8   : > { %v291_v6 = vadd.f32 %v290_v52, %v289_v9  ;;  %v364_v29 = vsel %vm265_vm0, %v247_v15, 0.0  ;;  %v251_v34 = vmul.f32 %v15250_v48, %v15152_v21  ;;  %v304_v35 = vrot.slane %v303_v1, 2 }
  0xe9   : > { %v316_v8 = vrot.slane %v315_v32, 4  ;;  %v343_v36 = vsel %vm265_vm0, %v244_v18, 0.0  ;;  %v248_v30 = vmul.f32 %v15250_v48, %v15155_v22  ;;  %v338_v38 = vadd.f32 %v337_v2, %v336_v63 }
  0xea   : > { %v292_v7 = vrot.slane %v291_v6, 1  ;;  %v351_v46 = vrot.slane %v350_v24, 4  ;;  %v378_v62 = vsel %vm265_vm0, %v249_v58, 0.0  ;;  %v253_v31 = vmul.f32 %v15250_v48, %v15158_v23 }
  0xeb   : > { %v327_v9 = vrot.slane %v326_v59, 1  ;;  %v330_v37 = vrot.slane %v329_v25, 4  ;;  %v365_v43 = vrot.slane %v364_v29, 4  ;;  %v357_v39 = vsel %vm265_vm0, %v246_v33, 0.0 }
  0xec   : > { %v15314_v21 = vadd.f32 %v313_v20, %v312_v45  ;;  %v344_v27 = vrot.slane %v343_v36, 4  ;;  %v392_v28 = vsel %vm265_vm0, %v251_v34, 0.0  ;;  %v250_v22 = vmul.f32 %v15250_v48, %v15161_v42 }
  0xed   : > { %v305_v47 = vadd.f32 %v304_v35, %v303_v1  ;;  %v317_v50 = vadd.f32 %v316_v8, %v315_v32  ;;  %v379_v51 = vrot.slane %v378_v62, 4  ;;  %v371_v52 = vsel %vm265_vm0, %v248_v30, 0.0 }
  0xee   : > { %v339_v56 = vrot.slane %v338_v38, 2  ;;  %v352_v23 = vadd.f32 %v351_v46, %v350_v24  ;;  %v358_v12 = vrot.slane %v357_v39, 4  ;;  %v406_v41 = vsel %vm265_vm0, %v253_v31, 0.0 }
  0xef   : > { %v15321_v10 = vadd.f32 %v292_v7, %v291_v6  ;;  %v331_v3 = vadd.f32 %v330_v37, %v329_v25  ;;  %v366_v45 = vadd.f32 %v365_v43, %v364_v29  ;;  %v393_v4 = vrot.slane %v392_v28, 4 }
  0xf0   : > { %v15323_v63 = vadd.f32 %v327_v9, %v326_v59  ;;  %v345_v5 = vadd.f32 %v344_v27, %v343_v36  ;;  %v372_v0 = vrot.slane %v371_v52, 4  ;;  %v385_v42 = vsel %vm265_vm0, %v250_v22, 0.0 }
  0xf1   : > { %v306_v15 = vrot.slane %v305_v47, 1  ;;  %v318_v1 = vrot.slane %v317_v50, 2  ;;  %v380_v18 = vadd.f32 %v379_v51, %v378_v62  ;;  %v407_v2 = vrot.slane %v406_v41, 4 }
  0xf2   : > { %v340_v32 = vadd.f32 %v339_v56, %v338_v38  ;;  %v353_v58 = vrot.slane %v352_v23, 2  ;;  %v359_v20 = vadd.f32 %v358_v12, %v357_v39  ;;  %v255_v6 = vmul.f32 %v15250_v48, %v15175_v53 }
  0xf3   : > { %v332_v24 = vrot.slane %v331_v3, 2  ;;  %v367_v33 = vrot.slane %v366_v45, 2  ;;  %v394_v7 = vadd.f32 %v393_v4, %v392_v28  ;;  %v386_v25 = vrot.slane %v385_v42, 4 }
  0xf4   : > { %v346_v59 = vrot.slane %v345_v5, 2  ;;  %v373_v29 = vadd.f32 %v372_v0, %v371_v52  ;;  %v252_v34 = vmul.f32 %v15250_v48, %v15178_v54  ;;  %v257_v35 = vmul.f32 %v15250_v48, %v15181_v55 }
  0xf5   : > { %v15332_v8 = vadd.f32 %v306_v15, %v305_v47  ;;  %v319_v36 = vadd.f32 %v318_v1, %v317_v50  ;;  %v381_v30 = vrot.slane %v380_v18, 2  ;;  %v408_v38 = vadd.f32 %v407_v2, %v406_v41 }
  0xf6   : > { %v341_v46 = vrot.slane %v340_v32, 1  ;;  %v354_v62 = vadd.f32 %v353_v58, %v352_v23  ;;  %v360_v53 = vrot.slane %v359_v20, 2  ;;  %v420_v31 = vsel %vm265_vm0, %v255_v6, 0.0 }
  0xf7   : > { %v333_v9 = vadd.f32 %v332_v24, %v331_v3  ;;  %v368_v37 = vadd.f32 %v367_v33, %v366_v45  ;;  %v395_v43 = vrot.slane %v394_v7, 2  ;;  %v387_v39 = vadd.f32 %v386_v25, %v385_v42 }
  0xf8   : > { %v347_v27 = vadd.f32 %v346_v59, %v345_v5  ;;  %v374_v28 = vrot.slane %v373_v29, 2  ;;  %v399_v54 = vsel %vm265_vm0, %v252_v34, 0.0  ;;  %v434_v55 = vsel %vm265_vm0, %v257_v35, 0.0 }
  0xf9   : > { %v320_v22 = vrot.slane %v319_v36, 1  ;;  %v382_v47 = vadd.f32 %v381_v30, %v380_v18  ;;  %v409_v50 = vrot.slane %v408_v38, 2  ;;  %v421_v51 = vrot.slane %v420_v31, 4 }
  0xfa   : > { %v15337_v52 = vadd.f32 %v341_v46, %v340_v32  ;;  %v355_v56 = vrot.slane %v354_v62, 1  ;;  %v361_v23 = vadd.f32 %v360_v53, %v359_v20  ;;  %v254_v12 = vmul.f32 %v15250_v48, %v15184_v60 }
  0xfb   : > { %v396_v41 = vadd.f32 %v395_v43, %v394_v7  ;;  %v388_v3 = vrot.slane %v387_v39, 2  ;;  %v400_v45 = vrot.slane %v399_v54, 4  ;;  %v435_v4 = vrot.slane %v434_v55, 4 }
  0xfc   : > { %v334_v5 = vrot.slane %v333_v9, 1  ;;  %v369_v0 = vrot.slane %v368_v37, 1  ;;  %v348_v42 = vrot.slane %v347_v27, 1  ;;  %v375_v15 = vadd.f32 %v374_v28, %v373_v29 }
  0xfd   : > { %v15341_v1 = vadd.f32 %v320_v22, %v319_v36  ;;  %v383_v18 = vrot.slane %v382_v47, 1  ;;  %v410_v2 = vadd.f32 %v409_v50, %v408_v38  ;;  %v422_v58 = vadd.f32 %v421_v51, %v420_v31  ;;  %v15357_v36 = vld [vmem:[%s18437_s1 + $0x10] sm:$0xff] }
  0xfe   : > { %v15343_v32 = vadd.f32 %v355_v56, %v354_v62  ;;  %v362_v6 = vrot.slane %v361_v23, 1  ;;  %v413_v20 = vsel %vm265_vm0, %v254_v12, 0.0  ;;  %v259_v60 = vmul.f32 %v15250_v48, %v15200_v57 }
  0xff   : > { %v397_v24 = vrot.slane %v396_v41, 1  ;;  %v389_v33 = vadd.f32 %v388_v3, %v387_v39  ;;  %v401_v7 = vadd.f32 %v400_v45, %v399_v54  ;;  %v436_v25 = vadd.f32 %v435_v4, %v434_v55 }
 0x100   : > { %v15348_v59 = vadd.f32 %v334_v5, %v333_v9  ;;  %v15350_v29 = vadd.f32 %v369_v0, %v368_v37  ;;  %v15352_v34 = vadd.f32 %v348_v42, %v347_v27  ;;  %v376_v35 = vrot.slane %v375_v15, 1 }
 0x101   : > { %v15359_v46 = vadd.f32 %v383_v18, %v382_v47  ;;  %v411_v57 = vrot.slane %v410_v2, 1  ;;  %v423_v62 = vrot.slane %v422_v58, 2  ;;  %v414_v53 = vrot.slane %v413_v20, 4 }
 0x102   : > { %v15363_v37 = vadd.f32 %v362_v6, %v361_v23  ;;  %v448_v43 = vsel %vm265_vm0, %v259_v60, 0.0  ;;  %v15366_v39 = vadd.f32 %v397_v24, %v396_v41  ;;  %v390_v27 = vrot.slane %v389_v33, 1 }
 0x103   : > { %v402_v28 = vrot.slane %v401_v7, 2  ;;  %v437_v54 = vrot.slane %v436_v25, 2  ;;  %v15370_v47 = vadd.f32 %v376_v35, %v375_v15  ;;  %v15374_v51 = vadd.f32 %v411_v57, %v410_v2 }
 0x104   : > { %v424_v56 = vadd.f32 %v423_v62, %v422_v58  ;;  %v415_v23 = vadd.f32 %v414_v53, %v413_v20  ;;  %v449_v12 = vrot.slane %v448_v43, 4  ;;  %v15378_v5 = vadd.f32 %v390_v27, %v389_v33 }
 0x105   : > { %v403_v0 = vadd.f32 %v402_v28, %v401_v7  ;;  %v438_v42 = vadd.f32 %v437_v54, %v436_v25  ;;  %v258_v62 = vmul.f32 %v15250_v48, %v15209_v19 }
 0x106   : > { %v416_v20 = vrot.slane %v415_v23, 2 }
 0x107   : > { %v439_v25 = vrot.slane %v438_v42, 1 }
 0x118   : > { %v759_v30 = vpop.permute.xlu0 %758  ;;  %v753_v38 = vpop.permute.xlu1 %752 }
 0x119   : > { %v849_v31 = vmul.f32 %v759_v30, %v15283_v13  ;;  %v847_v9 = vmul.f32 %v753_v38, %v15289_v16  ;;  %v256_v13 = vmul.f32 %v15250_v48, %v15203_v61  ;;  %v261_v61 = vmul.f32 %v15250_v48, %v15206_v14 }
 0x11a   : > { %v404_v14 = vrot.slane %v403_v0, 1 }
 0x11b   : > { %v881_v55 = vadd.f32 %v849_v31, %v15357_v36  ;;  %v879_v22 = vadd.f32 %v847_v9, %v15357_v36  ;;  %v427_v2 = vsel %vm265_vm0, %v256_v13, 0.0  ;;  %v462_v30 = vsel %vm265_vm0, %v261_v61, 0.0 }
 0x11c   : > { %v765_v50 = vpop.permute.xlu0 %764  ;;  %v756_v16 = vpop.permute.xlu1 %755  ;;  %v428_v35 = vrot.slane %v427_v2, 4 }
 0x11d   : > { %v12413_v41 = vmul.f32 -1.442695, %v881_v55  ;;  %v12411_v3 = vmul.f32 -1.442695, %v879_v22  ;;  %v851_v45 = vmul.f32 %v765_v50, %v15291_v11  ;;  %v848_v4 = vmul.f32 %v756_v16, %v15295_v26 }
 0x11e   : > { %v425_v11 = vrot.slane %v424_v56, 1  ;;  %v450_v26 = vadd.f32 %v449_v12, %v448_v43  ;;  %v15396_v55 = vadd.f32 %v404_v14, %v403_v0  ;;  %v15398_v22 = vadd.f32 %v439_v25, %v438_v42 }
 0x11f   : > { %14248 = vpow2.f32 %v12413_v41  ;;  %v883_v15 = vadd.f32 %v851_v45, %v15357_v36  ;;  %v880_v18 = vadd.f32 %v848_v4, %v15357_v36  ;;  %v429_v13 = vadd.f32 %v428_v35, %v427_v2 }
 0x120   : > { %14250 = vpow2.f32 %v12411_v3  ;;  %v771_v58 = vpop.permute.xlu0 %770  ;;  %v762_v6 = vpop.permute.xlu1 %761  ;;  %v15392_v9 = vadd.f32 %v425_v11, %v424_v56  ;;  %v463_v50 = vrot.slane %v462_v30, 4  ;;  %v441_v56 = vsel %vm265_vm0, %v258_v62, 0.0 }
 0x121   : > { %v12415_v60 = vmul.f32 -1.442695, %v883_v15  ;;  %v12412_v24 = vmul.f32 -1.442695, %v880_v18  ;;  %v853_v33 = vmul.f32 %v771_v58, %v15314_v21  ;;  %v850_v7 = vmul.f32 %v762_v6, %v15321_v10 }
 0x122   : > { %v417_v21 = vadd.f32 %v416_v20, %v415_v23  ;;  %v451_v10 = vrot.slane %v450_v26, 2  ;;  %v263_v23 = vmul.f32 %v15250_v48, %v15220_v40  ;;  %v260_v3 = vmul.f32 %v15250_v48, %v15226_v44 }
 0x123   : > { %14252 = vpow2.f32 %v12415_v60  ;;  %v885_v38 = vadd.f32 %v853_v33, %v15357_v36  ;;  %v882_v57 = vadd.f32 %v850_v7, %v15357_v36  ;;  %v430_v18 = vrot.slane %v429_v13, 2 }
 0x124   : > { %14254 = vpow2.f32 %v12412_v24  ;;  %v777_v53 = vpop.permute.xlu0 %776  ;;  %v768_v31 = vpop.permute.xlu1 %767  ;;  %v418_v41 = vrot.slane %v417_v21, 1  ;;  %v15409_v2 = vadd.f32 %v463_v50, %v462_v30  ;;  %v442_v40 = vrot.slane %v441_v56, 4 }
 0x125   : > { %v12417_v43 = vmul.f32 -1.442695, %v885_v38  ;;  %v12414_v27 = vmul.f32 -1.442695, %v882_v57  ;;  %v855_v28 = vmul.f32 %v777_v53, %v15323_v63  ;;  %v852_v54 = vmul.f32 %v768_v31, %v15332_v8 }
 0x126   : > { %v452_v8 = vadd.f32 %v451_v10, %v450_v26  ;;  %v15414_v60 = vsel %vm265_vm0, %v263_v23, 0.0  ;;  %v15422_v14 = vadd.f32 %v418_v41, %v417_v21  ;;  %v431_v53 = vadd.f32 %v430_v18, %v429_v13 }
 0x127   : > { %v887_v19 = vadd.f32 %v855_v28, %v15357_v36  ;;  %v884_v16 = vadd.f32 %v852_v54, %v15357_v36  ;;  %14256 = vpow2.f32 %v12414_v27  ;;  %v477_v13 = vrot.slane %v15414_v60, 4 }
 0x128   : > { %v783_v12 = vpop.permute.xlu0 %782  ;;  %v774_v63 = vpop.permute.xlu1 %773  ;;  %14258 = vpow2.f32 %v12417_v43  ;;  %v453_v38 = vrot.slane %v452_v8, 1  ;;  %v432_v41 = vrot.slane %v431_v53, 1 }
 0x129   : > { %v14249_v45 = vpop.eup %14248  ;;  %v12419_v4 = vmul.f32 -1.442695, %v887_v19  ;;  %v857_v0 = vmul.f32 %v783_v12, %v15337_v52  ;;  %v854_v42 = vmul.f32 %v774_v63, %v15341_v1  ;;  %v12416_v15 = vmul.f32 -1.442695, %v884_v16 }
 0x12a   : > { %v14251_v61 = vpop.eup %14250  ;;  %v1009_v44 = vadd.f32 1.0, %v14249_v45  ;;  %v15417_v52 = vsel %vm265_vm0, %v260_v3, 0.0  ;;  %v262_v1 = vmul.f32 %v15250_v48, %v15229_v49 }
 0x12b   : > { %v1007_v58 = vadd.f32 1.0, %v14251_v61  ;;  %14260 = vpow2.f32 %v12419_v4  ;;  %v889_v6 = vadd.f32 %v857_v0, %v15357_v36  ;;  %v886_v11 = vadd.f32 %v854_v42, %v15357_v36 }
 0x12c   : > { %v789_v20 = vpop.permute.xlu0 %788  ;;  %v780_v26 = vpop.permute.xlu1 %779  ;;  %v456_v50 = vrot.slane %v15417_v52, 4  ;;  %v469_v3 = vsel %vm265_vm0, %v262_v1, 0.0 }
 0x12d   : > { %v14253_v24 = vpop.eup %14252  ;;  %14262 = vrcp.f32 %v1007_v58  ;;  %v12421_v33 = vmul.f32 -1.442695, %v889_v6  ;;  %v859_v7 = vmul.f32 %v789_v20, %v15343_v32  ;;  %v12418_v35 = vmul.f32 -1.442695, %v886_v11 }
 0x12e   : > { %v14255_v25 = vpop.eup %14254  ;;  %14264 = vpow2.f32 %v12416_v15  ;;  %v856_v30 = vmul.f32 %v780_v26, %v15348_v59  ;;  %v1011_v49 = vadd.f32 1.0, %v14253_v24  ;;  %v15427_v32 = vadd.f32 %v442_v40, %v441_v56 }
 0x12f   : > { %v1008_v57 = vadd.f32 1.0, %v14255_v25  ;;  %14266 = vpow2.f32 %v12421_v33  ;;  %v891_v62 = vadd.f32 %v859_v7, %v15357_v36  ;;  %v465_v59 = vrot.slane %v15409_v2, 2 }
 0x130   : > { %14268 = vrcp.f32 %v1009_v44  ;;  %v888_v31 = vadd.f32 %v856_v30, %v15357_v36  ;;  %v795_v10 = vpop.permute.xlu0 %794  ;;  %v786_v43 = vpop.permute.xlu1 %785  ;;  %v444_v18 = vrot.slane %v15427_v32, 2  ;;  %v470_v6 = vrot.slane %v469_v3, 4 }
 0x131   : > { %14270 = vrcp.f32 %v1008_v57  ;;  %v861_v21 = vmul.f32 %v795_v10, %v15350_v29  ;;  %v858_v27 = vmul.f32 %v786_v43, %v15352_v34  ;;  %v14257_v28 = vpop.eup %14256  ;;  %v12423_v23 = vmul.f32 -1.442695, %v891_v62 }
 0x132   : > { %14272 = vpow2.f32 %v12418_v35  ;;  %v12420_v54 = vmul.f32 -1.442695, %v888_v31  ;;  %v14259_v19 = vpop.eup %14258  ;;  %v1010_v16 = vadd.f32 1.0, %v14257_v28  ;;  %v15436_v34 = vadd.f32 %v453_v38, %v452_v8 }
 0x133   : > { %v893_v56 = vadd.f32 %v861_v21, %v15357_v36  ;;  %v890_v12 = vadd.f32 %v858_v27, %v15357_v36  ;;  %14274 = vrcp.f32 %v1011_v49  ;;  %v1013_v61 = vadd.f32 1.0, %v14259_v19 }
 0x134   : > { %v801_v29 = vpop.permute.xlu0 %800  ;;  %v792_v63 = vpop.permute.xlu1 %791  ;;  %14276 = vrcp.f32 %v1010_v16  ;;  %v15444_v58 = vadd.f32 %v465_v59, %v15409_v2  ;;  %v15454_v30 = vadd.f32 %v456_v50, %v15417_v52  ;;  %v264_v62 = vmul.f32 %v15250_v48, %v15241_v17 }
 0x135   : > { %v14261_v45 = vpop.eup %14260  ;;  %v12425_v4 = vmul.f32 -1.442695, %v893_v56  ;;  %v12422_v0 = vmul.f32 -1.442695, %v890_v12  ;;  %v863_v42 = vmul.f32 %v801_v29, %v15359_v46  ;;  %14278 = vpow2.f32 %v12420_v54 }
 0x136   : > { %v860_v15 = vmul.f32 %v792_v63, %v15363_v37  ;;  %14280 = vpow2.f32 %v12423_v23  ;;  %v1015_v44 = vadd.f32 1.0, %v14261_v45  ;;  %v15449_v37 = vadd.f32 %v477_v13, %v15414_v60 }
 0x137   : > { %v14263_v40 = vpop.eup %14262  ;;  %v895_v8 = vadd.f32 %v863_v42, %v15357_v36  ;;  %14282 = vpow2.f32 %v12425_v4  ;;  %v15457_v60 = vadd.f32 %v432_v41, %v431_v53  ;;  %v15464_v52 = vadd.f32 %v444_v18, %v15427_v32 }
 0x138   : > { %v14265_v11 = vpop.eup %14264  ;;  %v892_v20 = vadd.f32 %v860_v15, %v15357_v36  ;;  %13168 = vmatprep.mubr.msk.f32.mxu0 %vm265_vm0, %v14263_v40  ;;  %v807_v46 = vpop.permute.xlu0 %806  ;;  %14284 = vpow2.f32 %v12422_v0  ;;  %v471_v59 = vadd.f32 %v470_v6, %v469_v3  ;;  %v467_v32 = vrot.slane %v15444_v58, 1 }
 0x139   : > { %v798_v26 = vpop.permute.xlu1 %797  ;;  %v14267_v1 = vpop.eup %14266  ;;  %v1012_v24 = vadd.f32 1.0, %v14265_v11  ;;  %v12427_v33 = vmul.f32 -1.442695, %v895_v8  ;;  %v865_v2 = vmul.f32 %v807_v46, %v15366_v39  ;;  %14286 = vrcp.f32 %v1013_v61 }
 0x13a   : > { %v14269_v7 = vpop.eup %14268  ;;  %v12424_v25 = vmul.f32 -1.442695, %v892_v20  ;;  %v862_v35 = vmul.f32 %v798_v26, %v15370_v47  ;;  %v1017_v39 = vadd.f32 1.0, %v14267_v1  ;;  %v479_v13 = vrot.slane %v15449_v37, 2 }
 0x13b   : > { %v14271_v38 = vpop.eup %14270  ;;  %14288 = vrcp.f32 %v1012_v24  ;;  %v897_v57 = vadd.f32 %v865_v2, %v15357_v36  ;;  %v458_v23 = vrot.slane %v15454_v30, 2  ;;  %v446_v45 = vrot.slane %v15464_v52, 1 }
 0x13c   : > { %v14273_v49 = vpop.eup %14272  ;;  %14290 = vrcp.f32 %v1015_v44  ;;  %v894_v31 = vadd.f32 %v862_v35, %v15357_v36  ;;  %13169 = vmatmul.mubr.msk.f32.vlgmr.msra.gmra.mrb[0].mxu0 %vm265_vm0, %v14271_v38  ;;  %v813_v47 = vpop.permute.xlu0 %812  ;;  %v472_v4 = vrot.slane %v471_v59, 2  ;;  %v468_v61 = vadd.f32 %v467_v32, %v15444_v58 }
 0x13d   : > { %v804_v10 = vpop.permute.xlu1 %803  ;;  %v1014_v43 = vadd.f32 1.0, %v14273_v49  ;;  %14292 = vpow2.f32 %v12427_v33  ;;  %v12429_v21 = vmul.f32 -1.442695, %v897_v57  ;;  %v867_v53 = vmul.f32 %v813_v47, %v15374_v51  ;;  %13171 = vmatprep.mubr.msk.f32.mxu0 %vm265_vm0, %v14269_v7  ;;  %v14275_v17 = vpop.eup %14274 }
 0x13e   : > { %14294 = vpow2.f32 %v12424_v25  ;;  %v12426_v48 = vmul.f32 -1.442695, %v894_v31  ;;  %v864_v27 = vmul.f32 %v804_v10, %v15378_v5  ;;  %v14277_v28 = vpop.eup %14276  ;;  %v483_v5 = vsel %vm265_vm0, %v264_v62, 0.0 }
 0x13f   : > { %14296 = vrcp.f32 %v1014_v43  ;;  %v899_v54 = vadd.f32 %v867_v53, %v15357_v36  ;;  %v14279_v50 = vpop.eup %14278  ;;  %v484_v15 = vrot.slane %v483_v5, 4  ;;  %v480_v26 = vadd.f32 %v479_v13, %v15449_v37 }
 0x140   : > { %14298 = vrcp.f32 %v1017_v39  ;;  %v896_v51 = vadd.f32 %v864_v27, %v15357_v36  ;;  %13172 = vmatmul.mubr.msk.f32.gmra.mrb[2].mxu0 %vm265_vm0, %v14277_v28  ;;  %v819_v19 = vpop.permute.xlu0 %818  ;;  %v14281_v56 = vpop.eup %14280  ;;  %v1016_v12 = vadd.f32 1.0, %v14279_v50  ;;  %v459_v33 = vadd.f32 %v458_v23, %v15454_v30 }
 0x141   : > { %v810_v16 = vpop.permute.xlu1 %809  ;;  %14300 = vpow2.f32 %v12429_v21  ;;  %v12431_v29 = vmul.f32 -1.442695, %v899_v54  ;;  %v869_v63 = vmul.f32 %v819_v19, %v15392_v9  ;;  %13174 = vmatprep.mubr.msk.f32.mxu0 %vm265_vm0, %v14275_v17  ;;  %v14283_v41 = vpop.eup %14282  ;;  %v1019_v40 = vadd.f32 1.0, %v14281_v56 }
 0x142   : > { %14302 = vpow2.f32 %v12426_v48  ;;  %v866_v3 = vmul.f32 %v810_v16, %v15396_v55  ;;  %v14285_v0 = vpop.eup %14284  ;;  %v12428_v42 = vmul.f32 -1.442695, %v896_v51  ;;  %v1021_v58 = vadd.f32 1.0, %v14283_v41 }
 0x143   : > { %14304 = vrcp.f32 %v1016_v12  ;;  %v14287_v18 = vpop.eup %14286  ;;  %v1018_v8 = vadd.f32 1.0, %v14285_v0  ;;  %v901_v9 = vadd.f32 %v869_v63, %v15357_v36  ;;  %v15490_v25 = vadd.f32 %v472_v4, %v471_v59 }
 0x144   : > { %v898_v6 = vadd.f32 %v866_v3, %v15357_v36  ;;  %v825_v11 = vpop.permute.xlu0 %824  ;;  %14306 = vpow2.f32 %v12431_v29  ;;  %v447_v62 = vadd.f32 %v446_v45, %v15464_v52  ;;  %v481_v31 = vrot.slane %v480_v26, 1 }
 0x145   : > { %v816_v44 = vpop.permute.xlu1 %815  ;;  %v14289_v20 = vpop.eup %14288  ;;  %v871_v55 = vmul.f32 %v825_v11, %v15398_v22  ;;  %14308 = vrcp.f32 %v1018_v8  ;;  %v485_v22 = vadd.f32 %v484_v15, %v483_v5  ;;  %v12433_v37 = vmul.f32 -1.442695, %v901_v9 }
 0x146   : > { %v868_v46 = vmul.f32 %v816_v44, %v15422_v14  ;;  %v14291_v1 = vpop.eup %14290  ;;  %v12430_v24 = vmul.f32 -1.442695, %v898_v6  ;;  %13175 = vmatmul.mubr.msk.f32.gmra.mrb[4].mxu0 %vm265_vm0, %v14289_v20  ;;  %14310 = vpow2.f32 %v12428_v42  ;;  %v460_v17 = vrot.slane %v459_v33, 1 }
 0x147   : > { %v14293_v2 = vpop.eup %14292  ;;  %13177 = vmatprep.mubr.msk.f32.mxu0 %vm265_vm0, %v14287_v18  ;;  %14312 = vrcp.f32 %v1019_v40  ;;  %v903_v35 = vadd.f32 %v871_v55, %v15357_v36  ;;  %v474_v52 = vrot.slane %v15490_v25, 1  ;;  %v486_v48 = vrot.slane %v485_v22, 2 }
 0x148   : > { %v900_v7 = vadd.f32 %v868_v46, %v15357_v36  ;;  %v14295_v14 = vpop.eup %14294  ;;  %v831_v38 = vpop.permute.xlu0 %830  ;;  %14314 = vpow2.f32 %v12430_v24  ;;  %v1023_v10 = vadd.f32 1.0, %v14293_v2  ;;  %v482_v23 = vadd.f32 %v481_v31, %v480_v26 }
 0x149   : > { %v822_v57 = vpop.permute.xlu1 %821  ;;  %v14297_v49 = vpop.eup %14296  ;;  %v1020_v30 = vadd.f32 1.0, %v14295_v14  ;;  %14316 = vrcp.f32 %v1021_v58  ;;  %v873_v43 = vmul.f32 %v831_v38, %v15436_v34  ;;  %v12435_v59 = vmul.f32 -1.442695, %v903_v35 }
 0x14a   : > { %v12432_v39 = vmul.f32 -1.442695, %v900_v7  ;;  %v14299_v47 = vpop.eup %14298  ;;  %13178 = vmatmul.mubr.msk.f32.gmra.mrb[6].mxu0 %vm265_vm0, %v14297_v49  ;;  %v870_v21 = vmul.f32 %v822_v57, %v15457_v60  ;;  %v487_v29 = vadd.f32 %v486_v48, %v485_v22  ;;  %v461_v45 = vadd.f32 %v460_v17, %v459_v33 }
 0x14b   : > { %v14301_v53 = vpop.eup %14300  ;;  %14318 = vrcp.f32 %v1020_v30  ;;  %13180 = vmatprep.mubr.msk.f32.mxu0 %vm265_vm0, %v14291_v1  ;;  %v905_v28 = vadd.f32 %v873_v43, %v15357_v36  ;;  %v475_v8 = vadd.f32 %v474_v52, %v15490_v25 }
 0x14c   : > { %v14303_v27 = vpop.eup %14302  ;;  %14320 = vpow2.f32 %v12433_v37  ;;  %v902_v54 = vadd.f32 %v870_v21, %v15357_v36  ;;  %v837_v32 = vpop.permute.xlu0 %836  ;;  %v1025_v19 = vadd.f32 1.0, %v14301_v53  ;;  %v488_v44 = vrot.slane %v487_v29, 1 }
 0x14d   : > { %v828_v13 = vpop.permute.xlu1 %827  ;;  %v14305_v34 = vpop.eup %14304  ;;  %v1022_v50 = vadd.f32 1.0, %v14303_v27  ;;  %14322 = vpow2.f32 %v12432_v39  ;;  %v875_v60 = vmul.f32 %v837_v32, %v468_v61  ;;  %v12437_v56 = vmul.f32 -1.442695, %v905_v28 }
 0x14e   : > { %v872_v51 = vmul.f32 %v828_v13, %v447_v62  ;;  %14324 = vrcp.f32 %v1023_v10  ;;  %v12434_v16 = vmul.f32 -1.442695, %v902_v54  ;;  %13181 = vmatmul.mubr.msk.f32.gmra.mrb[8].mxu0 %vm265_vm0, %v14305_v34  ;;  %v14307_v5 = vpop.eup %14306  ;;  %v489_v14 = vadd.f32 %v488_v44, %v487_v29 }
 0x14f   : > { %14326 = vrcp.f32 %v1022_v50  ;;  %13183 = vmatprep.mubr.msk.f32.mxu0 %vm265_vm0, %v14299_v47  ;;  %v14309_v63 = vpop.eup %14308  ;;  %v907_v41 = vadd.f32 %v875_v60, %v15357_v36  ;;  %v1027_v42 = vadd.f32 1.0, %v14307_v5 }
 0x150   : > { %v904_v12 = vadd.f32 %v872_v51, %v15357_v36  ;;  %14328 = vpow2.f32 %v12435_v59  ;;  %v843_v3 = vpop.permute.xlu0 %842  ;;  %v14311_v0 = vpop.eup %14310 }
 0x151   : > { %v834_v4 = vpop.permute.xlu1 %833  ;;  %14330 = vpow2.f32 %v12434_v16  ;;  %v877_v61 = vmul.f32 %v843_v3, %v482_v23  ;;  %v14313_v15 = vpop.eup %14312  ;;  %v1024_v18 = vadd.f32 1.0, %v14311_v0  ;;  %v12439_v46 = vmul.f32 -1.442695, %v907_v41 }
 0x152   : > { %14332 = vrcp.f32 %v1025_v19  ;;  %13184 = vmatmul.mubr.msk.f32.gmra.mrb[10].mxu0 %vm265_vm0, %v14309_v63  ;;  %v874_v40 = vmul.f32 %v834_v4, %v461_v45  ;;  %v14315_v9 = vpop.eup %14314  ;;  %v12436_v6 = vmul.f32 -1.442695, %v904_v12 }
 0x153   : > { %14334 = vpow2.f32 %v12437_v56  ;;  %v909_v11 = vadd.f32 %v877_v61, %v15357_v36  ;;  %13186 = vmatprep.mubr.msk.f32.mxu0 %vm265_vm0, %v14313_v15  ;;  %v14317_v20 = vpop.eup %14316  ;;  %v1026_v55 = vadd.f32 1.0, %v14315_v9 }
 0x154   : > { %14336 = vrcp.f32 %v1024_v18  ;;  %v906_v26 = vadd.f32 %v874_v40, %v15357_v36 }
 0x155   : > { %v840_v1 = vpop.permute.xlu1 %839  ;;  %v14319_v58 = vpop.eup %14318  ;;  %14338 = vrcp.f32 %v1027_v42  ;;  %v12441_v24 = vmul.f32 -1.442695, %v909_v11 }
 0x156   : > { %v876_v33 = vmul.f32 %v840_v1, %v475_v8  ;;  %v14321_v2 = vpop.eup %14320  ;;  %14340 = vrcp.f32 %v1026_v55  ;;  %13187 = vmatmul.mubr.msk.f32.gmra.mrb[12].mxu0 %vm265_vm0, %v14319_v58  ;;  %v12438_v25 = vmul.f32 -1.442695, %v906_v26 }
 0x157   : > { %v14323_v7 = vpop.eup %14322  ;;  %14342 = vpow2.f32 %v12436_v6  ;;  %13189 = vmatprep.mubr.msk.f32.mxu0 %vm265_vm0, %v14317_v20  ;;  %v1029_v62 = vadd.f32 1.0, %v14321_v2 }
 0x158   : > { %v908_v22 = vadd.f32 %v876_v33, %v15357_v36  ;;  %v14325_v37 = vpop.eup %14324  ;;  %v1028_v35 = vadd.f32 1.0, %v14323_v7  ;;  %14344 = vpow2.f32 %v12439_v46 }
 0x159   : > { %v846_v38 = vpop.permute.xlu1 %845  ;;  %v14327_v57 = vpop.eup %14326  ;;  %14346 = vpow2.f32 %v12441_v24 }
 0x15a   : > { %v12440_v49 = vmul.f32 -1.442695, %v908_v22  ;;  %v878_v30 = vmul.f32 %v846_v38, %v489_v14  ;;  %v14329_v39 = vpop.eup %14328  ;;  %14348 = vrcp.f32 %v1028_v35  ;;  %13190 = vmatmul.mubr.msk.f32.gmra.mrb[14].mxu0 %vm265_vm0, %v14327_v57 }
 0x15b   : > { %v14331_v31 = vpop.eup %14330  ;;  %14350 = vpow2.f32 %v12438_v25  ;;  %13192 = vmatprep.mubr.msk.f32.mxu0 %vm265_vm0, %v14325_v37  ;;  %v1031_v53 = vadd.f32 1.0, %v14329_v39 }
 0x15c   : > { %v910_v47 = vadd.f32 %v878_v30, %v15357_v36  ;;  %v14333_v10 = vpop.eup %14332  ;;  %v1030_v43 = vadd.f32 1.0, %v14331_v31  ;;  %14352 = vpow2.f32 %v12440_v49 }
 0x15d   : > { %v14335_v21 = vpop.eup %14334  ;;  %14354 = vrcp.f32 %v1029_v62 }
 0x15e   : > { %v12442_v17 = vmul.f32 -1.442695, %v910_v47  ;;  %v14337_v52 = vpop.eup %14336  ;;  %14356 = vrcp.f32 %v1030_v43  ;;  %v1033_v36 = vadd.f32 1.0, %v14335_v21 }
 0x15f   : > { %v14339_v48 = vpop.eup %14338  ;;  %13193 = vmatmul.mubr.msk.f32.gmra.mrb[16].mxu0 %vm265_vm0, %v14337_v52 }
 0x160   : > { %14358 = vpow2.f32 %v12442_v17  ;;  %v14341_v27 = vpop.eup %14340  ;;  %13195 = vmatprep.mubr.msk.f32.mxu0 %vm265_vm0, %v14333_v10 }
 0x161   : > { %v14343_v59 = vpop.eup %14342  ;;  %14360 = vrcp.f32 %v1031_v53 }
 0x162   : > { %v14345_v28 = vpop.eup %14344  ;;  %v1032_v54 = vadd.f32 1.0, %v14343_v59 }
 0x163   : > { %v14347_v32 = vpop.eup %14346  ;;  %13196 = vmatmul.mubr.msk.f32.gmra.mrb[18].mxu0 %vm265_vm0, %v14341_v27  ;;  %v1035_v50 = vadd.f32 1.0, %v14345_v28 }
 0x164   : > { %v14349_v13 = vpop.eup %14348  ;;  %14362 = vrcp.f32 %v1032_v54  ;;  %13198 = vmatprep.mubr.msk.f32.mxu0 %vm265_vm0, %v14339_v48  ;;  %v1037_v56 = vadd.f32 1.0, %v14347_v32 }
 0x165   : > { %v14351_v34 = vpop.eup %14350  ;;  %14364 = vrcp.f32 %v1033_v36 }
 0x166   : > { %v14353_v60 = vpop.eup %14352  ;;  %v1034_v51 = vadd.f32 1.0, %v14351_v34 }
 0x167   : > { %v14355_v19 = vpop.eup %14354  ;;  %v1036_v16 = vadd.f32 1.0, %v14353_v60  ;;  %13199 = vmatmul.mubr.msk.f32.gmra.mrb[20].mxu0 %vm265_vm0, %v14349_v13 }
 0x168   : > { %v14357_v23 = vpop.eup %14356  ;;  %14366 = vrcp.f32 %v1034_v51  ;;  %13201 = vmatprep.mubr.msk.f32.mxu0 %vm265_vm0, %v14355_v19 }
 0x169   : > { %14368 = vrcp.f32 %v1035_v50 }
 0x16a   : > { %v14359_v5 = vpop.eup %14358  ;;  %14370 = vrcp.f32 %v1036_v16 }
 0x16b   : > { %v1038_v12 = vadd.f32 1.0, %v14359_v5  ;;  %v14361_v29 = vpop.eup %14360  ;;  %13202 = vmatmul.mubr.msk.f32.gmra.mrb[22].mxu0 %vm265_vm0, %v14357_v23  ;;  %14372 = vrcp.f32 %v1037_v56 }
 0x16c   : > { %13204 = vmatprep.mubr.msk.f32.mxu0 %vm265_vm0, %v14361_v29 }
 0x16d   : > { %14374 = vrcp.f32 %v1038_v12 }
 0x16e   : > { %v14363_v63 = vpop.eup %14362 }
 0x16f   : > { %v14365_v41 = vpop.eup %14364  ;;  %13205 = vmatmul.mubr.msk.f32.gmra.mrb[24].mxu0 %vm265_vm0, %v14363_v63 }
 0x170   : > { %13207 = vmatprep.mubr.msk.f32.mxu0 %vm265_vm0, %v14365_v41 }
 0x172   : > { %v14367_v3 = vpop.eup %14366 }
 0x173   : > { %v14369_v45 = vpop.eup %14368  ;;  %13208 = vmatmul.mubr.msk.f32.gmra.mrb[26].mxu0 %vm265_vm0, %v14367_v3 }
 0x174   : > { %v14371_v4 = vpop.eup %14370  ;;  %13210 = vmatprep.mubr.msk.f32.mxu0 %vm265_vm0, %v14369_v45 }
 0x175   : > { %v14373_v0 = vpop.eup %14372 }
 0x177   : > { %13211 = vmatmul.mubr.msk.f32.gmra.mrb[28].mxu0 %vm265_vm0, %v14371_v4  ;;  %v14375_v42 = vpop.eup %14374 }
 0x178   : > { %13213 = vmatprep.mubr.msk.f32.mxu0 %vm265_vm0, %v14373_v0 }
 0x17b   : > { %13214 = vmatmul.mubr.msk.f32.gmra.mrb[30].mxu0 %vm265_vm0, %v14375_v42 }
 0x20f   : > { %v15531_v61 = vpop.f32.mrb[0].mxu0 }
 0x210   : > { %v15533_v15 = vpop.f32.mrb[1].mxu0  ;;  %v1427_v18 = vsel %vm265_vm0, %v15531_v61, -inf }
 0x211   : > { %1428 = vmax.xlane.f32.xlu0 %v1427_v18  ;;  %v1424_v2 = vsel %vm265_vm0, %v15533_v15, -inf }
 0x213   : > { %v15537_v40 = vpop.f32.mrb[2].mxu0 }
 0x214   : > { %v15539_v8 = vpop.f32.mrb[3].mxu0  ;;  %v1433_v9 = vsel %vm265_vm0, %v15537_v40, -inf }
 0x215   : > { %1434 = vmax.xlane.f32.xlu0 %v1433_v9  ;;  %v1430_v6 = vsel %vm265_vm0, %v15539_v8, -inf }
 0x216   : > { %1431 = vmax.xlane.f32.xlu1 %v1430_v6 }
 0x219   : > { %v15545_v11 = vpop.f32.mrb[4].mxu0 }
 0x21a   : > { %v15547_v44 = vpop.f32.mrb[5].mxu0  ;;  %v1439_v20 = vsel %vm265_vm0, %v15545_v11, -inf }
 0x21b   : > { %1440 = vmax.xlane.f32.xlu1 %v1439_v20  ;;  %v1436_v55 = vsel %vm265_vm0, %v15547_v44, -inf }
 0x21c   : > { %1437 = vmax.xlane.f32.xlu0 %v1436_v55 }
 0x21d   : > { %v15553_v46 = vpop.f32.mrb[6].mxu0 }
 0x21e   : > { %v15555_v26 = vpop.f32.mrb[7].mxu0  ;;  %v1445_v1 = vsel %vm265_vm0, %v15553_v46, -inf }
 0x21f   : > { %1446 = vmax.xlane.f32.xlu1 %v1445_v1  ;;  %v1442_v58 = vsel %vm265_vm0, %v15555_v26, -inf }
 0x220   : > { %1443 = vmax.xlane.f32.xlu0 %v1442_v58 }
 0x221   : > { %v15561_v24 = vpop.f32.mrb[8].mxu0 }
 0x222   : > { %v15563_v33 = vpop.f32.mrb[9].mxu0  ;;  %v1451_v14 = vsel %vm265_vm0, %v15561_v24, -inf }
 0x223   : > { %v1448_v7 = vsel %vm265_vm0, %v15563_v33, -inf }
 0x224   : > { %1425 = vmax.xlane.f32.xlu0 %v1424_v2  ;;  %1449 = vmax.xlane.f32.xlu1 %v1448_v7 }
 0x225   : > { %v15569_v25 = vpop.f32.mrb[10].mxu0 }
 0x226   : > { %v15571_v22 = vpop.f32.mrb[11].mxu0  ;;  %v1457_v57 = vsel %vm265_vm0, %v15569_v25, -inf }
 0x227   : > { %v1454_v37 = vsel %vm265_vm0, %v15571_v22, -inf }
 0x228   : > { %1452 = vmax.xlane.f32.xlu0 %v1451_v14  ;;  %1455 = vmax.xlane.f32.xlu1 %v1454_v37 }
 0x229   : > { %v15577_v35 = vpop.f32.mrb[12].mxu0 }
 0x22a   : > { %v15579_v38 = vpop.f32.mrb[13].mxu0  ;;  %v1463_v39 = vsel %vm265_vm0, %v15577_v35, -inf }
 0x22b   : > { %v1460_v62 = vsel %vm265_vm0, %v15579_v38, -inf }
 0x22c   : > { %1458 = vmax.xlane.f32.xlu0 %v1457_v57  ;;  %1461 = vmax.xlane.f32.xlu1 %v1460_v62 }
 0x22d   : > { %v15585_v49 = vpop.f32.mrb[14].mxu0 }
 0x22e   : > { %v15587_v30 = vpop.f32.mrb[15].mxu0  ;;  %v1469_v43 = vsel %vm265_vm0, %v15585_v49, -inf }
 0x22f   : > { %v1466_v31 = vsel %vm265_vm0, %v15587_v30, -inf }
 0x230   : > { %1464 = vmax.xlane.f32.xlu0 %v1463_v39  ;;  %1467 = vmax.xlane.f32.xlu1 %v1466_v31 }
 0x232   : > { %v15593_v47 = vpop.f32.mrb[16].mxu0 }
 0x233   : > { %v15595_v10 = vpop.f32.mrb[17].mxu0  ;;  %v1475_v52 = vsel %vm265_vm0, %v15593_v47, -inf }
 0x234   : > { %1470 = vmax.xlane.f32.xlu0 %v1469_v43  ;;  %v1472_v21 = vsel %vm265_vm0, %v15595_v10, -inf }
 0x235   : > { %1473 = vmax.xlane.f32.xlu1 %v1472_v21 }
 0x236   : > { %v15601_v53 = vpop.f32.mrb[18].mxu0 }
 0x237   : > { %v15603_v17 = vpop.f32.mrb[19].mxu0  ;;  %v1481_v36 = vsel %vm265_vm0, %v15601_v53, -inf }
 0x238   : > { %1476 = vmax.xlane.f32.xlu0 %v1475_v52  ;;  %v1478_v48 = vsel %vm265_vm0, %v15603_v17, -inf }
 0x239   : > { %1479 = vmax.xlane.f32.xlu1 %v1478_v48 }
 0x23a   : > { %v15609_v27 = vpop.f32.mrb[20].mxu0 }
 0x23b   : > { %v15611_v59 = vpop.f32.mrb[21].mxu0  ;;  %v1487_v13 = vsel %vm265_vm0, %v15609_v27, -inf }
 0x23c   : > { %1482 = vmax.xlane.f32.xlu0 %v1481_v36  ;;  %v1484_v28 = vsel %vm265_vm0, %v15611_v59, -inf }
 0x23d   : > { %1485 = vmax.xlane.f32.xlu1 %v1484_v28 }
 0x23e   : > { %v15617_v54 = vpop.f32.mrb[22].mxu0 }
 0x23f   : > { %v15619_v32 = vpop.f32.mrb[23].mxu0  ;;  %v1493_v51 = vsel %vm265_vm0, %v15617_v54, -inf }
 0x240   : > { %1488 = vmax.xlane.f32.xlu0 %v1487_v13  ;;  %v1490_v34 = vsel %vm265_vm0, %v15619_v32, -inf }
 0x241   : > { %1491 = vmax.xlane.f32.xlu1 %v1490_v34 }
 0x242   : > { %v15625_v50 = vpop.f32.mrb[24].mxu0 }
 0x243   : > { %v15627_v60 = vpop.f32.mrb[25].mxu0  ;;  %v1499_v5 = vsel %vm265_vm0, %v15625_v50, -inf }
 0x244   : > { %1494 = vmax.xlane.f32.xlu0 %v1493_v51  ;;  %v1496_v19 = vsel %vm265_vm0, %v15627_v60, -inf }
 0x245   : > { %1497 = vmax.xlane.f32.xlu1 %v1496_v19 }
 0x246   : > { %v15633_v16 = vpop.f32.mrb[26].mxu0 }
 0x247   : > { %v15635_v23 = vpop.f32.mrb[27].mxu0  ;;  %v1505_v63 = vsel %vm265_vm0, %v15633_v16, -inf }
 0x248   : > { %1500 = vmax.xlane.f32.xlu0 %v1499_v5  ;;  %v1502_v56 = vsel %vm265_vm0, %v15635_v23, -inf }
 0x249   : > { %1503 = vmax.xlane.f32.xlu1 %v1502_v56 }
 0x24a   : > { %v15641_v12 = vpop.f32.mrb[28].mxu0 }
 0x24b   : > { %v15643_v29 = vpop.f32.mrb[29].mxu0  ;;  %v1511_v4 = vsel %vm265_vm0, %v15641_v12, -inf }
 0x24c   : > { %1506 = vmax.xlane.f32.xlu0 %v1505_v63  ;;  %v1508_v41 = vsel %vm265_vm0, %v15643_v29, -inf }
 0x24d   : > { %1509 = vmax.xlane.f32.xlu1 %v1508_v41 }
 0x24e   : > { %v15649_v3 = vpop.f32.mrb[30].mxu0 }
 0x24f   : > { %v15651_v45 = vpop.f32.mrb[31].mxu0  ;;  %v1517_v42 = vsel %vm265_vm0, %v15649_v3, -inf }
 0x250   : > { %1512 = vmax.xlane.f32.xlu0 %v1511_v4  ;;  %v1514_v0 = vsel %vm265_vm0, %v15651_v45, -inf }
 0x251   : > { %1515 = vmax.xlane.f32.xlu1 %v1514_v0 }
 0x254   : > { %1518 = vmax.xlane.f32.xlu0 %v1517_v42 }
 0x29e   : > { %v1429_v18 = vpop.xlane.xlu0 %1428 }
 0x29f   : > { %v1521_v9 = vsub.f32 %v15531_v61, %v1429_v18 }
 0x2a1   : > { %v1554_v6 = vmul.f32 1.442695, %v1521_v9 }
 0x2a2   : > { %v1435_v20 = vpop.xlane.xlu0 %1434 }
 0x2a3   : > { %14376 = vpow2.f32 %v1554_v6  ;;  %v1523_v55 = vsub.f32 %v15537_v40, %v1435_v20  ;;  %v1432_v1 = vpop.xlane.xlu1 %1431 }
 0x2a4   : > { %v1522_v58 = vsub.f32 %v15539_v8, %v1432_v1 }
 0x2a5   : > { %v1558_v2 = vmul.f32 1.442695, %v1523_v55 }
 0x2a6   : > { %v1556_v7 = vmul.f32 1.442695, %v1522_v58 }
 0x2a7   : > { %14378 = vpow2.f32 %v1558_v2 }
 0x2a8   : > { %14380 = vpow2.f32 %v1556_v7  ;;  %v1441_v14 = vpop.xlane.xlu1 %1440 }
 0x2a9   : > { %v1525_v37 = vsub.f32 %v15545_v11, %v1441_v14  ;;  %v1438_v57 = vpop.xlane.xlu0 %1437 }
 0x2aa   : > { %v1524_v62 = vsub.f32 %v15547_v44, %v1438_v57 }
 0x2ab   : > { %v1562_v39 = vmul.f32 1.442695, %v1525_v37 }
 0x2ac   : > { %v1560_v61 = vmul.f32 1.442695, %v1524_v62  ;;  %v1447_v31 = vpop.xlane.xlu1 %1446 }
 0x2ad   : > { %v15664_v43 = vpop.eup %14376  ;;  %14382 = vpow2.f32 %v1562_v39  ;;  %v1527_v40 = vsub.f32 %v15553_v46, %v1447_v31  ;;  %v1444_v21 = vpop.xlane.xlu0 %1443 }
 0x2ae   : > { %14384 = vpow2.f32 %v1560_v61  ;;  %v1526_v8 = vsub.f32 %v15555_v26, %v1444_v21  ;;  %v1619_v52 = vsel %vm265_vm0, %v15664_v43, 0.0 }
 0x2af   : > { %v1566_v48 = vmul.f32 1.442695, %v1527_v40  ;;  %1620 = vadd.xlane.f32.xlu1 %v1619_v52 }
 0x2b0   : > { %v1564_v11 = vmul.f32 1.442695, %v1526_v8 }
 0x2b1   : > { %v15670_v36 = vpop.eup %14378  ;;  %14386 = vpow2.f32 %v1566_v48  ;;  %v1426_v44 = vpop.xlane.xlu0 %1425 }
 0x2b2   : > { %v1450_v28 = vpop.xlane.xlu1 %1449  ;;  %v15672_v13 = vpop.eup %14380  ;;  %14388 = vpow2.f32 %v1564_v11  ;;  %v1520_v46 = vsub.f32 %v15533_v15, %v1426_v44  ;;  %v1625_v26 = vsel %vm265_vm0, %v15670_v36, 0.0 }
 0x2b3   : > { %v1528_v34 = vsub.f32 %v15563_v33, %v1450_v28  ;;  %1626 = vadd.xlane.f32.xlu1 %v1625_v26  ;;  %v1622_v51 = vsel %vm265_vm0, %v15672_v13, 0.0 }
 0x2b4   : > { %v1552_v19 = vmul.f32 1.442695, %v1520_v46  ;;  %1623 = vadd.xlane.f32.xlu0 %v1622_v51 }
 0x2b5   : > { %v1568_v5 = vmul.f32 1.442695, %v1528_v34  ;;  %v1453_v56 = vpop.xlane.xlu0 %1452 }
 0x2b6   : > { %v1456_v63 = vpop.xlane.xlu1 %1455  ;;  %14390 = vpow2.f32 %v1552_v19  ;;  %v1529_v41 = vsub.f32 %v15561_v24, %v1453_v56 }
 0x2b7   : > { %v1530_v4 = vsub.f32 %v15571_v22, %v1456_v63  ;;  %v15682_v15 = vpop.eup %14382  ;;  %14392 = vpow2.f32 %v1568_v5 }
 0x2b8   : > { %v15684_v33 = vpop.eup %14384  ;;  %v1570_v0 = vmul.f32 1.442695, %v1529_v41  ;;  %v1631_v18 = vsel %vm265_vm0, %v15682_v15, 0.0 }
 0x2b9   : > { %v1572_v42 = vmul.f32 1.442695, %v1530_v4  ;;  %v1459_v9 = vpop.xlane.xlu0 %1458  ;;  %v1628_v20 = vsel %vm265_vm0, %v15684_v33, 0.0  ;;  %1632 = vadd.xlane.f32.xlu1 %v1631_v18 }
 0x2ba   : > { %v1462_v6 = vpop.xlane.xlu1 %1461  ;;  %14394 = vpow2.f32 %v1570_v0  ;;  %v1531_v24 = vsub.f32 %v15569_v25, %v1459_v9  ;;  %1629 = vadd.xlane.f32.xlu0 %v1628_v20 }
 0x2bb   : > { %v1532_v22 = vsub.f32 %v15579_v38, %v1462_v6  ;;  %v15692_v55 = vpop.eup %14386  ;;  %14396 = vpow2.f32 %v1572_v42 }
 0x2bc   : > { %v15694_v1 = vpop.eup %14388  ;;  %v1574_v58 = vmul.f32 1.442695, %v1531_v24  ;;  %v1637_v7 = vsel %vm265_vm0, %v15692_v55, 0.0 }
 0x2bd   : > { %v1576_v2 = vmul.f32 1.442695, %v1532_v22  ;;  %v1465_v14 = vpop.xlane.xlu0 %1464  ;;  %v1634_v57 = vsel %vm265_vm0, %v15694_v1, 0.0  ;;  %1638 = vadd.xlane.f32.xlu1 %v1637_v7 }
 0x2be   : > { %v1468_v37 = vpop.xlane.xlu1 %1467  ;;  %14398 = vpow2.f32 %v1574_v58  ;;  %v1533_v25 = vsub.f32 %v15577_v35, %v1465_v14  ;;  %1635 = vadd.xlane.f32.xlu0 %v1634_v57 }
 0x2bf   : > { %v1534_v38 = vsub.f32 %v15587_v30, %v1468_v37  ;;  %14400 = vpow2.f32 %v1576_v2 }
 0x2c0   : > { %v15702_v62 = vpop.eup %14390  ;;  %v1578_v39 = vmul.f32 1.442695, %v1533_v25 }
 0x2c1   : > { %v1580_v61 = vmul.f32 1.442695, %v1534_v38  ;;  %v15704_v31 = vpop.eup %14392  ;;  %v1471_v40 = vpop.xlane.xlu0 %1470  ;;  %v1616_v21 = vsel %vm265_vm0, %v15702_v62, 0.0 }
 0x2c2   : > { %14402 = vpow2.f32 %v1578_v39  ;;  %v1535_v8 = vsub.f32 %v15585_v49, %v1471_v40  ;;  %v1474_v52 = vpop.xlane.xlu1 %1473  ;;  %1617 = vadd.xlane.f32.xlu0 %v1616_v21  ;;  %v1640_v35 = vsel %vm265_vm0, %v15704_v31, 0.0 }
 0x2c3   : > { %14404 = vpow2.f32 %v1580_v61  ;;  %v1536_v30 = vsub.f32 %v15595_v10, %v1474_v52  ;;  %1641 = vadd.xlane.f32.xlu1 %v1640_v35 }
 0x2c4   : > { %v15712_v48 = vpop.eup %14394  ;;  %v1582_v11 = vmul.f32 1.442695, %v1535_v8 }
 0x2c5   : > { %v15714_v44 = vpop.eup %14396  ;;  %v1584_v28 = vmul.f32 1.442695, %v1536_v30  ;;  %v1477_v46 = vpop.xlane.xlu0 %1476  ;;  %v1643_v34 = vsel %vm265_vm0, %v15712_v48, 0.0 }
 0x2c6   : > { %14406 = vpow2.f32 %v1582_v11  ;;  %v1537_v49 = vsub.f32 %v15593_v47, %v1477_v46  ;;  %v1480_v26 = vpop.xlane.xlu1 %1479  ;;  %1644 = vadd.xlane.f32.xlu0 %v1643_v34  ;;  %v1646_v51 = vsel %vm265_vm0, %v15714_v44, 0.0  ;;  %v18439_v47 = vmov 0.0  }
 0x2c7   : > { %14408 = vpow2.f32 %v1584_v28  ;;  %v1538_v10 = vsub.f32 %v15603_v17, %v1480_v26  ;;  %1647 = vadd.xlane.f32.xlu1 %v1646_v51  ;;  %13221 = vmatprep.subr.mxu1 %v18439_v47 }
 0x2c8   : > { %v15722_v19 = vpop.eup %14398  ;;  %v1586_v5 = vmul.f32 1.442695, %v1537_v49  ;;  %13216 = vmatprep.subr.mxu0 %v18439_v47  ;;  %13223 = vmatprep.mubr.msk.f32.mxu1 %vm14975_vm1, %v18439_v47 }
 0x2c9   : > { %v15724_v56 = vpop.eup %14400  ;;  %v1588_v63 = vmul.f32 1.442695, %v1538_v10  ;;  %v1483_v41 = vpop.xlane.xlu0 %1482  ;;  %v1649_v4 = vsel %vm265_vm0, %v15722_v19, 0.0  ;;  %13218 = vmatprep.mubr.msk.f32.mxu0 %vm14975_vm1, %v18439_v47 }
 0x2ca   : > { %14410 = vpow2.f32 %v1586_v5  ;;  %v1539_v0 = vsub.f32 %v15601_v53, %v1483_v41  ;;  %v1486_v17 = vpop.xlane.xlu1 %1485  ;;  %1650 = vadd.xlane.f32.xlu0 %v1649_v4  ;;  %v1652_v42 = vsel %vm265_vm0, %v15724_v56, 0.0 }
 0x2cb   : > { %14412 = vpow2.f32 %v1588_v63  ;;  %v1540_v18 = vsub.f32 %v15611_v59, %v1486_v17  ;;  %1653 = vadd.xlane.f32.xlu1 %v1652_v42 }
 0x2cc   : > { %v15734_v9 = vpop.eup %14402  ;;  %v1590_v6 = vmul.f32 1.442695, %v1539_v0 }
 0x2cd   : > { %v15736_v20 = vpop.eup %14404  ;;  %v1592_v24 = vmul.f32 1.442695, %v1540_v18  ;;  %v1489_v22 = vpop.xlane.xlu0 %1488  ;;  %v1655_v58 = vsel %vm265_vm0, %v15734_v9, 0.0 }
 0x2ce   : > { %14414 = vpow2.f32 %v1590_v6  ;;  %v1541_v53 = vsub.f32 %v15609_v27, %v1489_v22  ;;  %v1492_v59 = vpop.xlane.xlu1 %1491  ;;  %1656 = vadd.xlane.f32.xlu0 %v1655_v58  ;;  %v1658_v2 = vsel %vm265_vm0, %v15736_v20, 0.0 }
 0x2cf   : > { %14416 = vpow2.f32 %v1592_v24  ;;  %v1542_v7 = vsub.f32 %v15619_v32, %v1492_v59  ;;  %1659 = vadd.xlane.f32.xlu1 %v1658_v2 }
 0x2d0   : > { %v15748_v14 = vpop.eup %14406  ;;  %v1594_v37 = vmul.f32 1.442695, %v1541_v53 }
 0x2d1   : > { %v15750_v57 = vpop.eup %14408  ;;  %v1596_v25 = vmul.f32 1.442695, %v1542_v7  ;;  %v1495_v38 = vpop.xlane.xlu0 %1494  ;;  %v1661_v39 = vsel %vm265_vm0, %v15748_v14, 0.0 }
 0x2d2   : > { %14418 = vpow2.f32 %v1594_v37  ;;  %v1543_v27 = vsub.f32 %v15617_v54, %v1495_v38  ;;  %v1498_v61 = vpop.xlane.xlu1 %1497  ;;  %1662 = vadd.xlane.f32.xlu0 %v1661_v39  ;;  %v1664_v40 = vsel %vm265_vm0, %v15750_v57, 0.0 }
 0x2d3   : > { %14420 = vpow2.f32 %v1596_v25  ;;  %v1544_v32 = vsub.f32 %v15627_v60, %v1498_v61  ;;  %1665 = vadd.xlane.f32.xlu1 %v1664_v40 }
 0x2d4   : > { %v15758_v21 = vpop.eup %14410  ;;  %v1598_v8 = vmul.f32 1.442695, %v1543_v27 }
 0x2d5   : > { %v15760_v52 = vpop.eup %14412  ;;  %v1600_v35 = vmul.f32 1.442695, %v1544_v32  ;;  %v1501_v30 = vpop.xlane.xlu0 %1500  ;;  %v1667_v11 = vsel %vm265_vm0, %v15758_v21, 0.0 }
 0x2d6   : > { %14422 = vpow2.f32 %v1598_v8  ;;  %v1545_v54 = vsub.f32 %v15625_v50, %v1501_v30  ;;  %v1504_v28 = vpop.xlane.xlu1 %1503  ;;  %1668 = vadd.xlane.f32.xlu0 %v1667_v11  ;;  %v1670_v46 = vsel %vm265_vm0, %v15760_v52, 0.0 }
 0x2d7   : > { %14424 = vpow2.f32 %v1600_v35  ;;  %v1546_v60 = vsub.f32 %v15635_v23, %v1504_v28  ;;  %1671 = vadd.xlane.f32.xlu1 %v1670_v46 }
 0x2d8   : > { %v15768_v34 = vpop.eup %14414  ;;  %v1602_v49 = vmul.f32 1.442695, %v1545_v54 }
 0x2d9   : > { %v15770_v26 = vpop.eup %14416  ;;  %v1604_v51 = vmul.f32 1.442695, %v1546_v60  ;;  %v1507_v10 = vpop.xlane.xlu0 %1506  ;;  %v1673_v5 = vsel %vm265_vm0, %v15768_v34, 0.0 }
 0x2da   : > { %14426 = vpow2.f32 %v1602_v49  ;;  %v1547_v50 = vsub.f32 %v15633_v16, %v1507_v10  ;;  %v1510_v63 = vpop.xlane.xlu1 %1509  ;;  %1674 = vadd.xlane.f32.xlu0 %v1673_v5  ;;  %v1676_v41 = vsel %vm265_vm0, %v15770_v26, 0.0 }
 0x2db   : > { %14428 = vpow2.f32 %v1604_v51  ;;  %v1548_v23 = vsub.f32 %v15643_v29, %v1510_v63  ;;  %1677 = vadd.xlane.f32.xlu1 %v1676_v41 }
 0x2dc   : > { %v15778_v4 = vpop.eup %14418  ;;  %v1606_v0 = vmul.f32 1.442695, %v1547_v50 }
 0x2dd   : > { %v15780_v17 = vpop.eup %14420  ;;  %v1608_v42 = vmul.f32 1.442695, %v1548_v23  ;;  %v1513_v18 = vpop.xlane.xlu0 %1512  ;;  %v1679_v6 = vsel %vm265_vm0, %v15778_v4, 0.0 }
 0x2de   : > { %14430 = vpow2.f32 %v1606_v0  ;;  %v1549_v16 = vsub.f32 %v15641_v12, %v1513_v18  ;;  %v1516_v24 = vpop.xlane.xlu1 %1515  ;;  %1680 = vadd.xlane.f32.xlu0 %v1679_v6  ;;  %v1682_v22 = vsel %vm265_vm0, %v15780_v17, 0.0 }
 0x2df   : > { %14432 = vpow2.f32 %v1608_v42  ;;  %v1550_v29 = vsub.f32 %v15651_v45, %v1516_v24  ;;  %1683 = vadd.xlane.f32.xlu1 %v1682_v22  ;;  %v14824_v42 = vld [vmem:[%s15051_s29 + $0x8] sm:$0xff] }
 0x2e0   : > { %v15788_v58 = vpop.eup %14422  ;;  %v1610_v53 = vmul.f32 1.442695, %v1549_v16 }
 0x2e1   : > { %v15790_v59 = vpop.eup %14424  ;;  %v1612_v2 = vmul.f32 1.442695, %v1550_v29  ;;  %v1519_v7 = vpop.xlane.xlu0 %1518  ;;  %v1685_v37 = vsel %vm265_vm0, %v15788_v58, 0.0  ;;  %v14825_v29 = vld [vmem:[%s15051_s29 + $0x10] sm:$0xff] }
 0x2e2   : > { %14434 = vpow2.f32 %v1610_v53  ;;  %v1551_v12 = vsub.f32 %v15649_v3, %v1519_v7  ;;  %1686 = vadd.xlane.f32.xlu0 %v1685_v37  ;;  %v1688_v25 = vsel %vm265_vm0, %v15790_v59, 0.0  ;;  %v14826_v37 = vld [vmem:[%s15051_s29 + $0x18] sm:$0xff] }
 0x2e3   : > { %14436 = vpow2.f32 %v1612_v2  ;;  %1689 = vadd.xlane.f32.xlu1 %v1688_v25 }
 0x2e4   : > { %v15797_v45 = vpop.eup %14426  ;;  %v1614_v38 = vmul.f32 1.442695, %v1551_v12 }
 0x2e5   : > { %v15799_v39 = vpop.eup %14428  ;;  %v1691_v27 = vsel %vm265_vm0, %v15797_v45, 0.0 }
 0x2e6   : > { %14438 = vpow2.f32 %v1614_v38  ;;  %1692 = vadd.xlane.f32.xlu0 %v1691_v27  ;;  %v1694_v61 = vsel %vm265_vm0, %v15799_v39, 0.0 }
 0x2e7   : > { %1695 = vadd.xlane.f32.xlu1 %v1694_v61 }
 0x2e8   : > { %v15805_v3 = vpop.eup %14430 }
 0x2e9   : > { %v15807_v40 = vpop.eup %14432  ;;  %v1697_v32 = vsel %vm265_vm0, %v15805_v3, 0.0 }
 0x2ea   : > { %1698 = vadd.xlane.f32.xlu0 %v1697_v32  ;;  %v1700_v8 = vsel %vm265_vm0, %v15807_v40, 0.0 }
 0x2eb   : > { %1701 = vadd.xlane.f32.xlu1 %v1700_v8 }
 0x2ec   : > { %v15813_v35 = vpop.eup %14434 }
 0x2ed   : > { %v15815_v30 = vpop.eup %14436  ;;  %v1703_v11 = vsel %vm265_vm0, %v15813_v35, 0.0 }
 0x2ee   : > { %1704 = vadd.xlane.f32.xlu0 %v1703_v11  ;;  %v1706_v54 = vsel %vm265_vm0, %v15815_v30, 0.0 }
 0x2ef   : > { %1707 = vadd.xlane.f32.xlu1 %v1706_v54  ;;  %v14828_v54 = vld [vmem:[%s15051_s29 + $0x28] sm:$0xff] }
 0x2f0   : > { %v15821_v28 = vpop.eup %14438 }
 0x2f1   : > { %v1709_v46 = vsel %vm265_vm0, %v15821_v28, 0.0 }
 0x2f2   : > { %1710 = vadd.xlane.f32.xlu0 %v1709_v46  ;;  %v14829_v46 = vld [vmem:[%s15051_s29] sm:$0xff] }
 0x33c   : > { %v1621_v60 = vpop.xlane.xlu1 %1620 }
 0x33d   : > { %14440 = vrcp.f32 %v1621_v60 }
 0x340   : > { %v1627_v49 = vpop.xlane.xlu1 %1626 }
 0x341   : > { %v1624_v51 = vpop.xlane.xlu0 %1623 }
 0x342   : > { %14442 = vrcp.f32 %v1624_v51  ;;  %v14830_v51 = vld [vmem:[%s15051_s29 + $0x30] sm:$0xff] }
 0x343   : > { %14444 = vrcp.f32 %v1627_v49 }
 0x346   : > { %v1633_v10 = vpop.xlane.xlu1 %1632 }
 0x347   : > { %v14441_v5 = vpop.eup %14440  ;;  %v1630_v50 = vpop.xlane.xlu0 %1629 }
 0x348   : > { %14446 = vrcp.f32 %v1630_v50  ;;  %v1745_v63 = vmul.f32 %v14441_v5, %v15664_v43  ;;  %v14831_v50 = vld [vmem:[%s15051_s29 + $0x38] sm:$0xff] }
 0x349   : > { %14448 = vrcp.f32 %v1633_v10 }
 0x34a   : > { %v1639_v41 = vpop.xlane.xlu1 %1638  ;;  %13222 = vmatpush3.xpose.msk.msra.mxu1 %vm265_vm0, %v1745_v63 }
 0x34b   : > { %v1636_v23 = vpop.xlane.xlu0 %1635  ;;  %13226 = vmatprep.subr.mxu1 %v18439_v47 }
 0x34c   : > { %v14443_v0 = vpop.eup %14442  ;;  %14450 = vrcp.f32 %v1636_v23 }
 0x34d   : > { %13224 = vmatmul.mubr.msk.f32.vlgmr.msra.gmra.mrb[0].mxu1 %vm265_vm0, %v14824_v42  ;;  %v1746_v18 = vmul.f32 %v14443_v0, %v15672_v13  ;;  %v14445_v6 = vpop.eup %14444 }
 0x34e   : > { %13228 = vmatprep.mubr.msk.f32.mxu1 %vm14975_vm1, %v18439_v47  ;;  %v1747_v24 = vmul.f32 %v14445_v6, %v15670_v36 }
 0x34f   : > { %v1618_v43 = vpop.xlane.xlu0 %1617  ;;  %13227 = vmatpush3.xpose.msk.msra.mxu1 %vm265_vm0, %v1746_v18 }
 0x350   : > { %14452 = vrcp.f32 %v1618_v43  ;;  %v1642_v16 = vpop.xlane.xlu1 %1641  ;;  %13231 = vmatprep.subr.mxu1 %v18439_v47 }
 0x351   : > { %14454 = vrcp.f32 %v1639_v41 }
 0x352   : > { %v14447_v22 = vpop.eup %14446  ;;  %13229 = vmatmul.mubr.msk.f32.vlgmr.msra.gmra.mrb[2].mxu1 %vm265_vm0, %v14825_v29  ;;  %14456 = vrcp.f32 %v1642_v16 }
 0x353   : > { %v1645_v13 = vpop.xlane.xlu0 %1644  ;;  %13232 = vmatpush3.xpose.msk.msra.mxu1 %vm265_vm0, %v1747_v24  ;;  %13233 = vmatprep.mubr.msk.f32.mxu1 %vm14975_vm1, %v18439_v47  ;;  %v1748_v2 = vmul.f32 %v14447_v22, %v15684_v33  ;;  %v14449_v7 = vpop.eup %14448  ;;  %v14827_v33 = vld [vmem:[%s15051_s29 + $0x20] sm:$0xff]  ;;  %v14833_v24 = vld [vmem:[%s15051_s29 + $0x48] sm:$0xff] }
 0x354   : > { %v1648_v53 = vpop.xlane.xlu1 %1647  ;;  %13236 = vmatprep.subr.mxu1 %v18439_v47  ;;  %v1749_v38 = vmul.f32 %v14449_v7, %v15682_v15  ;;  %14458 = vrcp.f32 %v1645_v13 }
 0x355   : > { %14460 = vrcp.f32 %v1648_v53  ;;  %v14835_v53 = vld [vmem:[%s15051_s29 + $0x50] sm:$0xff] }
 0x356   : > { %13234 = vmatmul.mubr.msk.f32.vlgmr.msra.gmra.mrb[4].mxu1 %vm265_vm0, %v14826_v37  ;;  %v14451_v25 = vpop.eup %14450 }
 0x357   : > { %v1651_v36 = vpop.xlane.xlu0 %1650  ;;  %13237 = vmatpush3.xpose.msk.msra.mxu1 %vm265_vm0, %v1748_v2  ;;  %13238 = vmatprep.mubr.msk.f32.mxu1 %vm14975_vm1, %v18439_v47  ;;  %v1750_v15 = vmul.f32 %v14451_v25, %v15694_v1 }
 0x358   : > { %v1654_v12 = vpop.xlane.xlu1 %1653  ;;  %13241 = vmatprep.subr.mxu1 %v18439_v47 }
 0x35a   : > { %v14453_v27 = vpop.eup %14452  ;;  %13239 = vmatmul.mubr.msk.f32.vlgmr.msra.gmra.mrb[6].mxu1 %vm265_vm0, %v14827_v33 }
 0x35b   : > { %v1744_v61 = vmul.f32 %v14453_v27, %v15702_v62  ;;  %13242 = vmatpush3.xpose.msk.msra.mxu1 %vm265_vm0, %v1749_v38  ;;  %13243 = vmatprep.mubr.msk.f32.mxu1 %vm14975_vm1, %v18439_v47  ;;  %v1657_v32 = vpop.xlane.xlu0 %1656  ;;  %v14455_v11 = vpop.eup %14454 }
 0x35c   : > { %v1660_v8 = vpop.xlane.xlu1 %1659  ;;  %13246 = vmatprep.subr.mxu1 %v18439_v47  ;;  %v1751_v1 = vmul.f32 %v14455_v11, %v15692_v55  ;;  %v14457_v60 = vpop.eup %14456 }
 0x35d   : > { %13217 = vmatpush3.xpose.msk.msra.mxu0 %vm265_vm0, %v1744_v61  ;;  %v1752_v55 = vmul.f32 %v14457_v60, %v15704_v31  ;;  %v14832_v31 = vld [vmem:[%s15051_s29 + $0x40] sm:$0xff] }
 0x35e   : > { %13244 = vmatmul.mubr.msk.f32.vlgmr.msra.gmra.mrb[8].mxu1 %vm265_vm0, %v14828_v54  ;;  %13296 = vmatprep.subr.mxu0 %v18439_v47  ;;  %v14459_v5 = vpop.eup %14458  ;;  %v14838_v61 = vld [vmem:[%s15051_s29 + $0xa0] sm:$0xff] }
 0x35f   : > { %13247 = vmatpush3.xpose.msk.msra.mxu1 %vm265_vm0, %v1750_v15  ;;  %13248 = vmatprep.mubr.msk.f32.mxu1 %vm14975_vm1, %v18439_v47  ;;  %v1663_v49 = vpop.xlane.xlu0 %1662  ;;  %v1753_v23 = vmul.f32 %v14459_v5, %v15712_v48  ;;  %v14461_v0 = vpop.eup %14460  ;;  %v14839_v15 = vld [vmem:[%s15051_s29 + $0x60] sm:$0xff] }
 0x360   : > { %v1666_v62 = vpop.xlane.xlu1 %1665  ;;  %13219 = vmatmul.mubr.msk.f32.vlgmr.msra.gmra.mrb[32].mxu0 %vm265_vm0, %v14829_v46  ;;  %13251 = vmatprep.subr.mxu1 %v18439_v47  ;;  %v1754_v48 = vmul.f32 %v14461_v0, %v15714_v44  ;;  %v14834_v44 = vld [vmem:[%s15051_s29 + $0x80] sm:$0xff] }
 0x361   : > { %14462 = vrcp.f32 %v1666_v62  ;;  %13298 = vmatprep.mubr.msk.f32.mxu0 %vm14975_vm1, %v18439_v47  ;;  %v14840_v62 = vld [vmem:[%s15051_s29 + $0xb0] sm:$0xff] }
 0x362   : > { %13249 = vmatmul.mubr.msk.f32.vlgmr.msra.gmra.mrb[10].mxu1 %vm265_vm0, %v14830_v51  ;;  %14464 = vrcp.f32 %v1651_v36  ;;  %v14842_v51 = vld [vmem:[%s15051_s29 + $0xc0] sm:$0xff] }
 0x363   : > { %13252 = vmatpush3.xpose.msk.msra.mxu1 %vm265_vm0, %v1751_v1  ;;  %13253 = vmatprep.mubr.msk.f32.mxu1 %vm14975_vm1, %v18439_v47  ;;  %v1669_v63 = vpop.xlane.xlu0 %1668 }
 0x364   : > { %v1672_v10 = vpop.xlane.xlu1 %1671  ;;  %13256 = vmatprep.subr.mxu1 %v18439_v47 }
 0x365   : > { %14466 = vrcp.f32 %v1672_v10 }
 0x366   : > { %13254 = vmatmul.mubr.msk.f32.vlgmr.msra.gmra.mrb[12].mxu1 %vm265_vm0, %v14831_v50  ;;  %14468 = vrcp.f32 %v1654_v12  ;;  %v14836_v12 = vld [vmem:[%s15051_s29 + $0x90] sm:$0xff] }
 0x367   : > { %13257 = vmatpush3.xpose.msk.msra.mxu1 %vm265_vm0, %v1752_v55  ;;  %13258 = vmatprep.mubr.msk.f32.mxu1 %vm14975_vm1, %v18439_v47  ;;  %v1675_v16 = vpop.xlane.xlu0 %1674  ;;  %v14844_v50 = vld [vmem:[%s15051_s29 + $0xd0] sm:$0xff] }
 0x368   : > { %v1678_v41 = vpop.xlane.xlu1 %1677  ;;  %13261 = vmatprep.subr.mxu1 %v18439_v47 }
 0x369   : > { %14470 = vrcp.f32 %v1678_v41 }
 0x36a   : > { %13259 = vmatmul.mubr.msk.f32.vlgmr.msra.gmra.mrb[14].mxu1 %vm265_vm0, %v14832_v31  ;;  %14472 = vrcp.f32 %v1657_v32  ;;  %v14846_v31 = vld [vmem:[%s15051_s29 + $0xe0] sm:$0xff] }
 0x36b   : > { %v14463_v42 = vpop.eup %14462  ;;  %13262 = vmatpush3.xpose.msk.msra.mxu1 %vm265_vm0, %v1753_v23  ;;  %13263 = vmatprep.mubr.msk.f32.mxu1 %vm14975_vm1, %v18439_v47  ;;  %v14845_v23 = vld [vmem:[%s15051_s29 + $0x78] sm:$0xff] }
 0x36c   : > { %v1684_v18 = vpop.xlane.xlu1 %1683  ;;  %v1760_v6 = vmul.f32 %v14463_v42, %v15750_v57  ;;  %13266 = vmatprep.subr.mxu1 %v18439_v47  ;;  %v14465_v43 = vpop.eup %14464 }
 0x36d   : > { %14474 = vrcp.f32 %v1684_v18  ;;  %v1755_v2 = vmul.f32 %v14465_v43, %v15722_v19  ;;  %v14849_v43 = vld [vmem:[%s15051_s29 + $0x98] sm:$0xff] }
 0x36e   : > { %13297 = vmatpush3.xpose.msk.msra.mxu0 %vm265_vm0, %v1760_v6  ;;  %13264 = vmatmul.mubr.msk.f32.vlgmr.msra.gmra.mrb[16].mxu1 %vm265_vm0, %v14833_v24  ;;  %14476 = vrcp.f32 %v1660_v8 }
 0x36f   : > { %v14467_v22 = vpop.eup %14466  ;;  %13306 = vmatprep.subr.mxu0 %v18439_v47  ;;  %13267 = vmatpush3.xpose.msk.msra.mxu1 %vm265_vm0, %v1754_v48 }
 0x370   : > { %v1690_v57 = vpop.xlane.xlu1 %1689  ;;  %v1762_v29 = vmul.f32 %v14467_v22, %v15760_v52  ;;  %13268 = vmatprep.mubr.msk.f32.mxu1 %vm14975_vm1, %v18439_v47  ;;  %13271 = vmatprep.subr.mxu1 %v18439_v47  ;;  %v14469_v13 = vpop.eup %14468  ;;  %v14850_v22 = vld [vmem:[%s15051_s29 + $0xa8] sm:$0xff] }
 0x371   : > { %14478 = vrcp.f32 %v1690_v57  ;;  %13299 = vmatmul.mubr.msk.f32.vlgmr.msra.gmra.mrb[34].mxu0 %vm265_vm0, %v14834_v44  ;;  %v1681_v52 = vpop.xlane.xlu0 %1680  ;;  %v1756_v25 = vmul.f32 %v14469_v13, %v15724_v56  ;;  %v14851_v44 = vld [vmem:[%s15051_s29 + $0xb8] sm:$0xff] }
 0x372   : > { %13307 = vmatpush3.xpose.msk.msra.mxu0 %vm265_vm0, %v1762_v29  ;;  %13269 = vmatmul.mubr.msk.f32.vlgmr.msra.gmra.mrb[18].mxu1 %vm265_vm0, %v14835_v53  ;;  %14480 = vrcp.f32 %v1663_v49  ;;  %v14852_v53 = vld [vmem:[%s15051_s29 + $0xc8] sm:$0xff] }
 0x373   : > { %v14471_v7 = vpop.eup %14470  ;;  %13308 = vmatprep.mubr.msk.f32.mxu0 %vm14975_vm1, %v18439_v47  ;;  %13316 = vmatprep.subr.mxu0 %v18439_v47 }
 0x374   : > { %v1696_v37 = vpop.xlane.xlu1 %1695  ;;  %13272 = vmatpush3.xpose.msk.msra.mxu1 %vm265_vm0, %v1755_v2  ;;  %v1764_v36 = vmul.f32 %v14471_v7, %v15770_v26  ;;  %13273 = vmatprep.mubr.msk.f32.mxu1 %vm14975_vm1, %v18439_v47  ;;  %v14473_v19 = vpop.eup %14472  ;;  %v14837_v26 = vld [vmem:[%s15051_s29 + $0x58] sm:$0xff] }
 0x375   : > { %14482 = vrcp.f32 %v1696_v37  ;;  %13309 = vmatmul.mubr.msk.f32.vlgmr.msra.gmra.mrb[36].mxu0 %vm265_vm0, %v14836_v12  ;;  %13276 = vmatprep.subr.mxu1 %v18439_v47  ;;  %v1687_v32 = vpop.xlane.xlu0 %1686  ;;  %v1757_v8 = vmul.f32 %v14473_v19, %v15734_v9  ;;  %v14853_v7 = vld [vmem:[%s15051_s29 + $0xd8] sm:$0xff]  ;;  %v16057_v37 = vld [vmem:[%s18437_s1 + $0x48] ss:$0 sm:$0xff] }
 0x376   : > { %13317 = vmatpush3.xpose.msk.msra.mxu0 %vm265_vm0, %v1764_v36  ;;  %13318 = vmatprep.mubr.msk.f32.mxu0 %vm14975_vm1, %v18439_v47  ;;  %14484 = vrcp.f32 %v1669_v63 }
 0x377   : > { %v14475_v38 = vpop.eup %14474  ;;  %13274 = vmatmul.mubr.msk.f32.vlgmr.msra.gmra.mrb[20].mxu1 %vm265_vm0, %v14837_v26  ;;  %13326 = vmatprep.subr.mxu0 %v18439_v47 }
 0x378   : > { %v1702_v27 = vpop.xlane.xlu1 %1701  ;;  %13277 = vmatpush3.xpose.msk.msra.mxu1 %vm265_vm0, %v1756_v25  ;;  %v1766_v33 = vmul.f32 %v14475_v38, %v15780_v17  ;;  %13278 = vmatprep.mubr.msk.f32.mxu1 %vm14975_vm1, %v18439_v47  ;;  %v14477_v56 = vpop.eup %14476 }
 0x379   : > { %14486 = vrcp.f32 %v1702_v27  ;;  %13319 = vmatmul.mubr.msk.f32.vlgmr.msra.gmra.mrb[38].mxu0 %vm265_vm0, %v14838_v61  ;;  %13281 = vmatprep.subr.mxu1 %v18439_v47  ;;  %v1758_v46 = vmul.f32 %v14477_v56, %v15736_v20  ;;  %v1693_v60 = vpop.xlane.xlu0 %1692 }
 0x37a   : > { %13327 = vmatpush3.xpose.msk.msra.mxu0 %vm265_vm0, %v1766_v33  ;;  %13328 = vmatprep.mubr.msk.f32.mxu0 %vm14975_vm1, %v18439_v47  ;;  %14488 = vrcp.f32 %v1675_v16 }
 0x37b   : > { %v14479_v17 = vpop.eup %14478  ;;  %13279 = vmatmul.mubr.msk.f32.vlgmr.msra.gmra.mrb[22].mxu1 %vm265_vm0, %v14839_v15  ;;  %13336 = vmatprep.subr.mxu0 %v18439_v47 }
 0x37c   : > { %v1708_v11 = vpop.xlane.xlu1 %1707  ;;  %13282 = vmatpush3.xpose.msk.msra.mxu1 %vm265_vm0, %v1757_v8  ;;  %v1768_v54 = vmul.f32 %v14479_v17, %v15790_v59  ;;  %13283 = vmatprep.mubr.msk.f32.mxu1 %vm14975_vm1, %v18439_v47  ;;  %v14481_v9 = vpop.eup %14480  ;;  %v14841_v59 = vld [vmem:[%s15051_s29 + $0x68] sm:$0xff] }
 0x37d   : > { %14490 = vrcp.f32 %v1708_v11  ;;  %13329 = vmatmul.mubr.msk.f32.vlgmr.msra.gmra.mrb[40].mxu0 %vm265_vm0, %v14840_v62  ;;  %13286 = vmatprep.subr.mxu1 %v18439_v47  ;;  %v1759_v10 = vmul.f32 %v14481_v9, %v15748_v14  ;;  %v1699_v63 = vpop.xlane.xlu0 %1698 }
 0x37e   : > { %13337 = vmatpush3.xpose.msk.msra.mxu0 %vm265_vm0, %v1768_v54  ;;  %13338 = vmatprep.mubr.msk.f32.mxu0 %vm14975_vm1, %v18439_v47  ;;  %14492 = vrcp.f32 %v1681_v52  ;;  %v14854_v52 = vld [vmem:[%s15051_s29 + $0xe8] sm:$0xff] }
 0x37f   : > { %v14483_v1 = vpop.eup %14482  ;;  %13284 = vmatmul.mubr.msk.f32.vlgmr.msra.gmra.mrb[24].mxu1 %vm265_vm0, %v14841_v59  ;;  %13346 = vmatprep.subr.mxu0 %v18439_v47  ;;  %14494 = vrcp.f32 %v1687_v32 }
 0x380   : > { %13287 = vmatpush3.xpose.msk.msra.mxu1 %vm265_vm0, %v1758_v46  ;;  %v1770_v49 = vmul.f32 %v14483_v1, %v15799_v39  ;;  %13288 = vmatprep.mubr.msk.f32.mxu1 %vm14975_vm1, %v18439_v47  ;;  %v14485_v20 = vpop.eup %14484  ;;  %v14843_v39 = vld [vmem:[%s15051_s29 + $0x70] sm:$0xff]  ;;  %14496 = vrcp.f32 %v1693_v60 }
 0x381   : > { %13339 = vmatmul.mubr.msk.f32.vlgmr.msra.gmra.mrb[42].mxu0 %vm265_vm0, %v14842_v51  ;;  %13291 = vmatprep.subr.mxu1 %v18439_v47  ;;  %v1761_v41 = vmul.f32 %v14485_v20, %v15758_v21  ;;  %v1705_v18 = vpop.xlane.xlu0 %1704  ;;  %14498 = vrcp.f32 %v1699_v63 }
 0x382   : > { %13347 = vmatpush3.xpose.msk.msra.mxu0 %vm265_vm0, %v1770_v49  ;;  %13348 = vmatprep.mubr.msk.f32.mxu0 %vm14975_vm1, %v18439_v47  ;;  %14500 = vrcp.f32 %v1705_v18 }
 0x383   : > { %v14487_v55 = vpop.eup %14486  ;;  %13289 = vmatmul.mubr.msk.f32.vlgmr.msra.gmra.mrb[26].mxu1 %vm265_vm0, %v14843_v39  ;;  %13356 = vmatprep.subr.mxu0 %v18439_v47 }
 0x384   : > { %13292 = vmatpush3.xpose.msk.msra.mxu1 %vm265_vm0, %v1759_v10  ;;  %v1772_v5 = vmul.f32 %v14487_v55, %v15807_v40  ;;  %13293 = vmatprep.mubr.msk.f32.mxu1 %vm14975_vm1, %v18439_v47  ;;  %v14489_v14 = vpop.eup %14488 }
 0x385   : > { %13349 = vmatmul.mubr.msk.f32.vlgmr.msra.gmra.mrb[44].mxu0 %vm265_vm0, %v14844_v50  ;;  %13301 = vmatprep.subr.mxu1 %v18439_v47  ;;  %v1763_v21 = vmul.f32 %v14489_v14, %v15768_v34  ;;  %v14848_v34 = vld [vmem:[%s15051_s29 + $0xf0] sm:$0xff]  ;;  %v1711_v16 = vpop.xlane.xlu0 %1710 }
 0x386   : > { %13357 = vmatpush3.xpose.msk.msra.mxu0 %vm265_vm0, %v1772_v5  ;;  %13358 = vmatprep.mubr.msk.f32.mxu0 %vm14975_vm1, %v18439_v47  ;;  %14502 = vrcp.f32 %v1711_v16 }
 0x387   : > { %v14491_v40 = vpop.eup %14490  ;;  %13294 = vmatmul.mubr.msk.f32.vlgmr.msra.gmra.mrb[28].mxu1 %vm265_vm0, %v14845_v23  ;;  %13366 = vmatprep.subr.mxu0 %v18439_v47 }
 0x388   : > { %13302 = vmatpush3.xpose.msk.msra.mxu1 %vm265_vm0, %v1761_v41  ;;  %v1774_v0 = vmul.f32 %v14491_v40, %v15815_v30  ;;  %13303 = vmatprep.mubr.msk.f32.mxu1 %vm14975_vm1, %v18439_v47  ;;  %v14493_v42 = vpop.eup %14492  ;;  %v14847_v30 = vld [vmem:[%s15051_s29 + $0x88] sm:$0xff] }
 0x389   : > { %13359 = vmatmul.mubr.msk.f32.vlgmr.msra.gmra.mrb[46].mxu0 %vm265_vm0, %v14846_v31  ;;  %13311 = vmatprep.subr.mxu1 %v18439_v47  ;;  %v1765_v6 = vmul.f32 %v14493_v42, %v15778_v4  ;;  %v14495_v48 = vpop.eup %14494 }
 0x38a   : > { %13367 = vmatpush3.xpose.msk.msra.mxu0 %vm265_vm0, %v1774_v0  ;;  %13368 = vmatprep.mubr.msk.f32.mxu0 %vm14975_vm1, %v18439_v47  ;;  %v1767_v24 = vmul.f32 %v14495_v48, %v15788_v58  ;;  %v14497_v4 = vpop.eup %14496 }
 0x38b   : > { %13304 = vmatmul.mubr.msk.f32.vlgmr.msra.gmra.mrb[30].mxu1 %vm265_vm0, %v14847_v30  ;;  %13376 = vmatprep.subr.mxu0 %v18439_v47  ;;  %v1769_v57 = vmul.f32 %v14497_v4, %v15797_v45  ;;  %v14499_v29 = vpop.eup %14498 }
 0x38c   : > { %13312 = vmatpush3.xpose.msk.msra.mxu1 %vm265_vm0, %v1763_v21  ;;  %13313 = vmatprep.mubr.msk.f32.mxu1 %vm14975_vm1, %v18439_v47  ;;  %v1771_v58 = vmul.f32 %v14499_v29, %v15805_v3  ;;  %v14501_v13 = vpop.eup %14500 }
 0x38d   : > { %13321 = vmatprep.subr.mxu1 %v18439_v47  ;;  %13369 = vmatmul.mubr.msk.f32.vlgmr.msra.gmra.mrb[48].mxu0 %vm265_vm0, %v14848_v34  ;;  %v1773_v45 = vmul.f32 %v14501_v13, %v15813_v35  ;;  %v14855_v35 = vld [vmem:[%s15051_s29 + $0xf8] sm:$0xff] }
 0x38e   : > { %13378 = vmatprep.mubr.msk.f32.mxu0 %vm14975_vm1, %v18439_v47 }
 0x38f   : > { %13314 = vmatmul.mubr.msk.f32.vlgmr.msra.gmra.mrb[32].mxu1 %vm265_vm0, %v14849_v43 }
 0x390   : > { %13322 = vmatpush3.xpose.msk.msra.mxu1 %vm265_vm0, %v1765_v6  ;;  %13323 = vmatprep.mubr.msk.f32.mxu1 %vm14975_vm1, %v18439_v47  ;;  %v14503_v2 = vpop.eup %14502 }
 0x391   : > { %13331 = vmatprep.subr.mxu1 %v18439_v47  ;;  %v1775_v3 = vmul.f32 %v14503_v2, %v15821_v28  ;;  %v16052_v28 = vld [vmem:[%s18437_s1 + $0x40] ss:$0 sm:$0xff] }
 0x393   : > { %13324 = vmatmul.mubr.msk.f32.vlgmr.msra.gmra.mrb[34].mxu1 %vm265_vm0, %v14850_v22 }
 0x394   : > { %13332 = vmatpush3.xpose.msk.msra.mxu1 %vm265_vm0, %v1767_v24  ;;  %13333 = vmatprep.mubr.msk.f32.mxu1 %vm14975_vm1, %v18439_v47 }
 0x395   : > { %13341 = vmatprep.subr.mxu1 %v18439_v47 }
 0x397   : > { %13334 = vmatmul.mubr.msk.f32.vlgmr.msra.gmra.mrb[36].mxu1 %vm265_vm0, %v14851_v44 }
 0x398   : > { %13342 = vmatpush3.xpose.msk.msra.mxu1 %vm265_vm0, %v1769_v57  ;;  %13343 = vmatprep.mubr.msk.f32.mxu1 %vm14975_vm1, %v18439_v47 }
 0x399   : > { %13351 = vmatprep.subr.mxu1 %v18439_v47 }
 0x39b   : > { %13344 = vmatmul.mubr.msk.f32.vlgmr.msra.gmra.mrb[38].mxu1 %vm265_vm0, %v14852_v53 }
 0x39c   : > { %13352 = vmatpush3.xpose.msk.msra.mxu1 %vm265_vm0, %v1771_v58  ;;  %13353 = vmatprep.mubr.msk.f32.mxu1 %vm14975_vm1, %v18439_v47 }
 0x39d   : > { %13361 = vmatprep.subr.mxu1 %v18439_v47 }
 0x39f   : > { %13354 = vmatmul.mubr.msk.f32.vlgmr.msra.gmra.mrb[40].mxu1 %vm265_vm0, %v14853_v7 }
 0x3a0   : > { %13362 = vmatpush3.xpose.msk.msra.mxu1 %vm265_vm0, %v1773_v45  ;;  %13363 = vmatprep.mubr.msk.f32.mxu1 %vm14975_vm1, %v18439_v47 }
 0x3a1   : > { %13371 = vmatprep.subr.mxu1 %v18439_v47 }
 0x3a3   : > { %13364 = vmatmul.mubr.msk.f32.vlgmr.msra.gmra.mrb[42].mxu1 %vm265_vm0, %v14854_v52 }
 0x3a4   : > { %13372 = vmatpush3.xpose.msk.msra.mxu1 %vm265_vm0, %v1775_v3  ;;  %13373 = vmatprep.mubr.msk.f32.mxu1 %vm14975_vm1, %v18439_v47 }
 0x3a5   : > { %13381 = vmatprep.subr.mxu1 %v18439_v47 }
 0x3a7   : > { %13374 = vmatmul.mubr.msk.f32.vlgmr.msra.gmra.mrb[44].mxu1 %vm265_vm0, %v14855_v35 }
 0x3a8   : > { %13383 = vmatprep.mubr.msk.f32.mxu1 %vm14975_vm1, %v18439_v47 }
 0x420   : > { %v1924_v36 = vpop.f32.mrb[0].mxu1 }
 0x421   : > { %v4213_v12 = vmul.f32 %v16052_v28, %v1924_v36  ;;  %v4345_v19 = vmul.f32 %v16057_v37, %v1924_v36  ;;  %v13225_v25 = vpop.f32.mrb[1].mxu1 }
 0x423   : > { %v4379_v38 = vsel %vm265_vm0, %v4345_v19, 0.0  ;;  %v4247_v27 = vsel %vm265_vm0, %v4213_v12, 0.0 }
 0x424   : > { %4380 = vadd.xlane.f32.xlu0 %v4379_v38 }
 0x425   : > { %v2000_v26 = vpop.f32.mrb[2].mxu1 }
 0x426   : > { %v13230_v33 = vpop.f32.mrb[3].mxu1  ;;  %v4346_v14 = vmul.f32 %v16057_v37, %v2000_v26  ;;  %v4214_v21 = vmul.f32 %v16052_v28, %v2000_v26 }
 0x428   : > { %4248 = vadd.xlane.f32.xlu0 %v4247_v27  ;;  %v4382_v42 = vsel %vm265_vm0, %v4346_v14, 0.0  ;;  %v4250_v48 = vsel %vm265_vm0, %v4214_v21, 0.0 }
 0x429   : > { %v2076_v61 = vpop.f32.mrb[4].mxu1 }
 0x42a   : > { %v4215_v56 = vmul.f32 %v16052_v28, %v2076_v61  ;;  %v4347_v32 = vmul.f32 %v16057_v37, %v2076_v61  ;;  %v13235_v8 = vpop.f32.mrb[5].mxu1 }
 0x42c   : > { %v4385_v17 = vsel %vm265_vm0, %v4347_v32, 0.0  ;;  %v4253_v54 = vsel %vm265_vm0, %v4215_v56, 0.0 }
 0x42d   : > { %4386 = vadd.xlane.f32.xlu0 %v4385_v17  ;;  %v2152_v15 = vpop.f32.mrb[6].mxu1 }
 0x42e   : > { %v13240_v11 = vpop.f32.mrb[7].mxu1  ;;  %v4348_v6 = vmul.f32 %v16057_v37, %v2152_v15  ;;  %v4216_v44 = vmul.f32 %v16052_v28, %v2152_v15 }
 0x430   : > { %v4388_v58 = vsel %vm265_vm0, %v4348_v6, 0.0  ;;  %v4256_v3 = vsel %vm265_vm0, %v4216_v44, 0.0 }
 0x431   : > { %4254 = vadd.xlane.f32.xlu0 %v4253_v54  ;;  %v2228_v62 = vpop.f32.mrb[8].mxu1 }
 0x432   : > { %v4217_v9 = vmul.f32 %v16052_v28, %v2228_v62  ;;  %v4349_v46 = vmul.f32 %v16057_v37, %v2228_v62  ;;  %v13245_v1 = vpop.f32.mrb[9].mxu1 }
 0x433   : > { %v1848_v59 = vpop.f32.mrb[32].mxu0 }
 0x434   : > { %v4344_v60 = vmul.f32 %v16057_v37, %v1848_v59  ;;  %v4391_v49 = vsel %vm265_vm0, %v4349_v46, 0.0  ;;  %v13220_v51 = vpop.f32.mrb[33].mxu0  ;;  %v4212_v10 = vmul.f32 %v16052_v28, %v1848_v59  ;;  %v4259_v5 = vsel %vm265_vm0, %v4217_v9, 0.0 }
 0x435   : > { %4392 = vadd.xlane.f32.xlu0 %v4391_v49  ;;  %v2304_v20 = vpop.f32.mrb[10].mxu1 }
 0x436   : > { %v4376_v55 = vsel %vm265_vm0, %v4344_v60, 0.0  ;;  %v13250_v39 = vpop.f32.mrb[11].mxu1  ;;  %v4244_v63 = vsel %vm265_vm0, %v4212_v10, 0.0  ;;  %v4350_v7 = vmul.f32 %v16057_v37, %v2304_v20  ;;  %v4218_v26 = vmul.f32 %v16052_v28, %v2304_v20 }
 0x437   : > { %4377 = vadd.xlane.f32.xlu1 %v4376_v55 }
 0x438   : > { %v4394_v27 = vsel %vm265_vm0, %v4350_v7, 0.0  ;;  %v4262_v15 = vsel %vm265_vm0, %v4218_v26, 0.0 }
 0x439   : > { %4260 = vadd.xlane.f32.xlu0 %v4259_v5  ;;  %v2380_v50 = vpop.f32.mrb[12].mxu1 }
 0x43a   : > { %v4219_v41 = vmul.f32 %v16052_v28, %v2380_v50  ;;  %v4351_v40 = vmul.f32 %v16057_v37, %v2380_v50  ;;  %v13255_v23 = vpop.f32.mrb[13].mxu1 }
 0x43b   : > { %4245 = vadd.xlane.f32.xlu1 %v4244_v63 }
 0x43c   : > { %v4397_v0 = vsel %vm265_vm0, %v4351_v40, 0.0  ;;  %v4265_v18 = vsel %vm265_vm0, %v4219_v41, 0.0 }
 0x43d   : > { %4398 = vadd.xlane.f32.xlu0 %v4397_v0  ;;  %v2456_v31 = vpop.f32.mrb[14].mxu1 }
 0x43e   : > { %v13260_v30 = vpop.f32.mrb[15].mxu1  ;;  %v4352_v17 = vmul.f32 %v16057_v37, %v2456_v31  ;;  %v4220_v60 = vmul.f32 %v16052_v28, %v2456_v31 }
 0x43f   : > { %4383 = vadd.xlane.f32.xlu1 %v4382_v42 }
 0x440   : > { %v4400_v49 = vsel %vm265_vm0, %v4352_v17, 0.0  ;;  %v4268_v50 = vsel %vm265_vm0, %v4220_v60, 0.0 }
 0x441   : > { %4266 = vadd.xlane.f32.xlu0 %v4265_v18  ;;  %v2532_v34 = vpop.f32.mrb[16].mxu1 }
 0x442   : > { %v4221_v43 = vmul.f32 %v16052_v28, %v2532_v34  ;;  %v4353_v16 = vmul.f32 %v16057_v37, %v2532_v34  ;;  %v13265_v24 = vpop.f32.mrb[17].mxu1 }
 0x443   : > { %4251 = vadd.xlane.f32.xlu1 %v4250_v48 }
 0x444   : > { %v4403_v4 = vsel %vm265_vm0, %v4353_v16, 0.0  ;;  %v16087_v22 = vpop.f32.mrb[34].mxu0  ;;  %v4271_v53 = vsel %vm265_vm0, %v4221_v43, 0.0 }
 0x445   : > { %4404 = vadd.xlane.f32.xlu0 %v4403_v4  ;;  %v16089_v57 = vpop.f32.mrb[18].mxu1  ;;  %v13300_v29 = vpop.f32.mrb[35].mxu0  ;;  %v4360_v55 = vmul.f32 %v16057_v37, %v16087_v22  ;;  %v4228_v42 = vmul.f32 %v16052_v28, %v16087_v22 }
 0x446   : > { %v13270_v13 = vpop.f32.mrb[19].mxu1  ;;  %v4354_v16 = vmul.f32 %v16057_v37, %v16089_v57 }
 0x447   : > { %4389 = vadd.xlane.f32.xlu1 %v4388_v58  ;;  %v4424_v23 = vsel %vm265_vm0, %v4360_v55, 0.0  ;;  %v4292_v24 = vsel %vm265_vm0, %v4228_v42, 0.0  ;;  %v4222_v58 = vmul.f32 %v16052_v28, %v16089_v57 }
 0x448   : > { %v16094_v45 = vpop.f32.mrb[36].mxu0  ;;  %v4406_v13 = vsel %vm265_vm0, %v4354_v16, 0.0 }
 0x449   : > { %4272 = vadd.xlane.f32.xlu0 %v4271_v53  ;;  %v13310_v2 = vpop.f32.mrb[37].mxu0  ;;  %v4230_v26 = vmul.f32 %v16052_v28, %v16094_v45 }
 0x44a   : > { %v2684_v52 = vpop.f32.mrb[20].mxu1 }
 0x44b   : > { %4257 = vadd.xlane.f32.xlu1 %v4256_v3  ;;  %v4223_v35 = vmul.f32 %v16052_v28, %v2684_v52  ;;  %v4355_v36 = vmul.f32 %v16057_v37, %v2684_v52  ;;  %v13275_v12 = vpop.f32.mrb[21].mxu1  ;;  %v4362_v52 = vmul.f32 %v16057_v37, %v16094_v45 }
 0x44c   : > { %v16100_v19 = vpop.f32.mrb[38].mxu0 }
 0x44d   : > { %v4409_v25 = vsel %vm265_vm0, %v4355_v36, 0.0  ;;  %v13320_v38 = vpop.f32.mrb[39].mxu0  ;;  %v4277_v56 = vsel %vm265_vm0, %v4223_v35, 0.0  ;;  %v4274_v35 = vsel %vm265_vm0, %v4222_v58, 0.0  ;;  %v4364_v17 = vmul.f32 %v16057_v37, %v16100_v19 }
 0x44e   : > { %4410 = vadd.xlane.f32.xlu0 %v4409_v25  ;;  %v16105_v33 = vpop.f32.mrb[22].mxu1  ;;  %v4430_v38 = vsel %vm265_vm0, %v4362_v52, 0.0 }
 0x44f   : > { %4395 = vadd.xlane.f32.xlu1 %v4394_v27  ;;  %v13280_v61 = vpop.f32.mrb[23].mxu1 }
 0x450   : > { %v16108_v32 = vpop.f32.mrb[40].mxu0 }
 0x451   : > { %v13330_v8 = vpop.f32.mrb[41].mxu0 }
 0x452   : > { %4278 = vadd.xlane.f32.xlu0 %v4277_v56  ;;  %v2836_v11 = vpop.f32.mrb[24].mxu1 }
 0x453   : > { %4263 = vadd.xlane.f32.xlu1 %v4262_v15  ;;  %v4225_v54 = vmul.f32 %v16052_v28, %v2836_v11  ;;  %v4357_v62 = vmul.f32 %v16057_v37, %v2836_v11  ;;  %v13285_v9 = vpop.f32.mrb[25].mxu1  ;;  %v4298_v15 = vsel %vm265_vm0, %v4230_v26, 0.0 }
 0x454   : > { %v16114_v46 = vpop.f32.mrb[42].mxu0  ;;  %v4436_v9 = vsel %vm265_vm0, %v4364_v17, 0.0 }
 0x455   : > { %v4415_v1 = vsel %vm265_vm0, %v4357_v62, 0.0  ;;  %v13340_v59 = vpop.f32.mrb[43].mxu0  ;;  %v4283_v10 = vsel %vm265_vm0, %v4225_v54, 0.0  ;;  %v4368_v58 = vmul.f32 %v16057_v37, %v16114_v46 }
 0x456   : > { %4416 = vadd.xlane.f32.xlu0 %v4415_v1  ;;  %v16119_v51 = vpop.f32.mrb[26].mxu1  ;;  %v4232_v1 = vmul.f32 %v16052_v28, %v16100_v19 }
 0x457   : > { %4401 = vadd.xlane.f32.xlu1 %v4400_v49  ;;  %v13290_v20 = vpop.f32.mrb[27].mxu1 }
 0x458   : > { %v16124_v39 = vpop.f32.mrb[44].mxu0  ;;  %v4304_v55 = vsel %vm265_vm0, %v4232_v1, 0.0 }
 0x459   : > { %v13350_v5 = vpop.f32.mrb[45].mxu0 }
 0x45a   : > { %4284 = vadd.xlane.f32.xlu0 %v4283_v10  ;;  %v2988_v14 = vpop.f32.mrb[28].mxu1  ;;  %v4356_v10 = vmul.f32 %v16057_v37, %v16105_v33 }
 0x45b   : > { %4269 = vadd.xlane.f32.xlu1 %v4268_v50  ;;  %v4227_v63 = vmul.f32 %v16052_v28, %v2988_v14  ;;  %v4359_v41 = vmul.f32 %v16057_v37, %v2988_v14  ;;  %v13295_v40 = vpop.f32.mrb[29].mxu1 }
 0x45c   : > { %v16130_v0 = vpop.f32.mrb[46].mxu0 }
 0x45d   : > { %v4421_v31 = vsel %vm265_vm0, %v4359_v41, 0.0  ;;  %v13360_v21 = vpop.f32.mrb[47].mxu0  ;;  %v4289_v18 = vsel %vm265_vm0, %v4227_v63, 0.0  ;;  %v4224_v63 = vmul.f32 %v16052_v28, %v16105_v33  ;;  %v4412_v41 = vsel %vm265_vm0, %v4356_v10, 0.0 }
 0x45e   : > { %4422 = vadd.xlane.f32.xlu0 %v4421_v31  ;;  %v3140_v30 = vpop.f32.mrb[30].mxu1  ;;  %v4366_v31 = vmul.f32 %v16057_v37, %v16108_v32  ;;  %v4372_v26 = vmul.f32 %v16057_v37, %v16130_v0 }
 0x45f   : > { %4425 = vadd.xlane.f32.xlu1 %v4424_v23  ;;  %v4361_v34 = vmul.f32 %v16057_v37, %v3140_v30  ;;  %v13305_v6 = vpop.f32.mrb[31].mxu1  ;;  %v4229_v22 = vmul.f32 %v16052_v28, %v3140_v30  ;;  %v4280_v21 = vsel %vm265_vm0, %v4224_v63, 0.0 }
 0x460   : > { %v16137_v48 = vpop.f32.mrb[48].mxu0  ;;  %v4442_v33 = vsel %vm265_vm0, %v4366_v31, 0.0 }
 0x461   : > { %v13370_v43 = vpop.f32.mrb[49].mxu0  ;;  %v4427_v29 = vsel %vm265_vm0, %v4361_v34, 0.0  ;;  %v4295_v2 = vsel %vm265_vm0, %v4229_v22, 0.0 }
 0x462   : > { %4290 = vadd.xlane.f32.xlu0 %v4289_v18  ;;  %v3292_v4 = vpop.f32.mrb[32].mxu1  ;;  %v4234_v18 = vmul.f32 %v16052_v28, %v16108_v32  ;;  %v4358_v43 = vmul.f32 %v16057_v37, %v16119_v51  ;;  %v4226_v32 = vmul.f32 %v16052_v28, %v16119_v51  ;;  %v4448_v51 = vsel %vm265_vm0, %v4368_v58, 0.0 }
 0x463   : > { %4293 = vadd.xlane.f32.xlu1 %v4292_v24  ;;  %v13315_v44 = vpop.f32.mrb[33].mxu1  ;;  %v4363_v7 = vmul.f32 %v16057_v37, %v3292_v4  ;;  %v4231_v12 = vmul.f32 %v16052_v28, %v3292_v4 }
 0x464   : > { %v4310_v16 = vsel %vm265_vm0, %v4234_v18, 0.0  ;;  %v4418_v22 = vsel %vm265_vm0, %v4358_v43, 0.0 }
 0x465   : > { %v4433_v57 = vsel %vm265_vm0, %v4363_v7, 0.0  ;;  %v4301_v61 = vsel %vm265_vm0, %v4231_v12, 0.0  ;;  %v4236_v7 = vmul.f32 %v16052_v28, %v16114_v46  ;;  %v4238_v46 = vmul.f32 %v16052_v28, %v16124_v39 }
 0x466   : > { %4428 = vadd.xlane.f32.xlu0 %v4427_v29  ;;  %v3444_v53 = vpop.f32.mrb[34].mxu1 }
 0x467   : > { %4407 = vadd.xlane.f32.xlu1 %v4406_v13  ;;  %v13325_v3 = vpop.f32.mrb[35].mxu1  ;;  %v4365_v56 = vmul.f32 %v16057_v37, %v3444_v53  ;;  %v4233_v54 = vmul.f32 %v16052_v28, %v3444_v53  ;;  %v4286_v13 = vsel %vm265_vm0, %v4226_v32, 0.0 }
 0x469   : > { %v4439_v45 = vsel %vm265_vm0, %v4365_v56, 0.0  ;;  %v4307_v60 = vsel %vm265_vm0, %v4233_v54, 0.0  ;;  %v4240_v56 = vmul.f32 %v16052_v28, %v16130_v0 }
 0x46a   : > { %4296 = vadd.xlane.f32.xlu0 %v4295_v2  ;;  %v3596_v36 = vpop.f32.mrb[36].mxu1 }
 0x46b   : > { %4275 = vadd.xlane.f32.xlu1 %v4274_v35  ;;  %v13335_v25 = vpop.f32.mrb[37].mxu1  ;;  %v4367_v49 = vmul.f32 %v16057_v37, %v3596_v36  ;;  %v4235_v50 = vmul.f32 %v16052_v28, %v3596_v36  ;;  %v4370_v35 = vmul.f32 %v16057_v37, %v16124_v39  ;;  %v4316_v36 = vsel %vm265_vm0, %v4236_v7, 0.0 }
 0x46c   : > { %v4374_v39 = vmul.f32 %v16057_v37, %v16137_v48  ;;  %v4328_v17 = vsel %vm265_vm0, %v4240_v56, 0.0 }
 0x46d   : > { %v4445_v19 = vsel %vm265_vm0, %v4367_v49, 0.0  ;;  %v4313_v40 = vsel %vm265_vm0, %v4235_v50, 0.0  ;;  %v4454_v25 = vsel %vm265_vm0, %v4370_v35, 0.0 }
 0x46e   : > { %4434 = vadd.xlane.f32.xlu0 %v4433_v57  ;;  %v3748_v27 = vpop.f32.mrb[38].mxu1  ;;  %v4466_v54 = vsel %vm265_vm0, %v4374_v39, 0.0 }
 0x46f   : > { %4431 = vadd.xlane.f32.xlu1 %v4430_v38  ;;  %v13345_v8 = vpop.f32.mrb[39].mxu1  ;;  %v4369_v23 = vmul.f32 %v16057_v37, %v3748_v27  ;;  %v4237_v42 = vmul.f32 %v16052_v28, %v3748_v27  ;;  %v4322_v27 = vsel %vm265_vm0, %v4238_v46, 0.0 }
 0x470   : > { %v4504_v8 = vlaneseq }
 0x471   : > { %v4451_v30 = vsel %vm265_vm0, %v4369_v23, 0.0  ;;  %v4319_v34 = vsel %vm265_vm0, %v4237_v42, 0.0 }
 0x472   : > { %4302 = vadd.xlane.f32.xlu0 %v4301_v61  ;;  %v3900_v11 = vpop.f32.mrb[40].mxu1  ;;  %v4460_v61 = vsel %vm265_vm0, %v4372_v26, 0.0 }
 0x473   : > { %4299 = vadd.xlane.f32.xlu1 %v4298_v15  ;;  %v13355_v62 = vpop.f32.mrb[41].mxu1  ;;  %v4371_v6 = vmul.f32 %v16057_v37, %v3900_v11  ;;  %v4239_v24 = vmul.f32 %v16052_v28, %v3900_v11  ;;  %v4505_v15 = vand.u32 127, %v4504_v8  ;;  %v4507_v11 = vshrl.u32 %v4504_v8, 7 }
 0x475   : > { %v4457_v4 = vsel %vm265_vm0, %v4371_v6, 0.0  ;;  %v4325_v29 = vsel %vm265_vm0, %v4239_v24, 0.0  ;;  %v16230_v62 = vsub.s32 %v4505_v15, %v4507_v11 }
 0x476   : > { %4440 = vadd.xlane.f32.xlu0 %v4439_v45  ;;  %v4052_v59 = vpop.f32.mrb[42].mxu1  ;;  %v4242_v45 = vmul.f32 %v16052_v28, %v16137_v48 }
 0x477   : > { %4437 = vadd.xlane.f32.xlu1 %v4436_v9  ;;  %v13365_v20 = vpop.f32.mrb[43].mxu1  ;;  %v4373_v44 = vmul.f32 %v16057_v37, %v4052_v59  ;;  %v4241_v53 = vmul.f32 %v16052_v28, %v4052_v59 }
 0x478   : > { %v4334_v1 = vsel %vm265_vm0, %v4242_v45, 0.0 }
 0x479   : > { %v4463_v2 = vsel %vm265_vm0, %v4373_v44, 0.0  ;;  %v4331_v3 = vsel %vm265_vm0, %v4241_v53, 0.0 }
 0x47a   : > { %4308 = vadd.xlane.f32.xlu0 %v4307_v60  ;;  %v4204_v5 = vpop.f32.mrb[44].mxu1 }
 0x47b   : > { %4305 = vadd.xlane.f32.xlu1 %v4304_v55  ;;  %v13375_v14 = vpop.f32.mrb[45].mxu1  ;;  %v4375_v52 = vmul.f32 %v16057_v37, %v4204_v5  ;;  %v4243_v12 = vmul.f32 %v16052_v28, %v4204_v5  ;;  %v16237_v37 = vld [vmem:[%s18437_s1 + $0x20] sm:$0xff] }
 0x47d   : > { %v4469_v57 = vsel %vm265_vm0, %v4375_v52, 0.0  ;;  %v4337_v38 = vsel %vm265_vm0, %v4243_v12, 0.0 }
 0x47e   : > { %4446 = vadd.xlane.f32.xlu0 %v4445_v19 }
 0x47f   : > { %4413 = vadd.xlane.f32.xlu1 %v4412_v41 }
 0x482   : > { %4314 = vadd.xlane.f32.xlu0 %v4313_v40 }
 0x483   : > { %4281 = vadd.xlane.f32.xlu1 %v4280_v21 }
 0x486   : > { %4452 = vadd.xlane.f32.xlu0 %v4451_v30 }
 0x487   : > { %4443 = vadd.xlane.f32.xlu1 %v4442_v33 }
 0x48a   : > { %4320 = vadd.xlane.f32.xlu0 %v4319_v34 }
 0x48b   : > { %4311 = vadd.xlane.f32.xlu1 %v4310_v16 }
 0x48e   : > { %4458 = vadd.xlane.f32.xlu0 %v4457_v4 }
 0x48f   : > { %4419 = vadd.xlane.f32.xlu1 %v4418_v22 }
 0x492   : > { %4326 = vadd.xlane.f32.xlu0 %v4325_v29 }
 0x493   : > { %4287 = vadd.xlane.f32.xlu1 %v4286_v13 }
 0x496   : > { %4464 = vadd.xlane.f32.xlu0 %v4463_v2 }
 0x497   : > { %4449 = vadd.xlane.f32.xlu1 %v4448_v51  ;;  %v16252_v51 = vld [vmem:[%s18437_s1 + $0x28] sm:$0xff] }
 0x49a   : > { %4332 = vadd.xlane.f32.xlu0 %v4331_v3 }
 0x49b   : > { %4317 = vadd.xlane.f32.xlu1 %v4316_v36 }
 0x49e   : > { %4470 = vadd.xlane.f32.xlu0 %v4469_v57 }
 0x49f   : > { %4455 = vadd.xlane.f32.xlu1 %v4454_v25 }
 0x4a2   : > { %4338 = vadd.xlane.f32.xlu0 %v4337_v38 }
 0x4a3   : > { %4323 = vadd.xlane.f32.xlu1 %v4322_v27 }
 0x4a7   : > { %4461 = vadd.xlane.f32.xlu1 %v4460_v61 }
 0x4ab   : > { %4329 = vadd.xlane.f32.xlu1 %v4328_v17 }
 0x4af   : > { %4467 = vadd.xlane.f32.xlu1 %v4466_v54 }
 0x4b1   : > { %v4381_v9 = vpop.xlane.xlu0 %4380 }
 0x4b2   : > { %v4513_v0 = vrot.slane %v4381_v9, %v16230_v62 }
 0x4b3   : > { %4335 = vadd.xlane.f32.xlu1 %v4334_v1 }
 0x4b5   : > { %v4249_v59 = vpop.xlane.xlu0 %4248 }
 0x4b6   : > { %v4865_v60 = vmul.f32 %v4513_v0, %v4249_v59 }
 0x4b8   : > { %v4897_v49 = vadd.f32 %v4865_v60, %v16237_v37 }
 0x4ba   : > { %v12542_v20 = vmul.f32 -1.442695, %v4897_v49  ;;  %v4387_v28 = vpop.xlane.xlu0 %4386 }
 0x4bb   : > { %v4521_v48 = vrot.slane %v4387_v28, %v16230_v62 }
 0x4bc   : > { %14504 = vpow2.f32 %v12542_v20 }
 0x4be   : > { %v4255_v10 = vpop.xlane.xlu0 %4254 }
 0x4bf   : > { %v4867_v55 = vmul.f32 %v4521_v48, %v4255_v10 }
 0x4c1   : > { %v4899_v5 = vadd.f32 %v4867_v55, %v16237_v37 }
 0x4c2   : > { %v4393_v50 = vpop.xlane.xlu0 %4392 }
 0x4c3   : > { %v12544_v19 = vmul.f32 -1.442695, %v4899_v5  ;;  %v4529_v14 = vrot.slane %v4393_v50, %v16230_v62 }
 0x4c4   : > { %v4378_v63 = vpop.xlane.xlu1 %4377 }
 0x4c5   : > { %14506 = vpow2.f32 %v12544_v19  ;;  %v4509_v31 = vrot.slane %v4378_v63, %v16230_v62 }
 0x4c6   : > { %v14505_v41 = vpop.eup %14504  ;;  %v4261_v40 = vpop.xlane.xlu0 %4260 }
 0x4c7   : > { %v5025_v23 = vadd.f32 1.0, %v14505_v41  ;;  %v4869_v21 = vmul.f32 %v4529_v14, %v4261_v40 }
 0x4c8   : > { %v4246_v42 = vpop.xlane.xlu1 %4245 }
 0x4c9   : > { %14508 = vrcp.f32 %v5025_v23  ;;  %v4901_v30 = vadd.f32 %v4869_v21, %v16237_v37  ;;  %v4864_v33 = vmul.f32 %v4509_v31, %v4246_v42 }
 0x4ca   : > { %v4399_v18 = vpop.xlane.xlu0 %4398 }
 0x4cb   : > { %v12546_v34 = vmul.f32 -1.442695, %v4901_v30  ;;  %v4896_v6 = vadd.f32 %v4864_v33, %v16237_v37  ;;  %v4537_v43 = vrot.slane %v4399_v18, %v16230_v62 }
 0x4cc   : > { %v4384_v16 = vpop.xlane.xlu1 %4383 }
 0x4cd   : > { %14510 = vpow2.f32 %v12546_v34  ;;  %v12541_v24 = vmul.f32 -1.442695, %v4896_v6  ;;  %v4517_v22 = vrot.slane %v4384_v16, %v16230_v62 }
 0x4ce   : > { %v4267_v4 = vpop.xlane.xlu0 %4266 }
 0x4cf   : > { %v14507_v32 = vpop.eup %14506  ;;  %14512 = vpow2.f32 %v12541_v24  ;;  %v4871_v29 = vmul.f32 %v4537_v43, %v4267_v4 }
 0x4d0   : > { %v5027_v44 = vadd.f32 1.0, %v14507_v32  ;;  %v4252_v58 = vpop.xlane.xlu1 %4251 }
 0x4d1   : > { %v4903_v13 = vadd.f32 %v4871_v29, %v16237_v37  ;;  %v4866_v53 = vmul.f32 %v4517_v22, %v4252_v58 }
 0x4d2   : > { %14514 = vrcp.f32 %v5027_v44  ;;  %v4405_v2 = vpop.xlane.xlu0 %4404 }
 0x4d3   : > { %v14509_v7 = vpop.eup %14508  ;;  %v12548_v3 = vmul.f32 -1.442695, %v4903_v13  ;;  %v4898_v52 = vadd.f32 %v4866_v53, %v16237_v37  ;;  %v4545_v35 = vrot.slane %v4405_v2, %v16230_v62 }
 0x4d4   : > { %v4390_v36 = vpop.xlane.xlu1 %4389  ;;  %13382 = vmatpush3.msra.mxu1 %v14509_v7 }
 0x4d5   : > { %14516 = vpow2.f32 %v12548_v3  ;;  %v12543_v12 = vmul.f32 -1.442695, %v4898_v52  ;;  %13384 = vmatmul.mubr.msk.f32.vlgmr.msra.gmra.mrb[46].mxu1 %vm265_vm0, %v16252_v51  ;;  %13391 = vmatprep.subr.mxu1 %v18439_v47  ;;  %v4525_v46 = vrot.slane %v4390_v36, %v16230_v62 }
 0x4d6   : > { %v4273_v57 = vpop.xlane.xlu0 %4272  ;;  %13393 = vmatprep.mubr.msk.f32.mxu1 %vm14975_vm1, %v18439_v47 }
 0x4d7   : > { %v14511_v25 = vpop.eup %14510  ;;  %14518 = vpow2.f32 %v12543_v12  ;;  %v4873_v38 = vmul.f32 %v4545_v35, %v4273_v57 }
 0x4d8   : > { %v5029_v26 = vadd.f32 1.0, %v14511_v25  ;;  %v4258_v27 = vpop.xlane.xlu1 %4257 }
 0x4d9   : > { %v14513_v61 = vpop.eup %14512  ;;  %v4905_v56 = vadd.f32 %v4873_v38, %v16237_v37  ;;  %v4868_v8 = vmul.f32 %v4525_v46, %v4258_v27 }
 0x4da   : > { %14520 = vrcp.f32 %v5029_v26  ;;  %v5024_v39 = vadd.f32 1.0, %v14513_v61 }
 0x4db   : > { %v12550_v17 = vmul.f32 -1.442695, %v4905_v56  ;;  %v4900_v15 = vadd.f32 %v4868_v8, %v16237_v37  ;;  %v4411_v11 = vpop.xlane.xlu0 %4410 }
 0x4dc   : > { %v14515_v54 = vpop.eup %14514  ;;  %14522 = vrcp.f32 %v5024_v39  ;;  %v4553_v45 = vrot.slane %v4411_v11, %v16230_v62  ;;  %v4396_v9 = vpop.xlane.xlu1 %4395 }
 0x4dd   : > { %14524 = vpow2.f32 %v12550_v17  ;;  %v12545_v0 = vmul.f32 -1.442695, %v4900_v15  ;;  %13392 = vmatpush3.msra.mxu1 %v14515_v54  ;;  %v4533_v59 = vrot.slane %v4396_v9, %v16230_v62 }
 0x4de   : > { %13394 = vmatmul.mubr.msk.f32.vlgmr.msra.gmra.mrb[48].mxu1 %vm265_vm0, %v16252_v51  ;;  %13401 = vmatprep.subr.mxu1 %v18439_v47 }
 0x4df   : > { %v14517_v1 = vpop.eup %14516  ;;  %14526 = vpow2.f32 %v12545_v0  ;;  %v4279_v60 = vpop.xlane.xlu0 %4278  ;;  %13403 = vmatprep.mubr.msk.f32.mxu1 %vm14975_vm1, %v18439_v47 }
 0x4e0   : > { %v5031_v49 = vadd.f32 1.0, %v14517_v1  ;;  %v4875_v20 = vmul.f32 %v4553_v45, %v4279_v60  ;;  %v4264_v28 = vpop.xlane.xlu1 %4263 }
 0x4e1   : > { %v14519_v48 = vpop.eup %14518  ;;  %v4870_v10 = vmul.f32 %v4533_v59, %v4264_v28 }
 0x4e2   : > { %14528 = vrcp.f32 %v5031_v49  ;;  %v5026_v55 = vadd.f32 1.0, %v14519_v48  ;;  %v4907_v5 = vadd.f32 %v4875_v20, %v16237_v37 }
 0x4e3   : > { %v4902_v50 = vadd.f32 %v4870_v10, %v16237_v37  ;;  %v4417_v19 = vpop.xlane.xlu0 %4416 }
 0x4e4   : > { %v14521_v14 = vpop.eup %14520  ;;  %14530 = vrcp.f32 %v5026_v55  ;;  %v12552_v63 = vmul.f32 -1.442695, %v4907_v5  ;;  %v4561_v41 = vrot.slane %v4417_v19, %v16230_v62  ;;  %v4402_v40 = vpop.xlane.xlu1 %4401 }
 0x4e5   : > { %v12547_v23 = vmul.f32 -1.442695, %v4902_v50  ;;  %13402 = vmatpush3.msra.mxu1 %v14521_v14  ;;  %v4541_v42 = vrot.slane %v4402_v40, %v16230_v62 }
 0x4e6   : > { %v14523_v31 = vpop.eup %14522  ;;  %14532 = vpow2.f32 %v12552_v63  ;;  %13404 = vmatmul.mubr.msk.f32.vlgmr.msra.gmra.mrb[50].mxu1 %vm265_vm0, %v16252_v51  ;;  %13411 = vmatprep.subr.mxu1 %v18439_v47 }
 0x4e7   : > { %v14525_v21 = vpop.eup %14524  ;;  %14534 = vpow2.f32 %v12547_v23  ;;  %13377 = vmatpush3.msra.mxu0 %v14523_v31  ;;  %v4285_v30 = vpop.xlane.xlu0 %4284  ;;  %13413 = vmatprep.mubr.msk.f32.mxu1 %vm14975_vm1, %v18439_v47 }
 0x4e8   : > { %v5033_v33 = vadd.f32 1.0, %v14525_v21  ;;  %v4877_v18 = vmul.f32 %v4561_v41, %v4285_v30  ;;  %13379 = vmatmul.mubr.msk.f32.vlgmr.msra.gmra.mrb[50].mxu0 %vm265_vm0, %v16252_v51  ;;  %v4270_v34 = vpop.xlane.xlu1 %4269  ;;  %13386 = vmatprep.subr.mxu0 %v18439_v47 }
 0x4e9   : > { %v14527_v6 = vpop.eup %14526  ;;  %v4872_v43 = vmul.f32 %v4541_v42, %v4270_v34  ;;  %13388 = vmatprep.mubr.msk.f32.mxu0 %vm14975_vm1, %v18439_v47 }
 0x4ea   : > { %14536 = vrcp.f32 %v5033_v33  ;;  %v5028_v16 = vadd.f32 1.0, %v14527_v6  ;;  %v4909_v24 = vadd.f32 %v4877_v18, %v16237_v37 }
 0x4eb   : > { %v4904_v4 = vadd.f32 %v4872_v43, %v16237_v37  ;;  %v4423_v32 = vpop.xlane.xlu0 %4422 }
 0x4ec   : > { %v14529_v22 = vpop.eup %14528  ;;  %14538 = vrcp.f32 %v5028_v16  ;;  %v12554_v29 = vmul.f32 -1.442695, %v4909_v24  ;;  %v4569_v44 = vrot.slane %v4423_v32, %v16230_v62  ;;  %v16288_v58 = vpop.xlane.xlu1 %4425 }
 0x4ed   : > { %v12549_v13 = vmul.f32 -1.442695, %v4904_v4  ;;  %13412 = vmatpush3.msra.mxu1 %v14529_v22 }
 0x4ee   : > { %v14531_v53 = vpop.eup %14530  ;;  %14540 = vpow2.f32 %v12554_v29  ;;  %13414 = vmatmul.mubr.msk.f32.vlgmr.msra.gmra.mrb[52].mxu1 %vm265_vm0, %v16252_v51  ;;  %13421 = vmatprep.subr.mxu1 %v18439_v47 }
 0x4ef   : > { %14542 = vpow2.f32 %v12549_v13  ;;  %13387 = vmatpush3.msra.mxu0 %v14531_v53  ;;  %v4291_v2 = vpop.xlane.xlu0 %4290  ;;  %13423 = vmatprep.mubr.msk.f32.mxu1 %vm14975_vm1, %v18439_v47 }
 0x4f0   : > { %v14533_v7 = vpop.eup %14532  ;;  %v4879_v3 = vmul.f32 %v4569_v44, %v4291_v2  ;;  %13389 = vmatmul.mubr.msk.f32.vlgmr.msra.gmra.mrb[52].mxu0 %vm265_vm0, %v16252_v51  ;;  %v16297_v52 = vpop.xlane.xlu1 %4293  ;;  %13396 = vmatprep.subr.mxu0 %v18439_v47 }
 0x4f1   : > { %v14535_v35 = vpop.eup %14534  ;;  %v5035_v36 = vadd.f32 1.0, %v14533_v7  ;;  %13398 = vmatprep.mubr.msk.f32.mxu0 %vm14975_vm1, %v18439_v47 }
 0x4f2   : > { %v5030_v12 = vadd.f32 1.0, %v14535_v35  ;;  %v4911_v57 = vadd.f32 %v4879_v3, %v16237_v37 }
 0x4f3   : > { %14544 = vrcp.f32 %v5035_v36  ;;  %v4429_v25 = vpop.xlane.xlu0 %4428 }
 0x4f4   : > { %v14537_v46 = vpop.eup %14536  ;;  %14546 = vrcp.f32 %v5030_v12  ;;  %v12556_v38 = vmul.f32 -1.442695, %v4911_v57  ;;  %v4577_v26 = vrot.slane %v4429_v25, %v16230_v62  ;;  %v4408_v27 = vpop.xlane.xlu1 %4407  ;;  %v4573_v57 = vrot.slane %v16288_v58, %v16230_v62 }
 0x4f5   : > { %13422 = vmatpush3.msra.mxu1 %v14537_v46  ;;  %v4549_v56 = vrot.slane %v4408_v27, %v16230_v62 }
 0x4f6   : > { %v14539_v61 = vpop.eup %14538  ;;  %14548 = vpow2.f32 %v12556_v38  ;;  %13424 = vmatmul.mubr.msk.f32.vlgmr.msra.gmra.mrb[54].mxu1 %vm265_vm0, %v16252_v51  ;;  %13431 = vmatprep.subr.mxu1 %v18439_v47 }
 0x4f7   : > { %13397 = vmatpush3.msra.mxu0 %v14539_v61  ;;  %v4297_v8 = vpop.xlane.xlu0 %4296  ;;  %13433 = vmatprep.mubr.msk.f32.mxu1 %vm14975_vm1, %v18439_v47 }
 0x4f8   : > { %v14541_v39 = vpop.eup %14540  ;;  %v4881_v17 = vmul.f32 %v4577_v26, %v4297_v8  ;;  %13399 = vmatmul.mubr.msk.f32.vlgmr.msra.gmra.mrb[54].mxu0 %vm265_vm0, %v16252_v51  ;;  %v4276_v15 = vpop.xlane.xlu1 %4275  ;;  %13406 = vmatprep.subr.mxu0 %v18439_v47 }
 0x4f9   : > { %v14543_v11 = vpop.eup %14542  ;;  %v5037_v54 = vadd.f32 1.0, %v14541_v39  ;;  %v4874_v45 = vmul.f32 %v4549_v56, %v4276_v15  ;;  %13408 = vmatprep.mubr.msk.f32.mxu0 %vm14975_vm1, %v18439_v47  ;;  %v4880_v56 = vmul.f32 %v4573_v57, %v16297_v52 }
 0x4fa   : > { %v5032_v9 = vadd.f32 1.0, %v14543_v11  ;;  %v4913_v0 = vadd.f32 %v4881_v17, %v16237_v37 }
 0x4fb   : > { %14550 = vrcp.f32 %v5037_v54  ;;  %v4906_v1 = vadd.f32 %v4874_v45, %v16237_v37  ;;  %v4435_v59 = vpop.xlane.xlu0 %4434  ;;  %v4912_v52 = vadd.f32 %v4880_v56, %v16237_v37 }
 0x4fc   : > { %14552 = vrcp.f32 %v5032_v9  ;;  %v12558_v60 = vmul.f32 -1.442695, %v4913_v0  ;;  %v4585_v49 = vrot.slane %v4435_v59, %v16230_v62  ;;  %v16318_v20 = vpop.xlane.xlu1 %4431 }
 0x4fd   : > { %v14545_v28 = vpop.eup %14544  ;;  %v12551_v48 = vmul.f32 -1.442695, %v4906_v1  ;;  %v4581_v45 = vrot.slane %v16318_v20, %v16230_v62 }
 0x4fe   : > { %v14547_v10 = vpop.eup %14546  ;;  %14554 = vpow2.f32 %v12558_v60  ;;  %13432 = vmatpush3.msra.mxu1 %v14545_v28 }
 0x4ff   : > { %14556 = vpow2.f32 %v12551_v48  ;;  %13407 = vmatpush3.msra.mxu0 %v14547_v10  ;;  %13434 = vmatmul.mubr.msk.f32.vlgmr.msra.gmra.mrb[56].mxu1 %vm265_vm0, %v16252_v51  ;;  %v4303_v55 = vpop.xlane.xlu0 %4302  ;;  %v12557_v48 = vmul.f32 -1.442695, %v4912_v52 }
 0x500   : > { %v14549_v5 = vpop.eup %14548  ;;  %v4883_v50 = vmul.f32 %v4585_v49, %v4303_v55  ;;  %13409 = vmatmul.mubr.msk.f32.vlgmr.msra.gmra.mrb[56].mxu0 %vm265_vm0, %v16252_v51  ;;  %v16324_v19 = vpop.xlane.xlu1 %4299  ;;  %13416 = vmatprep.subr.mxu0 %v18439_v47 }
 0x501   : > { %v5039_v14 = vadd.f32 1.0, %v14549_v5  ;;  %13441 = vmatprep.subr.mxu1 %v18439_v47  ;;  %13418 = vmatprep.mubr.msk.f32.mxu0 %vm14975_vm1, %v18439_v47  ;;  %v4882_v1 = vmul.f32 %v4581_v45, %v16324_v19 }
 0x502   : > { %v4915_v63 = vadd.f32 %v4883_v50, %v16237_v37  ;;  %13443 = vmatprep.mubr.msk.f32.mxu1 %vm14975_vm1, %v18439_v47 }
 0x503   : > { %14558 = vrcp.f32 %v5039_v14  ;;  %v4441_v41 = vpop.xlane.xlu0 %4440  ;;  %v4914_v50 = vadd.f32 %v4882_v1, %v16237_v37 }
 0x504   : > { %v12560_v40 = vmul.f32 -1.442695, %v4915_v63  ;;  %v4593_v23 = vrot.slane %v4441_v41, %v16230_v62  ;;  %v16334_v31 = vpop.xlane.xlu1 %4437 }
 0x505   : > { %v14551_v21 = vpop.eup %14550  ;;  %v4589_v20 = vrot.slane %v16334_v31, %v16230_v62 }
 0x506   : > { %v14553_v42 = vpop.eup %14552  ;;  %14560 = vpow2.f32 %v12560_v40  ;;  %13442 = vmatpush3.msra.mxu1 %v14551_v21 }
 0x507   : > { %13417 = vmatpush3.msra.mxu0 %v14553_v42  ;;  %13444 = vmatmul.mubr.msk.f32.vlgmr.msra.gmra.mrb[58].mxu1 %vm265_vm0, %v16252_v51  ;;  %v4309_v30 = vpop.xlane.xlu0 %4308 }
 0x508   : > { %v14555_v33 = vpop.eup %14554  ;;  %v4885_v18 = vmul.f32 %v4593_v23, %v4309_v30  ;;  %13419 = vmatmul.mubr.msk.f32.vlgmr.msra.gmra.mrb[58].mxu0 %vm265_vm0, %v16252_v51  ;;  %v16340_v34 = vpop.xlane.xlu1 %4305  ;;  %13451 = vmatprep.subr.mxu1 %v18439_v47 }
 0x509   : > { %v14557_v6 = vpop.eup %14556  ;;  %v5041_v43 = vadd.f32 1.0, %v14555_v33  ;;  %13453 = vmatprep.mubr.msk.f32.mxu1 %vm14975_vm1, %v18439_v47  ;;  %13426 = vmatprep.subr.mxu0 %v18439_v47  ;;  %v4884_v41 = vmul.f32 %v4589_v20, %v16340_v34 }
 0x50a   : > { %v5034_v16 = vadd.f32 1.0, %v14557_v6  ;;  %v4917_v24 = vadd.f32 %v4885_v18, %v16237_v37  ;;  %13428 = vmatprep.mubr.msk.f32.mxu0 %vm14975_vm1, %v18439_v47  ;;  %v12559_v18 = vmul.f32 -1.442695, %v4914_v50 }
 0x50b   : > { %14562 = vrcp.f32 %v5041_v43  ;;  %v4447_v4 = vpop.xlane.xlu0 %4446  ;;  %v4916_v34 = vadd.f32 %v4884_v41, %v16237_v37 }
 0x50c   : > { %14564 = vrcp.f32 %v5034_v16  ;;  %v12562_v32 = vmul.f32 -1.442695, %v4917_v24  ;;  %v4601_v22 = vrot.slane %v4447_v4, %v16230_v62  ;;  %v4414_v29 = vpop.xlane.xlu1 %4413 }
 0x50d   : > { %v14559_v44 = vpop.eup %14558  ;;  %v4557_v13 = vrot.slane %v4414_v29, %v16230_v62 }
 0x50e   : > { %14566 = vpow2.f32 %v12562_v32  ;;  %13452 = vmatpush3.msra.mxu1 %v14559_v44 }
 0x50f   : > { %13454 = vmatmul.mubr.msk.f32.vlgmr.msra.gmra.mrb[60].mxu1 %vm265_vm0, %v16252_v51  ;;  %v4315_v53 = vpop.xlane.xlu0 %4314  ;;  %13461 = vmatprep.subr.mxu1 %v18439_v47 }
 0x510   : > { %v14561_v2 = vpop.eup %14560  ;;  %v4887_v7 = vmul.f32 %v4601_v22, %v4315_v53  ;;  %v4282_v3 = vpop.xlane.xlu1 %4281  ;;  %13463 = vmatprep.mubr.msk.f32.mxu1 %vm14975_vm1, %v18439_v47 }
 0x511   : > { %v5043_v35 = vadd.f32 1.0, %v14561_v2  ;;  %v4876_v36 = vmul.f32 %v4557_v13, %v4282_v3  ;;  %v12561_v2 = vmul.f32 -1.442695, %v4916_v34 }
 0x512   : > { %v4919_v12 = vadd.f32 %v4887_v7, %v16237_v37 }
 0x513   : > { %14568 = vrcp.f32 %v5043_v35  ;;  %v4908_v25 = vadd.f32 %v4876_v36, %v16237_v37  ;;  %v4453_v46 = vpop.xlane.xlu0 %4452 }
 0x514   : > { %v12564_v38 = vmul.f32 -1.442695, %v4919_v12  ;;  %v4609_v26 = vrot.slane %v4453_v46, %v16230_v62  ;;  %v4444_v27 = vpop.xlane.xlu1 %4443 }
 0x515   : > { %v14563_v61 = vpop.eup %14562  ;;  %v12553_v8 = vmul.f32 -1.442695, %v4908_v25  ;;  %v4597_v42 = vrot.slane %v4444_v27, %v16230_v62 }
 0x516   : > { %v14565_v39 = vpop.eup %14564  ;;  %14570 = vpow2.f32 %v12564_v38  ;;  %13462 = vmatpush3.msra.mxu1 %v14563_v61 }
 0x517   : > { %14572 = vpow2.f32 %v12553_v8  ;;  %13427 = vmatpush3.msra.mxu0 %v14565_v39  ;;  %13464 = vmatmul.mubr.msk.f32.vlgmr.msra.gmra.mrb[62].mxu1 %vm265_vm0, %v16252_v51  ;;  %v4321_v58 = vpop.xlane.xlu0 %4320 }
 0x518   : > { %v14567_v17 = vpop.eup %14566  ;;  %v4889_v15 = vmul.f32 %v4609_v26, %v4321_v58  ;;  %13429 = vmatmul.mubr.msk.f32.vlgmr.msra.gmra.mrb[60].mxu0 %vm265_vm0, %v16252_v51  ;;  %v4312_v11 = vpop.xlane.xlu1 %4311  ;;  %13471 = vmatprep.subr.mxu1 %v18439_v47 }
 0x519   : > { %v5045_v54 = vadd.f32 1.0, %v14567_v17  ;;  %13473 = vmatprep.mubr.msk.f32.mxu1 %vm14975_vm1, %v18439_v47  ;;  %13436 = vmatprep.subr.mxu0 %v18439_v47  ;;  %v4886_v4 = vmul.f32 %v4597_v42, %v4312_v11 }
 0x51a   : > { %v4921_v9 = vadd.f32 %v4889_v15, %v16237_v37  ;;  %13438 = vmatprep.mubr.msk.f32.mxu0 %vm14975_vm1, %v18439_v47 }
 0x51b   : > { %14574 = vrcp.f32 %v5045_v54  ;;  %v4459_v0 = vpop.xlane.xlu0 %4458  ;;  %v4918_v3 = vadd.f32 %v4886_v4, %v16237_v37 }
 0x51c   : > { %v12566_v59 = vmul.f32 -1.442695, %v4921_v9  ;;  %v4617_v60 = vrot.slane %v4459_v0, %v16230_v62  ;;  %v4420_v49 = vpop.xlane.xlu1 %4419 }
 0x51d   : > { %v14569_v28 = vpop.eup %14568  ;;  %v4565_v10 = vrot.slane %v4420_v49, %v16230_v62  ;;  %v12563_v27 = vmul.f32 -1.442695, %v4918_v3 }
 0x51e   : > { %14576 = vpow2.f32 %v12566_v59  ;;  %13472 = vmatpush3.msra.mxu1 %v14569_v28 }
 0x51f   : > { %13474 = vmatmul.mubr.msk.f32.vlgmr.msra.gmra.mrb[64].mxu1 %vm265_vm0, %v16252_v51  ;;  %v4327_v55 = vpop.xlane.xlu0 %4326  ;;  %13481 = vmatprep.subr.mxu1 %v18439_v47  ;;  %14578 = vpow2.f32 %v12557_v48 }
 0x520   : > { %v14571_v5 = vpop.eup %14570  ;;  %v4891_v19 = vmul.f32 %v4617_v60, %v4327_v55  ;;  %v4288_v14 = vpop.xlane.xlu1 %4287  ;;  %13483 = vmatprep.mubr.msk.f32.mxu1 %vm14975_vm1, %v18439_v47 }
 0x521   : > { %v14573_v63 = vpop.eup %14572  ;;  %v5047_v40 = vadd.f32 1.0, %v14571_v5  ;;  %v4878_v23 = vmul.f32 %v4565_v10, %v4288_v14 }
 0x522   : > { %v5036_v31 = vadd.f32 1.0, %v14573_v63  ;;  %v4923_v21 = vadd.f32 %v4891_v19, %v16237_v37 }
 0x523   : > { %14580 = vrcp.f32 %v5047_v40  ;;  %v4910_v30 = vadd.f32 %v4878_v23, %v16237_v37  ;;  %v4465_v33 = vpop.xlane.xlu0 %4464 }
 0x524   : > { %14582 = vrcp.f32 %v5036_v31  ;;  %v12568_v6 = vmul.f32 -1.442695, %v4923_v21  ;;  %v4625_v43 = vrot.slane %v4465_v33, %v16230_v62  ;;  %v4450_v16 = vpop.xlane.xlu1 %4449 }
 0x525   : > { %v14575_v24 = vpop.eup %14574  ;;  %v12555_v32 = vmul.f32 -1.442695, %v4910_v30  ;;  %v4605_v22 = vrot.slane %v4450_v16, %v16230_v62 }
 0x526   : > { %14584 = vpow2.f32 %v12568_v6  ;;  %13482 = vmatpush3.msra.mxu1 %v14575_v24 }
 0x527   : > { %14586 = vpow2.f32 %v12555_v32  ;;  %13484 = vmatmul.mubr.msk.f32.vlgmr.msra.gmra.mrb[66].mxu1 %vm265_vm0, %v16252_v51  ;;  %v4333_v29 = vpop.xlane.xlu0 %4332  ;;  %13491 = vmatprep.subr.mxu1 %v18439_v47 }
 0x528   : > { %v14577_v44 = vpop.eup %14576  ;;  %14588 = vpow2.f32 %v12559_v18  ;;  %v4893_v13 = vmul.f32 %v4625_v43, %v4333_v29  ;;  %v4318_v53 = vpop.xlane.xlu1 %4317  ;;  %13493 = vmatprep.mubr.msk.f32.mxu1 %vm14975_vm1, %v18439_v47 }
 0x529   : > { %v5049_v7 = vadd.f32 1.0, %v14577_v44  ;;  %v4888_v35 = vmul.f32 %v4605_v22, %v4318_v53  ;;  %v14579_v12 = vpop.eup %14578 }
 0x52a   : > { %v4925_v36 = vadd.f32 %v4893_v13, %v16237_v37  ;;  %v5040_v8 = vadd.f32 1.0, %v14579_v12 }
 0x52b   : > { %14590 = vrcp.f32 %v5049_v7  ;;  %v4471_v57 = vpop.xlane.xlu0 %4470  ;;  %v4920_v61 = vadd.f32 %v4888_v35, %v16237_v37 }
 0x52c   : > { %v12570_v25 = vmul.f32 -1.442695, %v4925_v36  ;;  %v4633_v46 = vrot.slane %v4471_v57, %v16230_v62  ;;  %v4456_v38 = vpop.xlane.xlu1 %4455  ;;  %14592 = vpow2.f32 %v12561_v2 }
 0x52d   : > { %v14581_v26 = vpop.eup %14580  ;;  %v4613_v39 = vrot.slane %v4456_v38, %v16230_v62  ;;  %v12565_v45 = vmul.f32 -1.442695, %v4920_v61 }
 0x52e   : > { %v14583_v56 = vpop.eup %14582  ;;  %14594 = vpow2.f32 %v12570_v25  ;;  %13492 = vmatpush3.msra.mxu1 %v14581_v26 }
 0x52f   : > { %13437 = vmatpush3.msra.mxu0 %v14583_v56  ;;  %13494 = vmatmul.mubr.msk.f32.vlgmr.msra.gmra.mrb[68].mxu1 %vm265_vm0, %v16252_v51  ;;  %v4339_v58 = vpop.xlane.xlu0 %4338  ;;  %14596 = vpow2.f32 %v12563_v27 }
 0x530   : > { %v14585_v17 = vpop.eup %14584  ;;  %v4895_v15 = vmul.f32 %v4633_v46, %v4339_v58  ;;  %13439 = vmatmul.mubr.msk.f32.vlgmr.msra.gmra.mrb[62].mxu0 %vm265_vm0, %v16252_v51  ;;  %v4324_v11 = vpop.xlane.xlu1 %4323  ;;  %13501 = vmatprep.subr.mxu1 %v18439_v47  ;;  %14598 = vrcp.f32 %v5040_v8 }
 0x531   : > { %v14587_v52 = vpop.eup %14586  ;;  %v5051_v54 = vadd.f32 1.0, %v14585_v17  ;;  %v4890_v9 = vmul.f32 %v4613_v39, %v4324_v11  ;;  %13503 = vmatprep.mubr.msk.f32.mxu1 %vm14975_vm1, %v18439_v47  ;;  %13446 = vmatprep.subr.mxu0 %v18439_v47 }
 0x532   : > { %v14589_v0 = vpop.eup %14588  ;;  %v5038_v1 = vadd.f32 1.0, %v14587_v52  ;;  %v4927_v59 = vadd.f32 %v4895_v15, %v16237_v37  ;;  %13448 = vmatprep.mubr.msk.f32.mxu0 %vm14975_vm1, %v18439_v47 }
 0x533   : > { %14600 = vrcp.f32 %v5051_v54  ;;  %v4922_v60 = vadd.f32 %v4890_v9, %v16237_v37  ;;  %v5042_v10 = vadd.f32 1.0, %v14589_v0 }
 0x534   : > { %14602 = vrcp.f32 %v5038_v1  ;;  %v12572_v49 = vmul.f32 -1.442695, %v4927_v59  ;;  %v4462_v28 = vpop.xlane.xlu1 %4461 }
 0x535   : > { %v14591_v48 = vpop.eup %14590  ;;  %14604 = vpow2.f32 %v12565_v45  ;;  %v12567_v20 = vmul.f32 -1.442695, %v4922_v60  ;;  %v4621_v5 = vrot.slane %v4462_v28, %v16230_v62 }
 0x536   : > { %14606 = vpow2.f32 %v12572_v49  ;;  %13502 = vmatpush3.msra.mxu1 %v14591_v48  ;;  %v14593_v55 = vpop.eup %14592 }
 0x537   : > { %13504 = vmatmul.mubr.msk.f32.vlgmr.msra.gmra.mrb[70].mxu1 %vm265_vm0, %v16252_v51  ;;  %13511 = vmatprep.subr.mxu1 %v18439_v47  ;;  %14608 = vpow2.f32 %v12567_v20  ;;  %v5044_v41 = vadd.f32 1.0, %v14593_v55 }
 0x538   : > { %v14595_v50 = vpop.eup %14594  ;;  %v4330_v19 = vpop.xlane.xlu1 %4329  ;;  %13513 = vmatprep.mubr.msk.f32.mxu1 %vm14975_vm1, %v18439_v47  ;;  %14610 = vrcp.f32 %v5042_v10 }
 0x539   : > { %v5053_v14 = vadd.f32 1.0, %v14595_v50  ;;  %v4892_v63 = vmul.f32 %v4621_v5, %v4330_v19  ;;  %v14597_v40 = vpop.eup %14596 }
 0x53a   : > { %v14599_v31 = vpop.eup %14598  ;;  %v5046_v18 = vadd.f32 1.0, %v14597_v40 }
 0x53b   : > { %14612 = vrcp.f32 %v5053_v14  ;;  %v4924_v23 = vadd.f32 %v4892_v63, %v16237_v37 }
 0x53c   : > { %v4468_v21 = vpop.xlane.xlu1 %4467  ;;  %14614 = vrcp.f32 %v5044_v41 }
 0x53d   : > { %v14601_v42 = vpop.eup %14600  ;;  %v12569_v30 = vmul.f32 -1.442695, %v4924_v23  ;;  %v4629_v43 = vrot.slane %v4468_v21, %v16230_v62 }
 0x53e   : > { %v14603_v33 = vpop.eup %14602  ;;  %13512 = vmatpush3.msra.mxu1 %v14601_v42 }
 0x53f   : > { %v14605_v6 = vpop.eup %14604  ;;  %14616 = vpow2.f32 %v12569_v30  ;;  %13447 = vmatpush3.msra.mxu0 %v14603_v33  ;;  %13514 = vmatmul.mubr.msk.f32.vlgmr.msra.gmra.mrb[72].mxu1 %vm265_vm0, %v16252_v51 }
 0x540   : > { %v14607_v16 = vpop.eup %14606  ;;  %13449 = vmatmul.mubr.msk.f32.vlgmr.msra.gmra.mrb[64].mxu0 %vm265_vm0, %v16252_v51  ;;  %v4336_v24 = vpop.xlane.xlu1 %4335  ;;  %13456 = vmatprep.subr.mxu0 %v18439_v47  ;;  %14618 = vrcp.f32 %v5046_v18  ;;  %v5048_v32 = vadd.f32 1.0, %v14605_v6 }
 0x541   : > { %v5055_v34 = vadd.f32 1.0, %v14607_v16  ;;  %v4894_v4 = vmul.f32 %v4629_v43, %v4336_v24  ;;  %13457 = vmatpush3.msra.mxu0 %v14599_v31  ;;  %13458 = vmatprep.mubr.msk.f32.mxu0 %vm14975_vm1, %v18439_v47  ;;  %v14609_v62 = vpop.eup %14608 }
 0x542   : > { %13466 = vmatprep.subr.mxu0 %v18439_v47  ;;  %13521 = vmatprep.subr.mxu1 %v18439_v47  ;;  %v14611_v29 = vpop.eup %14610  ;;  %v5050_v53 = vadd.f32 1.0, %v14609_v62 }
 0x543   : > { %14620 = vrcp.f32 %v5055_v34  ;;  %v4926_v22 = vadd.f32 %v4894_v4, %v16237_v37  ;;  %13523 = vmatprep.mubr.msk.f32.mxu1 %vm14975_vm1, %v18439_v47 }
 0x544   : > { %13459 = vmatmul.mubr.msk.f32.vlgmr.msra.gmra.mrb[66].mxu0 %vm265_vm0, %v16252_v51  ;;  %14622 = vrcp.f32 %v5048_v32 }
 0x545   : > { %v14613_v44 = vpop.eup %14612  ;;  %v12571_v13 = vmul.f32 -1.442695, %v4926_v22  ;;  %13467 = vmatpush3.msra.mxu0 %v14611_v29  ;;  %13468 = vmatprep.mubr.msk.f32.mxu0 %vm14975_vm1, %v18439_v47 }
 0x546   : > { %13522 = vmatpush3.msra.mxu1 %v14613_v44  ;;  %13476 = vmatprep.subr.mxu0 %v18439_v47  ;;  %v14615_v37 = vpop.eup %14614 }
 0x547   : > { %14624 = vpow2.f32 %v12571_v13  ;;  %13524 = vmatmul.mubr.msk.f32.vlgmr.msra.gmra.mrb[74].mxu1 %vm265_vm0, %v16252_v51  ;;  %13531 = vmatprep.subr.mxu1 %v18439_v47 }
 0x548   : > { %13469 = vmatmul.mubr.msk.f32.vlgmr.msra.gmra.mrb[68].mxu0 %vm265_vm0, %v16252_v51  ;;  %13533 = vmatprep.mubr.msk.f32.mxu1 %vm14975_vm1, %v18439_v47  ;;  %14626 = vrcp.f32 %v5050_v53 }
 0x549   : > { %v14617_v2 = vpop.eup %14616  ;;  %13477 = vmatpush3.msra.mxu0 %v14615_v37  ;;  %13478 = vmatprep.mubr.msk.f32.mxu0 %vm14975_vm1, %v18439_v47 }
 0x54a   : > { %v5052_v7 = vadd.f32 1.0, %v14617_v2  ;;  %13486 = vmatprep.subr.mxu0 %v18439_v47  ;;  %v14619_v3 = vpop.eup %14618 }
 0x54c   : > { %14628 = vrcp.f32 %v5052_v7  ;;  %13479 = vmatmul.mubr.msk.f32.vlgmr.msra.gmra.mrb[70].mxu0 %vm265_vm0, %v16252_v51 }
 0x54d   : > { %v14621_v35 = vpop.eup %14620  ;;  %13487 = vmatpush3.msra.mxu0 %v14619_v3  ;;  %13488 = vmatprep.mubr.msk.f32.mxu0 %vm14975_vm1, %v18439_v47 }
 0x54e   : > { %13532 = vmatpush3.msra.mxu1 %v14621_v35  ;;  %13496 = vmatprep.subr.mxu0 %v18439_v47  ;;  %v14623_v36 = vpop.eup %14622 }
 0x54f   : > { %13534 = vmatmul.mubr.msk.f32.vlgmr.msra.gmra.mrb[76].mxu1 %vm265_vm0, %v16252_v51  ;;  %13541 = vmatprep.subr.mxu1 %v18439_v47 }
 0x550   : > { %13489 = vmatmul.mubr.msk.f32.vlgmr.msra.gmra.mrb[72].mxu0 %vm265_vm0, %v16252_v51  ;;  %13543 = vmatprep.mubr.msk.f32.mxu1 %vm14975_vm1, %v18439_v47 }
 0x551   : > { %v14625_v12 = vpop.eup %14624  ;;  %13497 = vmatpush3.msra.mxu0 %v14623_v36  ;;  %13498 = vmatprep.mubr.msk.f32.mxu0 %vm14975_vm1, %v18439_v47 }
 0x552   : > { %v5054_v57 = vadd.f32 1.0, %v14625_v12  ;;  %13506 = vmatprep.subr.mxu0 %v18439_v47  ;;  %v14627_v25 = vpop.eup %14626 }
 0x554   : > { %14630 = vrcp.f32 %v5054_v57  ;;  %13499 = vmatmul.mubr.msk.f32.vlgmr.msra.gmra.mrb[74].mxu0 %vm265_vm0, %v16252_v51 }
 0x555   : > { %13507 = vmatpush3.msra.mxu0 %v14627_v25  ;;  %13508 = vmatprep.mubr.msk.f32.mxu0 %vm14975_vm1, %v18439_v47 }
 0x556   : > { %v14629_v46 = vpop.eup %14628  ;;  %13516 = vmatprep.subr.mxu0 %v18439_v47 }
 0x558   : > { %13509 = vmatmul.mubr.msk.f32.vlgmr.msra.gmra.mrb[76].mxu0 %vm265_vm0, %v16252_v51 }
 0x559   : > { %13517 = vmatpush3.msra.mxu0 %v14629_v46  ;;  %13518 = vmatprep.mubr.msk.f32.mxu0 %vm14975_vm1, %v18439_v47 }
 0x55a   : > { %13526 = vmatprep.subr.mxu0 %v18439_v47 }
 0x55c   : > { %13519 = vmatmul.mubr.msk.f32.vlgmr.msra.gmra.mrb[78].mxu0 %vm265_vm0, %v16252_v51 }
 0x55d   : > { %13528 = vmatprep.mubr.msk.f32.mxu0 %vm14975_vm1, %v18439_v47 }
 0x55e   : > { %v14631_v38 = vpop.eup %14630 }
 0x55f   : > { %13527 = vmatpush3.msra.mxu0 %v14631_v38 }
 0x560   : > { %13529 = vmatmul.mubr.msk.f32.vlgmr.msra.gmra.mrb[80].mxu0 %vm265_vm0, %v16252_v51  ;;  %13536 = vmatprep.subr.mxu0 %v18439_v47 }
 0x561   : > { %13538 = vmatprep.mubr.msk.f32.mxu0 %vm14975_vm1, %v18439_v47 }
 0x5a8   : > { %v5259_v26 = vpop.f32.mrb[46].mxu1 }
 0x5a9   : > { %v7370_v27 = vsel %vm265_vm0, %v5259_v26, -inf  ;;  %v13385_v61 = vpop.f32.mrb[47].mxu1 }
 0x5aa   : > { %v7371_v56 = vrot.slane %v7370_v27, 4 }
 0x5ac   : > { %v7372_v8 = vmax.f32 %v7370_v27, %v7371_v56 }
 0x5ae   : > { %v7373_v39 = vrot.slane %v7372_v8, 2 }
 0x5b0   : > { %v7374_v58 = vmax.f32 %v7372_v8, %v7373_v39 }
 0x5b1   : > { %v5399_v17 = vpop.f32.mrb[48].mxu1 }
 0x5b2   : > { %v7375_v15 = vrot.slane %v7374_v58, 1  ;;  %v7384_v11 = vsel %vm265_vm0, %v5399_v17, -inf  ;;  %v13395_v52 = vpop.f32.mrb[49].mxu1 }
 0x5b3   : > { %v7385_v54 = vrot.slane %v7384_v11, 4 }
 0x5b4   : > { %v7376_v51 = vmax.f32 %v7374_v58, %v7375_v15 }
 0x5b5   : > { %v7386_v45 = vmax.f32 %v7384_v11, %v7385_v54 }
 0x5b6   : > { %v7588_v9 = vsub.f32 %v5259_v26, %v7376_v51 }
 0x5b7   : > { %v7387_v0 = vrot.slane %v7386_v45, 2 }
 0x5b8   : > { %v7621_v1 = vmul.f32 1.442695, %v7588_v9 }
 0x5b9   : > { %v7388_v59 = vmax.f32 %v7386_v45, %v7387_v0  ;;  %v5539_v60 = vpop.f32.mrb[50].mxu1 }
 0x5ba   : > { %14632 = vpow2.f32 %v7621_v1  ;;  %v7398_v49 = vsel %vm265_vm0, %v5539_v60, -inf  ;;  %v13405_v28 = vpop.f32.mrb[51].mxu1 }
 0x5bb   : > { %v7389_v48 = vrot.slane %v7388_v59, 1  ;;  %v5189_v20 = vpop.f32.mrb[50].mxu0  ;;  %v7399_v10 = vrot.slane %v7398_v49, 4 }
 0x5bc   : > { %v7363_v55 = vsel %vm265_vm0, %v5189_v20, -inf  ;;  %v13380_v5 = vpop.f32.mrb[51].mxu0 }
 0x5bd   : > { %v7390_v50 = vmax.f32 %v7388_v59, %v7389_v48  ;;  %v7364_v19 = vrot.slane %v7363_v55, 4  ;;  %v7400_v14 = vmax.f32 %v7398_v49, %v7399_v10 }
 0x5bf   : > { %v7590_v63 = vsub.f32 %v5399_v17, %v7390_v50  ;;  %v7365_v41 = vmax.f32 %v7363_v55, %v7364_v19  ;;  %v7401_v40 = vrot.slane %v7400_v14, 2 }
 0x5c1   : > { %v7625_v23 = vmul.f32 1.442695, %v7590_v63  ;;  %v7366_v31 = vrot.slane %v7365_v41, 2  ;;  %v7402_v21 = vmax.f32 %v7400_v14, %v7401_v40  ;;  %v5679_v42 = vpop.f32.mrb[52].mxu1 }
 0x5c2   : > { %v7412_v30 = vsel %vm265_vm0, %v5679_v42, -inf  ;;  %v13415_v33 = vpop.f32.mrb[53].mxu1 }
 0x5c3   : > { %14634 = vpow2.f32 %v7625_v23  ;;  %v7367_v18 = vmax.f32 %v7365_v41, %v7366_v31  ;;  %v7403_v6 = vrot.slane %v7402_v21, 1  ;;  %v5329_v43 = vpop.f32.mrb[52].mxu0  ;;  %v7413_v16 = vrot.slane %v7412_v30, 4 }
 0x5c4   : > { %v16490_v24 = vpop.eup %14632  ;;  %v7377_v34 = vsel %vm265_vm0, %v5329_v43, -inf  ;;  %v13390_v4 = vpop.f32.mrb[53].mxu0 }
 0x5c5   : > { %v7690_v32 = vsel %vm265_vm0, %v16490_v24, 0.0  ;;  %v7368_v62 = vrot.slane %v7367_v18, 1  ;;  %v7404_v22 = vmax.f32 %v7402_v21, %v7403_v6  ;;  %v7378_v29 = vrot.slane %v7377_v34, 4 }
 0x5c6   : > { %v7691_v44 = vrot.slane %v7690_v32, 4  ;;  %v7414_v13 = vmax.f32 %v7412_v30, %v7413_v16 }
 0x5c7   : > { %v7369_v53 = vmax.f32 %v7367_v18, %v7368_v62  ;;  %v7592_v37 = vsub.f32 %v5539_v60, %v7404_v22  ;;  %v7379_v2 = vmax.f32 %v7377_v34, %v7378_v29 }
 0x5c8   : > { %v7692_v7 = vadd.f32 %v7691_v44, %v7690_v32  ;;  %v7415_v3 = vrot.slane %v7414_v13, 2 }
 0x5c9   : > { %v7587_v35 = vsub.f32 %v5189_v20, %v7369_v53  ;;  %v7629_v36 = vmul.f32 1.442695, %v7592_v37  ;;  %v7380_v12 = vrot.slane %v7379_v2, 2  ;;  %v5819_v57 = vpop.f32.mrb[54].mxu1 }
 0x5ca   : > { %v7693_v25 = vrot.slane %v7692_v7, 2  ;;  %v7416_v46 = vmax.f32 %v7414_v13, %v7415_v3  ;;  %v7426_v38 = vsel %vm265_vm0, %v5819_v57, -inf  ;;  %v13425_v26 = vpop.f32.mrb[55].mxu1 }
 0x5cb   : > { %v7619_v27 = vmul.f32 1.442695, %v7587_v35  ;;  %14636 = vpow2.f32 %v7629_v36  ;;  %v7381_v61 = vmax.f32 %v7379_v2, %v7380_v12  ;;  %v5469_v56 = vpop.f32.mrb[54].mxu0  ;;  %v7427_v8 = vrot.slane %v7426_v38, 4 }
 0x5cc   : > { %v7694_v39 = vadd.f32 %v7693_v25, %v7692_v7  ;;  %v7417_v58 = vrot.slane %v7416_v46, 1  ;;  %v7391_v17 = vsel %vm265_vm0, %v5469_v56, -inf  ;;  %v13400_v15 = vpop.f32.mrb[55].mxu0 }
 0x5cd   : > { %v16497_v11 = vpop.eup %14634  ;;  %14638 = vpow2.f32 %v7619_v27  ;;  %v7382_v52 = vrot.slane %v7381_v61, 1  ;;  %v7392_v54 = vrot.slane %v7391_v17, 4  ;;  %v7428_v51 = vmax.f32 %v7426_v38, %v7427_v8 }
 0x5ce   : > { %v7695_v45 = vrot.slane %v7694_v39, 1  ;;  %v7704_v9 = vsel %vm265_vm0, %v16497_v11, 0.0  ;;  %v7418_v0 = vmax.f32 %v7416_v46, %v7417_v58 }
 0x5cf   : > { %v7705_v1 = vrot.slane %v7704_v9, 4  ;;  %v7383_v59 = vmax.f32 %v7381_v61, %v7382_v52  ;;  %v7393_v60 = vmax.f32 %v7391_v17, %v7392_v54  ;;  %v7429_v49 = vrot.slane %v7428_v51, 2 }
 0x5d0   : > { %v7594_v28 = vsub.f32 %v5679_v42, %v7418_v0  ;;  %v7696_v48 = vadd.f32 %v7695_v45, %v7694_v39 }
 0x5d1   : > { %v7589_v20 = vsub.f32 %v5329_v43, %v7383_v59  ;;  %v7394_v10 = vrot.slane %v7393_v60, 2  ;;  %v7430_v55 = vmax.f32 %v7428_v51, %v7429_v49  ;;  %v7706_v19 = vadd.f32 %v7705_v1, %v7704_v9  ;;  %v16537_v49 = vld [vmem:[%s18437_s1 + $0x8] sm:$0xff] }
 0x5d2   : > { %v7633_v5 = vmul.f32 1.442695, %v7594_v28  ;;  %v16501_v50 = vpop.f32.mrb[56].mxu1  ;;  %14640 = vrcp.f32 %v7696_v48 }
 0x5d3   : > { %v7623_v14 = vmul.f32 1.442695, %v7589_v20  ;;  %v7395_v63 = vmax.f32 %v7393_v60, %v7394_v10  ;;  %v7431_v41 = vrot.slane %v7430_v55, 1  ;;  %v16503_v40 = vpop.f32.mrb[56].mxu0  ;;  %v13435_v23 = vpop.f32.mrb[57].mxu1  ;;  %v7440_v21 = vsel %vm265_vm0, %v16501_v50, -inf }
 0x5d4   : > { %14642 = vpow2.f32 %v7633_v5  ;;  %v7405_v31 = vsel %vm265_vm0, %v16503_v40, -inf  ;;  %v13410_v42 = vpop.f32.mrb[57].mxu0  ;;  %v7441_v16 = vrot.slane %v7440_v21, 4  ;;  %v7707_v4 = vrot.slane %v7706_v19, 2 }
 0x5d5   : > { %v16509_v30 = vpop.eup %14636  ;;  %14644 = vpow2.f32 %v7623_v14  ;;  %v7396_v33 = vrot.slane %v7395_v63, 1  ;;  %v7432_v18 = vmax.f32 %v7430_v55, %v7431_v41  ;;  %v7406_v43 = vrot.slane %v7405_v31, 4 }
 0x5d6   : > { %v7718_v6 = vsel %vm265_vm0, %v16509_v30, 0.0  ;;  %v7442_v13 = vmax.f32 %v7440_v21, %v7441_v16  ;;  %v7708_v12 = vadd.f32 %v7707_v4, %v7706_v19 }
 0x5d7   : > { %v16513_v34 = vpop.eup %14638  ;;  %v7719_v32 = vrot.slane %v7718_v6, 4  ;;  %v7397_v62 = vmax.f32 %v7395_v63, %v7396_v33  ;;  %v7596_v22 = vsub.f32 %v5819_v57, %v7432_v18  ;;  %v7407_v44 = vmax.f32 %v7405_v31, %v7406_v43 }
 0x5d8   : > { %v7683_v29 = vsel %vm265_vm0, %v16513_v34, 0.0  ;;  %v7443_v35 = vrot.slane %v7442_v13, 2  ;;  %v7709_v0 = vrot.slane %v7708_v12, 1 }
 0x5d9   : > { %v7684_v53 = vrot.slane %v7683_v29, 4  ;;  %v7720_v37 = vadd.f32 %v7719_v32, %v7718_v6  ;;  %v7591_v2 = vsub.f32 %v5469_v56, %v7397_v62  ;;  %v7637_v7 = vmul.f32 1.442695, %v7596_v22 }
 0x5da   : > { %v7408_v3 = vrot.slane %v7407_v44, 2  ;;  %v16517_v36 = vpop.f32.mrb[58].mxu1  ;;  %v7444_v61 = vmax.f32 %v7442_v13, %v7443_v35  ;;  %v7710_v13 = vadd.f32 %v7709_v0, %v7708_v12 }
 0x5db   : > { %v7685_v25 = vadd.f32 %v7684_v53, %v7683_v29  ;;  %v7627_v46 = vmul.f32 1.442695, %v7591_v2  ;;  %14646 = vpow2.f32 %v7637_v7  ;;  %v16519_v38 = vpop.f32.mrb[58].mxu0  ;;  %v13445_v57 = vpop.f32.mrb[59].mxu1  ;;  %v7454_v56 = vsel %vm265_vm0, %v16517_v36, -inf }
 0x5dc   : > { %v14641_v26 = vpop.eup %14640  ;;  %v7409_v27 = vmax.f32 %v7407_v44, %v7408_v3  ;;  %v7419_v8 = vsel %vm265_vm0, %v16519_v38, -inf  ;;  %v13420_v39 = vpop.f32.mrb[59].mxu0  ;;  %v7721_v58 = vrot.slane %v7720_v37, 2  ;;  %v7445_v54 = vrot.slane %v7444_v61, 1 }
 0x5dd   : > { %14648 = vpow2.f32 %v7627_v46  ;;  %v7420_v17 = vrot.slane %v7419_v8, 4  ;;  %v7455_v51 = vrot.slane %v7454_v56, 4  ;;  %v16528_v45 = vmul.f32 %v14641_v26, %v16490_v24 }
 0x5de   : > { %v16525_v15 = vpop.eup %14642  ;;  %v7410_v52 = vrot.slane %v7409_v27, 1  ;;  %v7686_v1 = vrot.slane %v7685_v25, 2  ;;  %v7446_v24 = vmax.f32 %v7444_v61, %v7445_v54  ;;  %v7722_v10 = vadd.f32 %v7721_v58, %v7720_v37 }
 0x5df   : > { %v16530_v9 = vpop.eup %14644  ;;  %v7732_v59 = vsel %vm265_vm0, %v16525_v15, 0.0  ;;  %v7421_v60 = vmax.f32 %v7419_v8, %v7420_v17  ;;  %v7456_v19 = vmax.f32 %v7454_v56, %v7455_v51  ;;  %v7972_v31 = vmul.f32 %v16528_v45, %v16537_v49 }
 0x5e0   : > { %v7697_v28 = vsel %vm265_vm0, %v16530_v9, 0.0  ;;  %v7733_v48 = vrot.slane %v7732_v59, 4  ;;  %v7411_v20 = vmax.f32 %v7409_v27, %v7410_v52  ;;  %v7598_v41 = vsub.f32 %v16501_v50, %v7446_v24 }
 0x5e1   : > { %v7698_v55 = vrot.slane %v7697_v28, 4  ;;  %v7422_v5 = vrot.slane %v7421_v60, 2  ;;  %v7457_v33 = vrot.slane %v7456_v19, 2  ;;  %v7687_v43 = vadd.f32 %v7686_v1, %v7685_v25 }
 0x5e2   : > { %v7734_v14 = vadd.f32 %v7733_v48, %v7732_v59  ;;  %v7593_v63 = vsub.f32 %v16503_v40, %v7411_v20  ;;  %v16543_v23 = vpop.f32.mrb[60].mxu1  ;;  %v7641_v4 = vmul.f32 1.442695, %v7598_v41  ;;  %v8006_v29 = vsel %vm265_vm0, %v7972_v31, 0.0 }
 0x5e3   : > { %v7699_v21 = vadd.f32 %v7698_v55, %v7697_v28  ;;  %v7423_v42 = vmax.f32 %v7421_v60, %v7422_v5  ;;  %v7468_v18 = vsel %vm265_vm0, %v16543_v23, -inf  ;;  %v13455_v6 = vpop.f32.mrb[61].mxu1  ;;  %v7458_v22 = vmax.f32 %v7456_v19, %v7457_v33  ;;  %8007 = vadd.xlane.f32.xlu0 %v8006_v29 }
 0x5e4   : > { %v7631_v16 = vmul.f32 1.442695, %v7593_v63  ;;  %v7469_v32 = vrot.slane %v7468_v18, 4  ;;  %v7735_v40 = vrot.slane %v7734_v14, 2  ;;  %v7688_v25 = vrot.slane %v7687_v43, 1 }
 0x5e5   : > { %v16549_v62 = vpop.eup %14646  ;;  %v7424_v50 = vrot.slane %v7423_v42, 1  ;;  %v7700_v37 = vrot.slane %v7699_v21, 2  ;;  %v7459_v3 = vrot.slane %v7458_v22, 1  ;;  %v7723_v46 = vrot.slane %v7722_v10, 1 }
 0x5e6   : > { %14650 = vpow2.f32 %v7631_v16  ;;  %v7470_v44 = vmax.f32 %v7468_v18, %v7469_v32  ;;  %v7746_v7 = vsel %vm265_vm0, %v16549_v62, 0.0  ;;  %v7736_v57 = vadd.f32 %v7735_v40, %v7734_v14 }
 0x5e7   : > { %v16552_v53 = vpop.eup %14648  ;;  %14652 = vpow2.f32 %v7641_v4  ;;  %v7425_v2 = vmax.f32 %v7423_v42, %v7424_v50  ;;  %v7460_v61 = vmax.f32 %v7458_v22, %v7459_v3  ;;  %v7701_v56 = vadd.f32 %v7700_v37, %v7699_v21 }
 0x5e8   : > { %v7471_v35 = vrot.slane %v7470_v44, 2  ;;  %v7711_v27 = vsel %vm265_vm0, %v16552_v53, 0.0  ;;  %14654 = vrcp.f32 %v7710_v13  ;;  %v7747_v39 = vrot.slane %v7746_v7, 4 }
 0x5e9   : > { %v7595_v26 = vsub.f32 %v16519_v38, %v7425_v2  ;;  %v7600_v51 = vsub.f32 %v16517_v36, %v7460_v61  ;;  %v7737_v60 = vrot.slane %v7736_v57, 1  ;;  %v7712_v28 = vrot.slane %v7711_v27, 4 }
 0x5ea   : > { %v7472_v12 = vmax.f32 %v7470_v44, %v7471_v35  ;;  %v16559_v8 = vpop.f32.mrb[62].mxu1  ;;  %v7724_v5 = vadd.f32 %v7723_v46, %v7722_v10  ;;  %v7748_v19 = vadd.f32 %v7747_v39, %v7746_v7  ;;  %v7689_v63 = vadd.f32 %v7688_v25, %v7687_v43 }
 0x5eb   : > { %v7635_v58 = vmul.f32 1.442695, %v7595_v26  ;;  %v16561_v17 = vpop.f32.mrb[60].mxu0  ;;  %v7482_v52 = vsel %vm265_vm0, %v16559_v8, -inf  ;;  %v13465_v54 = vpop.f32.mrb[63].mxu1  ;;  %v7702_v36 = vrot.slane %v7701_v56, 1  ;;  %v7713_v33 = vadd.f32 %v7712_v28, %v7711_v27 }
 0x5ec   : > { %v7473_v38 = vrot.slane %v7472_v12, 1  ;;  %v7433_v0 = vsel %vm265_vm0, %v16561_v17, -inf  ;;  %v7483_v1 = vrot.slane %v7482_v52, 4  ;;  %v13430_v59 = vpop.f32.mrb[61].mxu0  ;;  %v7645_v20 = vmul.f32 1.442695, %v7600_v51 }
 0x5ed   : > { %14656 = vpow2.f32 %v7635_v58  ;;  %v7434_v48 = vrot.slane %v7433_v0, 4  ;;  %v7738_v6 = vadd.f32 %v7737_v60, %v7736_v57  ;;  %v7749_v40 = vrot.slane %v7748_v19, 2 }
 0x5ee   : > { %v7474_v24 = vmax.f32 %v7472_v12, %v7473_v38  ;;  %v7484_v55 = vmax.f32 %v7482_v52, %v7483_v1  ;;  %14658 = vpow2.f32 %v7645_v20  ;;  %v7703_v46 = vadd.f32 %v7702_v36, %v7701_v56 }
 0x5ef   : > { %v7435_v14 = vmax.f32 %v7433_v0, %v7434_v48  ;;  %14660 = vrcp.f32 %v7724_v5  ;;  %v7714_v26 = vrot.slane %v7713_v33, 2  ;;  %v7750_v27 = vadd.f32 %v7749_v40, %v7748_v19 }
 0x5f0   : > { %v16568_v41 = vpop.eup %14650  ;;  %v7602_v31 = vsub.f32 %v16543_v23, %v7474_v24  ;;  %v7485_v21 = vrot.slane %v7484_v55, 2  ;;  %14662 = vrcp.f32 %v7689_v63 }
 0x5f1   : > { %v16571_v42 = vpop.eup %14652  ;;  %v7436_v18 = vrot.slane %v7435_v14, 2  ;;  %v7725_v16 = vsel %vm265_vm0, %v16568_v41, 0.0  ;;  %v16597_v28 = vadd.f32 %v7714_v26, %v7713_v33 }
 0x5f2   : > { %v7760_v10 = vsel %vm265_vm0, %v16571_v42, 0.0  ;;  %v7649_v43 = vmul.f32 1.442695, %v7602_v31  ;;  %v7486_v4 = vmax.f32 %v7484_v55, %v7485_v21  ;;  %v16577_v32 = vpop.f32.mrb[64].mxu1  ;;  %v14655_v29 = vpop.eup %14654  ;;  %v7726_v2 = vrot.slane %v7725_v16, 4 }
 0x5f3   : > { %v7437_v50 = vmax.f32 %v7435_v14, %v7436_v18  ;;  %v7496_v23 = vsel %vm265_vm0, %v16577_v32, -inf  ;;  %v13475_v22 = vpop.f32.mrb[65].mxu1  ;;  %v7761_v44 = vrot.slane %v7760_v10, 4  ;;  %v16582_v3 = vmul.f32 %v14655_v29, %v16497_v11 }
 0x5f4   : > { %14664 = vpow2.f32 %v7649_v43  ;;  %v7487_v13 = vrot.slane %v7486_v4, 1  ;;  %v7497_v37 = vrot.slane %v7496_v23, 4  ;;  %v7727_v54 = vadd.f32 %v7726_v2, %v7725_v16 }
 0x5f5   : > { %v7438_v7 = vrot.slane %v7437_v50, 1  ;;  %14666 = vrcp.f32 %v7738_v6  ;;  %v7974_v12 = vmul.f32 %v16582_v3, %v16537_v49  ;;  %v7762_v39 = vadd.f32 %v7761_v44, %v7760_v10 }
 0x5f6   : > { %v7488_v35 = vmax.f32 %v7486_v4, %v7487_v13  ;;  %v7498_v25 = vmax.f32 %v7496_v23, %v7497_v37  ;;  %14668 = vrcp.f32 %v7703_v46  ;;  %v7728_v14 = vrot.slane %v7727_v54, 2 }
 0x5f7   : > { %v16584_v57 = vpop.eup %14656  ;;  %v7439_v61 = vmax.f32 %v7437_v50, %v7438_v7  ;;  %v8012_v51 = vsel %vm265_vm0, %v7974_v12, 0.0  ;;  %v7763_v20 = vrot.slane %v7762_v39, 2  ;;  %v7716_v16 = vrot.slane %v16597_v28, 1 }
 0x5f8   : > { %v7604_v58 = vsub.f32 %v16559_v8, %v7488_v35  ;;  %v7499_v52 = vrot.slane %v7498_v25, 2  ;;  %v16591_v38 = vpop.eup %14658  ;;  %v7739_v56 = vsel %vm265_vm0, %v16584_v57, 0.0  ;;  %8013 = vadd.xlane.f32.xlu0 %v8012_v51  ;;  %v7751_v8 = vrot.slane %v7750_v27, 1 }
 0x5f9   : > { %v7597_v11 = vsub.f32 %v16561_v17, %v7439_v61  ;;  %v14661_v60 = vpop.eup %14660  ;;  %v7774_v17 = vsel %vm265_vm0, %v16591_v38, 0.0  ;;  %v7740_v63 = vrot.slane %v7739_v56, 4  ;;  %v7764_v4 = vadd.f32 %v7763_v20, %v7762_v39 }
 0x5fa   : > { %v7653_v0 = vmul.f32 1.442695, %v7604_v58  ;;  %v7500_v1 = vmax.f32 %v7498_v25, %v7499_v52  ;;  %v16595_v59 = vpop.f32.mrb[66].mxu1  ;;  %v16602_v5 = vmul.f32 %v14661_v60, %v16509_v30  ;;  %v14663_v19 = vpop.eup %14662  ;;  %v7775_v21 = vrot.slane %v7774_v17, 4 }
 0x5fb   : > { %v13485_v48 = vpop.f32.mrb[67].mxu1  ;;  %v7639_v24 = vmul.f32 1.442695, %v7597_v11  ;;  %v7510_v36 = vsel %vm265_vm0, %v16595_v59, -inf  ;;  %v16612_v30 = vmul.f32 %v14663_v19, %v16513_v34  ;;  %v7752_v43 = vadd.f32 %v7751_v8, %v7750_v27 }
 0x5fc   : > { %v7501_v55 = vrot.slane %v7500_v1, 1  ;;  %14670 = vpow2.f32 %v7653_v0  ;;  %v7976_v18 = vmul.f32 %v16602_v5, %v16537_v49  ;;  %v7511_v10 = vrot.slane %v7510_v36, 4 }
 0x5fd   : > { %14672 = vpow2.f32 %v7639_v24  ;;  %v7741_v23 = vadd.f32 %v7740_v63, %v7739_v56  ;;  %v7971_v29 = vmul.f32 %v16612_v30, %v16537_v49  ;;  %v16620_v13 = vadd.f32 %v7728_v14, %v7727_v54 }
 0x5fe   : > { %v16606_v31 = vpop.eup %14664  ;;  %v7502_v33 = vmax.f32 %v7500_v1, %v7501_v55  ;;  %v8018_v50 = vsel %vm265_vm0, %v7976_v18, 0.0  ;;  %v7512_v44 = vmax.f32 %v7510_v36, %v7511_v10  ;;  %v7776_v34 = vadd.f32 %v7775_v21, %v7774_v17 }
 0x5ff   : > { %v14667_v6 = vpop.eup %14666  ;;  %v7788_v22 = vsel %vm265_vm0, %v16606_v31, 0.0  ;;  %8019 = vadd.xlane.f32.xlu0 %v8018_v50  ;;  %14674 = vrcp.f32 %v7752_v43  ;;  %v7765_v61 = vrot.slane %v7764_v4, 1  ;;  %v7742_v58 = vrot.slane %v7741_v23, 2 }
 0x600   : > { %v7606_v40 = vsub.f32 %v16577_v32, %v7502_v33  ;;  %v16623_v2 = vmul.f32 %v14667_v6, %v16525_v15  ;;  %v8003_v32 = vsel %vm265_vm0, %v7971_v29, 0.0  ;;  %v7513_v35 = vrot.slane %v7512_v44, 2  ;;  %v14669_v27 = vpop.eup %14668 }
 0x601   : > { %v7789_v12 = vrot.slane %v7788_v22, 4  ;;  %8004 = vadd.xlane.f32.xlu1 %v8003_v32  ;;  %v16635_v54 = vmul.f32 %v14669_v27, %v16530_v9  ;;  %v7777_v51 = vrot.slane %v7776_v34, 2  ;;  %v7730_v48 = vrot.slane %v16620_v13, 1 }
 0x602   : > { %v7657_v37 = vmul.f32 1.442695, %v7606_v40  ;;  %v16625_v7 = vpop.f32.mrb[68].mxu1  ;;  %v7978_v15 = vmul.f32 %v16623_v2, %v16537_v49  ;;  %v7514_v52 = vmax.f32 %v7512_v44, %v7513_v35  ;;  %v16645_v24 = vadd.f32 %v7742_v58, %v7741_v23 }
 0x603   : > { %v16628_v25 = vpop.f32.mrb[62].mxu0  ;;  %v7524_v46 = vsel %vm265_vm0, %v16625_v7, -inf  ;;  %v13495_v26 = vpop.f32.mrb[69].mxu1  ;;  %v7973_v8 = vmul.f32 %v16635_v54, %v16537_v49  ;;  %v7790_v20 = vadd.f32 %v7789_v12, %v7788_v22  ;;  %v7778_v36 = vadd.f32 %v7777_v51, %v7776_v34 }
 0x604   : > { %14676 = vpow2.f32 %v7657_v37  ;;  %v13440_v39 = vpop.f32.mrb[63].mxu0  ;;  %v7447_v11 = vsel %vm265_vm0, %v16628_v25, -inf  ;;  %v8024_v56 = vsel %vm265_vm0, %v7978_v15, 0.0  ;;  %v7525_v1 = vrot.slane %v7524_v46, 4 }
 0x605   : > { %v7448_v0 = vrot.slane %v7447_v11, 4  ;;  %v7515_v60 = vrot.slane %v7514_v52, 1  ;;  %8025 = vadd.xlane.f32.xlu0 %v8024_v56  ;;  %v8009_v19 = vsel %vm265_vm0, %v7973_v8, 0.0  ;;  %v7717_v33 = vadd.f32 %v7716_v16, %v16597_v28 }
 0x606   : > { %v16642_v17 = vpop.eup %14670  ;;  %v7526_v14 = vmax.f32 %v7524_v46, %v7525_v1  ;;  %8010 = vadd.xlane.f32.xlu1 %v8009_v19  ;;  %v7766_v6 = vadd.f32 %v7765_v61, %v7764_v4  ;;  %v7791_v22 = vrot.slane %v7790_v20, 2  ;;  %v7744_v26 = vrot.slane %v16645_v24, 1 }
 0x607   : > { %v7449_v9 = vmax.f32 %v7447_v11, %v7448_v0  ;;  %v7516_v55 = vmax.f32 %v7514_v52, %v7515_v60  ;;  %v16648_v63 = vpop.eup %14672  ;;  %v7802_v10 = vsel %vm265_vm0, %v16642_v17, 0.0  ;;  %14678 = vrcp.f32 %v7717_v33 }
 0x608   : > { %v7527_v40 = vrot.slane %v7526_v14, 2  ;;  %v7753_v28 = vsel %vm265_vm0, %v16648_v63, 0.0  ;;  %14680 = vrcp.f32 %v7766_v6  ;;  %v7803_v32 = vrot.slane %v7802_v10, 4 }
 0x609   : > { %v7450_v21 = vrot.slane %v7449_v9, 2  ;;  %v7608_v43 = vsub.f32 %v16595_v59, %v7516_v55  ;;  %v14675_v34 = vpop.eup %14674  ;;  %v7779_v61 = vrot.slane %v7778_v36, 1  ;;  %v7792_v58 = vadd.f32 %v7791_v22, %v7790_v20 }
 0x60a   : > { %v16651_v18 = vpop.f32.mrb[70].mxu1  ;;  %v7528_v4 = vmax.f32 %v7526_v14, %v7527_v40  ;;  %v16663_v35 = vmul.f32 %v14675_v34, %v16549_v62  ;;  %v7754_v52 = vrot.slane %v7753_v28, 4  ;;  %v16670_v56 = vadd.f32 %v7803_v32, %v7802_v10 }
 0x60b   : > { %v7538_v50 = vsel %vm265_vm0, %v16651_v18, -inf  ;;  %v13505_v23 = vpop.f32.mrb[71].mxu1  ;;  %v7451_v29 = vmax.f32 %v7449_v9, %v7450_v21  ;;  %v7661_v16 = vmul.f32 1.442695, %v7608_v43  ;;  %v7731_v1 = vadd.f32 %v7730_v48, %v16620_v13 }
 0x60c   : > { %v7539_v44 = vrot.slane %v7538_v50, 4  ;;  %v7529_v27 = vrot.slane %v7528_v4, 1  ;;  %v7980_v39 = vmul.f32 %v16663_v35, %v16537_v49  ;;  %v7780_v33 = vadd.f32 %v7779_v61, %v7778_v36 }
 0x60d   : > { %v7452_v59 = vrot.slane %v7451_v29, 1  ;;  %14682 = vpow2.f32 %v7661_v16  ;;  %v7793_v40 = vrot.slane %v7792_v58, 1  ;;  %v7805_v23 = vrot.slane %v16670_v56, 2 }
 0x60e   : > { %v16660_v37 = vpop.eup %14676  ;;  %v7540_v46 = vmax.f32 %v7538_v50, %v7539_v44  ;;  %v7530_v11 = vmax.f32 %v7528_v4, %v7529_v27  ;;  %v8030_v0 = vsel %vm265_vm0, %v7980_v39, 0.0  ;;  %14684 = vrcp.f32 %v7731_v1 }
 0x60f   : > { %v7816_v12 = vsel %vm265_vm0, %v16660_v37, 0.0  ;;  %v7453_v15 = vmax.f32 %v7451_v29, %v7452_v59  ;;  %8031 = vadd.xlane.f32.xlu0 %v8030_v0  ;;  %v16684_v50 = vadd.f32 %v7754_v52, %v7753_v28  ;;  %v7745_v28 = vadd.f32 %v7744_v26, %v16645_v24 }
 0x610   : > { %v7541_v51 = vrot.slane %v7540_v46, 2  ;;  %v7817_v8 = vrot.slane %v7816_v12, 4  ;;  %v7610_v9 = vsub.f32 %v16625_v7, %v7530_v11  ;;  %v7794_v24 = vadd.f32 %v7793_v40, %v7792_v58 }
 0x611   : > { %v7599_v62 = vsub.f32 %v16628_v25, %v7453_v15  ;;  %v14679_v7 = vpop.eup %14678 }
 0x612   : > { %v16675_v60 = vpop.f32.mrb[72].mxu1  ;;  %v7542_v55 = vmax.f32 %v7540_v46, %v7541_v51  ;;  %v7665_v48 = vmul.f32 1.442695, %v7610_v9  ;;  %v14681_v22 = vpop.eup %14680  ;;  %v16688_v29 = vmul.f32 %v14679_v7, %v16552_v53  ;;  %v16698_v46 = vadd.f32 %v7817_v8, %v7816_v12 }
 0x613   : > { %v16678_v19 = vpop.f32.mrb[64].mxu0  ;;  %v7552_v20 = vsel %vm265_vm0, %v16675_v60, -inf  ;;  %v13515_v14 = vpop.f32.mrb[73].mxu1  ;;  %v7643_v21 = vmul.f32 1.442695, %v7599_v62  ;;  %v16693_v16 = vmul.f32 %v14681_v22, %v16571_v42 }
 0x614   : > { %v7461_v25 = vsel %vm265_vm0, %v16678_v19, -inf  ;;  %v13450_v13 = vpop.f32.mrb[65].mxu0  ;;  %v7543_v6 = vrot.slane %v7542_v55, 1  ;;  %v7553_v43 = vrot.slane %v7552_v20, 4  ;;  %v7975_v53 = vmul.f32 %v16688_v29, %v16537_v49 }
 0x615   : > { %v7462_v10 = vrot.slane %v7461_v25, 4  ;;  %14686 = vpow2.f32 %v7643_v21  ;;  %v7982_v42 = vmul.f32 %v16693_v16, %v16537_v49  ;;  %v7756_v13 = vrot.slane %v16684_v50, 2 }
 0x616   : > { %14688 = vpow2.f32 %v7665_v48  ;;  %v7544_v44 = vmax.f32 %v7542_v55, %v7543_v6  ;;  %v7554_v4 = vmax.f32 %v7552_v20, %v7553_v43  ;;  %v8015_v12 = vsel %vm265_vm0, %v7975_v53, 0.0 }
 0x617   : > { %v7463_v34 = vmax.f32 %v7461_v25, %v7462_v10  ;;  %v16690_v36 = vpop.f32.mrb[66].mxu0  ;;  %14690 = vrcp.f32 %v7780_v33  ;;  %v16696_v59 = vpop.eup %14682  ;;  %8016 = vadd.xlane.f32.xlu1 %v8015_v12  ;;  %v16721_v48 = vadd.f32 %v7805_v23, %v16670_v56  ;;  %v7819_v40 = vrot.slane %v16698_v46, 2 }
 0x618   : > { %v13460_v32 = vpop.f32.mrb[67].mxu0  ;;  %v7612_v27 = vsub.f32 %v16651_v18, %v7544_v44  ;;  %v7830_v15 = vsel %vm265_vm0, %v16696_v59, 0.0  ;;  %v7555_v39 = vrot.slane %v7554_v4, 2  ;;  %v8036_v18 = vsel %vm265_vm0, %v7982_v42, 0.0  ;;  %v14685_v14 = vpop.eup %14684 }
 0x619   : > { %v7464_v61 = vrot.slane %v7463_v34, 2  ;;  %v7831_v26 = vrot.slane %v7830_v15, 4  ;;  %14692 = vrcp.f32 %v7745_v28  ;;  %v7475_v8 = vsel %vm265_vm0, %v16690_v36, -inf  ;;  %8037 = vadd.xlane.f32.xlu0 %v8036_v18 }
 0x61a   : > { %v16707_v52 = vpop.f32.mrb[74].mxu1  ;;  %v7669_v11 = vmul.f32 1.442695, %v7612_v27  ;;  %v7556_v1 = vmax.f32 %v7554_v4, %v7555_v39  ;;  %v7476_v20 = vrot.slane %v7475_v8, 4  ;;  %v16724_v6 = vmul.f32 %v14685_v14, %v16568_v41 }
 0x61b   : > { %v7465_v51 = vmax.f32 %v7463_v34, %v7464_v61  ;;  %v16710_v62 = vpop.f32.mrb[68].mxu0  ;;  %v13525_v0 = vpop.f32.mrb[75].mxu1  ;;  %v7832_v55 = vadd.f32 %v7831_v26, %v7830_v15  ;;  %v7566_v33 = vsel %vm265_vm0, %v16707_v52, -inf }
 0x61c   : > { %v13470_v9 = vpop.f32.mrb[69].mxu0  ;;  %14694 = vpow2.f32 %v7669_v11  ;;  %v7557_v21 = vrot.slane %v7556_v1, 1  ;;  %v7489_v25 = vsel %vm265_vm0, %v16710_v62, -inf  ;;  %v7477_v34 = vmax.f32 %v7475_v8, %v7476_v20 }
 0x61d   : > { %v7466_v58 = vrot.slane %v7465_v51, 1  ;;  %14696 = vrcp.f32 %v7794_v24  ;;  %v7833_v22 = vrot.slane %v7832_v55, 2  ;;  %v7977_v41 = vmul.f32 %v16724_v6, %v16537_v49 }
 0x61e   : > { %v7558_v44 = vmax.f32 %v7556_v1, %v7557_v21  ;;  %v7490_v23 = vrot.slane %v7489_v25, 4  ;;  %v7567_v32 = vrot.slane %v7566_v33, 4  ;;  %v16744_v24 = vadd.f32 %v7756_v13, %v16684_v50 }
 0x61f   : > { %v7467_v10 = vmax.f32 %v7465_v51, %v7466_v58  ;;  %v16726_v43 = vpop.f32.mrb[70].mxu0  ;;  %v16728_v7 = vpop.eup %14686  ;;  %v8021_v12 = vsel %vm265_vm0, %v7977_v41, 0.0  ;;  %v7478_v8 = vrot.slane %v7477_v34, 2  ;;  %v16753_v9 = vadd.f32 %v7819_v40, %v16698_v46 }
 0x620   : > { %v13480_v4 = vpop.f32.mrb[71].mxu0  ;;  %v16731_v28 = vpop.eup %14688  ;;  %v7767_v56 = vsel %vm265_vm0, %v16728_v7, 0.0  ;;  %v7614_v42 = vsub.f32 %v16675_v60, %v7558_v44  ;;  %8022 = vadd.xlane.f32.xlu1 %v8021_v12  ;;  %v7491_v20 = vmax.f32 %v7489_v25, %v7490_v23  ;;  %v7568_v13 = vmax.f32 %v7566_v33, %v7567_v32 }
 0x621   : > { %v14691_v53 = vpop.eup %14690  ;;  %v7768_v27 = vrot.slane %v7767_v56, 4  ;;  %v7844_v61 = vsel %vm265_vm0, %v16731_v28, 0.0  ;;  %v7601_v15 = vsub.f32 %v16678_v19, %v7467_v10  ;;  %v7479_v21 = vmax.f32 %v7477_v34, %v7478_v8 }
 0x622   : > { %v16741_v39 = vpop.f32.mrb[76].mxu1  ;;  %v7845_v26 = vrot.slane %v7844_v61, 4  ;;  %v16748_v11 = vmul.f32 %v14691_v53, %v16591_v38  ;;  %v7673_v19 = vmul.f32 1.442695, %v7614_v42  ;;  %v16757_v38 = vadd.f32 %v7833_v22, %v7832_v55 }
 0x623   : > { %v16750_v51 = vpop.f32.mrb[72].mxu0  ;;  %v13535_v0 = vpop.f32.mrb[77].mxu1  ;;  %v7769_v18 = vadd.f32 %v7768_v27, %v7767_v56  ;;  %v7647_v1 = vmul.f32 1.442695, %v7601_v15  ;;  %v7807_v55 = vrot.slane %v16721_v48, 1  ;;  %v7480_v22 = vrot.slane %v7479_v21, 1 }
 0x624   : > { %v13490_v60 = vpop.f32.mrb[73].mxu0  ;;  %v7846_v50 = vadd.f32 %v7845_v26, %v7844_v61  ;;  %v7984_v58 = vmul.f32 %v16748_v11, %v16537_v49  ;;  %v14693_v14 = vpop.eup %14692  ;;  %v7492_v34 = vrot.slane %v7491_v20, 2  ;;  %v7569_v15 = vrot.slane %v7568_v13, 2 }
 0x625   : > { %14698 = vpow2.f32 %v7647_v1  ;;  %v7770_v44 = vrot.slane %v7769_v18, 2  ;;  %v16763_v46 = vmul.f32 %v14693_v14, %v16584_v57  ;;  %v7503_v57 = vsel %vm265_vm0, %v16726_v43, -inf }
 0x626   : > { %v16759_v10 = vpop.eup %14694  ;;  %14700 = vpow2.f32 %v7673_v19  ;;  %v8042_v4 = vsel %vm265_vm0, %v7984_v58, 0.0  ;;  %v7847_v23 = vrot.slane %v7846_v50, 2  ;;  %v7481_v27 = vmax.f32 %v7479_v21, %v7480_v22 }
 0x627   : > { %v16765_v40 = vpop.f32.mrb[74].mxu0  ;;  %v14697_v56 = vpop.eup %14696  ;;  %8043 = vadd.xlane.f32.xlu0 %v8042_v4  ;;  %v7979_v32 = vmul.f32 %v16763_v46, %v16537_v49  ;;  %v7858_v53 = vsel %vm265_vm0, %v16759_v10, 0.0  ;;  %v7493_v61 = vmax.f32 %v7491_v20, %v7492_v34  ;;  %v16777_v26 = vadd.f32 %v7770_v44, %v7769_v18 }
 0x628   : > { %v13500_v33 = vpop.f32.mrb[75].mxu0  ;;  %v16781_v0 = vmul.f32 %v14697_v56, %v16606_v31  ;;  %v7603_v19 = vsub.f32 %v16690_v36, %v7481_v27  ;;  %v7570_v60 = vmax.f32 %v7568_v13, %v7569_v15  ;;  %v7504_v58 = vrot.slane %v7503_v57, 4 }
 0x629   : > { %v8027_v12 = vsel %vm265_vm0, %v7979_v32, 0.0  ;;  %v7494_v8 = vrot.slane %v7493_v61, 1  ;;  %v16786_v20 = vadd.f32 %v7847_v23, %v7846_v50  ;;  %v7859_v21 = vrot.slane %v7858_v53, 4 }
 0x62a   : > { %8028 = vadd.xlane.f32.xlu1 %v8027_v12  ;;  %v7986_v18 = vmul.f32 %v16781_v0, %v16537_v49  ;;  %v7517_v44 = vsel %vm265_vm0, %v16750_v51, -inf  ;;  %v7651_v31 = vmul.f32 1.442695, %v7603_v19  ;;  %v7571_v56 = vrot.slane %v7570_v60, 1 }
 0x62b   : > { %v16783_v1 = vpop.f32.mrb[76].mxu0  ;;  %v7495_v4 = vmax.f32 %v7493_v61, %v7494_v8  ;;  %v7505_v22 = vmax.f32 %v7503_v57, %v7504_v58  ;;  %v7518_v13 = vrot.slane %v7517_v44, 4  ;;  %v7580_v50 = vsel %vm265_vm0, %v16741_v39, -inf }
 0x62c   : > { %v13510_v14 = vpop.f32.mrb[77].mxu0  ;;  %v8048_v36 = vsel %vm265_vm0, %v7986_v18, 0.0  ;;  %14702 = vpow2.f32 %v7651_v31  ;;  %v7572_v27 = vmax.f32 %v7570_v60, %v7571_v56  ;;  %v7860_v12 = vadd.f32 %v7859_v21, %v7858_v53 }
 0x62d   : > { %v7605_v32 = vsub.f32 %v16710_v62, %v7495_v4  ;;  %8049 = vadd.xlane.f32.xlu0 %v8048_v36  ;;  %v7506_v61 = vrot.slane %v7505_v22, 2  ;;  %v7519_v8 = vmax.f32 %v7517_v44, %v7518_v13  ;;  %v7581_v58 = vrot.slane %v7580_v50, 4 }
 0x62e   : > { %v7616_v31 = vsub.f32 %v16707_v52, %v7572_v27  ;;  %v7808_v21 = vadd.f32 %v7807_v55, %v16721_v48  ;;  %v7861_v13 = vrot.slane %v7860_v12, 2  ;;  %v18474_v52 = vrot.slane %v16744_v24, 1 }
 0x62f   : > { %v16796_v33 = vpop.f32.mrb[78].mxu0  ;;  %v16798_v23 = vpop.eup %14698  ;;  %v7655_v47 = vmul.f32 1.442695, %v7605_v32  ;;  %v7507_v60 = vmax.f32 %v7505_v22, %v7506_v61  ;;  %v7520_v4 = vrot.slane %v7519_v8, 2  ;;  %v7582_v56 = vmax.f32 %v7580_v50, %v7581_v58 }
 0x630   : > { %v13520_v15 = vpop.f32.mrb[79].mxu0  ;;  %v16801_v57 = vpop.eup %14700  ;;  %v7781_v19 = vsel %vm265_vm0, %v16798_v23, 0.0  ;;  %v7677_v53 = vmul.f32 1.442695, %v7616_v31  ;;  %v7759_v22 = vadd.f32 %v18474_v52, %v16744_v24  ;;  %v7531_v50 = vsel %vm265_vm0, %v16765_v40, -inf }
 0x631   : > { %v7782_v14 = vrot.slane %v7781_v19, 4  ;;  %v7872_v18 = vsel %vm265_vm0, %v16801_v57, 0.0  ;;  %14704 = vpow2.f32 %v7655_v47  ;;  %v7508_v34 = vrot.slane %v7507_v60, 1 }
 0x632   : > { %v7873_v62 = vrot.slane %v7872_v18, 4  ;;  %v7521_v42 = vmax.f32 %v7519_v8, %v7520_v4  ;;  %v7583_v41 = vrot.slane %v7582_v56, 2  ;;  %14706 = vpow2.f32 %v7677_v53 }
 0x633   : > { %v16808_v36 = vpop.f32.mrb[80].mxu0  ;;  %v7783_v15 = vadd.f32 %v7782_v14, %v7781_v19  ;;  %v7509_v27 = vmax.f32 %v7507_v60, %v7508_v34  ;;  %v7849_v48 = vrot.slane %v16786_v20, 1  ;;  %14708 = vrcp.f32 %v7808_v21 }
 0x634   : > { %v13530_v44 = vpop.f32.mrb[81].mxu0  ;;  %v7874_v25 = vadd.f32 %v7873_v62, %v7872_v18  ;;  %v7522_v47 = vrot.slane %v7521_v42, 1  ;;  %v7584_v61 = vmax.f32 %v7582_v56, %v7583_v41  ;;  %v7532_v55 = vrot.slane %v7531_v50, 4 }
 0x635   : > { %v7784_v32 = vrot.slane %v7783_v15, 2  ;;  %v7545_v19 = vsel %vm265_vm0, %v16783_v1, -inf  ;;  %v16819_v8 = vadd.f32 %v7861_v13, %v7860_v12  ;;  %v7607_v58 = vsub.f32 %v16726_v43, %v7509_v27 }
 0x636   : > { %v7523_v14 = vmax.f32 %v7521_v42, %v7522_v47  ;;  %v7585_v24 = vrot.slane %v7584_v61, 1  ;;  %v16822_v18 = vpop.eup %14702  ;;  %v7875_v31 = vrot.slane %v7874_v25, 2  ;;  %14710 = vrcp.f32 %v7759_v22 }
 0x637   : > { %v7533_v34 = vmax.f32 %v7531_v50, %v7532_v55  ;;  %v7546_v62 = vrot.slane %v7545_v19, 4  ;;  %v16824_v41 = vadd.f32 %v7784_v32, %v7783_v15  ;;  %v7795_v60 = vsel %vm265_vm0, %v16822_v18, 0.0 }
 0x638   : > { %v7659_v4 = vmul.f32 1.442695, %v7607_v58  ;;  %v7609_v56 = vsub.f32 %v16750_v51, %v7523_v14  ;;  %v7796_v12 = vrot.slane %v7795_v60, 4  ;;  %v7586_v53 = vmax.f32 %v7584_v61, %v7585_v24 }
 0x639   : > { %v7534_v21 = vrot.slane %v7533_v34, 2  ;;  %v7547_v43 = vmax.f32 %v7545_v19, %v7546_v62  ;;  %v18475_v44 = vrot.slane %v16753_v9, 1  ;;  %v7559_v15 = vsel %vm265_vm0, %v16796_v33, -inf }
 0x63a   : > { %14712 = vpow2.f32 %v7659_v4  ;;  %v7663_v42 = vmul.f32 1.442695, %v7609_v56  ;;  %v7797_v22 = vadd.f32 %v7796_v12, %v7795_v60  ;;  %v7618_v50 = vsub.f32 %v16741_v39, %v7586_v53 }
 0x63b   : > { %v7822_v13 = vadd.f32 %v18475_v44, %v16753_v9  ;;  %v16834_v52 = vpop.eup %14704  ;;  %v7535_v32 = vmax.f32 %v7533_v34, %v7534_v21  ;;  %v7548_v51 = vrot.slane %v7547_v43, 2  ;;  %v16837_v27 = vadd.f32 %v7875_v31, %v7874_v25 }
 0x63c   : > { %v7809_v47 = vsel %vm265_vm0, %v16834_v52, 0.0  ;;  %14714 = vpow2.f32 %v7663_v42  ;;  %v7560_v61 = vrot.slane %v7559_v15, 4  ;;  %v16841_v55 = vpop.eup %14706  ;;  %v7798_v9 = vrot.slane %v7797_v22, 2 }
 0x63d   : > { %v7810_v19 = vrot.slane %v7809_v47, 4  ;;  %v7681_v58 = vmul.f32 1.442695, %v7618_v50  ;;  %v7536_v14 = vrot.slane %v7535_v32, 1  ;;  %v7886_v24 = vsel %vm265_vm0, %v16841_v55, 0.0  ;;  %v14709_v34 = vpop.eup %14708 }
 0x63e   : > { %v7549_v62 = vmax.f32 %v7547_v43, %v7548_v51  ;;  %14716 = vrcp.f32 %v7822_v13  ;;  %v7561_v39 = vmax.f32 %v7559_v15, %v7560_v61  ;;  %v7887_v31 = vrot.slane %v7886_v24, 4 }
 0x63f   : > { %v7811_v25 = vadd.f32 %v7810_v19, %v7809_v47  ;;  %14718 = vpow2.f32 %v7681_v58  ;;  %v7573_v60 = vsel %vm265_vm0, %v16808_v36, -inf  ;;  %v16848_v4 = vmul.f32 %v14709_v34, %v16642_v17 }
 0x640   : > { %v7537_v56 = vmax.f32 %v7535_v32, %v7536_v14  ;;  %v7550_v12 = vrot.slane %v7549_v62, 1  ;;  %v7562_v53 = vrot.slane %v7561_v39, 2  ;;  %v14711_v21 = vpop.eup %14710  ;;  %v16851_v44 = vadd.f32 %v7798_v9, %v7797_v22 }
 0x641   : > { %v7812_v43 = vrot.slane %v7811_v25, 2  ;;  %v7888_v13 = vadd.f32 %v7887_v31, %v7886_v24  ;;  %v7988_v50 = vmul.f32 %v16848_v4, %v16537_v49  ;;  %v16857_v51 = vmul.f32 %v14711_v21, %v16648_v63 }
 0x642   : > { %v7611_v17 = vsub.f32 %v16765_v40, %v7537_v56  ;;  %v7551_v47 = vmax.f32 %v7549_v62, %v7550_v12  ;;  %v7563_v61 = vmax.f32 %v7561_v39, %v7562_v53  ;;  %v7574_v19 = vrot.slane %v7573_v60, 4 }
 0x643   : > { %v7889_v32 = vrot.slane %v7888_v13, 2  ;;  %v7877_v22 = vrot.slane %v16837_v27, 1  ;;  %v8054_v9 = vsel %vm265_vm0, %v7988_v50, 0.0  ;;  %v7981_v14 = vmul.f32 %v16857_v51, %v16537_v49 }
 0x644   : > { %v16860_v58 = vpop.eup %14712  ;;  %v7667_v24 = vmul.f32 1.442695, %v7611_v17  ;;  %v7800_v34 = vrot.slane %v16851_v44, 1  ;;  %v16867_v63 = vadd.f32 %v7812_v43, %v7811_v25  ;;  %8055 = vadd.xlane.f32.xlu0 %v8054_v9  ;;  %v7613_v62 = vsub.f32 %v16783_v1, %v7551_v47 }
 0x645   : > { %v7823_v40 = vsel %vm265_vm0, %v16860_v58, 0.0  ;;  %v8033_v56 = vsel %vm265_vm0, %v7981_v14, 0.0  ;;  %v7564_v12 = vrot.slane %v7563_v61, 1  ;;  %v7890_v53 = vadd.f32 %v7889_v32, %v7888_v13 }
 0x646   : > { %v16872_v39 = vpop.eup %14714  ;;  %v7824_v31 = vrot.slane %v7823_v40, 4  ;;  %14720 = vpow2.f32 %v7667_v24  ;;  %8034 = vadd.xlane.f32.xlu1 %v8033_v56  ;;  %v7671_v25 = vmul.f32 1.442695, %v7613_v62  ;;  %v7575_v21 = vmax.f32 %v7573_v60, %v7574_v19 }
 0x647   : > { %v7837_v49 = vsel %vm265_vm0, %v16872_v39, 0.0  ;;  %v7565_v9 = vmax.f32 %v7563_v61, %v7564_v12  ;;  %v18476_v1 = vrot.slane %v16757_v38, 1  ;;  %v7850_v32 = vadd.f32 %v7849_v48, %v16786_v20 }
 0x648   : > { %v14717_v43 = vpop.eup %14716  ;;  %v7825_v50 = vadd.f32 %v7824_v31, %v7823_v40  ;;  %v7838_v17 = vrot.slane %v7837_v49, 4  ;;  %14722 = vpow2.f32 %v7671_v25  ;;  %v7576_v13 = vrot.slane %v7575_v21, 2 }
 0x649   : > { %v7836_v47 = vadd.f32 %v18476_v1, %v16757_v38  ;;  %v16880_v15 = vpop.eup %14718  ;;  %v16883_v14 = vmul.f32 %v14717_v43, %v16660_v37  ;;  %v7615_v24 = vsub.f32 %v16796_v33, %v7565_v9  ;;  %v7814_v38 = vrot.slane %v16867_v63, 1  ;;  %v16895_v37 = vld [vmem:[%s18437_s1 + $0x8] sm:$0xff] }
 0x64a   : > { %v7826_v60 = vrot.slane %v7825_v50, 2  ;;  %v7839_v19 = vadd.f32 %v7838_v17, %v7837_v49  ;;  %v7900_v61 = vsel %vm265_vm0, %v16880_v15, 0.0  ;;  %v7577_v31 = vmax.f32 %v7575_v21, %v7576_v13 }
 0x64b   : > { %v7901_v40 = vrot.slane %v7900_v61, 4  ;;  %v7990_v62 = vmul.f32 %v16895_v37, %v16883_v14  ;;  %v7675_v56 = vmul.f32 1.442695, %v7615_v24  ;;  %14724 = vrcp.f32 %v7836_v47 }
 0x64c   : > { %v7827_v20 = vadd.f32 %v7826_v60, %v7825_v50  ;;  %v7840_v48 = vrot.slane %v7839_v19, 2  ;;  %v7578_v33 = vrot.slane %v7577_v31, 1  ;;  %14726 = vrcp.f32 %v7850_v32 }
 0x64d   : > { %v7902_v12 = vadd.f32 %v7901_v40, %v7900_v61  ;;  %v8060_v49 = vsel %vm265_vm0, %v7990_v62, 0.0  ;;  %v7891_v25 = vrot.slane %v7890_v53, 1  ;;  %14728 = vpow2.f32 %v7675_v56 }
 0x64e   : > { %v7841_v43 = vadd.f32 %v7840_v48, %v7839_v19  ;;  %8061 = vadd.xlane.f32.xlu0 %v8060_v49  ;;  %v18477_v17 = vrot.slane %v16777_v26, 1  ;;  %v7579_v42 = vmax.f32 %v7577_v31, %v7578_v33  ;;  %v18478_v21 = vrot.slane %v16819_v8, 1 }
 0x64f   : > { %v7903_v1 = vrot.slane %v7902_v12, 2  ;;  %v7878_v47 = vadd.f32 %v7877_v22, %v16837_v27  ;;  %v7828_v60 = vrot.slane %v7827_v20, 1  ;;  %v18479_v32 = vrot.slane %v16824_v41, 1 }
 0x650   : > { %v7773_v9 = vadd.f32 %v18477_v17, %v16777_v26  ;;  %v7864_v50 = vadd.f32 %v18478_v21, %v16819_v8  ;;  %v16907_v13 = vpop.eup %14720  ;;  %v7801_v61 = vadd.f32 %v7800_v34, %v16851_v44  ;;  %v7617_v40 = vsub.f32 %v16808_v36, %v7579_v42 }
 0x651   : > { %v7787_v19 = vadd.f32 %v18479_v32, %v16824_v41  ;;  %v7904_v24 = vadd.f32 %v7903_v1, %v7902_v12  ;;  %v7851_v26 = vsel %vm265_vm0, %v16907_v13, 0.0  ;;  %v7842_v8 = vrot.slane %v7841_v43, 1 }
 0x652   : > { %14730 = vrcp.f32 %v7773_v9  ;;  %v7852_v62 = vrot.slane %v7851_v26, 4  ;;  %v7892_v27 = vadd.f32 %v7891_v25, %v7890_v53  ;;  %v16916_v22 = vpop.eup %14722  ;;  %v7679_v48 = vmul.f32 1.442695, %v7617_v40 }
 0x653   : > { %14732 = vrcp.f32 %v7864_v50  ;;  %v7905_v31 = vrot.slane %v7904_v24, 1  ;;  %v7815_v41 = vadd.f32 %v7814_v38, %v16867_v63  ;;  %v7865_v44 = vsel %vm265_vm0, %v16916_v22, 0.0 }
 0x654   : > { %14734 = vrcp.f32 %v7878_v47  ;;  %v7853_v56 = vadd.f32 %v7852_v62, %v7851_v26  ;;  %v7829_v34 = vadd.f32 %v7828_v60, %v7827_v20  ;;  %v7866_v12 = vrot.slane %v7865_v44, 4 }
 0x655   : > { %14736 = vrcp.f32 %v7787_v19  ;;  %v14725_v36 = vpop.eup %14724  ;;  %v7906_v33 = vadd.f32 %v7905_v31, %v7904_v24  ;;  %v7843_v17 = vadd.f32 %v7842_v8, %v7841_v43 }
 0x656   : > { %14738 = vrcp.f32 %v7801_v61  ;;  %v14727_v42 = vpop.eup %14726  ;;  %v7867_v49 = vadd.f32 %v7866_v12, %v7865_v44  ;;  %v16922_v53 = vmul.f32 %v14725_v36, %v16696_v59  ;;  %v7854_v63 = vrot.slane %v7853_v56, 2 }
 0x657   : > { %14740 = vpow2.f32 %v7679_v48  ;;  %v16924_v25 = vpop.eup %14728  ;;  %v16927_v38 = vmul.f32 %v14727_v42, %v16731_v28 }
 0x658   : > { %14742 = vrcp.f32 %v7892_v27  ;;  %v7879_v20 = vsel %vm265_vm0, %v16924_v25, 0.0  ;;  %v7992_v9 = vmul.f32 %v16895_v37, %v16922_v53  ;;  %v7868_v47 = vrot.slane %v7867_v49, 2 }
 0x659   : > { %14744 = vrcp.f32 %v7815_v41  ;;  %v7880_v21 = vrot.slane %v7879_v20, 4  ;;  %v7994_v59 = vmul.f32 %v16895_v37, %v16927_v38  ;;  %v7855_v32 = vadd.f32 %v7854_v63, %v7853_v56 }
 0x65a   : > { %14746 = vrcp.f32 %v7829_v34  ;;  %v8066_v60 = vsel %vm265_vm0, %v7992_v9, 0.0  ;;  %v7869_v48 = vadd.f32 %v7868_v47, %v7867_v49 }
 0x65b   : > { %14748 = vrcp.f32 %v7906_v33  ;;  %v7881_v19 = vadd.f32 %v7880_v21, %v7879_v20  ;;  %8067 = vadd.xlane.f32.xlu0 %v8066_v60  ;;  %v8072_v26 = vsel %vm265_vm0, %v7994_v59, 0.0  ;;  %v7856_v34 = vrot.slane %v7855_v32, 1 }
 0x65c   : > { %v14731_v1 = vpop.eup %14730  ;;  %14750 = vrcp.f32 %v7843_v17  ;;  %v7870_v9 = vrot.slane %v7869_v48, 1 }
 0x65d   : > { %v14733_v50 = vpop.eup %14732  ;;  %v16937_v28 = vmul.f32 %v14731_v1, %v16728_v7  ;;  %v7882_v62 = vrot.slane %v7881_v19, 2  ;;  %v7857_v60 = vadd.f32 %v7856_v34, %v7855_v32 }
 0x65e   : > { %v14735_v43 = vpop.eup %14734  ;;  %v16940_v61 = vmul.f32 %v14733_v50, %v16759_v10 }
 0x65f   : > { %v14737_v24 = vpop.eup %14736  ;;  %v7983_v40 = vmul.f32 %v16895_v37, %v16937_v28  ;;  %v16946_v8 = vmul.f32 %v14735_v43, %v16801_v57  ;;  %8073 = vadd.xlane.f32.xlu0 %v8072_v26  ;;  %v7883_v42 = vadd.f32 %v7882_v62, %v7881_v19  ;;  %14752 = vrcp.f32 %v7857_v60 }
 0x660   : > { %v14739_v7 = vpop.eup %14738  ;;  %v7996_v27 = vmul.f32 %v16895_v37, %v16940_v61  ;;  %v16951_v31 = vmul.f32 %v14737_v24, %v16798_v23  ;;  %v18480_v60 = vmov 0.0  }
 0x661   : > { %v16953_v10 = vpop.eup %14740  ;;  %v8039_v41 = vsel %vm265_vm0, %v7983_v40, 0.0  ;;  %v16957_v56 = vmul.f32 %v14739_v7, %v16822_v18  ;;  %v7998_v12 = vmul.f32 %v16895_v37, %v16946_v8  ;;  %v7884_v19 = vrot.slane %v7883_v42, 1 }
 0x662   : > { %v14743_v44 = vpop.eup %14742  ;;  %v7893_v57 = vsel %vm265_vm0, %v16953_v10, 0.0  ;;  %8040 = vadd.xlane.f32.xlu1 %v8039_v41  ;;  %v7985_v23 = vmul.f32 %v16895_v37, %v16951_v31  ;;  %v8078_v33 = vsel %vm265_vm0, %v7996_v27, 0.0  ;;  %v7871_v27 = vadd.f32 %v7870_v9, %v7869_v48 }
 0x663   : > { %v14745_v36 = vpop.eup %14744  ;;  %v7894_v49 = vrot.slane %v7893_v57, 4  ;;  %v7987_v18 = vmul.f32 %v16895_v37, %v16957_v56  ;;  %v16970_v20 = vmul.f32 %v14743_v44, %v16841_v55  ;;  %8079 = vadd.xlane.f32.xlu0 %v8078_v33  ;;  %v8084_v59 = vsel %vm265_vm0, %v7998_v12, 0.0 }
 0x664   : > { %v14747_v63 = vpop.eup %14746  ;;  %v8045_v17 = vsel %vm265_vm0, %v7985_v23, 0.0  ;;  %v16973_v21 = vmul.f32 %v14745_v36, %v16834_v52  ;;  %14754 = vrcp.f32 %v7871_v27 }
 0x665   : > { %v7895_v1 = vadd.f32 %v7894_v49, %v7893_v57  ;;  %v8000_v50 = vmul.f32 %v16895_v37, %v16970_v20  ;;  %v16979_v47 = vmul.f32 %v14747_v63, %v16860_v58  ;;  %v14749_v43 = vpop.eup %14748  ;;  %v8051_v24 = vsel %vm265_vm0, %v7987_v18, 0.0  ;;  %v14857_v18 = vld [vmem:[%s15051_s29 + $0x8] sm:$0xff] }
 0x666   : > { %8046 = vadd.xlane.f32.xlu1 %v8045_v17  ;;  %v7989_v52 = vmul.f32 %v16895_v37, %v16973_v21  ;;  %v14751_v26 = vpop.eup %14750  ;;  %v16985_v40 = vmul.f32 %v14749_v43, %v16880_v15  ;;  %v7885_v15 = vadd.f32 %v7884_v19, %v7883_v42  ;;  %v17003_v42 = vld [vmem:[%s18437_s1] sm:$0xff] }
 0x667   : > { %v7896_v55 = vrot.slane %v7895_v1, 2  ;;  %8085 = vadd.xlane.f32.xlu0 %v8084_v59  ;;  %v8090_v58 = vsel %vm265_vm0, %v8000_v50, 0.0  ;;  %v7991_v62 = vmul.f32 %v16895_v37, %v16979_v47  ;;  %v16994_v34 = vmul.f32 %v14751_v26, %v16872_v39 }
 0x668   : > { %v8057_v32 = vsel %vm265_vm0, %v7989_v52, 0.0  ;;  %v8002_v44 = vmul.f32 %v16895_v37, %v16985_v40  ;;  %14756 = vrcp.f32 %v7885_v15  ;;  %v8100_v17 = vmul.f32 %v16528_v45, %v17003_v42 }
 0x669   : > { %v7897_v7 = vadd.f32 %v7896_v55, %v7895_v1  ;;  %v8063_v12 = vsel %vm265_vm0, %v7991_v62, 0.0  ;;  %v7993_v48 = vmul.f32 %v16895_v37, %v16994_v34  ;;  %v14753_v36 = vpop.eup %14752  ;;  %v14859_v62 = vld [vmem:[%s15051_s29 + $0x28] sm:$0xff] }
 0x66a   : > { %8052 = vadd.xlane.f32.xlu1 %v8051_v24  ;;  %v8096_v23 = vsel %vm265_vm0, %v8002_v44, 0.0  ;;  %v17007_v33 = vmul.f32 %v14753_v36, %v16907_v13  ;;  %v14862_v36 = vld [vmem:[%s15051_s29 + $0x10] sm:$0xff] }
 0x66b   : > { %v7898_v41 = vrot.slane %v7897_v7, 1  ;;  %8091 = vadd.xlane.f32.xlu0 %v8090_v58  ;;  %v8069_v49 = vsel %vm265_vm0, %v7993_v48, 0.0  ;;  %v14858_v58 = vld [vmem:[%s15051_s29 + $0x18] sm:$0xff]  ;;  %v8106_v48 = vmul.f32 %v16623_v2, %v17003_v42 }
 0x66c   : > { %v7995_v9 = vmul.f32 %v16895_v37, %v17007_v33 }
 0x66d   : > { %v7899_v57 = vadd.f32 %v7898_v41, %v7897_v7  ;;  %v8104_v41 = vmul.f32 %v16602_v5, %v17003_v42 }
 0x66e   : > { %8058 = vadd.xlane.f32.xlu1 %v8057_v32  ;;  %v14755_v1 = vpop.eup %14754  ;;  %v8075_v50 = vsel %vm265_vm0, %v7995_v9, 0.0 }
 0x66f   : > { %14758 = vrcp.f32 %v7899_v57  ;;  %8097 = vadd.xlane.f32.xlu0 %v8096_v23  ;;  %v17020_v13 = vmul.f32 %v14755_v1, %v16916_v22  ;;  %v8099_v57 = vmul.f32 %v16612_v30, %v17003_v42  ;;  %v14864_v1 = vld [vmem:[%s15051_s29 + $0x20] sm:$0xff] }
 0x670   : > { %v8008_v39 = vpop.xlane.xlu0 %8007 }
 0x671   : > { %v17010_v63 = vmul.f32 %v14857_v18, %v8008_v39  ;;  %v7997_v19 = vmul.f32 %v16895_v37, %v17020_v13  ;;  %v14863_v18 = vld [vmem:[%s15051_s29 + $0x48] sm:$0xff] }
 0x672   : > { %8064 = vadd.xlane.f32.xlu1 %v8063_v12  ;;  %v14757_v59 = vpop.eup %14756  ;;  %v14861_v12 = vld [vmem:[%s15051_s29 + $0x38] sm:$0xff] }
 0x673   : > { %13542 = vmatpush3.msra.mxu1 %v17010_v63  ;;  %v17026_v45 = vmul.f32 %v14757_v59, %v16924_v25  ;;  %v8081_v55 = vsel %vm265_vm0, %v7997_v19, 0.0  ;;  %v14865_v19 = vld [vmem:[%s15051_s29 + $0x58] sm:$0xff] }
 0x674   : > { %13544 = vmatmul.mubr.msk.f32.vlgmr.msra.gmra.mrb[78].mxu1 %vm265_vm0, %v8100_v17  ;;  %13551 = vmatprep.subr.mxu1 %v18480_v60 }
 0x675   : > { %13553 = vmatprep.mubr.msk.f32.mxu1 %vm14975_vm1, %v18480_v60  ;;  %v7999_v22 = vmul.f32 %v16895_v37, %v17026_v45 }
 0x676   : > { %8070 = vadd.xlane.f32.xlu1 %v8069_v49  ;;  %v8101_v49 = vmul.f32 %v16635_v54, %v17003_v42  ;;  %v8108_v54 = vmul.f32 %v16663_v35, %v17003_v42 }
 0x677   : > { %v8087_v52 = vsel %vm265_vm0, %v7999_v22, 0.0 }
 0x679   : > { %v14759_v43 = vpop.eup %14758 }
 0x67a   : > { %8076 = vadd.xlane.f32.xlu1 %v8075_v50  ;;  %v17034_v24 = vmul.f32 %v14759_v43, %v16953_v10  ;;  %v8102_v10 = vmul.f32 %v16582_v3, %v17003_v42  ;;  %v14860_v3 = vld [vmem:[%s15051_s29] sm:$0xff]  ;;  %v8103_v43 = vmul.f32 %v16688_v29, %v17003_v42 }
 0x67c   : > { %v8001_v25 = vmul.f32 %v16895_v37, %v17034_v24 }
 0x67e   : > { %8082 = vadd.xlane.f32.xlu1 %v8081_v55  ;;  %v8093_v26 = vsel %vm265_vm0, %v8001_v25, 0.0  ;;  %v8110_v55 = vmul.f32 %v16693_v16, %v17003_v42  ;;  %v14866_v16 = vld [vmem:[%s15051_s29 + $0x30] sm:$0xff] }
 0x682   : > { %8088 = vadd.xlane.f32.xlu1 %v8087_v52  ;;  %v8105_v52 = vmul.f32 %v16724_v6, %v17003_v42 }
 0x685   : > { %v8014_v7 = vpop.xlane.xlu0 %8013 }
 0x686   : > { %8094 = vadd.xlane.f32.xlu1 %v8093_v26  ;;  %v17041_v32 = vmul.f32 %v14858_v58, %v8014_v7  ;;  %v14867_v26 = vld [vmem:[%s15051_s29 + $0x68] sm:$0xff]  ;;  %v8112_v58 = vmul.f32 %v16748_v11, %v17003_v42 }
 0x688   : > { %13552 = vmatpush3.msra.mxu1 %v17041_v32 }
 0x689   : > { %13554 = vmatmul.mubr.msk.f32.vlgmr.msra.gmra.mrb[80].mxu1 %vm265_vm0, %v8102_v10  ;;  %13561 = vmatprep.subr.mxu1 %v18480_v60  ;;  %v14868_v10 = vld [vmem:[%s15051_s29 + $0x40] sm:$0xff] }
 0x68a   : > { %13563 = vmatprep.mubr.msk.f32.mxu1 %vm14975_vm1, %v18480_v60 }
 0x68c   : > { %v8020_v37 = vpop.xlane.xlu0 %8019 }
 0x68d   : > { %v17051_v27 = vmul.f32 %v14859_v62, %v8020_v37  ;;  %v8107_v62 = vmul.f32 %v16763_v46, %v17003_v42 }
 0x68e   : > { %v8005_v44 = vpop.xlane.xlu1 %8004 }
 0x68f   : > { %13562 = vmatpush3.msra.mxu1 %v17051_v27  ;;  %v17057_v15 = vmul.f32 %v14860_v3, %v8005_v44  ;;  %v8114_v3 = vmul.f32 %v16781_v0, %v17003_v42 }
 0x690   : > { %13564 = vmatmul.mubr.msk.f32.vlgmr.msra.gmra.mrb[82].mxu1 %vm265_vm0, %v8104_v41  ;;  %13571 = vmatprep.subr.mxu1 %v18480_v60  ;;  %v14869_v41 = vld [vmem:[%s15051_s29 + $0x78] sm:$0xff] }
 0x691   : > { %13573 = vmatprep.mubr.msk.f32.mxu1 %vm14975_vm1, %v18480_v60  ;;  %13537 = vmatpush3.msra.mxu0 %v17057_v15 }
 0x692   : > { %v8026_v5 = vpop.xlane.xlu0 %8025  ;;  %13539 = vmatmul.mubr.msk.f32.vlgmr.msra.gmra.mrb[82].mxu0 %vm265_vm0, %v8099_v57  ;;  %13546 = vmatprep.subr.mxu0 %v18480_v60  ;;  %v14870_v57 = vld [vmem:[%s15051_s29 + $0x88] sm:$0xff] }
 0x693   : > { %v17068_v23 = vmul.f32 %v14861_v12, %v8026_v5  ;;  %13548 = vmatprep.mubr.msk.f32.mxu0 %vm14975_vm1, %v18480_v60  ;;  %v8011_v30 = vpop.xlane.xlu1 %8010  ;;  %v8116_v12 = vmul.f32 %v16848_v4, %v17003_v42 }
 0x694   : > { %v17077_v39 = vmul.f32 %v14862_v36, %v8011_v30  ;;  %v14871_v30 = vld [vmem:[%s15051_s29 + $0x50] sm:$0xff]  ;;  %v8109_v36 = vmul.f32 %v16857_v51, %v17003_v42 }
 0x695   : > { %13572 = vmatpush3.msra.mxu1 %v17068_v23 }
 0x696   : > { %13574 = vmatmul.mubr.msk.f32.vlgmr.msra.gmra.mrb[84].mxu1 %vm265_vm0, %v8106_v48  ;;  %13581 = vmatprep.subr.mxu1 %v18480_v60 }
 0x697   : > { %13583 = vmatprep.mubr.msk.f32.mxu1 %vm14975_vm1, %v18480_v60  ;;  %13547 = vmatpush3.msra.mxu0 %v17077_v39 }
 0x698   : > { %13549 = vmatmul.mubr.msk.f32.vlgmr.msra.gmra.mrb[84].mxu0 %vm265_vm0, %v8101_v49  ;;  %13556 = vmatprep.subr.mxu0 %v18480_v60  ;;  %v14872_v49 = vld [vmem:[%s15051_s29 + $0x98] sm:$0xff] }
 0x699   : > { %13558 = vmatprep.mubr.msk.f32.mxu0 %vm14975_vm1, %v18480_v60 }
 0x69c   : > { %v8032_v2 = vpop.xlane.xlu0 %8031 }
 0x69d   : > { %v17091_v17 = vmul.f32 %v14863_v18, %v8032_v2  ;;  %v8118_v2 = vmul.f32 %v16883_v14, %v17003_v42 }
 0x69f   : > { %13582 = vmatpush3.msra.mxu1 %v17091_v17 }
 0x6a0   : > { %13584 = vmatmul.mubr.msk.f32.vlgmr.msra.gmra.mrb[86].mxu1 %vm265_vm0, %v8108_v54  ;;  %13591 = vmatprep.subr.mxu1 %v18480_v60  ;;  %v14873_v54 = vld [vmem:[%s15051_s29 + $0xa8] sm:$0xff] }
 0x6a1   : > { %13593 = vmatprep.mubr.msk.f32.mxu1 %vm14975_vm1, %v18480_v60 }
 0x6a4   : > { %v8017_v9 = vpop.xlane.xlu1 %8016 }
 0x6a5   : > { %v17101_v59 = vmul.f32 %v14864_v1, %v8017_v9  ;;  %v8120_v1 = vmul.f32 %v16922_v53, %v17003_v42  ;;  %v8122_v53 = vmul.f32 %v16927_v38, %v17003_v42  ;;  %v17221_v38 = vld [vmem:[%s15051_s29 + $0x70] sm:$0xff] }
 0x6a6   : > { %v8038_v50 = vpop.xlane.xlu0 %8037 }
 0x6a7   : > { %v17106_v35 = vmul.f32 %v14865_v19, %v8038_v50  ;;  %13557 = vmatpush3.msra.mxu0 %v17101_v59 }
 0x6a8   : > { %13559 = vmatmul.mubr.msk.f32.vlgmr.msra.gmra.mrb[86].mxu0 %vm265_vm0, %v8103_v43  ;;  %13566 = vmatprep.subr.mxu0 %v18480_v60  ;;  %v14874_v43 = vld [vmem:[%s15051_s29 + $0xb8] sm:$0xff] }
 0x6a9   : > { %13568 = vmatprep.mubr.msk.f32.mxu0 %vm14975_vm1, %v18480_v60  ;;  %13592 = vmatpush3.msra.mxu1 %v17106_v35 }
 0x6aa   : > { %13594 = vmatmul.mubr.msk.f32.vlgmr.msra.gmra.mrb[88].mxu1 %vm265_vm0, %v8110_v55  ;;  %13601 = vmatprep.subr.mxu1 %v18480_v60  ;;  %v14875_v55 = vld [vmem:[%s15051_s29 + $0x60] sm:$0xff] }
 0x6ab   : > { %13603 = vmatprep.mubr.msk.f32.mxu1 %vm14975_vm1, %v18480_v60 }
 0x6ad   : > { %v8023_v29 = vpop.xlane.xlu1 %8022 }
 0x6ae   : > { %v17121_v22 = vmul.f32 %v14866_v16, %v8023_v29  ;;  %v8111_v16 = vmul.f32 %v16937_v28, %v17003_v42 }
 0x6b0   : > { %13567 = vmatpush3.msra.mxu0 %v17121_v22 }
 0x6b1   : > { %13569 = vmatmul.mubr.msk.f32.vlgmr.msra.gmra.mrb[88].mxu0 %vm265_vm0, %v8105_v52  ;;  %13576 = vmatprep.subr.mxu0 %v18480_v60 }
 0x6b2   : > { %13578 = vmatprep.mubr.msk.f32.mxu0 %vm14975_vm1, %v18480_v60 }
 0x6b4   : > { %v8044_v25 = vpop.xlane.xlu0 %8043 }
 0x6b5   : > { %v17129_v7 = vmul.f32 %v14867_v26, %v8044_v25  ;;  %v14876_v26 = vld [vmem:[%s15051_s29 + $0xc8] sm:$0xff] }
 0x6b7   : > { %13602 = vmatpush3.msra.mxu1 %v17129_v7  ;;  %v8029_v6 = vpop.xlane.xlu1 %8028 }
 0x6b8   : > { %13604 = vmatmul.mubr.msk.f32.vlgmr.msra.gmra.mrb[90].mxu1 %vm265_vm0, %v8112_v58  ;;  %13611 = vmatprep.subr.mxu1 %v18480_v60  ;;  %v17139_v37 = vmul.f32 %v14868_v10, %v8029_v6  ;;  %v8124_v6 = vmul.f32 %v16940_v61, %v17003_v42  ;;  %v8113_v10 = vmul.f32 %v16951_v31, %v17003_v42  ;;  %v17247_v31 = vld [vmem:[%s15051_s29 + $0x80] sm:$0xff] }
 0x6b9   : > { %13613 = vmatprep.mubr.msk.f32.mxu1 %vm14975_vm1, %v18480_v60 }
 0x6ba   : > { %13577 = vmatpush3.msra.mxu0 %v17139_v37  ;;  %v8050_v11 = vpop.xlane.xlu0 %8049 }
 0x6bb   : > { %13579 = vmatmul.mubr.msk.f32.vlgmr.msra.gmra.mrb[90].mxu0 %vm265_vm0, %v8107_v62  ;;  %13586 = vmatprep.subr.mxu0 %v18480_v60  ;;  %v17149_v44 = vmul.f32 %v14869_v41, %v8050_v11  ;;  %v17238_v41 = vld [vmem:[%s15051_s29 + $0xd8] sm:$0xff] }
 0x6bc   : > { %13588 = vmatprep.mubr.msk.f32.mxu0 %vm14975_vm1, %v18480_v60 }
 0x6bd   : > { %13612 = vmatpush3.msra.mxu1 %v17149_v44 }
 0x6be   : > { %13614 = vmatmul.mubr.msk.f32.vlgmr.msra.gmra.mrb[92].mxu1 %vm265_vm0, %v8114_v3  ;;  %13621 = vmatprep.subr.mxu1 %v18480_v60 }
 0x6bf   : > { %13623 = vmatprep.mubr.msk.f32.mxu1 %vm14975_vm1, %v18480_v60 }
 0x6d1   : > { %v8056_v46 = vpop.xlane.xlu0 %8055 }
 0x6d2   : > { %v17161_v5 = vmul.f32 %v14870_v57, %v8056_v46  ;;  %v8126_v46 = vmul.f32 %v16946_v8, %v17003_v42  ;;  %v8115_v57 = vmul.f32 %v16957_v56, %v17003_v42 }
 0x6d3   : > { %v8035_v48 = vpop.xlane.xlu1 %8034 }
 0x6d4   : > { %v17166_v0 = vmul.f32 %v14871_v30, %v8035_v48  ;;  %13622 = vmatpush3.msra.mxu1 %v17161_v5  ;;  %v17264_v30 = vld [vmem:[%s15051_s29 + $0xe8] sm:$0xff] }
 0x6d5   : > { %13624 = vmatmul.mubr.msk.f32.vlgmr.msra.gmra.mrb[94].mxu1 %vm265_vm0, %v8116_v12  ;;  %13631 = vmatprep.subr.mxu1 %v18480_v60 }
 0x6d6   : > { %13587 = vmatpush3.msra.mxu0 %v17166_v0  ;;  %13633 = vmatprep.mubr.msk.f32.mxu1 %vm14975_vm1, %v18480_v60 }
 0x6d7   : > { %13589 = vmatmul.mubr.msk.f32.vlgmr.msra.gmra.mrb[92].mxu0 %vm265_vm0, %v8109_v36  ;;  %13596 = vmatprep.subr.mxu0 %v18480_v60  ;;  %v17271_v36 = vld [vmem:[%s15051_s29 + $0x90] sm:$0xff] }
 0x6d8   : > { %13598 = vmatprep.mubr.msk.f32.mxu0 %vm14975_vm1, %v18480_v60 }
 0x6db   : > { %v8062_v4 = vpop.xlane.xlu0 %8061 }
 0x6dc   : > { %v17181_v51 = vmul.f32 %v14872_v49, %v8062_v4  ;;  %v8128_v4 = vmul.f32 %v16970_v20, %v17003_v42  ;;  %v8117_v49 = vmul.f32 %v16973_v21, %v17003_v42  ;;  %v17291_v20 = vld [vmem:[%s15051_s29 + $0xa0] sm:$0xff] }
 0x6de   : > { %13632 = vmatpush3.msra.mxu1 %v17181_v51 }
 0x6df   : > { %13634 = vmatmul.mubr.msk.f32.vlgmr.msra.gmra.mrb[96].mxu1 %vm265_vm0, %v8118_v2  ;;  %13641 = vmatprep.subr.mxu1 %v18480_v60 }
 0x6e0   : > { %13643 = vmatprep.mubr.msk.f32.mxu1 %vm14975_vm1, %v18480_v60 }
 0x6e8   : > { %v8068_v18 = vpop.xlane.xlu0 %8067 }
 0x6e9   : > { %v17191_v9 = vmul.f32 %v14873_v54, %v8068_v18 }
 0x6eb   : > { %13642 = vmatpush3.msra.mxu1 %v17191_v9 }
 0x6ec   : > { %13644 = vmatmul.mubr.msk.f32.vlgmr.msra.gmra.mrb[98].mxu1 %vm265_vm0, %v8120_v1  ;;  %v8074_v14 = vpop.xlane.xlu0 %8073  ;;  %13651 = vmatprep.subr.mxu1 %v18480_v60  ;;  %v17297_v1 = vld [vmem:[%s15051_s29 + $0xf8] sm:$0xff] }
 0x6ed   : > { %v17199_v19 = vmul.f32 %v14874_v43, %v8074_v14  ;;  %13653 = vmatprep.mubr.msk.f32.mxu1 %vm14975_vm1, %v18480_v60  ;;  %v8130_v14 = vmul.f32 %v16985_v40, %v17003_v42  ;;  %v17317_v40 = vld [vmem:[%s15051_s29 + $0xb0] sm:$0xff] }
 0x6ef   : > { %v8041_v50 = vpop.xlane.xlu1 %8040  ;;  %13652 = vmatpush3.msra.mxu1 %v17199_v19 }
 0x6f0   : > { %v17202_v29 = vmul.f32 %v14875_v55, %v8041_v50  ;;  %13654 = vmatmul.mubr.msk.f32.vlgmr.msra.gmra.mrb[100].mxu1 %vm265_vm0, %v8122_v53  ;;  %v8080_v52 = vpop.xlane.xlu0 %8079  ;;  %13661 = vmatprep.subr.mxu1 %v18480_v60  ;;  %v8119_v50 = vmul.f32 %v16979_v47, %v17003_v42  ;;  %v8121_v47 = vmul.f32 %v16994_v34, %v17003_v42 }
 0x6f1   : > { %v17215_v58 = vmul.f32 %v14876_v26, %v8080_v52  ;;  %13663 = vmatprep.mubr.msk.f32.mxu1 %vm14975_vm1, %v18480_v60  ;;  %v17343_v26 = vld [vmem:[%s15051_s29 + $0xd0] sm:$0xff] }
 0x6f2   : > { %13597 = vmatpush3.msra.mxu0 %v17202_v29 }
 0x6f3   : > { %13599 = vmatmul.mubr.msk.f32.vlgmr.msra.gmra.mrb[94].mxu0 %vm265_vm0, %v8111_v16  ;;  %v8047_v25 = vpop.xlane.xlu1 %8046  ;;  %13606 = vmatprep.subr.mxu0 %v18480_v60  ;;  %v17330_v16 = vld [vmem:[%s15051_s29 + $0xc0] sm:$0xff] }
 0x6f4   : > { %v17224_v28 = vmul.f32 %v17221_v38, %v8047_v25  ;;  %13608 = vmatprep.mubr.msk.f32.mxu0 %vm14975_vm1, %v18480_v60  ;;  %13662 = vmatpush3.msra.mxu1 %v17215_v58  ;;  %v8086_v62 = vpop.xlane.xlu0 %8085  ;;  %v8123_v25 = vmul.f32 %v17007_v33, %v17003_v42 }
 0x6f5   : > { %13664 = vmatmul.mubr.msk.f32.vlgmr.msra.gmra.mrb[102].mxu1 %vm265_vm0, %v8124_v6  ;;  %13671 = vmatprep.subr.mxu1 %v18480_v60  ;;  %v17241_v61 = vmul.f32 %v17238_v41, %v8086_v62  ;;  %v17356_v62 = vld [vmem:[%s15051_s29 + $0xe0] sm:$0xff] }
 0x6f6   : > { %13607 = vmatpush3.msra.mxu0 %v17224_v28  ;;  %13673 = vmatprep.mubr.msk.f32.mxu1 %vm14975_vm1, %v18480_v60 }
 0x6f7   : > { %v8053_v11 = vpop.xlane.xlu1 %8052  ;;  %13609 = vmatmul.mubr.msk.f32.vlgmr.msra.gmra.mrb[96].mxu0 %vm265_vm0, %v8113_v10  ;;  %13616 = vmatprep.subr.mxu0 %v18480_v60  ;;  %v8125_v10 = vmul.f32 %v17020_v13, %v17003_v42 }
 0x6f8   : > { %v17250_v3 = vmul.f32 %v17247_v31, %v8053_v11  ;;  %13618 = vmatprep.mubr.msk.f32.mxu0 %vm14975_vm1, %v18480_v60  ;;  %13672 = vmatpush3.msra.mxu1 %v17241_v61  ;;  %v8092_v12 = vpop.xlane.xlu0 %8091 }
 0x6f9   : > { %13674 = vmatmul.mubr.msk.f32.vlgmr.msra.gmra.mrb[104].mxu1 %vm265_vm0, %v8126_v46  ;;  %v17267_v8 = vmul.f32 %v17264_v30, %v8092_v12  ;;  %13681 = vmatprep.subr.mxu1 %v18480_v60  ;;  %v8127_v46 = vmul.f32 %v17026_v45, %v17003_v42 }
 0x6fa   : > { %13617 = vmatpush3.msra.mxu0 %v17250_v3  ;;  %13683 = vmatprep.mubr.msk.f32.mxu1 %vm14975_vm1, %v18480_v60 }
 0x6fb   : > { %v8059_v48 = vpop.xlane.xlu1 %8058  ;;  %13626 = vmatprep.subr.mxu0 %v18480_v60  ;;  %13619 = vmatmul.mubr.msk.f32.vlgmr.msra.gmra.mrb[98].mxu0 %vm265_vm0, %v8115_v57  ;;  %v17369_v57 = vld [vmem:[%s15051_s29 + $0xf0] sm:$0xff] }
 0x6fc   : > { %v17274_v56 = vmul.f32 %v17271_v36, %v8059_v48  ;;  %13628 = vmatprep.mubr.msk.f32.mxu0 %vm14975_vm1, %v18480_v60  ;;  %13682 = vmatpush3.msra.mxu1 %v17267_v8  ;;  %v8098_v18 = vpop.xlane.xlu0 %8097  ;;  %v8129_v48 = vmul.f32 %v17034_v24, %v17003_v42  ;;  %v187_v42 = vld [vmem:[%s18437_s1 + $0x58] sm:$0xff] }
 0x6fd   : > { %13684 = vmatmul.mubr.msk.f32.vlgmr.msra.gmra.mrb[106].mxu1 %vm265_vm0, %v8128_v4  ;;  %v17300_v21 = vmul.f32 %v17297_v1, %v8098_v18  ;;  %13691 = vmatprep.subr.mxu1 %v18480_v60 }
 0x6fe   : > { %13627 = vmatpush3.msra.mxu0 %v17274_v56  ;;  %13693 = vmatprep.mubr.msk.f32.mxu1 %vm14975_vm1, %v18480_v60 }
 0x6ff   : > { %v8065_v2 = vpop.xlane.xlu1 %8064  ;;  %13636 = vmatprep.subr.mxu0 %v18480_v60  ;;  %13629 = vmatmul.mubr.msk.f32.vlgmr.msra.gmra.mrb[100].mxu0 %vm265_vm0, %v8117_v49 }
 0x700   : > { %v17294_v54 = vmul.f32 %v17291_v20, %v8065_v2  ;;  %13638 = vmatprep.mubr.msk.f32.mxu0 %vm14975_vm1, %v18480_v60  ;;  %13692 = vmatpush3.msra.mxu1 %v17300_v21 }
 0x701   : > { %13694 = vmatmul.mubr.msk.f32.vlgmr.msra.gmra.mrb[108].mxu1 %vm265_vm0, %v8130_v14  ;;  %v186_v14 = vld [vmem:[%s18437_s1 + $0x50] sm:$0xff] }
 0x702   : > { %13637 = vmatpush3.msra.mxu0 %v17294_v54  ;;  %v14006_v24 = vpack.c.bf16 %v187_v42, %v186_v14 }
 0x703   : > { %v8071_v43 = vpop.xlane.xlu1 %8070  ;;  %13646 = vmatprep.subr.mxu0 %v18480_v60  ;;  %13639 = vmatmul.mubr.msk.f32.vlgmr.msra.gmra.mrb[102].mxu0 %vm265_vm0, %v8119_v50 }
 0x704   : > { %v17320_v55 = vmul.f32 %v17317_v40, %v8071_v43  ;;  %13648 = vmatprep.mubr.msk.f32.mxu0 %vm14975_vm1, %v18480_v60  ;;  %14106 = vmatprep.subr.bf16.mxu1 %v14006_v24 }
 0x705   : > { %14107 = vmatpush3.bf16.msra.mxu1 %v14006_v24 }
 0x706   : > { %13647 = vmatpush3.msra.mxu0 %v17320_v55 }
 0x707   : > { %v8077_v53 = vpop.xlane.xlu1 %8076  ;;  %13656 = vmatprep.subr.mxu0 %v18480_v60  ;;  %13649 = vmatmul.mubr.msk.f32.vlgmr.msra.gmra.mrb[104].mxu0 %vm265_vm0, %v8121_v47 }
 0x708   : > { %v17333_v52 = vmul.f32 %v17330_v16, %v8077_v53  ;;  %13658 = vmatprep.mubr.msk.f32.mxu0 %vm14975_vm1, %v18480_v60 }
 0x70a   : > { %13657 = vmatpush3.msra.mxu0 %v17333_v52 }
 0x70b   : > { %v8083_v34 = vpop.xlane.xlu1 %8082  ;;  %13666 = vmatprep.subr.mxu0 %v18480_v60  ;;  %13659 = vmatmul.mubr.msk.f32.vlgmr.msra.gmra.mrb[106].mxu0 %vm265_vm0, %v8123_v25 }
 0x70c   : > { %v17346_v6 = vmul.f32 %v17343_v26, %v8083_v34  ;;  %13668 = vmatprep.mubr.msk.f32.mxu0 %vm14975_vm1, %v18480_v60 }
 0x70e   : > { %13667 = vmatpush3.msra.mxu0 %v17346_v6 }
 0x70f   : > { %v8089_v33 = vpop.xlane.xlu1 %8088  ;;  %13676 = vmatprep.subr.mxu0 %v18480_v60  ;;  %13669 = vmatmul.mubr.msk.f32.vlgmr.msra.gmra.mrb[108].mxu0 %vm265_vm0, %v8125_v10 }
 0x710   : > { %v17359_v11 = vmul.f32 %v17356_v62, %v8089_v33  ;;  %13678 = vmatprep.mubr.msk.f32.mxu0 %vm14975_vm1, %v18480_v60 }
 0x712   : > { %13677 = vmatpush3.msra.mxu0 %v17359_v11 }
 0x713   : > { %v8095_v13 = vpop.xlane.xlu1 %8094  ;;  %13686 = vmatprep.subr.mxu0 %v18480_v60  ;;  %13679 = vmatmul.mubr.msk.f32.vlgmr.msra.gmra.mrb[110].mxu0 %vm265_vm0, %v8127_v46 }
 0x714   : > { %v17372_v12 = vmul.f32 %v17369_v57, %v8095_v13  ;;  %13688 = vmatprep.mubr.msk.f32.mxu0 %vm14975_vm1, %v18480_v60 }
 0x716   : > { %13687 = vmatpush3.msra.mxu0 %v17372_v12 }
 0x717   : > { %13689 = vmatmul.mubr.msk.f32.vlgmr.msra.gmra.mrb[112].mxu0 %vm265_vm0, %v8129_v48  ;;  %14007 = vmatprep.subr.bf16.mxu0 %v14006_v24 }
 0x718   : > { %14009 = vmatpush3.bf16.msra.mxu0 %v14006_v24 }
 0x747   : > { %v8305_v45 = vpop.f32.mrb[78].mxu1 }
 0x748   : > { %10533 = vrot.lane.b32.xlu0 %v8305_v45, %s14976_s30  ;;  %v13545_v4 = vpop.f32.mrb[79].mxu1 }
 0x75c   : > { %v8451_v49 = vpop.f32.mrb[80].mxu1 }
 0x75d   : > { %v13555_v2 = vpop.f32.mrb[81].mxu1 }
 0x763   : > { %v8597_v18 = vpop.f32.mrb[82].mxu1 }
 0x764   : > { %v13565_v60 = vpop.f32.mrb[83].mxu1 }
 0x765   : > { %v8232_v50 = vpop.f32.mrb[82].mxu0 }
 0x766   : > { %10531 = vrot.lane.b32.xlu1 %v8232_v50, %s14976_s30  ;;  %v13540_v43 = vpop.f32.mrb[83].mxu0 }
 0x769   : > { %v8743_v47 = vpop.f32.mrb[84].mxu1 }
 0x76a   : > { %v13575_v53 = vpop.f32.mrb[85].mxu1 }
 0x76b   : > { %v8378_v25 = vpop.f32.mrb[84].mxu0 }
 0x76c   : > { %10535 = vrot.lane.b32.xlu1 %v8378_v25, %s14976_s30  ;;  %v13550_v34 = vpop.f32.mrb[85].mxu0 }
 0x770   : > { %10537 = vrot.lane.b32.xlu1 %v8451_v49, %s14976_s30 }
 0x773   : > { %v8889_v10 = vpop.f32.mrb[86].mxu1 }
 0x774   : > { %10541 = vrot.lane.b32.xlu1 %v8597_v18, %s14976_s30  ;;  %v13585_v33 = vpop.f32.mrb[87].mxu1 }
 0x778   : > { %10545 = vrot.lane.b32.xlu1 %v8743_v47, %s14976_s30 }
 0x77b   : > { %v8524_v46 = vpop.f32.mrb[86].mxu0 }
 0x77c   : > { %10549 = vrot.lane.b32.xlu1 %v8889_v10, %s14976_s30  ;;  %10539 = vrot.lane.b32.xlu0 %v8524_v46, %s14976_s30  ;;  %v13560_v13 = vpop.f32.mrb[87].mxu0 }
 0x77d   : > { %v9035_v48 = vpop.f32.mrb[88].mxu1 }
 0x77e   : > { %v13595_v45 = vpop.f32.mrb[89].mxu1 }
 0x780   : > { %10553 = vrot.lane.b32.xlu1 %v9035_v48, %s14976_s30 }
 0x784   : > { %v8670_v4 = vpop.f32.mrb[88].mxu0 }
 0x785   : > { %10543 = vrot.lane.b32.xlu0 %v8670_v4, %s14976_s30  ;;  %v13570_v49 = vpop.f32.mrb[89].mxu0 }
 0x78b   : > { %v9181_v2 = vpop.f32.mrb[90].mxu1 }
 0x78c   : > { %v13605_v14 = vpop.f32.mrb[91].mxu1  ;;  %10557 = vrot.lane.b32.xlu1 %v9181_v2, %s14976_s30 }
 0x78e   : > { %v8816_v18 = vpop.f32.mrb[90].mxu0 }
 0x78f   : > { %10547 = vrot.lane.b32.xlu0 %v8816_v18, %s14976_s30  ;;  %v13580_v42 = vpop.f32.mrb[91].mxu0 }
 0x791   : > { %v9327_v60 = vpop.f32.mrb[92].mxu1 }
 0x792   : > { %v13615_v24 = vpop.f32.mrb[93].mxu1  ;;  %10561 = vrot.lane.b32.xlu1 %v9327_v60, %s14976_s30 }
 0x7a8   : > { %v9473_v50 = vpop.f32.mrb[94].mxu1 }
 0x7a9   : > { %v13625_v43 = vpop.f32.mrb[95].mxu1  ;;  %10565 = vrot.lane.b32.xlu1 %v9473_v50, %s14976_s30 }
 0x7aa   : > { %v8962_v47 = vpop.f32.mrb[92].mxu0 }
 0x7ab   : > { %10551 = vrot.lane.b32.xlu0 %v8962_v47, %s14976_s30  ;;  %v13590_v53 = vpop.f32.mrb[93].mxu0 }
 0x7b2   : > { %v9619_v25 = vpop.f32.mrb[96].mxu1 }
 0x7b3   : > { %v13635_v34 = vpop.f32.mrb[97].mxu1  ;;  %10569 = vrot.lane.b32.xlu1 %v9619_v25, %s14976_s30 }
 0x7bf   : > { %v9765_v10 = vpop.f32.mrb[98].mxu1 }
 0x7c0   : > { %v13645_v33 = vpop.f32.mrb[99].mxu1  ;;  %10573 = vrot.lane.b32.xlu1 %v9765_v10, %s14976_s30 }
 0x7c3   : > { %v9911_v13 = vpop.f32.mrb[100].mxu1 }
 0x7c4   : > { %v13655_v48 = vpop.f32.mrb[101].mxu1  ;;  %10577 = vrot.lane.b32.xlu1 %v9911_v13, %s14976_s30 }
 0x7c6   : > { %v9108_v46 = vpop.f32.mrb[94].mxu0 }
 0x7c7   : > { %10555 = vrot.lane.b32.xlu0 %v9108_v46, %s14976_s30  ;;  %v13600_v45 = vpop.f32.mrb[95].mxu0  ;;  %v10534_v46 = vpop.permute.xlu0 %10533 }
 0x7c8   : > { %v10057_v4 = vpop.f32.mrb[102].mxu1 }
 0x7c9   : > { %v13665_v49 = vpop.f32.mrb[103].mxu1  ;;  %10581 = vrot.lane.b32.xlu1 %v10057_v4, %s14976_s30  ;;  %v10628_v4 = vsel %vm265_vm0, %v17010_v63, %v10534_v46 }
 0x7ca   : > { %v9254_v2 = vpop.f32.mrb[96].mxu0 }
 0x7cb   : > { %10559 = vrot.lane.b32.xlu0 %v9254_v2, %s14976_s30  ;;  %v13610_v14 = vpop.f32.mrb[97].mxu0 }
 0x7cc   : > { %v10203_v18 = vpop.f32.mrb[104].mxu1 }
 0x7cd   : > { %v13675_v42 = vpop.f32.mrb[105].mxu1  ;;  %10585 = vrot.lane.b32.xlu1 %v10203_v18, %s14976_s30 }
 0x7ce   : > { %v9400_v60 = vpop.f32.mrb[98].mxu0 }
 0x7cf   : > { %10563 = vrot.lane.b32.xlu0 %v9400_v60, %s14976_s30  ;;  %v13620_v24 = vpop.f32.mrb[99].mxu0 }
 0x7d0   : > { %v10349_v50 = vpop.f32.mrb[106].mxu1 }
 0x7d1   : > { %v13685_v47 = vpop.f32.mrb[107].mxu1  ;;  %10589 = vrot.lane.b32.xlu1 %v10349_v50, %s14976_s30 }
 0x7d2   : > { %v9546_v43 = vpop.f32.mrb[100].mxu0 }
 0x7d3   : > { %10567 = vrot.lane.b32.xlu0 %v9546_v43, %s14976_s30  ;;  %v13630_v53 = vpop.f32.mrb[101].mxu0 }
 0x7d4   : > { %v10495_v25 = vpop.f32.mrb[108].mxu1  ;;  %v227_v53 = vld [vmem:[%s18437_s1 + $0x198] sm:$0xff] }
 0x7d5   : > { %v13695_v10 = vpop.f32.mrb[109].mxu1  ;;  %10593 = vrot.lane.b32.xlu1 %v10495_v25, %s14976_s30 }
 0x7d6   : > { %v9692_v34 = vpop.f32.mrb[102].mxu0 }
 0x7d7   : > { %10571 = vrot.lane.b32.xlu0 %v9692_v34, %s14976_s30  ;;  %v13640_v33 = vpop.f32.mrb[103].mxu0  ;;  %v189_v34 = vld [vmem:[%s18437_s1 + $0x68] sm:$0xff] }
 0x7d8   : > { %v10532_v13 = vpop.permute.xlu1 %10531 }
 0x7d9   : > { %v10627_v45 = vsel %vm265_vm0, %v17057_v15, %v10532_v13 }
 0x7da   : > { %v9838_v48 = vpop.f32.mrb[104].mxu0  ;;  %13700 = vmatprep.mubr.msk.f32.mxu0 %vm10663_vm2, %v10627_v45 }
 0x7db   : > { %10575 = vrot.lane.b32.xlu0 %v9838_v48, %s14976_s30  ;;  %v13650_v49 = vpop.f32.mrb[105].mxu0  ;;  %13701 = vmatmul.mubr.msk.f32.vlgmr.msra.gmra.mrb[114].mxu0 %vm10663_vm2, %v10628_v4 }
 0x7de   : > { %v9984_v2 = vpop.f32.mrb[106].mxu0  ;;  %v10536_v18 = vpop.permute.xlu1 %10535 }
 0x7df   : > { %10579 = vrot.lane.b32.xlu0 %v9984_v2, %s14976_s30  ;;  %v13660_v14 = vpop.f32.mrb[107].mxu0  ;;  %v10629_v42 = vsel %vm265_vm0, %v17077_v39, %v10536_v18 }
 0x7e0   : > { %13703 = vmatprep.mubr.msk.f32.mxu0 %vm10663_vm2, %v10629_v42 }
 0x7e2   : > { %v10130_v15 = vpop.f32.mrb[108].mxu0  ;;  %v10538_v60 = vpop.permute.xlu1 %10537 }
 0x7e3   : > { %10583 = vrot.lane.b32.xlu0 %v10130_v15, %s14976_s30  ;;  %v13670_v63 = vpop.f32.mrb[109].mxu0  ;;  %v10630_v24 = vsel %vm265_vm0, %v17041_v32, %v10538_v60  ;;  %v190_v32 = vld [vmem:[%s18437_s1 + $0x70] sm:$0xff] }
 0x7e4   : > { %13704 = vmatmul.mubr.msk.f32.gmra.mrb[116].mxu0 %vm10663_vm2, %v10630_v24  ;;  %v14010_v10 = vpack.c.bf16 %v190_v32, %v189_v34 }
 0x7e6   : > { %v10276_v50 = vpop.f32.mrb[110].mxu0  ;;  %v10542_v25 = vpop.permute.xlu1 %10541  ;;  %14011 = vmatprep.subr.bf16.mxu1 %v14010_v10 }
 0x7e7   : > { %10587 = vrot.lane.b32.xlu0 %v10276_v50, %s14976_s30  ;;  %v13680_v43 = vpop.f32.mrb[111].mxu0  ;;  %v10632_v46 = vsel %vm265_vm0, %v17051_v27, %v10542_v25 }
 0x7ea   : > { %v10422_v47 = vpop.f32.mrb[112].mxu0  ;;  %v10546_v48 = vpop.permute.xlu1 %10545 }
 0x7eb   : > { %10591 = vrot.lane.b32.xlu0 %v10422_v47, %s14976_s30  ;;  %v13690_v39 = vpop.f32.mrb[113].mxu0  ;;  %v10634_v49 = vsel %vm265_vm0, %v17068_v23, %v10546_v48  ;;  %s18394_s30 = scalar_lea.hbm %s18438_s2, %s12711_s24 }
 0x7ec   : > { %v193_v39 = vld [vmem:[%s18437_s1 + $0x88] sm:$0xff] }
 0x7ee   : > { %v10540_v33 = vpop.permute.xlu0 %10539  ;;  %v10550_v27 = vpop.permute.xlu1 %10549 }
 0x7ef   : > { %12254 = vperm.xlu0 %14247, %v227_v53   ;;  %v10631_v13 = vsel %vm265_vm0, %v17101_v59, %v10540_v33  ;;  %v10636_v14 = vsel %vm265_vm0, %v17091_v17, %v10550_v27  ;;  %v194_v53 = vld [vmem:[%s18437_s1 + $0x90] sm:$0xff]  ;;  %v195_v33 = vld [vmem:[%s18437_s1 + $0x98] sm:$0xff] }
 0x7f0   : > { %13706 = vmatprep.mubr.msk.f32.mxu0 %vm10663_vm2, %v10631_v13 }
 0x7f1   : > { %13707 = vmatmul.mubr.msk.f32.gmra.mrb[118].mxu0 %vm10663_vm2, %v10632_v46  ;;  %v196_v46 = vld [vmem:[%s18437_s1 + $0xa0] sm:$0xff] }
 0x7f7   : > { %v10544_v45 = vpop.permute.xlu0 %10543 }
 0x7f8   : > { %v10633_v4 = vsel %vm265_vm0, %v17121_v22, %v10544_v45  ;;  %v10554_v22 = vpop.permute.xlu1 %10553  ;;  %v197_v45 = vld [vmem:[%s18437_s1 + $0xa8] sm:$0xff] }
 0x7f9   : > { %13709 = vmatprep.mubr.msk.f32.mxu0 %vm10663_vm2, %v10633_v4  ;;  %v10638_v42 = vsel %vm265_vm0, %v17106_v35, %v10554_v22  ;;  %v198_v4 = vld [vmem:[%s18437_s1 + $0xb0] sm:$0xff] }
 0x7fa   : > { %13710 = vmatmul.mubr.msk.f32.gmra.mrb[120].mxu0 %vm10663_vm2, %v10634_v49 }
 0x801   : > { %v10548_v2 = vpop.permute.xlu0 %10547 }
 0x802   : > { %v10635_v59 = vsel %vm265_vm0, %v17139_v37, %v10548_v2  ;;  %v10558_v37 = vpop.permute.xlu1 %10557 }
 0x803   : > { %13712 = vmatprep.mubr.msk.f32.mxu0 %vm10663_vm2, %v10635_v59  ;;  %v10640_v63 = vsel %vm265_vm0, %v17129_v7, %v10558_v37  ;;  %v192_v7 = vld [vmem:[%s18437_s1 + $0x80] sm:$0xff]  ;;  %v199_v59 = vld [vmem:[%s18437_s1 + $0xb8] sm:$0xff]  ;;  %v202_v37 = vld [vmem:[%s18437_s1 + $0xd0] sm:$0xff] }
 0x804   : > { %13713 = vmatmul.mubr.msk.f32.gmra.mrb[122].mxu0 %vm10663_vm2, %v10636_v14  ;;  %v200_v14 = vld [vmem:[%s18437_s1 + $0xc0] sm:$0xff] }
 0x81d   : > { %v10552_v18 = vpop.permute.xlu0 %10551 }
 0x81e   : > { %v10637_v23 = vsel %vm265_vm0, %v17166_v0, %v10552_v18  ;;  %v10562_v0 = vpop.permute.xlu1 %10561 }
 0x81f   : > { %13715 = vmatprep.mubr.msk.f32.mxu0 %vm10663_vm2, %v10637_v23  ;;  %v10642_v24 = vsel %vm265_vm0, %v17149_v44, %v10562_v0  ;;  %v203_v0 = vld [vmem:[%s18437_s1 + $0xd8] sm:$0xff] }
 0x820   : > { %13716 = vmatmul.mubr.msk.f32.gmra.mrb[124].mxu0 %vm10663_vm2, %v10638_v42  ;;  %v201_v42 = vld [vmem:[%s18437_s1 + $0xc8] sm:$0xff] }
 0x822   : > { %v10566_v50 = vpop.permute.xlu1 %10565 }
 0x823   : > { %v10644_v44 = vsel %vm265_vm0, %v17161_v5, %v10566_v50  ;;  %v14018_v5 = vpack.c.bf16 %v194_v53, %v193_v39 }
 0x826   : > { %v10570_v25 = vpop.permute.xlu1 %10569 }
 0x827   : > { %v10646_v32 = vsel %vm265_vm0, %v17181_v51, %v10570_v25  ;;  %v14022_v51 = vpack.c.bf16 %v196_v46, %v195_v33 }
 0x832   : > { %v10574_v13 = vpop.permute.xlu1 %10573 }
 0x833   : > { %v10648_v48 = vsel %vm265_vm0, %v17191_v9, %v10574_v13  ;;  %v14026_v9 = vpack.c.bf16 %v198_v4, %v197_v45 }
 0x836   : > { %v10578_v49 = vpop.permute.xlu1 %10577 }
 0x837   : > { %v10650_v2 = vsel %vm265_vm0, %v17199_v19, %v10578_v49  ;;  %v14030_v19 = vpack.c.bf16 %v200_v14, %v199_v59 }
 0x839   : > { %v10556_v15 = vpop.permute.xlu0 %10555 }
 0x83a   : > { %v10639_v17 = vsel %vm265_vm0, %v17202_v29, %v10556_v15  ;;  %v191_v29 = vld [vmem:[%s18437_s1 + $0x78] sm:$0xff] }
 0x83b   : > { %13718 = vmatprep.mubr.msk.f32.mxu0 %vm10663_vm2, %v10639_v17  ;;  %v14014_v47 = vpack.c.bf16 %v192_v7, %v191_v29  ;;  %v10582_v22 = vpop.permute.xlu1 %10581 }
 0x83c   : > { %13719 = vmatmul.mubr.msk.f32.gmra.mrb[126].mxu0 %vm10663_vm2, %v10640_v63  ;;  %v10652_v23 = vsel %vm265_vm0, %v17215_v58, %v10582_v22  ;;  %v14034_v58 = vpack.c.bf16 %v202_v37, %v201_v42 }
 0x83d   : > { %v10560_v60 = vpop.permute.xlu0 %10559 }
 0x83e   : > { %v10641_v35 = vsel %vm265_vm0, %v17224_v28, %v10560_v60  ;;  %v204_v60 = vld [vmem:[%s18437_s1 + $0xe0] sm:$0xff] }
 0x83f   : > { %13721 = vmatprep.mubr.msk.f32.mxu0 %vm10663_vm2, %v10641_v35  ;;  %v10586_v15 = vpop.permute.xlu1 %10585 }
 0x840   : > { %13722 = vmatmul.mubr.msk.f32.gmra.mrb[128].mxu0 %vm10663_vm2, %v10642_v24  ;;  %v10654_v63 = vsel %vm265_vm0, %v17241_v61, %v10586_v15  ;;  %v14038_v61 = vpack.c.bf16 %v204_v60, %v203_v0  ;;  %v213_v60 = vld [vmem:[%s18437_s1 + $0x128] sm:$0xff] }
 0x841   : > { %v10564_v43 = vpop.permute.xlu0 %10563 }
 0x842   : > { %v10643_v28 = vsel %vm265_vm0, %v17250_v3, %v10564_v43 }
 0x843   : > { %13724 = vmatprep.mubr.msk.f32.mxu1 %vm10663_vm2, %v10643_v28  ;;  %v10590_v35 = vpop.permute.xlu1 %10589 }
 0x844   : > { %13725 = vmatmul.mubr.msk.f32.vlgmr.msra.gmra.mrb[110].mxu1 %vm10663_vm2, %v10644_v44  ;;  %v10656_v29 = vsel %vm265_vm0, %v17267_v8, %v10590_v35  ;;  %v17568_v8 = vld [vmem:[%s18437_s1 + $0x60] ss:$0 sm:$0xff] }
 0x845   : > { %v10568_v34 = vpop.permute.xlu0 %10567  ;;  %14013 = vmatpush3.bf16.msra.mxu1 %v14010_v10 }
 0x846   : > { %v10645_v3 = vsel %vm265_vm0, %v17274_v56, %v10568_v34  ;;  %14015 = vmatprep.subr.bf16.mxu1 %v14014_v47 }
 0x847   : > { %13727 = vmatprep.mubr.msk.f32.mxu1 %vm10663_vm2, %v10645_v3  ;;  %v10594_v7 = vpop.permute.xlu1 %10593 }
 0x848   : > { %13728 = vmatmul.mubr.msk.f32.gmra.mrb[112].mxu1 %vm10663_vm2, %v10646_v32  ;;  %v10658_v28 = vsel %vm265_vm0, %v17300_v21, %v10594_v7  ;;  %v217_v7 = vld [vmem:[%s18437_s1 + $0x148] sm:$0xff] }
 0x849   : > { %v10572_v10 = vpop.permute.xlu0 %10571  ;;  %14017 = vmatpush3.bf16.msra.mxu1 %v14014_v47 }
 0x84a   : > { %v10647_v56 = vsel %vm265_vm0, %v17294_v54, %v10572_v10  ;;  %14019 = vmatprep.subr.bf16.mxu1 %v14018_v5 }
 0x84b   : > { %13730 = vmatprep.mubr.msk.f32.mxu1 %vm10663_vm2, %v10647_v56 }
 0x84c   : > { %13731 = vmatmul.mubr.msk.f32.gmra.mrb[114].mxu1 %vm10663_vm2, %v10648_v48 }
 0x84d   : > { %v10576_v27 = vpop.permute.xlu0 %10575  ;;  %14021 = vmatpush3.bf16.msra.mxu1 %v14018_v5  ;;  %v206_v5 = vld [vmem:[%s18437_s1 + $0xf0] sm:$0xff] }
 0x84e   : > { %v10649_v54 = vsel %vm265_vm0, %v17320_v55, %v10576_v27  ;;  %14023 = vmatprep.subr.bf16.mxu1 %v14022_v51 }
 0x84f   : > { %13733 = vmatprep.mubr.msk.f32.mxu1 %vm10663_vm2, %v10649_v54 }
 0x850   : > { %13734 = vmatmul.mubr.msk.f32.gmra.mrb[116].mxu1 %vm10663_vm2, %v10650_v2 }
 0x851   : > { %v10580_v18 = vpop.permute.xlu0 %10579  ;;  %14025 = vmatpush3.bf16.msra.mxu1 %v14022_v51 }
 0x852   : > { %v10651_v55 = vsel %vm265_vm0, %v17333_v52, %v10580_v18  ;;  %14027 = vmatprep.subr.bf16.mxu1 %v14026_v9 }
 0x853   : > { %13736 = vmatprep.mubr.msk.f32.mxu1 %vm10663_vm2, %v10651_v55 }
 0x854   : > { %13737 = vmatmul.mubr.msk.f32.gmra.mrb[118].mxu1 %vm10663_vm2, %v10652_v23 }
 0x855   : > { %v10584_v17 = vpop.permute.xlu0 %10583  ;;  %14029 = vmatpush3.bf16.msra.mxu1 %v14026_v9 }
 0x856   : > { %v10653_v52 = vsel %vm265_vm0, %v17346_v6, %v10584_v17  ;;  %14031 = vmatprep.subr.bf16.mxu1 %v14030_v19 }
 0x857   : > { %13739 = vmatprep.mubr.msk.f32.mxu1 %vm10663_vm2, %v10653_v52  ;;  %v210_v52 = vld [vmem:[%s18437_s1 + $0x110] sm:$0xff] }
 0x858   : > { %13740 = vmatmul.mubr.msk.f32.gmra.mrb[120].mxu1 %vm10663_vm2, %v10654_v63  ;;  %v212_v63 = vld [vmem:[%s18437_s1 + $0x120] sm:$0xff] }
 0x859   : > { %v10588_v24 = vpop.permute.xlu0 %10587  ;;  %14033 = vmatpush3.bf16.msra.mxu1 %v14030_v19  ;;  %v14046_v35 = vpack.c.bf16 %v213_v60, %v212_v63 }
 0x85a   : > { %v10655_v6 = vsel %vm265_vm0, %v17359_v11, %v10588_v24  ;;  %14035 = vmatprep.subr.bf16.mxu1 %v14034_v58  ;;  %v214_v24 = vld [vmem:[%s18437_s1 + $0x130] sm:$0xff] }
 0x85b   : > { %13742 = vmatprep.mubr.msk.f32.mxu1 %vm10663_vm2, %v10655_v6  ;;  %v215_v6 = vld [vmem:[%s18437_s1 + $0x138] sm:$0xff] }
 0x85c   : > { %13743 = vmatmul.mubr.msk.f32.gmra.mrb[122].mxu1 %vm10663_vm2, %v10656_v29  ;;  %v216_v29 = vld [vmem:[%s18437_s1 + $0x140] sm:$0xff] }
 0x85d   : > { %v10592_v50 = vpop.permute.xlu0 %10591  ;;  %14037 = vmatpush3.bf16.msra.mxu1 %v14034_v58  ;;  %v211_v58 = vld [vmem:[%s18437_s1 + $0x118] sm:$0xff] }
 0x85e   : > { %v10657_v43 = vsel %vm265_vm0, %v17372_v12, %v10592_v50  ;;  %14039 = vmatprep.subr.bf16.mxu1 %v14038_v61  ;;  %v14042_v0 = vpack.c.bf16 %v211_v58, %v210_v52  ;;  %v14054_v50 = vpack.c.bf16 %v217_v7, %v216_v29 }
 0x85f   : > { %13745 = vmatprep.mubr.msk.f32.mxu1 %vm10663_vm2, %v10657_v43  ;;  %v218_v43 = vld [vmem:[%s18437_s1 + $0x150] sm:$0xff] }
 0x860   : > { %13746 = vmatmul.mubr.msk.f32.gmra.mrb[124].mxu1 %vm10663_vm2, %v10658_v28  ;;  %14043 = vmatprep.subr.bf16.mxu0 %v14042_v0  ;;  %v219_v28 = vld [vmem:[%s18437_s1 + $0x158] sm:$0xff] }
 0x861   : > { %14041 = vmatpush3.bf16.msra.mxu1 %v14038_v61  ;;  %14045 = vmatpush3.bf16.msra.mxu0 %v14042_v0  ;;  %v14050_v61 = vpack.c.bf16 %v215_v6, %v214_v24 }
 0x862   : > { %13828 = vmatprep.subr.mxu1 %v206_v5  ;;  %14047 = vmatprep.subr.bf16.mxu0 %v14046_v35 }
 0x865   : > { %14049 = vmatpush3.bf16.msra.mxu0 %v14046_v35 }
 0x866   : > { %14051 = vmatprep.subr.bf16.mxu0 %v14050_v61 }
 0x869   : > { %14053 = vmatpush3.bf16.msra.mxu0 %v14050_v61 }
 0x86a   : > { %14055 = vmatprep.subr.bf16.mxu0 %v14054_v50 }
 0x86d   : > { %14057 = vmatpush3.bf16.msra.mxu0 %v14054_v50 }
 0x8ae   : > { %v13702_v11 = vpop.f32.mrb[114].mxu0 }
 0x8af   : > { %v10832_v47 = vadd.f32 %v13702_v11, %v17568_v8  ;;  %v10826_v44 = vpop.f32.mrb[115].mxu0  ;;  %v14058_v11 = vpack.c.bf16 %v219_v28, %v218_v43 }
 0x8b0   : > { %v10827_v12 = vadd.f32 %v17568_v8, %v10826_v44  ;;  %v221_v44 = vld [vmem:[%s18437_s1 + $0x168] sm:$0xff] }
 0x8b1   : > { %v10986_v53 = vmax.f32 %v10832_v47, 0.0  ;;  %v220_v47 = vld [vmem:[%s18437_s1 + $0x160] sm:$0xff]  ;;  %14059 = vmatprep.subr.bf16.mxu0 %v14058_v11 }
 0x8b2   : > { %v10985_v39 = vmax.f32 %v10827_v12, 0.0  ;;  %v14062_v12 = vpack.c.bf16 %v221_v44, %v220_v47  ;;  %14061 = vmatpush3.bf16.msra.mxu0 %v14058_v11 }
 0x8b4   : > { %13780 = vmatprep.mubr.f32.mxu1 %v10985_v39  ;;  %14063 = vmatprep.subr.bf16.mxu0 %v14062_v12 }
 0x8b5   : > { %13781 = vmatmul.mubr.f32.vlgmr.msra.gmra.mrb[126].mxu1 %v10986_v53 }
 0x8b6   : > { %13829 = vmatpush3.msra.mxu1 %v206_v5  ;;  %14065 = vmatpush3.bf16.msra.mxu0 %v14062_v12 }
 0x8b7   : > { %v13705_v21 = vpop.f32.mrb[116].mxu0 }
 0x8b8   : > { %v10842_v25 = vadd.f32 %v13705_v21, %v17568_v8  ;;  %v10836_v34 = vpop.f32.mrb[117].mxu0 }
 0x8b9   : > { %v10837_v3 = vadd.f32 %v17568_v8, %v10836_v34 }
 0x8ba   : > { %v10988_v33 = vmax.f32 %v10842_v25, 0.0 }
 0x8bb   : > { %v10987_v32 = vmax.f32 %v10837_v3, 0.0 }
 0x8bd   : > { %13783 = vmatprep.mubr.f32.mxu1 %v10987_v32 }
 0x8be   : > { %13784 = vmatmul.mubr.f32.gmra.mrb[128].mxu1 %v10988_v33 }
 0x8c4   : > { %v13708_v46 = vpop.f32.mrb[118].mxu0 }
 0x8c5   : > { %v10852_v13 = vadd.f32 %v13708_v46, %v17568_v8  ;;  %v10846_v10 = vpop.f32.mrb[119].mxu0 }
 0x8c6   : > { %v10847_v56 = vadd.f32 %v17568_v8, %v10846_v10 }
 0x8c7   : > { %v10990_v48 = vmax.f32 %v10852_v13, 0.0 }
 0x8c8   : > { %v10989_v51 = vmax.f32 %v10847_v56, 0.0 }
 0x8ca   : > { %13786 = vmatprep.mubr.f32.mxu1 %v10989_v51 }
 0x8cb   : > { %13787 = vmatmul.mubr.f32.gmra.mrb[130].mxu1 %v10990_v48 }
 0x8cd   : > { %v13711_v45 = vpop.f32.mrb[120].mxu0 }
 0x8ce   : > { %v10862_v4 = vadd.f32 %v13711_v45, %v17568_v8  ;;  %v10856_v49 = vpop.f32.mrb[121].mxu0 }
 0x8cf   : > { %v10857_v27 = vadd.f32 %v17568_v8, %v10856_v49 }
 0x8d0   : > { %v10992_v9 = vmax.f32 %v10862_v4, 0.0 }
 0x8d1   : > { %v10991_v54 = vmax.f32 %v10857_v27, 0.0 }
 0x8d3   : > { %13789 = vmatprep.mubr.f32.mxu1 %v10991_v54 }
 0x8d4   : > { %13790 = vmatmul.mubr.f32.gmra.mrb[132].mxu1 %v10992_v9 }
 0x8d7   : > { %v13714_v2 = vpop.f32.mrb[122].mxu0 }
 0x8d8   : > { %v10872_v59 = vadd.f32 %v13714_v2, %v17568_v8  ;;  %v10866_v14 = vpop.f32.mrb[123].mxu0 }
 0x8d9   : > { %v10867_v22 = vadd.f32 %v17568_v8, %v10866_v14 }
 0x8da   : > { %v10994_v55 = vmax.f32 %v10872_v59, 0.0 }
 0x8db   : > { %v10993_v18 = vmax.f32 %v10867_v22, 0.0 }
 0x8dd   : > { %13792 = vmatprep.mubr.f32.mxu1 %v10993_v18 }
 0x8de   : > { %13793 = vmatmul.mubr.f32.gmra.mrb[134].mxu1 %v10994_v55 }
 0x8f3   : > { %v13717_v19 = vpop.f32.mrb[124].mxu0 }
 0x8f4   : > { %v10882_v23 = vadd.f32 %v13717_v19, %v17568_v8  ;;  %v10876_v42 = vpop.f32.mrb[125].mxu0 }
 0x8f5   : > { %v10877_v37 = vadd.f32 %v17568_v8, %v10876_v42 }
 0x8f6   : > { %v10996_v17 = vmax.f32 %v10882_v23, 0.0 }
 0x8f7   : > { %v10995_v15 = vmax.f32 %v10877_v37, 0.0 }
 0x8f9   : > { %13795 = vmatprep.mubr.f32.mxu1 %v10995_v15 }
 0x8fa   : > { %13796 = vmatmul.mubr.f32.gmra.mrb[136].mxu1 %v10996_v17 }
 0x90f   : > { %v13720_v39 = vpop.f32.mrb[126].mxu0 }
 0x910   : > { %v10892_v53 = vadd.f32 %v13720_v39, %v17568_v8  ;;  %v10886_v21 = vpop.f32.mrb[127].mxu0 }
 0x911   : > { %v10887_v25 = vadd.f32 %v17568_v8, %v10886_v21 }
 0x912   : > { %v10998_v3 = vmax.f32 %v10892_v53, 0.0 }
 0x913   : > { %v10997_v34 = vmax.f32 %v10887_v25, 0.0  ;;  %v13723_v5 = vpop.f32.mrb[128].mxu0 }
 0x914   : > { %v10902_v32 = vadd.f32 %v13723_v5, %v17568_v8  ;;  %v10896_v33 = vpop.f32.mrb[129].mxu0 }
 0x915   : > { %13798 = vmatprep.mubr.f32.mxu1 %v10997_v34  ;;  %v10897_v46 = vadd.f32 %v17568_v8, %v10896_v33 }
 0x916   : > { %13799 = vmatmul.mubr.f32.gmra.mrb[138].mxu1 %v10998_v3  ;;  %v11000_v56 = vmax.f32 %v10902_v32, 0.0 }
 0x917   : > { %v10999_v13 = vmax.f32 %v10897_v46, 0.0  ;;  %v13726_v10 = vpop.f32.mrb[110].mxu1  ;;  %v14889_v46 = vld [vmem:[%s15051_s29] sm:$0xff] }
 0x918   : > { %v10912_v51 = vadd.f32 %v13726_v10, %v17568_v8  ;;  %v10906_v48 = vpop.f32.mrb[111].mxu1  ;;  %v14891_v10 = vld [vmem:[%s15051_s29 + $0x10] sm:$0xff] }
 0x919   : > { %v10907_v45 = vadd.f32 %v17568_v8, %v10906_v48  ;;  %13801 = vmatprep.mubr.f32.mxu1 %v10999_v13  ;;  %v14890_v13 = vld [vmem:[%s15051_s29 + $0x8] sm:$0xff]  ;;  %v14895_v48 = vld [vmem:[%s15051_s29 + $0x30] sm:$0xff] }
 0x91a   : > { %13802 = vmatmul.mubr.f32.gmra.mrb[140].mxu1 %v11000_v56  ;;  %v11002_v27 = vmax.f32 %v10912_v51, 0.0  ;;  %v14893_v56 = vld [vmem:[%s15051_s29 + $0x20] sm:$0xff]  ;;  %v14894_v51 = vld [vmem:[%s15051_s29 + $0x28] sm:$0xff] }
 0x91b   : > { %v11001_v4 = vmax.f32 %v10907_v45, 0.0  ;;  %v13729_v49 = vpop.f32.mrb[112].mxu1  ;;  %v14896_v45 = vld [vmem:[%s15051_s29 + $0x38] sm:$0xff] }
 0x91c   : > { %v10922_v54 = vadd.f32 %v13729_v49, %v17568_v8  ;;  %v10916_v9 = vpop.f32.mrb[113].mxu1  ;;  %v14898_v49 = vld [vmem:[%s15051_s29 + $0x48] sm:$0xff] }
 0x91d   : > { %v10917_v2 = vadd.f32 %v17568_v8, %v10916_v9  ;;  %13804 = vmatprep.mubr.f32.mxu1 %v11001_v4  ;;  %v14897_v4 = vld [vmem:[%s15051_s29 + $0x40] sm:$0xff] }
 0x91e   : > { %13805 = vmatmul.mubr.f32.gmra.mrb[142].mxu1 %v11002_v27  ;;  %v11004_v22 = vmax.f32 %v10922_v54, 0.0  ;;  %v14899_v27 = vld [vmem:[%s15051_s29 + $0x50] sm:$0xff]  ;;  %v14900_v54 = vld [vmem:[%s15051_s29 + $0x58] sm:$0xff]  ;;  %v14901_v9 = vld [vmem:[%s15051_s29 + $0x60] sm:$0xff] }
 0x91f   : > { %v11003_v59 = vmax.f32 %v10917_v2, 0.0  ;;  %v13732_v14 = vpop.f32.mrb[114].mxu1  ;;  %v14902_v2 = vld [vmem:[%s15051_s29 + $0x68] sm:$0xff] }
 0x920   : > { %v10932_v18 = vadd.f32 %v13732_v14, %v17568_v8  ;;  %v10926_v55 = vpop.f32.mrb[115].mxu1  ;;  %v14904_v14 = vld [vmem:[%s15051_s29 + $0x88] sm:$0xff] }
 0x921   : > { %v10927_v19 = vadd.f32 %v17568_v8, %v10926_v55  ;;  %13807 = vmatprep.mubr.f32.mxu1 %v11003_v59  ;;  %v14903_v59 = vld [vmem:[%s15051_s29 + $0x78] sm:$0xff] }
 0x922   : > { %13808 = vmatmul.mubr.f32.gmra.mrb[144].mxu1 %v11004_v22  ;;  %v11006_v37 = vmax.f32 %v10932_v18, 0.0  ;;  %v14905_v22 = vld [vmem:[%s15051_s29 + $0x98] sm:$0xff] }
 0x923   : > { %v11005_v23 = vmax.f32 %v10927_v19, 0.0  ;;  %v13735_v42 = vpop.f32.mrb[116].mxu1  ;;  %v14907_v18 = vld [vmem:[%s15051_s29 + $0xb8] sm:$0xff] }
 0x924   : > { %v10942_v15 = vadd.f32 %v13735_v42, %v17568_v8  ;;  %v10936_v17 = vpop.f32.mrb[117].mxu1 }
 0x925   : > { %v10937_v52 = vadd.f32 %v17568_v8, %v10936_v17  ;;  %13810 = vmatprep.mubr.f32.mxu1 %v11005_v23 }
 0x926   : > { %13811 = vmatmul.mubr.f32.gmra.mrb[146].mxu1 %v11006_v37  ;;  %v11008_v0 = vmax.f32 %v10942_v15, 0.0 }
 0x927   : > { %v11007_v58 = vmax.f32 %v10937_v52, 0.0  ;;  %v13738_v63 = vpop.f32.mrb[118].mxu1 }
 0x928   : > { %v10952_v60 = vadd.f32 %v13738_v63, %v17568_v8  ;;  %v10946_v35 = vpop.f32.mrb[119].mxu1 }
 0x929   : > { %v10947_v24 = vadd.f32 %v17568_v8, %v10946_v35  ;;  %13813 = vmatprep.mubr.f32.mxu1 %v11007_v58 }
 0x92a   : > { %13814 = vmatmul.mubr.f32.gmra.mrb[148].mxu1 %v11008_v0  ;;  %v11010_v29 = vmax.f32 %v10952_v60, 0.0 }
 0x92b   : > { %v11009_v6 = vmax.f32 %v10947_v24, 0.0  ;;  %v13741_v61 = vpop.f32.mrb[120].mxu1 }
 0x92c   : > { %v10962_v7 = vadd.f32 %v13741_v61, %v17568_v8  ;;  %v10956_v50 = vpop.f32.mrb[121].mxu1 }
 0x92d   : > { %v10957_v43 = vadd.f32 %v17568_v8, %v10956_v50  ;;  %13816 = vmatprep.mubr.f32.mxu1 %v11009_v6 }
 0x92e   : > { %13817 = vmatmul.mubr.f32.gmra.mrb[150].mxu1 %v11010_v29  ;;  %v11012_v47 = vmax.f32 %v10962_v7, 0.0 }
 0x92f   : > { %v11011_v28 = vmax.f32 %v10957_v43, 0.0  ;;  %v13744_v11 = vpop.f32.mrb[122].mxu1 }
 0x930   : > { %v10972_v44 = vadd.f32 %v13744_v11, %v17568_v8  ;;  %v10966_v12 = vpop.f32.mrb[123].mxu1 }
 0x931   : > { %v10967_v39 = vadd.f32 %v17568_v8, %v10966_v12  ;;  %13819 = vmatprep.mubr.f32.mxu1 %v11011_v28 }
 0x932   : > { %13820 = vmatmul.mubr.f32.gmra.mrb[152].mxu1 %v11012_v47  ;;  %v11014_v25 = vmax.f32 %v10972_v44, 0.0 }
 0x933   : > { %v11013_v53 = vmax.f32 %v10967_v39, 0.0  ;;  %v13747_v21 = vpop.f32.mrb[124].mxu1 }
 0x934   : > { %v10982_v34 = vadd.f32 %v13747_v21, %v17568_v8  ;;  %v10976_v3 = vpop.f32.mrb[125].mxu1 }
 0x935   : > { %v10977_v5 = vadd.f32 %v17568_v8, %v10976_v3  ;;  %13822 = vmatprep.mubr.f32.mxu1 %v11013_v53  ;;  %v14892_v8 = vld [vmem:[%s15051_s29 + $0x18] sm:$0xff] }
 0x936   : > { %13823 = vmatmul.mubr.f32.gmra.mrb[154].mxu1 %v11014_v25  ;;  %v11016_v33 = vmax.f32 %v10982_v34, 0.0 }
 0x937   : > { %v11015_v32 = vmax.f32 %v10977_v5, 0.0 }
 0x939   : > { %13825 = vmatprep.mubr.f32.mxu1 %v11015_v32 }
 0x93a   : > { %13826 = vmatmul.mubr.f32.gmra.mrb[156].mxu1 %v11016_v33 }
 0x93b   : > { %13830 = vmatprep.mubr.msk.f32.mxu1 %vm265_vm0, %v14889_v46 }
 0x93e   : > { %13831 = vmatmul.mubr.msk.f32.vlgmr.msra.gmra.mrb[126].mxu1 %vm265_vm0, %v14890_v13 }
 0x93f   : > { %13833 = vmatprep.mubr.msk.f32.mxu1 %vm265_vm0, %v14891_v10 }
 0x942   : > { %13834 = vmatmul.mubr.msk.f32.gmra.mrb[128].mxu1 %vm265_vm0, %v14892_v8 }
 0x943   : > { %13836 = vmatprep.mubr.msk.f32.mxu1 %vm265_vm0, %v14893_v56 }
 0x946   : > { %13837 = vmatmul.mubr.msk.f32.gmra.mrb[130].mxu1 %vm265_vm0, %v14894_v51 }
 0x947   : > { %13839 = vmatprep.mubr.msk.f32.mxu1 %vm265_vm0, %v14895_v48 }
 0x94a   : > { %13840 = vmatmul.mubr.msk.f32.gmra.mrb[132].mxu1 %vm265_vm0, %v14896_v45 }
 0x94b   : > { %13842 = vmatprep.mubr.msk.f32.mxu1 %vm265_vm0, %v14897_v4 }
 0x94e   : > { %13843 = vmatmul.mubr.msk.f32.gmra.mrb[134].mxu1 %vm265_vm0, %v14898_v49 }
 0x94f   : > { %13845 = vmatprep.mubr.msk.f32.mxu1 %vm265_vm0, %v14899_v27 }
 0x952   : > { %13846 = vmatmul.mubr.msk.f32.gmra.mrb[136].mxu1 %vm265_vm0, %v14900_v54 }
 0x953   : > { %13848 = vmatprep.mubr.msk.f32.mxu1 %vm265_vm0, %v14901_v9 }
 0x956   : > { %13849 = vmatmul.mubr.msk.f32.gmra.mrb[138].mxu1 %vm265_vm0, %v14902_v2 }
 0x957   : > { %13851 = vmatprep.mubr.msk.f32.mxu1 %vm265_vm0, %v17221_v38  ;;  %v14906_v38 = vld [vmem:[%s15051_s29 + $0xa8] sm:$0xff] }
 0x95a   : > { %13852 = vmatmul.mubr.msk.f32.gmra.mrb[140].mxu1 %vm265_vm0, %v14903_v59 }
 0x95b   : > { %13854 = vmatprep.mubr.msk.f32.mxu1 %vm265_vm0, %v17247_v31  ;;  %v14908_v31 = vld [vmem:[%s15051_s29 + $0xc8] sm:$0xff]  ;;  %s12408_s29 = sshll.u32 %s135_s23, 4 }
 0x95c   : > { %s137_s25 = scalar_lea.vmem [#allocation2], %s12408_s29 }
 0x95d   : > { %s12345_s26 = sshll.u32 %s137_s25, 4  ;;  %s18396_s26 = int_to_ptr.vmem [resolvable:$true] %s12345_s26 }
 0x95e   : > { %13855 = vmatmul.mubr.msk.f32.gmra.mrb[142].mxu1 %vm265_vm0, %v14904_v14  ;;  %s14909_s3 = scalar_lea.vmem %s18396_s26, 256  ;;  %p14916_p0 = scmp.lt.s32.totalorder %s18396_s26, %s14914_s5 }
 0x95f   : > { %13857 = vmatprep.mubr.msk.f32.mxu1 %vm265_vm0, %v17271_v36  ;;  %v222_v36 = vld [vmem:[%s18437_s1 + $0x170] sm:$0xff]  ;;  %p14910_p11 = scmp.ne.s32.totalorder %s18396_s26, %s14909_s3  ;;  %p14917_p1 = scmp.lt.s32.totalorder %s14915_s6, %s14909_s3 }
 0x961   : > { %p14911_p12 = pnand %p14910_p11, %p15031_p5  ;;  %p14918_p2 = por %p14917_p1, %p14916_p0 }
 0x962   : > { %13858 = vmatmul.mubr.msk.f32.gmra.mrb[144].mxu1 %vm265_vm0, %v14905_v22 }
 0x963   : > { %13860 = vmatprep.mubr.msk.f32.mxu1 %vm265_vm0, %v17291_v20  ;;  %p14912_p13 = pneg %p14911_p12 }
 0x965   : > { %p14919_p3 = pnand %p14918_p2, %p14912_p13 }
 0x966   : > { %13861 = vmatmul.mubr.msk.f32.gmra.mrb[146].mxu1 %vm265_vm0, %v14906_v38 }
 0x967   : > { %13863 = vmatprep.mubr.msk.f32.mxu1 %vm265_vm0, %v17317_v40  ;;  %v224_v40 = vld [vmem:[%s18437_s1 + $0x180] sm:$0xff] }
 0x96a   : > { %13864 = vmatmul.mubr.msk.f32.gmra.mrb[148].mxu1 %vm265_vm0, %v14907_v18 }
 0x96b   : > { %13866 = vmatprep.mubr.msk.f32.mxu1 %vm265_vm0, %v17330_v16 }
 0x96e   : > { %13867 = vmatmul.mubr.msk.f32.gmra.mrb[150].mxu1 %vm265_vm0, %v14908_v31 }
 0x96f   : > { %13869 = vmatprep.mubr.msk.f32.mxu1 %vm265_vm0, %v17343_v26  ;;  %v12671_v26 = vld [vmem:[%s18437_s1 + $0xf8] ss:$0 sm:$0xff] }
 0x972   : > { %13870 = vmatmul.mubr.msk.f32.gmra.mrb[152].mxu1 %vm265_vm0, %v17238_v41  ;;  %v223_v41 = vld [vmem:[%s18437_s1 + $0x178] sm:$0xff] }
 0x973   : > { %13872 = vmatprep.mubr.msk.f32.mxu1 %vm265_vm0, %v17356_v62  ;;  %v14066_v20 = vpack.c.bf16 %v223_v41, %v222_v36 }
 0x975   : > { %14067 = vmatprep.subr.bf16.mxu0 %v14066_v20 }
 0x976   : > { %13873 = vmatmul.mubr.msk.f32.gmra.mrb[154].mxu1 %vm265_vm0, %v17264_v30  ;;  %v225_v30 = vld [vmem:[%s18437_s1 + $0x188] sm:$0xff]  ;;  %14069 = vmatpush3.bf16.msra.mxu0 %v14066_v20 }
 0x977   : > { %13875 = vmatprep.mubr.msk.f32.mxu1 %vm265_vm0, %v17369_v57  ;;  %v14070_v16 = vpack.c.bf16 %v225_v30, %v224_v40 }
 0x979   : > { %14071 = vmatprep.subr.bf16.mxu0 %v14070_v16 }
 0x97a   : > { %13876 = vmatmul.mubr.msk.f32.gmra.mrb[156].mxu1 %vm265_vm0, %v17297_v1  ;;  %14073 = vmatpush3.bf16.msra.mxu0 %v14070_v16  ;;  %v12670_v1 = vld [vmem:[%s18437_s1 + $0xe8] ss:$0 sm:$0xff] }
 0x97b   : > { %v17723_v19 = vadd.f32 %v12671_v26, %v12670_v1 }
 0xa11   : > { %v13832_v62 = vpop.f32.mrb[126].mxu1 }
 0xa12   : > { %v14108_v57 = vadd.f32 %v13832_v62, %v12670_v1  ;;  %v11316_v55 = vpop.f32.mrb[127].mxu1 }
 0xa13   : > { %v14110_v23 = vadd.f32 %v12670_v1, %v11316_v55 }
 0xa14   : > { %v14109_v42 = vadd.f32 %v14108_v57, %v12671_v26 }
 0xa15   : > { %v14111_v37 = vadd.f32 %v14110_v23, %v12671_v26  ;;  %v13835_v15 = vpop.f32.mrb[128].mxu1 }
 0xa16   : > { %v11326_v17 = vpop.f32.mrb[129].mxu1  ;;  %v17728_v63 = vmax.f32 %v14109_v42, 0.0  ;;  %v14113_v0 = vadd.f32 %v17723_v19, %v13835_v15 }
 0xa17   : > { %v17725_v52 = vmax.f32 %v14111_v37, 0.0  ;;  %v14115_v58 = vadd.f32 %v17723_v19, %v11326_v17 }
 0xa18   : > { %v17737_v61 = vmax.f32 %v14113_v0, 0.0 }
 0xa19   : > { %v17731_v60 = vmax.f32 %v14115_v58, 0.0  ;;  %v13838_v35 = vpop.f32.mrb[130].mxu1  ;;  %13910 = vmatprep.mubr.f32.mxu0 %v17725_v52 }
 0xa1a   : > { %v11336_v24 = vpop.f32.mrb[131].mxu1  ;;  %13911 = vmatmul.mubr.f32.vlgmr.msra.gmra.mrb[130].mxu0 %v17728_v63  ;;  %v14117_v29 = vadd.f32 %v17723_v19, %v13838_v35 }
 0xa1b   : > { %v14119_v6 = vadd.f32 %v17723_v19, %v11336_v24  ;;  %13913 = vmatprep.mubr.f32.mxu0 %v17731_v60 }
 0xa1c   : > { %v17745_v11 = vmax.f32 %v14117_v29, 0.0 }
 0xa1d   : > { %v17740_v7 = vmax.f32 %v14119_v6, 0.0  ;;  %v13841_v50 = vpop.f32.mrb[132].mxu1 }
 0xa1e   : > { %v11346_v43 = vpop.f32.mrb[133].mxu1  ;;  %13914 = vmatmul.mubr.f32.gmra.mrb[132].mxu0 %v17737_v61  ;;  %v14121_v47 = vadd.f32 %v17723_v19, %v13841_v50 }
 0xa1f   : > { %v14123_v28 = vadd.f32 %v17723_v19, %v11346_v43  ;;  %13916 = vmatprep.mubr.f32.mxu0 %v17740_v7 }
 0xa20   : > { %v17753_v21 = vmax.f32 %v14121_v47, 0.0 }
 0xa21   : > { %v17748_v44 = vmax.f32 %v14123_v28, 0.0  ;;  %v13844_v12 = vpop.f32.mrb[134].mxu1 }
 0xa22   : > { %v11356_v39 = vpop.f32.mrb[135].mxu1  ;;  %13917 = vmatmul.mubr.f32.gmra.mrb[134].mxu0 %v17745_v11  ;;  %v14125_v25 = vadd.f32 %v17723_v19, %v13844_v12 }
 0xa23   : > { %18481 = vst [vmem:[#allocation5_spill] sm:$0xff] %v17748_v44  ;;  %v14127_v53 = vadd.f32 %v17723_v19, %v11356_v39  ;;  %13919 = vmatprep.mubr.f32.mxu0 %v17748_v44 }
 0xa24   : > { %v17761_v33 = vmax.f32 %v14125_v25, 0.0 }
 0xa25   : > { %v17756_v34 = vmax.f32 %v14127_v53, 0.0  ;;  %v13847_v3 = vpop.f32.mrb[136].mxu1 }
 0xa26   : > { %v11366_v5 = vpop.f32.mrb[137].mxu1  ;;  %13920 = vmatmul.mubr.f32.gmra.mrb[136].mxu0 %v17753_v21  ;;  %v14129_v46 = vadd.f32 %v17723_v19, %v13847_v3 }
 0xa27   : > { %v14131_v32 = vadd.f32 %v17723_v19, %v11366_v5  ;;  %13922 = vmatprep.mubr.f32.mxu0 %v17756_v34 }
 0xa28   : > { %v17769_v51 = vmax.f32 %v14129_v46, 0.0 }
 0xa29   : > { %v17764_v13 = vmax.f32 %v14131_v32, 0.0  ;;  %v13850_v10 = vpop.f32.mrb[138].mxu1 }
 0xa2a   : > { %v11376_v8 = vpop.f32.mrb[139].mxu1  ;;  %13923 = vmatmul.mubr.f32.gmra.mrb[138].mxu0 %v17761_v33  ;;  %v14133_v48 = vadd.f32 %v17723_v19, %v13850_v10 }
 0xa2b   : > { %18482 = vst [vmem:[#allocation6_spill] sm:$0xff] %v17764_v13  ;;  %v14135_v56 = vadd.f32 %v17723_v19, %v11376_v8  ;;  %13925 = vmatprep.mubr.f32.mxu0 %v17764_v13 }
 0xa2c   : > { %v17777_v54 = vmax.f32 %v14133_v48, 0.0 }
 0xa2d   : > { %v17772_v45 = vmax.f32 %v14135_v56, 0.0  ;;  %v13853_v4 = vpop.f32.mrb[140].mxu1 }
 0xa2e   : > { %v11386_v49 = vpop.f32.mrb[141].mxu1  ;;  %13926 = vmatmul.mubr.f32.gmra.mrb[140].mxu0 %v17769_v51  ;;  %v14137_v9 = vadd.f32 %v17723_v19, %v13853_v4 }
 0xa2f   : > { %v14139_v27 = vadd.f32 %v17723_v19, %v11386_v49  ;;  %13928 = vmatprep.mubr.f32.mxu0 %v17772_v45 }
 0xa30   : > { %v17785_v38 = vmax.f32 %v14137_v9, 0.0 }
 0xa31   : > { %v17780_v2 = vmax.f32 %v14139_v27, 0.0  ;;  %v13856_v59 = vpop.f32.mrb[142].mxu1 }
 0xa32   : > { %v11396_v14 = vpop.f32.mrb[143].mxu1  ;;  %13929 = vmatmul.mubr.f32.gmra.mrb[142].mxu0 %v17777_v54  ;;  %v14141_v18 = vadd.f32 %v17723_v19, %v13856_v59 }
 0xa33   : > { %18483 = vst [vmem:[#allocation7_spill] sm:$0xff] %v17780_v2  ;;  %v14143_v22 = vadd.f32 %v17723_v19, %v11396_v14  ;;  %13931 = vmatprep.mubr.f32.mxu0 %v17780_v2  ;;  %v11539_v14 = vmul.f32 %v17725_v52, %v17725_v52 }
 0xa34   : > { %v17793_v40 = vmax.f32 %v14141_v18, 0.0  ;;  %v11542_v18 = vmul.f32 %v17737_v61, %v17737_v61 }
 0xa35   : > { %v17788_v31 = vmax.f32 %v14143_v22, 0.0  ;;  %v13859_v36 = vpop.f32.mrb[144].mxu1  ;;  %v11540_v22 = vmul.f32 %v17728_v63, %v17728_v63 }
 0xa36   : > { %v11406_v41 = vpop.f32.mrb[145].mxu1  ;;  %13932 = vmatmul.mubr.f32.gmra.mrb[144].mxu0 %v17785_v38  ;;  %v14145_v30 = vadd.f32 %v17723_v19, %v13859_v36  ;;  %v11543_v36 = vmul.f32 %v17740_v7, %v17740_v7 }
 0xa37   : > { %v14147_v20 = vadd.f32 %v17723_v19, %v11406_v41  ;;  %13934 = vmatprep.mubr.f32.mxu0 %v17788_v31  ;;  %v11544_v41 = vmul.f32 %v17745_v11, %v17745_v11 }
 0xa38   : > { %v17801_v57 = vmax.f32 %v14145_v30, 0.0  ;;  %v11546_v30 = vmul.f32 %v17753_v21, %v17753_v21 }
 0xa39   : > { %v17796_v16 = vmax.f32 %v14147_v20, 0.0  ;;  %v13862_v1 = vpop.f32.mrb[146].mxu1  ;;  %v11545_v20 = vmul.f32 %v17748_v44, %v17748_v44 }
 0xa3a   : > { %v11416_v26 = vpop.f32.mrb[147].mxu1  ;;  %13935 = vmatmul.mubr.f32.gmra.mrb[146].mxu0 %v17793_v40  ;;  %v14149_v55 = vadd.f32 %v17723_v19, %v13862_v1  ;;  %v11547_v1 = vmul.f32 %v17756_v34, %v17756_v34 }
 0xa3b   : > { %18484 = vst [vmem:[#allocation8_spill] sm:$0xff] %v17796_v16  ;;  %v14151_v62 = vadd.f32 %v17723_v19, %v11416_v26  ;;  %13937 = vmatprep.mubr.f32.mxu0 %v17796_v16  ;;  %v11548_v26 = vmul.f32 %v17761_v33, %v17761_v33 }
 0xa3c   : > { %v17809_v17 = vmax.f32 %v14149_v55, 0.0  ;;  %v11550_v55 = vmul.f32 %v17769_v51, %v17769_v51 }
 0xa3d   : > { %v17804_v23 = vmax.f32 %v14151_v62, 0.0  ;;  %v13865_v42 = vpop.f32.mrb[148].mxu1  ;;  %v11549_v62 = vmul.f32 %v17764_v13, %v17764_v13 }
 0xa3e   : > { %v11426_v37 = vpop.f32.mrb[149].mxu1  ;;  %13938 = vmatmul.mubr.f32.gmra.mrb[148].mxu0 %v17801_v57  ;;  %18485 = vst [vmem:[#allocation9_spill] sm:$0xff] %v17809_v17  ;;  %v14153_v58 = vadd.f32 %v17723_v19, %v13865_v42  ;;  %v11551_v42 = vmul.f32 %v17772_v45, %v17772_v45 }
 0xa3f   : > { %v14155_v15 = vadd.f32 %v17723_v19, %v11426_v37  ;;  %13940 = vmatprep.mubr.f32.mxu0 %v17804_v23  ;;  %v11552_v37 = vmul.f32 %v17777_v54, %v17777_v54 }
 0xa40   : > { %v17817_v29 = vmax.f32 %v14153_v58, 0.0  ;;  %v11554_v58 = vmul.f32 %v17785_v38, %v17785_v38 }
 0xa41   : > { %v17812_v0 = vmax.f32 %v14155_v15, 0.0  ;;  %v13868_v35 = vpop.f32.mrb[150].mxu1  ;;  %v11553_v15 = vmul.f32 %v17780_v2, %v17780_v2 }
 0xa42   : > { %v11436_v24 = vpop.f32.mrb[151].mxu1  ;;  %13941 = vmatmul.mubr.f32.gmra.mrb[150].mxu0 %v17809_v17  ;;  %v14157_v50 = vadd.f32 %v17723_v19, %v13868_v35  ;;  %v11555_v35 = vmul.f32 %v17788_v31, %v17788_v31 }
 0xa43   : > { %18486 = vst [vmem:[#allocation10_spill] sm:$0xff] %v17812_v0  ;;  %v14159_v6 = vadd.f32 %v17723_v19, %v11436_v24  ;;  %13943 = vmatprep.mubr.f32.mxu0 %v17812_v0  ;;  %v11556_v24 = vmul.f32 %v17793_v40, %v17793_v40 }
 0xa44   : > { %v17825_v39 = vmax.f32 %v14157_v50, 0.0  ;;  %v11558_v50 = vmul.f32 %v17801_v57, %v17801_v57 }
 0xa45   : > { %v17820_v43 = vmax.f32 %v14159_v6, 0.0  ;;  %v13871_v28 = vpop.f32.mrb[152].mxu1  ;;  %v11557_v6 = vmul.f32 %v17796_v16, %v17796_v16 }
 0xa46   : > { %v11446_v47 = vpop.f32.mrb[153].mxu1  ;;  %13944 = vmatmul.mubr.f32.gmra.mrb[152].mxu0 %v17817_v29  ;;  %18488 = vst [vmem:[#allocation12_spill] sm:$0xff] %v17825_v39  ;;  %v14161_v53 = vadd.f32 %v17723_v19, %v13871_v28  ;;  %v11559_v28 = vmul.f32 %v17804_v23, %v17804_v23 }
 0xa47   : > { %18487 = vst [vmem:[#allocation11_spill] sm:$0xff] %v17820_v43  ;;  %v14163_v12 = vadd.f32 %v17723_v19, %v11446_v47  ;;  %13946 = vmatprep.mubr.f32.mxu0 %v17820_v43  ;;  %v11560_v47 = vmul.f32 %v17809_v17, %v17809_v17  ;;  %v18117_v17 = vld [vmem:[%s18437_s1 + $0x108] ss:$0 sm:$0xff] }
 0xa48   : > { %v17833_v46 = vmax.f32 %v14161_v53, 0.0  ;;  %v11562_v53 = vmul.f32 %v17817_v29, %v17817_v29 }
 0xa49   : > { %v17828_v25 = vmax.f32 %v14163_v12, 0.0  ;;  %v13874_v3 = vpop.f32.mrb[154].mxu1  ;;  %v11561_v12 = vmul.f32 %v17812_v0, %v17812_v0 }
 0xa4a   : > { %v11456_v5 = vpop.f32.mrb[155].mxu1  ;;  %13947 = vmatmul.mubr.f32.gmra.mrb[154].mxu0 %v17825_v39  ;;  %18490 = vst [vmem:[#allocation14_spill] sm:$0xff] %v17833_v46  ;;  %v14165_v10 = vadd.f32 %v17723_v19, %v13874_v3  ;;  %v11563_v3 = vmul.f32 %v17820_v43, %v17820_v43 }
 0xa4b   : > { %18489 = vst [vmem:[#allocation13_spill] sm:$0xff] %v17828_v25  ;;  %v14167_v32 = vadd.f32 %v17723_v19, %v11456_v5  ;;  %13949 = vmatprep.mubr.f32.mxu0 %v17828_v25  ;;  %v11564_v5 = vmul.f32 %v17825_v39, %v17825_v39 }
 0xa4c   : > { %v17841_v49 = vmax.f32 %v14165_v10, 0.0  ;;  %v11566_v10 = vmul.f32 %v17833_v46, %v17833_v46 }
 0xa4d   : > { %v17836_v8 = vmax.f32 %v14167_v32, 0.0  ;;  %v13877_v56 = vpop.f32.mrb[156].mxu1  ;;  %v11565_v32 = vmul.f32 %v17828_v25, %v17828_v25 }
 0xa4e   : > { %v11466_v48 = vpop.f32.mrb[157].mxu1  ;;  %13950 = vmatmul.mubr.f32.gmra.mrb[156].mxu0 %v17833_v46  ;;  %18492 = vst [vmem:[#allocation16_spill] sm:$0xff] %v17841_v49  ;;  %v14169_v27 = vadd.f32 %v17723_v19, %v13877_v56 }
 0xa4f   : > { %18491 = vst [vmem:[#allocation15_spill] sm:$0xff] %v17836_v8  ;;  %v14171_v4 = vadd.f32 %v17723_v19, %v11466_v48  ;;  %13952 = vmatprep.mubr.f32.mxu0 %v17836_v8  ;;  %v11541_v19 = vmul.f32 %v17731_v60, %v17731_v60  ;;  %v11567_v56 = vmul.f32 %v17836_v8, %v17836_v8 }
 0xa50   : > { %v17848_v59 = vmax.f32 %v14169_v27, 0.0  ;;  %v11568_v48 = vmul.f32 %v17841_v49, %v17841_v49 }
 0xa51   : > { %v17844_v9 = vmax.f32 %v14171_v4, 0.0 }
 0xa52   : > { %13953 = vmatmul.mubr.f32.gmra.mrb[158].mxu0 %v17841_v49  ;;  %18494 = vst [vmem:[#allocation18_spill] sm:$0xff] %v17848_v59  ;;  %v11570_v27 = vmul.f32 %v17848_v59, %v17848_v59 }
 0xa53   : > { %18493 = vst [vmem:[#allocation17_spill] sm:$0xff] %v17844_v9  ;;  %13955 = vmatprep.mubr.f32.mxu0 %v17844_v9  ;;  %v11569_v4 = vmul.f32 %v17844_v9, %v17844_v9 }
 0xa56   : > { %13956 = vmatmul.mubr.f32.gmra.mrb[160].mxu0 %v17848_v59 }
 0xa57   : > { %13958 = vmatprep.mubr.f32.mxu0 %v11539_v14 }
 0xa5a   : > { %13959 = vmatmul.mubr.f32.gmra.mrb[162].mxu0 %v11540_v22 }
 0xa5b   : > { %13961 = vmatprep.mubr.f32.mxu0 %v11541_v19 }
 0xa5e   : > { %13962 = vmatmul.mubr.f32.gmra.mrb[164].mxu0 %v11542_v18 }
 0xa5f   : > { %13964 = vmatprep.mubr.f32.mxu0 %v11543_v36 }
 0xa62   : > { %13965 = vmatmul.mubr.f32.gmra.mrb[166].mxu0 %v11544_v41 }
 0xa63   : > { %13967 = vmatprep.mubr.f32.mxu0 %v11545_v20 }
 0xa66   : > { %13968 = vmatmul.mubr.f32.gmra.mrb[168].mxu0 %v11546_v30 }
 0xa67   : > { %13970 = vmatprep.mubr.f32.mxu0 %v11547_v1 }
 0xa6a   : > { %13971 = vmatmul.mubr.f32.gmra.mrb[170].mxu0 %v11548_v26 }
 0xa6b   : > { %13973 = vmatprep.mubr.f32.mxu0 %v11549_v62 }
 0xa6e   : > { %13974 = vmatmul.mubr.f32.gmra.mrb[172].mxu0 %v11550_v55 }
 0xa6f   : > { %13976 = vmatprep.mubr.f32.mxu0 %v11551_v42 }
 0xa72   : > { %13977 = vmatmul.mubr.f32.gmra.mrb[174].mxu0 %v11552_v37 }
 0xa73   : > { %13979 = vmatprep.mubr.f32.mxu0 %v11553_v15 }
 0xa76   : > { %13980 = vmatmul.mubr.f32.gmra.mrb[176].mxu0 %v11554_v58 }
 0xa77   : > { %13982 = vmatprep.mubr.f32.mxu0 %v11555_v35 }
 0xa7a   : > { %13983 = vmatmul.mubr.f32.gmra.mrb[178].mxu0 %v11556_v24 }
 0xa7b   : > { %13985 = vmatprep.mubr.f32.mxu0 %v11557_v6 }
 0xa7e   : > { %13986 = vmatmul.mubr.f32.gmra.mrb[180].mxu0 %v11558_v50 }
 0xa7f   : > { %13988 = vmatprep.mubr.f32.mxu0 %v11559_v28 }
 0xa82   : > { %13989 = vmatmul.mubr.f32.gmra.mrb[182].mxu0 %v11560_v47 }
 0xa83   : > { %13991 = vmatprep.mubr.f32.mxu0 %v11561_v12 }
 0xa86   : > { %13992 = vmatmul.mubr.f32.gmra.mrb[184].mxu0 %v11562_v53 }
 0xa87   : > { %13994 = vmatprep.mubr.f32.mxu0 %v11563_v3 }
 0xa8a   : > { %13995 = vmatmul.mubr.f32.gmra.mrb[186].mxu0 %v11564_v5 }
 0xa8b   : > { %13997 = vmatprep.mubr.f32.mxu0 %v11565_v32 }
 0xa8e   : > { %13998 = vmatmul.mubr.f32.gmra.mrb[188].mxu0 %v11566_v10  ;;  %v17972_v10 = vld [vmem:[%s18437_s1 + $0x190] sm:$0xff] }
 0xa8f   : > { %14000 = vmatprep.mubr.f32.mxu0 %v11567_v56  ;;  %18505 = vst [vmem:[#allocation29_spill] sm:$0xff] %v17972_v10  ;;  %13164 = vmatprep.mubr.f32.mxu1 %v17972_v10 }
 0xa92   : > { %14001 = vmatmul.mubr.f32.gmra.mrb[190].mxu0 %v11568_v48 }
 0xa93   : > { %14003 = vmatprep.mubr.f32.mxu0 %v11569_v4 }
 0xa96   : > { %14004 = vmatmul.mubr.f32.gmra.mrb[192].mxu0 %v11570_v27 }
 0xaed   : > { %v17915_v14 = vpop.f32.mrb[130].mxu0 }
 0xaee   : > { %v17917_v22 = vpop.f32.mrb[131].mxu0  ;;  %v11957_v59 = vmul.f32 %v17915_v14, %v17915_v14 }
 0xaef   : > { %v11956_v49 = vmul.f32 %v17917_v22, %v17917_v22 }
 0xaf1   : > { %v17919_v19 = vpop.f32.mrb[132].mxu0 }
 0xaf2   : > { %v17921_v18 = vpop.f32.mrb[133].mxu0  ;;  %v11959_v46 = vmul.f32 %v17919_v19, %v17919_v19 }
 0xaf3   : > { %v11958_v39 = vmul.f32 %v17921_v18, %v17921_v18 }
 0xaf5   : > { %v17923_v36 = vpop.f32.mrb[134].mxu0 }
 0xaf6   : > { %v17925_v41 = vpop.f32.mrb[135].mxu0 }
 0xaf9   : > { %v17927_v20 = vpop.f32.mrb[136].mxu0 }
 0xafa   : > { %18495 = vst [vmem:[#allocation19_spill] sm:$0xff] %v17927_v20  ;;  %v17929_v30 = vpop.f32.mrb[137].mxu0 }
 0xafb   : > { %18496 = vst [vmem:[#allocation20_spill] sm:$0xff] %v17929_v30 }
 0xafd   : > { %v17931_v1 = vpop.f32.mrb[138].mxu0 }
 0xafe   : > { %v17933_v26 = vpop.f32.mrb[139].mxu0 }
 0xaff   : > { %v18025_v8 = vmul.f32 %v17933_v26, %v17933_v26 }
 0xb01   : > { %v17935_v62 = vpop.f32.mrb[140].mxu0 }
 0xb02   : > { %v17937_v55 = vpop.f32.mrb[141].mxu0 }
 0xb03   : > { %18497 = vst [vmem:[#allocation21_spill] sm:$0xff] %v17937_v55 }
 0xb05   : > { %v17939_v42 = vpop.f32.mrb[142].mxu0 }
 0xb06   : > { %v17941_v37 = vpop.f32.mrb[143].mxu0 }
 0xb07   : > { %v18049_v43 = vmul.f32 %v17941_v37, %v17941_v37 }
 0xb09   : > { %v17943_v15 = vpop.f32.mrb[144].mxu0 }
 0xb0a   : > { %v17945_v58 = vpop.f32.mrb[145].mxu0 }
 0xb0b   : > { %18498 = vst [vmem:[#allocation22_spill] sm:$0xff] %v17945_v58 }
 0xb0d   : > { %v17947_v35 = vpop.f32.mrb[146].mxu0 }
 0xb0e   : > { %v17949_v24 = vpop.f32.mrb[147].mxu0 }
 0xb11   : > { %v17951_v6 = vpop.f32.mrb[148].mxu0 }
 0xb12   : > { %18499 = vst [vmem:[#allocation23_spill] sm:$0xff] %v17951_v6  ;;  %v17953_v50 = vpop.f32.mrb[149].mxu0 }
 0xb13   : > { %18500 = vst [vmem:[#allocation24_spill] sm:$0xff] %v17953_v50 }
 0xb15   : > { %v17955_v28 = vpop.f32.mrb[150].mxu0 }
 0xb16   : > { %18501 = vst [vmem:[#allocation25_spill] sm:$0xff] %v17955_v28  ;;  %v17957_v47 = vpop.f32.mrb[151].mxu0 }
 0xb19   : > { %v17959_v12 = vpop.f32.mrb[152].mxu0 }
 0xb1a   : > { %v17961_v53 = vpop.f32.mrb[153].mxu0 }
 0xb1d   : > { %v17963_v3 = vpop.f32.mrb[154].mxu0 }
 0xb1e   : > { %18502 = vst [vmem:[#allocation26_spill] sm:$0xff] %v17963_v3  ;;  %v17965_v5 = vpop.f32.mrb[155].mxu0 }
 0xb1f   : > { %18503 = vst [vmem:[#allocation27_spill] sm:$0xff] %v17965_v5  ;;  %v18019_v5 = vmul.f32 %v17931_v1, %v17931_v1 }
 0xb21   : > { %v17967_v32 = vpop.f32.mrb[156].mxu0 }
 0xb22   : > { %18504 = vst [vmem:[#allocation28_spill] sm:$0xff] %v17967_v32  ;;  %v17974_v56 = vpop.f32.mrb[157].mxu0  ;;  %v11962_v32 = vmul.f32 %v17929_v30, %v17929_v30  ;;  %v18031_v30 = vmul.f32 %v17935_v62, %v17935_v62 }
 0xb23   : > { %18506 = vst [vmem:[#allocation30_spill] sm:$0xff] %v17974_v56  ;;  %v11960_v56 = vmul.f32 %v17925_v41, %v17925_v41 }
 0xb25   : > { %v17977_v48 = vpop.f32.mrb[158].mxu0 }
 0xb26   : > { %18507 = vst [vmem:[#allocation31_spill] sm:$0xff] %v17977_v48  ;;  %v17979_v4 = vpop.f32.mrb[159].mxu0 }
 0xb27   : > { %18508 = vst [vmem:[#allocation32_spill] sm:$0xff] %v17979_v4  ;;  %v11961_v4 = vmul.f32 %v17923_v36, %v17923_v36 }
 0xb29   : > { %v17981_v27 = vpop.f32.mrb[160].mxu0 }
 0xb2a   : > { %18509 = vst [vmem:[#allocation33_spill] sm:$0xff] %v17981_v27  ;;  %v17983_v9 = vpop.f32.mrb[161].mxu0 }
 0xb2b   : > { %18510 = vst [vmem:[#allocation34_spill] sm:$0xff] %v17983_v9 }
 0xb2d   : > { %v13960_v25 = vpop.f32.mrb[162].mxu0 }
 0xb2e   : > { %v11989_v9 = vsub.f32 %v13960_v25, %v11957_v59  ;;  %v11797_v27 = vpop.f32.mrb[163].mxu0  ;;  %v11963_v25 = vmul.f32 %v17927_v20, %v17927_v20 }
 0xb2f   : > { %v11988_v48 = vsub.f32 %v11797_v27, %v11956_v49 }
 0xb30   : > { %v12021_v59 = vmax.f32 %v11989_v9, 0.0 }
 0xb31   : > { %v12020_v49 = vmax.f32 %v11988_v48, 0.0  ;;  %v13963_v27 = vpop.f32.mrb[164].mxu0 }
 0xb32   : > { %v12085_v3 = vadd.f32 1e-05, %v12021_v59  ;;  %v11991_v9 = vsub.f32 %v13963_v27, %v11959_v46  ;;  %v11807_v0 = vpop.f32.mrb[165].mxu0  ;;  %v18037_v46 = vmul.f32 %v17937_v55, %v17937_v55  ;;  %v18055_v55 = vmul.f32 %v17943_v15, %v17943_v15 }
 0xb33   : > { %v12084_v10 = vadd.f32 1e-05, %v12020_v49  ;;  %v11990_v48 = vsub.f32 %v11807_v0, %v11958_v39  ;;  %v18043_v0 = vmul.f32 %v17939_v42, %v17939_v42  ;;  %v18073_v39 = vmul.f32 %v17949_v24, %v17949_v24 }
 0xb34   : > { %14760 = vrsqrt.f32 %v12085_v3  ;;  %v12023_v59 = vmax.f32 %v11991_v9, 0.0 }
 0xb35   : > { %14762 = vrsqrt.f32 %v12084_v10  ;;  %v12022_v20 = vmax.f32 %v11990_v48, 0.0  ;;  %v13966_v49 = vpop.f32.mrb[166].mxu0 }
 0xb36   : > { %v12087_v44 = vadd.f32 1e-05, %v12023_v59  ;;  %v11993_v3 = vsub.f32 %v13966_v49, %v11961_v4  ;;  %v11817_v9 = vpop.f32.mrb[167].mxu0  ;;  %v18061_v4 = vmul.f32 %v17945_v58, %v17945_v58  ;;  %v18079_v58 = vmul.f32 %v17951_v6, %v17951_v6  ;;  %v18099_v6 = vld [vmem:[%s18437_s1 + $0x100] ss:$0 sm:$0xff] }
 0xb37   : > { %v12086_v10 = vadd.f32 1e-05, %v12022_v20  ;;  %v11992_v48 = vsub.f32 %v11817_v9, %v11960_v56  ;;  %v18067_v56 = vmul.f32 %v17947_v35, %v17947_v35 }
 0xb38   : > { %14764 = vrsqrt.f32 %v12087_v44  ;;  %v12025_v59 = vmax.f32 %v11993_v3, 0.0 }
 0xb39   : > { %14766 = vrsqrt.f32 %v12086_v10  ;;  %v12024_v27 = vmax.f32 %v11992_v48, 0.0  ;;  %v13969_v20 = vpop.f32.mrb[168].mxu0 }
 0xb3a   : > { %v12089_v13 = vadd.f32 1e-05, %v12025_v59  ;;  %v11995_v44 = vsub.f32 %v13969_v20, %v11963_v25  ;;  %v11827_v3 = vpop.f32.mrb[169].mxu0  ;;  %v18085_v25 = vmul.f32 %v17953_v50, %v17953_v50  ;;  %v18511_v20 = vsub.f32 %v17728_v63, %v17915_v14 }
 0xb3b   : > { %v12088_v10 = vadd.f32 1e-05, %v12024_v27  ;;  %v11994_v48 = vsub.f32 %v11827_v3, %v11962_v32  ;;  %v18091_v3 = vmul.f32 %v17955_v28, %v17955_v28  ;;  %v18121_v63 = vmul.f32 %v17959_v12, %v17959_v12 }
 0xb3c   : > { %14768 = vrsqrt.f32 %v12089_v13  ;;  %v12027_v59 = vmax.f32 %v11995_v44, 0.0 }
 0xb3d   : > { %14770 = vrsqrt.f32 %v12088_v10  ;;  %v12026_v49 = vmax.f32 %v11994_v48, 0.0  ;;  %v13972_v27 = vpop.f32.mrb[170].mxu0  ;;  %v18103_v48 = vmul.f32 %v17957_v47, %v17957_v47 }
 0xb3e   : > { %v14761_v32 = vpop.eup %14760  ;;  %v12091_v13 = vadd.f32 1e-05, %v12027_v59  ;;  %v11997_v44 = vsub.f32 %v13972_v27, %v18019_v5  ;;  %v11837_v9 = vpop.f32.mrb[171].mxu0  ;;  %v12072_v5 = vsub.f32 %v17804_v23, %v17957_v47  ;;  %v18512_v27 = vsub.f32 %v17725_v52, %v17917_v22 }
 0xb3f   : > { %v14763_v10 = vpop.eup %14762  ;;  %v12149_v50 = vmul.f32 %v14761_v32, %v18511_v20  ;;  %v12090_v16 = vadd.f32 1e-05, %v12026_v49  ;;  %v11996_v59 = vsub.f32 %v11837_v9, %v18025_v8  ;;  %v18514_v52 = vsub.f32 %v17731_v60, %v17921_v18 }
 0xb40   : > { %v12148_v2 = vmul.f32 %v14763_v10, %v18512_v27  ;;  %14772 = vrsqrt.f32 %v12091_v13  ;;  %v12029_v28 = vmax.f32 %v11997_v44, 0.0  ;;  %v18513_v10 = vsub.f32 %v17737_v61, %v17919_v19 }
 0xb41   : > { %14774 = vrsqrt.f32 %v12090_v16  ;;  %v12028_v8 = vmax.f32 %v11996_v59, 0.0  ;;  %v13975_v14 = vpop.f32.mrb[172].mxu0  ;;  %v12185_v49 = vmul.f32 %v18099_v6, %v12149_v50 }
 0xb42   : > { %v14765_v9 = vpop.eup %14764  ;;  %v12093_v22 = vadd.f32 1e-05, %v12029_v28  ;;  %v11999_v20 = vsub.f32 %v13975_v14, %v18031_v30  ;;  %v11847_v32 = vpop.f32.mrb[173].mxu0  ;;  %v12184_v13 = vmul.f32 %v18099_v6, %v12148_v2  ;;  %v18143_v2 = vmul.f32 %v17961_v53, %v17961_v53 }
 0xb43   : > { %v14767_v44 = vpop.eup %14766  ;;  %v12151_v27 = vmul.f32 %v14765_v9, %v18513_v10  ;;  %v12092_v16 = vadd.f32 1e-05, %v12028_v8  ;;  %v11998_v59 = vsub.f32 %v11847_v32, %v18037_v46  ;;  %v18133_v50 = vadd.f32 %v18117_v17, %v12185_v49 }
 0xb44   : > { %v12150_v28 = vmul.f32 %v14767_v44, %v18514_v52  ;;  %14776 = vrsqrt.f32 %v12093_v22  ;;  %v12031_v30 = vmax.f32 %v11999_v20, 0.0  ;;  %v18139_v14 = vadd.f32 %v18117_v17, %v12184_v13 }
 0xb45   : > { %14778 = vrsqrt.f32 %v12092_v16  ;;  %v12030_v61 = vmax.f32 %v11998_v59, 0.0  ;;  %v13978_v19 = vpop.f32.mrb[174].mxu0  ;;  %v12187_v46 = vmul.f32 %v18099_v6, %v12151_v27  ;;  %v18515_v20 = vsub.f32 %v17745_v11, %v17923_v36 }
 0xb46   : > { %v14769_v8 = vpop.eup %14768  ;;  %v12095_v49 = vadd.f32 1e-05, %v12031_v30  ;;  %v12001_v9 = vsub.f32 %v13978_v19, %v18043_v0  ;;  %v11857_v60 = vpop.f32.mrb[175].mxu0  ;;  %v14076_v18 = vpack.c.bf16 %v18133_v50, %v18139_v14  ;;  %v12186_v52 = vmul.f32 %v18099_v6, %v12150_v28  ;;  %v18517_v28 = vld [vmem:[#allocation10_spill] sm:$0xff] }
 0xb47   : > { %v14771_v22 = vpop.eup %14770  ;;  %v12153_v32 = vmul.f32 %v14769_v8, %v18515_v20  ;;  %v12094_v13 = vadd.f32 1e-05, %v12030_v61  ;;  %v12000_v44 = vsub.f32 %v11857_v60, %v18049_v43  ;;  %v18155_v10 = vadd.f32 %v18117_v17, %v12187_v46 }
 0xb48   : > { %v18516_v0 = vsub.f32 %v17740_v7, %v17925_v41  ;;  %14780 = vrsqrt.f32 %v12095_v49  ;;  %v12033_v16 = vmax.f32 %v12001_v9, 0.0  ;;  %v18161_v59 = vadd.f32 %v18117_v17, %v12186_v52  ;;  %v18518_v9 = vld [vmem:[#allocation19_spill] sm:$0xff] }
 0xb49   : > { %v12074_v30 = vsub.f32 %v18517_v28, %v17961_v53  ;;  %14782 = vrsqrt.f32 %v12094_v13  ;;  %v12032_v11 = vmax.f32 %v12000_v44, 0.0  ;;  %v13981_v36 = vpop.f32.mrb[176].mxu0  ;;  %v12189_v43 = vmul.f32 %v18099_v6, %v12153_v32  ;;  %v18520_v13 = vld [vmem:[#allocation5_spill] sm:$0xff]  ;;  %v18521_v44 = vld [vmem:[#allocation20_spill] sm:$0xff] }
 0xb4a   : > { %v12152_v27 = vmul.f32 %v14771_v22, %v18516_v0  ;;  %v14773_v61 = vpop.eup %14772  ;;  %v12097_v19 = vadd.f32 1e-05, %v12033_v16  ;;  %v12003_v46 = vsub.f32 %v13981_v36, %v18055_v55  ;;  %v11867_v8 = vpop.f32.mrb[177].mxu0  ;;  %v18519_v60 = vsub.f32 %v17753_v21, %v18518_v9 }
 0xb4b   : > { %v14775_v49 = vpop.eup %14774  ;;  %v12096_v22 = vadd.f32 1e-05, %v12032_v11  ;;  %v12002_v20 = vsub.f32 %v11867_v8, %v18061_v4  ;;  %v18175_v32 = vadd.f32 %v18117_v17, %v12189_v43  ;;  %v18522_v55 = vsub.f32 %v18520_v13, %v18521_v44 }
 0xb4c   : > { %v12188_v41 = vmul.f32 %v18099_v6, %v12152_v27  ;;  %v12155_v52 = vmul.f32 %v14773_v61, %v18519_v60  ;;  %14784 = vrsqrt.f32 %v12097_v19  ;;  %v12035_v16 = vmax.f32 %v12003_v46, 0.0  ;;  %v18523_v27 = vld [vmem:[#allocation26_spill] sm:$0xff] }
 0xb4d   : > { %v12154_v0 = vmul.f32 %v14775_v49, %v18522_v55  ;;  %v18185_v7 = vmul.f32 %v18523_v27, %v18523_v27  ;;  %14786 = vrsqrt.f32 %v12096_v22  ;;  %v12034_v21 = vmax.f32 %v12002_v20, 0.0  ;;  %v13984_v11 = vpop.f32.mrb[178].mxu0 }
 0xb4e   : > { %v18181_v36 = vadd.f32 %v18117_v17, %v12188_v41  ;;  %v12191_v4 = vmul.f32 %v18099_v6, %v12155_v52  ;;  %v14777_v43 = vpop.eup %14776  ;;  %v12099_v61 = vadd.f32 1e-05, %v12035_v16  ;;  %v12005_v8 = vsub.f32 %v13984_v11, %v18067_v56  ;;  %v11877_v9 = vpop.f32.mrb[179].mxu0 }
 0xb4f   : > { %v12190_v46 = vmul.f32 %v18099_v6, %v12154_v0  ;;  %v14779_v41 = vpop.eup %14778  ;;  %v18524_v49 = vsub.f32 %v17761_v33, %v17931_v1  ;;  %v12098_v22 = vadd.f32 1e-05, %v12034_v21  ;;  %v12004_v20 = vsub.f32 %v11877_v9, %v18073_v39  ;;  %v18526_v0 = vld [vmem:[#allocation27_spill] sm:$0xff] }
 0xb50   : > { %v14084_v19 = vpack.c.bf16 %v18175_v32, %v18181_v36  ;;  %v18197_v52 = vadd.f32 %v18117_v17, %v12191_v4  ;;  %v18525_v56 = vsub.f32 %v17756_v34, %v17933_v26  ;;  %14788 = vrsqrt.f32 %v12099_v61 }
 0xb51   : > { %v12157_v60 = vmul.f32 %v14777_v43, %v18524_v49  ;;  %v12037_v44 = vmax.f32 %v12005_v8, 0.0  ;;  %v18203_v55 = vadd.f32 %v18117_v17, %v12190_v46  ;;  %v18207_v16 = vmul.f32 %v18526_v0, %v18526_v0  ;;  %v13987_v1 = vpop.f32.mrb[180].mxu0 }
 0xb52   : > { %v12156_v13 = vmul.f32 %v14779_v41, %v18525_v56  ;;  %14790 = vrsqrt.f32 %v12098_v22  ;;  %v12036_v33 = vmax.f32 %v12004_v20, 0.0  ;;  %v14781_v21 = vpop.eup %14780  ;;  %v12007_v4 = vsub.f32 %v13987_v1, %v18079_v58  ;;  %v11887_v34 = vpop.f32.mrb[181].mxu0  ;;  %v18529_v22 = vld [vmem:[#allocation21_spill] sm:$0xff] }
 0xb53   : > { %v12193_v39 = vmul.f32 %v18099_v6, %v12157_v60  ;;  %v12101_v11 = vadd.f32 1e-05, %v12037_v44  ;;  %v14088_v26 = vpack.c.bf16 %v18197_v52, %v18203_v55  ;;  %v14783_v61 = vpop.eup %14782  ;;  %v18527_v8 = vsub.f32 %v17769_v51, %v17935_v62  ;;  %v18528_v60 = vld [vmem:[#allocation6_spill] sm:$0xff]  ;;  %v18565_v52 = vld [vmem:[#allocation29_spill] sm:$0xff]  ;;  %v12255_v55 = vpop.permute.xlu0 %12254 }
 0xb54   : > { %v12192_v43 = vmul.f32 %v18099_v6, %v12156_v13  ;;  %v12100_v46 = vadd.f32 1e-05, %v12036_v33  ;;  %v12006_v41 = vsub.f32 %v11887_v34, %v18085_v25  ;;  %v18530_v58 = vsub.f32 %v18528_v60, %v18529_v22  ;;  %v18531_v13 = vld [vmem:[#allocation28_spill] sm:$0xff] }
 0xb55   : > { %v12159_v9 = vmul.f32 %v14781_v21, %v18527_v8  ;;  %v18219_v49 = vadd.f32 %v18117_v17, %v12193_v39  ;;  %14792 = vrsqrt.f32 %v12101_v11  ;;  %v12039_v56 = vmax.f32 %v12007_v4, 0.0  ;;  %v13990_v62 = vpop.f32.mrb[182].mxu0 }
 0xb56   : > { %v12158_v20 = vmul.f32 %v14783_v61, %v18530_v58  ;;  %v18225_v44 = vadd.f32 %v18117_v17, %v12192_v43  ;;  %v18229_v1 = vmul.f32 %v18531_v13, %v18531_v13  ;;  %14794 = vrsqrt.f32 %v12100_v46  ;;  %v14785_v33 = vpop.eup %14784  ;;  %v11897_v34 = vpop.f32.mrb[183].mxu0 }
 0xb57   : > { %v12038_v51 = vmax.f32 %v12006_v41, 0.0  ;;  %v12195_v25 = vmul.f32 %v18099_v6, %v12159_v9  ;;  %v12103_v39 = vadd.f32 1e-05, %v12039_v56  ;;  %v12009_v21 = vsub.f32 %v13990_v62, %v18091_v3  ;;  %v14787_v43 = vpop.eup %14786 }
 0xb58   : > { %v14092_v11 = vpack.c.bf16 %v18219_v49, %v18225_v44  ;;  %v12194_v4 = vmul.f32 %v18099_v6, %v12158_v20  ;;  %v18532_v61 = vsub.f32 %v17777_v54, %v17939_v42  ;;  %v12008_v41 = vsub.f32 %v11897_v34, %v18103_v48  ;;  %v18534_v20 = vld [vmem:[#allocation30_spill] sm:$0xff] }
 0xb59   : > { %v12102_v46 = vadd.f32 1e-05, %v12038_v51  ;;  %v18241_v9 = vadd.f32 %v18117_v17, %v12195_v25  ;;  %v18533_v3 = vsub.f32 %v17772_v45, %v17941_v37  ;;  %14796 = vrsqrt.f32 %v12103_v39  ;;  %v13993_v42 = vpop.f32.mrb[184].mxu0 }
 0xb5a   : > { %v12161_v8 = vmul.f32 %v14785_v33, %v18532_v61  ;;  %v12041_v22 = vmax.f32 %v12009_v21, 0.0  ;;  %v18247_v58 = vadd.f32 %v18117_v17, %v12194_v4  ;;  %v11982_v56 = vmul.f32 %v18534_v20, %v18534_v20  ;;  %v14789_v51 = vpop.eup %14788  ;;  %v11907_v33 = vpop.f32.mrb[185].mxu0 }
 0xb5b   : > { %v12160_v60 = vmul.f32 %v14787_v43, %v18533_v3  ;;  %14798 = vrsqrt.f32 %v12102_v46  ;;  %v12040_v54 = vmax.f32 %v12008_v41, 0.0  ;;  %v12011_v25 = vsub.f32 %v13993_v42, %v18121_v63  ;;  %v18537_v46 = vld [vmem:[#allocation22_spill] sm:$0xff] }
 0xb5c   : > { %v12197_v48 = vmul.f32 %v18099_v6, %v12161_v8  ;;  %v12105_v62 = vadd.f32 1e-05, %v12041_v22  ;;  %v14096_v45 = vpack.c.bf16 %v18241_v9, %v18247_v58  ;;  %v14791_v39 = vpop.eup %14790  ;;  %v18535_v21 = vsub.f32 %v17785_v38, %v17943_v15  ;;  %v18536_v8 = vld [vmem:[#allocation7_spill] sm:$0xff] }
 0xb5d   : > { %v12196_v37 = vmul.f32 %v18099_v6, %v12160_v60  ;;  %v12104_v4 = vadd.f32 1e-05, %v12040_v54  ;;  %v12010_v43 = vsub.f32 %v11907_v33, %v18143_v2  ;;  %v18538_v63 = vsub.f32 %v18536_v8, %v18537_v46  ;;  %v18539_v60 = vld [vmem:[#allocation31_spill] sm:$0xff]  ;;  %v13996_v15 = vpop.f32.mrb[186].mxu0 }
 0xb5e   : > { %v12163_v34 = vmul.f32 %v14789_v51, %v18535_v21  ;;  %v18261_v61 = vadd.f32 %v18117_v17, %v12197_v48  ;;  %14800 = vrsqrt.f32 %v12105_v62  ;;  %v12043_v3 = vmax.f32 %v12011_v25, 0.0  ;;  %v11917_v33 = vpop.f32.mrb[187].mxu0 }
 0xb5f   : > { %v12162_v41 = vmul.f32 %v14791_v39, %v18538_v63  ;;  %v18267_v22 = vadd.f32 %v18117_v17, %v12196_v37  ;;  %v11985_v42 = vmul.f32 %v18539_v60, %v18539_v60  ;;  %14802 = vrsqrt.f32 %v12104_v4  ;;  %v14793_v54 = vpop.eup %14792 }
 0xb60   : > { %v12042_v38 = vmax.f32 %v12010_v43, 0.0  ;;  %v12199_v2 = vmul.f32 %v18099_v6, %v12163_v34  ;;  %v12107_v48 = vadd.f32 1e-05, %v12043_v3  ;;  %v12013_v51 = vsub.f32 %v13996_v15, %v18185_v7  ;;  %v14795_v37 = vpop.eup %14794 }
 0xb61   : > { %v12198_v25 = vmul.f32 %v18099_v6, %v12162_v41  ;;  %v12012_v21 = vsub.f32 %v11917_v33, %v18207_v16  ;;  %v18540_v4 = vsub.f32 %v17793_v40, %v17947_v35  ;;  %v18541_v7 = vsub.f32 %v17788_v31, %v17949_v24  ;;  %v18542_v41 = vld [vmem:[#allocation32_spill] sm:$0xff] }
 0xb62   : > { %v12106_v39 = vadd.f32 1e-05, %v12042_v38  ;;  %v18281_v34 = vadd.f32 %v18117_v17, %v12199_v2  ;;  %14804 = vrsqrt.f32 %v12107_v48  ;;  %v12045_v8 = vmax.f32 %v12013_v51, 0.0  ;;  %v13999_v38 = vpop.f32.mrb[188].mxu0 }
 0xb63   : > { %v12165_v43 = vmul.f32 %v14793_v54, %v18540_v4  ;;  %v12164_v46 = vmul.f32 %v14795_v37, %v18541_v7  ;;  %v18287_v63 = vadd.f32 %v18117_v17, %v12198_v25  ;;  %v11984_v3 = vmul.f32 %v18542_v41, %v18542_v41  ;;  %v14797_v35 = vpop.eup %14796  ;;  %v11927_v54 = vpop.f32.mrb[189].mxu0  ;;  %v18543_v37 = vld [vmem:[#allocation23_spill] sm:$0xff] }
 0xb64   : > { %14806 = vrsqrt.f32 %v12106_v39  ;;  %v12044_v16 = vmax.f32 %v12012_v21, 0.0  ;;  %v12109_v15 = vadd.f32 1e-05, %v12045_v8  ;;  %v12015_v2 = vsub.f32 %v13999_v38, %v18229_v1  ;;  %v18545_v1 = vld [vmem:[#allocation8_spill] sm:$0xff]  ;;  %v18548_v38 = vld [vmem:[#allocation33_spill] sm:$0xff] }
 0xb65   : > { %v12201_v40 = vmul.f32 %v18099_v6, %v12165_v43  ;;  %v12200_v48 = vmul.f32 %v18099_v6, %v12164_v46  ;;  %v14799_v24 = vpop.eup %14798  ;;  %v12014_v33 = vsub.f32 %v11927_v54, %v11982_v56  ;;  %v18544_v39 = vsub.f32 %v17801_v57, %v18543_v37  ;;  %v18546_v8 = vld [vmem:[#allocation24_spill] sm:$0xff]  ;;  %v14002_v56 = vpop.f32.mrb[190].mxu0 }
 0xb66   : > { %v12108_v51 = vadd.f32 1e-05, %v12044_v16  ;;  %14808 = vrsqrt.f32 %v12109_v15  ;;  %v12047_v4 = vmax.f32 %v12015_v2, 0.0  ;;  %v18547_v7 = vsub.f32 %v18545_v1, %v18546_v8  ;;  %v18549_v1 = vld [vmem:[#allocation9_spill] sm:$0xff] }
 0xb67   : > { %v12237_v25 = vadd.f32 %v18117_v17, %v12201_v40  ;;  %v12167_v21 = vmul.f32 %v14797_v35, %v18544_v39  ;;  %v12236_v43 = vadd.f32 %v18117_v17, %v12200_v48  ;;  %v11987_v31 = vmul.f32 %v18548_v38, %v18548_v38  ;;  %v11937_v35 = vpop.f32.mrb[191].mxu0  ;;  %v18550_v8 = vld [vmem:[#allocation25_spill] sm:$0xff] }
 0xb68   : > { %v12166_v46 = vmul.f32 %v14799_v24, %v18547_v7  ;;  %14810 = vrsqrt.f32 %v12108_v51  ;;  %v12046_v16 = vmax.f32 %v12014_v33, 0.0  ;;  %v14801_v54 = vpop.eup %14800  ;;  %v12111_v62 = vadd.f32 1e-05, %v12047_v4 }
 0xb69   : > { %v12203_v40 = vmul.f32 %v18099_v6, %v12167_v21  ;;  %v12017_v57 = vsub.f32 %v14002_v56, %v11985_v42  ;;  %v14074_v15 = vpack.c.bf16 %v12237_v25, %v12236_v43  ;;  %v14803_v48 = vpop.eup %14802  ;;  %v12016_v39 = vsub.f32 %v11937_v35, %v11984_v3  ;;  %v18552_v25 = vld [vmem:[#allocation34_spill] sm:$0xff]  ;;  %v14005_v43 = vpop.f32.mrb[192].mxu0 }
 0xb6a   : > { %v12202_v2 = vmul.f32 %v18099_v6, %v12166_v46  ;;  %v12110_v37 = vadd.f32 1e-05, %v12046_v16  ;;  %v18551_v7 = vsub.f32 %v18549_v1, %v18550_v8  ;;  %14812 = vrsqrt.f32 %v12111_v62 }
 0xb6b   : > { %v12239_v24 = vadd.f32 %v18117_v17, %v12203_v40  ;;  %v12049_v33 = vmax.f32 %v12017_v57, 0.0  ;;  %14075 = vmatprep.subr.bf16.mxu1 %v14074_v15  ;;  %v12168_v42 = vmul.f32 %v14803_v48, %v12072_v5  ;;  %v11986_v4 = vmul.f32 %v18552_v25, %v18552_v25  ;;  %v11947_v40 = vpop.f32.mrb[193].mxu0 }
 0xb6c   : > { %v12169_v51 = vmul.f32 %v14801_v54, %v18551_v7  ;;  %v12238_v21 = vadd.f32 %v18117_v17, %v12202_v2  ;;  %14814 = vrsqrt.f32 %v12110_v37  ;;  %v12048_v3 = vmax.f32 %v12016_v39, 0.0  ;;  %14077 = vmatpush3.bf16.xpose.msra.mxu1 %v14076_v18  ;;  %v14805_v46 = vpop.eup %14804 }
 0xb6d   : > { %v12113_v16 = vadd.f32 1e-05, %v12049_v33  ;;  %v12019_v56 = vsub.f32 %v14005_v43, %v11987_v31  ;;  %v12204_v23 = vmul.f32 %v18099_v6, %v12168_v42  ;;  %v12018_v57 = vsub.f32 %v11947_v40, %v11986_v4  ;;  %v18554_v31 = vld [vmem:[#allocation12_spill] sm:$0xff]  ;;  %v18558_v43 = vld [vmem:[#allocation13_spill] sm:$0xff] }
 0xb6e   : > { %v12205_v62 = vmul.f32 %v18099_v6, %v12169_v51  ;;  %v14078_v54 = vpack.c.bf16 %v12239_v24, %v12238_v21  ;;  %v14807_v47 = vpop.eup %14806  ;;  %v12112_v5 = vadd.f32 1e-05, %v12048_v3  ;;  %v18553_v15 = vsub.f32 %v17817_v29, %v17959_v12  ;;  %v18555_v29 = vld [vmem:[#allocation11_spill] sm:$0xff]  ;;  %v18556_v21 = vld [vmem:[#allocation14_spill] sm:$0xff] }
 0xb6f   : > { %14816 = vrsqrt.f32 %v12113_v16  ;;  %v12051_v50 = vmax.f32 %v12019_v56, 0.0  ;;  %v12240_v14 = vadd.f32 %v18117_v17, %v12204_v23  ;;  %v12170_v18 = vmul.f32 %v14807_v47, %v12074_v30 }
 0xb70   : > { %v12241_v35 = vadd.f32 %v18117_v17, %v12205_v62  ;;  %v12171_v2 = vmul.f32 %v14805_v46, %v18553_v15  ;;  %14079 = vmatprep.subr.bf16.mxu1 %v14078_v54  ;;  %v12077_v48 = vsub.f32 %v18554_v31, %v18523_v27  ;;  %14818 = vrsqrt.f32 %v12112_v5  ;;  %v14809_v24 = vpop.eup %14808 }
 0xb71   : > { %v12050_v37 = vmax.f32 %v12018_v57, 0.0  ;;  %v12076_v12 = vsub.f32 %v18555_v29, %v18526_v0  ;;  %v12115_v1 = vadd.f32 1e-05, %v12051_v50  ;;  %v12206_v7 = vmul.f32 %v18099_v6, %v12170_v18  ;;  %v18560_v57 = vld [vmem:[#allocation15_spill] sm:$0xff] }
 0xb72   : > { %v12207_v39 = vmul.f32 %v18099_v6, %v12171_v2  ;;  %v14082_v8 = vpack.c.bf16 %v12241_v35, %v12240_v14  ;;  %v14811_v51 = vpop.eup %14810  ;;  %v12173_v28 = vmul.f32 %v14809_v24, %v12077_v48  ;;  %v12079_v42 = vsub.f32 %v18556_v21, %v18531_v13  ;;  %v18561_v48 = vld [vmem:[#allocation18_spill] sm:$0xff] }
 0xb73   : > { %v12114_v33 = vadd.f32 1e-05, %v12050_v37  ;;  %14820 = vrsqrt.f32 %v12115_v1  ;;  %v12242_v30 = vadd.f32 %v18117_v17, %v12206_v7  ;;  %v12172_v27 = vmul.f32 %v14811_v51, %v12076_v12 }
 0xb74   : > { %v12243_v53 = vadd.f32 %v18117_v17, %v12207_v39  ;;  %v18557_v0 = vpack.c.bf16 %v18155_v10, %v18161_v59  ;;  %v12209_v4 = vmul.f32 %v18099_v6, %v12173_v28  ;;  %v14813_v3 = vpop.eup %14812  ;;  %v12078_v62 = vsub.f32 %v18558_v43, %v18534_v20  ;;  %v18559_v10 = vld [vmem:[#allocation16_spill] sm:$0xff]  ;;  %v18562_v39 = vld [vmem:[#allocation17_spill] sm:$0xff] }
 0xb75   : > { %14822 = vrsqrt.f32 %v12114_v33  ;;  %v12208_v16 = vmul.f32 %v18099_v6, %v12172_v27  ;;  %v12175_v54 = vmul.f32 %v14813_v3, %v12079_v42  ;;  %v12081_v59 = vsub.f32 %v18559_v10, %v18539_v60 }
 0xb76   : > { %14081 = vmatpush3.bf16.xpose.msra.mxu1 %v18557_v0  ;;  %v14086_v46 = vpack.c.bf16 %v12243_v53, %v12242_v30  ;;  %v14815_v56 = vpop.eup %14814  ;;  %v12245_v40 = vadd.f32 %v18117_v17, %v12209_v4  ;;  %v12080_v20 = vsub.f32 %v18560_v57, %v18542_v41  ;;  %v12083_v37 = vsub.f32 %v18561_v48, %v18548_v38 }
 0xb77   : > { %14083 = vmatprep.subr.bf16.mxu1 %v14082_v8  ;;  %v12244_v13 = vadd.f32 %v18117_v17, %v12208_v16  ;;  %v12174_v23 = vmul.f32 %v14815_v56, %v12078_v62  ;;  %v12211_v47 = vmul.f32 %v18099_v6, %v12175_v54  ;;  %v12082_v24 = vsub.f32 %v18562_v39, %v18552_v25 }
 0xb79   : > { %v14817_v5 = vpop.eup %14816  ;;  %v14090_v35 = vpack.c.bf16 %v12245_v40, %v12244_v13  ;;  %v12210_v15 = vmul.f32 %v18099_v6, %v12174_v23  ;;  %v12247_v50 = vadd.f32 %v18117_v17, %v12211_v47 }
 0xb7a   : > { %v14819_v2 = vpop.eup %14818  ;;  %v12177_v14 = vmul.f32 %v14817_v5, %v12081_v59 }
 0xb7b   : > { %v12246_v18 = vadd.f32 %v18117_v17, %v12210_v15  ;;  %v12176_v31 = vmul.f32 %v14819_v2, %v12080_v20 }
 0xb7c   : > { %v12213_v60 = vmul.f32 %v18099_v6, %v12177_v14 }
 0xb7d   : > { %v14821_v41 = vpop.eup %14820  ;;  %v14094_v29 = vpack.c.bf16 %v12247_v50, %v12246_v18  ;;  %v12212_v12 = vmul.f32 %v18099_v6, %v12176_v31 }
 0xb7e   : > { %14085 = vmatpush3.bf16.xpose.msra.mxu1 %v14084_v19  ;;  %v12249_v8 = vadd.f32 %v18117_v17, %v12213_v60  ;;  %v12179_v7 = vmul.f32 %v14821_v41, %v12083_v37 }
 0xb7f   : > { %14087 = vmatprep.subr.bf16.mxu1 %v14086_v46  ;;  %v14823_v1 = vpop.eup %14822  ;;  %v12248_v38 = vadd.f32 %v18117_v17, %v12212_v12 }
 0xb80   : > { %v12178_v51 = vmul.f32 %v14823_v1, %v12082_v24  ;;  %v12215_v32 = vmul.f32 %v18099_v6, %v12179_v7 }
 0xb81   : > { %v14098_v36 = vpack.c.bf16 %v12249_v8, %v12248_v38 }
 0xb82   : > { %v12214_v19 = vmul.f32 %v18099_v6, %v12178_v51  ;;  %v12251_v25 = vadd.f32 %v18117_v17, %v12215_v32  ;;  %v18563_v6 = vpack.c.bf16 %v18261_v61, %v18267_v22 }
 0xb84   : > { %v12250_v33 = vadd.f32 %v18117_v17, %v12214_v19  ;;  %v18564_v17 = vpack.c.bf16 %v18281_v34, %v18287_v63 }
 0xb86   : > { %14089 = vmatpush3.bf16.xpose.msra.mxu1 %v14088_v26  ;;  %v14102_v53 = vpack.c.bf16 %v12251_v25, %v12250_v33 }
 0xb87   : > { %14091 = vmatprep.subr.bf16.mxu1 %v14090_v35 }
 0xb8e   : > { %14093 = vmatpush3.bf16.xpose.msra.mxu1 %v14092_v11 }
 0xb8f   : > { %14095 = vmatprep.subr.bf16.mxu1 %v14094_v29 }
 0xb96   : > { %14097 = vmatpush3.bf16.xpose.msra.mxu1 %v14096_v45 }
 0xb97   : > { %14099 = vmatprep.subr.bf16.mxu1 %v14098_v36 }
 0xb9e   : > { %14101 = vmatpush3.bf16.xpose.msra.mxu1 %v18563_v6 }
 0xb9f   : > { %14103 = vmatprep.subr.bf16.mxu1 %v14102_v53 }
 0xba6   : > { %14105 = vmatpush3.bf16.xpose.msra.mxu1 %v18564_v17 }
 0xbad   : > { %13165 = vmatmul.mubr.f32.vlgmr.msra.gmra.mrb[158].mxu1 %v18565_v52 }
 0xc80   : > { %v12323_v26 = vpop.f32.mrb[158].mxu1 }
 0xc81   : > { %v12324_v49 = vadd.f32 %v12323_v26, %v12255_v55  ;;  %v12325_v44 = vpop.f32.mrb[159].mxu1 }
 0xc82   : > { %v12326_v11 = vadd.f32 %v12325_v44, %v12255_v55 }
 0xc83   : > { %12328 = vst [vmem:[%s137_s25] sm:$0xff] %v12324_v49 }
 0xc84   : > { %12329 = vst [vmem:[%s137_s25 + $0x8] sm:$0xff] %v12326_v11 }
 0xc85   : > { %14922 = shalt.err (!%p14919_p3)
}
 0xc86   : > { %s14923_s7 = scalar_lea.hbm %s18394_s30, 256  ;;  %s14927_s16 = scalar_lea.hbm %s18438_s2, 512 }
 0xc87   : > { %p14924_p4 = scmp.ne.s32.totalorder %s18394_s30, %s14923_s7  ;;  %p14928_p9 = scmp.lt.u32.totalorder %s18394_s30, %s18438_s2 }
 0xc88   : > { %p14929_p10 = scmp.lt.u32.totalorder %s14927_s16, %s14923_s7  ;;  %p14931_p12 = scmp.lt.u32.totalorder %s14923_s7, %s18394_s30 }
 0xc89   : > { %p14925_p7 = pnand %p14924_p4, %p15031_p5 }
 0xc8a   : > { %p14930_p11 = por %p14929_p10, %p14928_p9 }
 0xc8b   : > { %p14926_p8 = pneg %p14925_p7 }
 0xc8c   : > { %p14932_p13 = por %p14931_p12, %p14930_p11 }
 0xc8e   : > { %p14933_p0 = pnand %p14932_p13, %p14926_p8 }
 0xc90   : > { %14936 = shalt.err (!%p14933_p0)
}
 0xc91   : > { %14204 = dma.vmem_to_hbm [thread:$0]  (%p15031_p5), %s18396_s26, 256, %s18394_s30, %s12331_s13  }
 0xc92 PF: > { %p14210_p1 = scmp.ge.s32.totalorder %s14971_s12, 2  ;;  %s12357_s22 = sand.u32 1, %s14959_s9  }
 0xc93   : > { %s12358_s23 = scalar_lea.sflag [#allocation3], %s12357_s22 }
 0xc94   : > { %p14207_p2 = pnand %p14210_p1, %p15035_p6 }
 0xc96   : > { %14954 = dma.done.wait (!%p14207_p2), %s12358_s23, 256  }
 0xc97   : > { %14956 = vsyncadd (!%p14207_p2), %s12358_s23, 4294967040  ;;  %p12_p3 = scmp.ge.s32.totalorder %s15018_s15, 4   ;;  %s18566_s9 = smov %s14963_s10 }
 0xc98   : > { %s18567_s10 = smov %s14967_s11  ;;  %s18568_s11 = smov %s15029_s18 }
 0xc99   : > { %s18569_s12 = smov %s15018_s15  ;;  %14 = sbr.rel (!%p12_p3) target bundleno = 3 (0x3), region = 63 }
 0xca0   :  { %12363 = vsyncpa [#allocation3], 1 }
 0xca1   :  { %12365 = vsyncpa [#allocation3 + $0x1], 1 }

</bundles_post_ra>
